<compile_context>
chip_gen: v7x
topology: tpu7x:2x2x1
jax: 0.10.0
libtpu: 0.0.40
codegen_flags: <defaults>
</compile_context>

<pallas_src>
import math
from functools import partial

import jax
import jax.numpy as jnp
from jax import lax
from jax.experimental import pallas as pl
from jax.experimental.pallas import tpu as pltpu

MXU_DTYPE = jnp.bfloat16  # MXU operand dtype; accumulation is always f32.


def _mm(a, b, dims=None):
    """MXU matmul: bf16 operands (cast only if not already bf16), f32 accumulation."""
    if dims is None:
        dims = (((a.ndim - 1,), (0,)), ((), ()))
    if a.dtype != MXU_DTYPE:
        a = a.astype(MXU_DTYPE)
    if b.dtype != MXU_DTYPE:
        b = b.astype(MXU_DTYPE)
    return lax.dot_general(a, b, dims, preferred_element_type=jnp.float32)


_NT = (((1,), (1,)), ((), ()))  # contract last dims of both (== A @ B.T), MXU-native


def _layernorm(x, g, b, eps):
    mu = jnp.mean(x, axis=-1, keepdims=True)
    var = jnp.mean((x - mu) ** 2, axis=-1, keepdims=True)
    return (x - mu) * lax.rsqrt(var + eps) * g + b


def _softmax_rows(x):
    x = x - jnp.max(x, axis=-1, keepdims=True)
    e = jnp.exp(x)
    return e * pl.reciprocal(jnp.sum(e, axis=-1, keepdims=True), approx=True)


# ----------------------------------------------------------------------------
# Fused Pallas kernel: whole decoder layer (both branches, all batches) in one
# grid step.  Everything is VMEM-resident.
# ----------------------------------------------------------------------------
def _decoder_layer_kernel(
    tgt_ref,                                 # (B*Lq, D) f32
    memblk_l_ref, msk_l_ref,                 # (3, B*Lk1, D) f32, (B, Lk1) f32
    memblk_s_ref, msk_s_ref,                 # (3, B*Lk2, D) f32, (B, Lk2) f32
    w_attn_ref, b_attn_ref,                  # (8, D, D) bf16, (8, D) f32
    w_inner_ref, b_inner_ref,                # (4, Lq, match) bf16, (4, match) f32
    w1_ref, b1_ref, w2_ref, nm_ref,          # (D,dff) bf16, (1,dff) f32, (dff,D) bf16, (5,D) f32
    o_ref,                                   # (B*Lq, D) f32
    *, batch, nhead, use_aia, divide_norm, scale_factor, eps,
):
    N, D = tgt_ref.shape
    Lq = N // batch
    hd = D // nhead
    scale = 1.0 / math.sqrt(hd)
    match = w_inner_ref.shape[-1]
    inner_scale = 1.0 / math.sqrt(match)

    tgt = tgt_ref[...]                                    # (B*Lq, D) f32
    q_base = tgt
    if divide_norm:
        q_base = tgt * (scale_factor *
                        lax.rsqrt(jnp.sum(tgt * tgt, axis=-1, keepdims=True)))

    def run_branch(br, memblk_ref, msk_ref):
        mem = memblk_ref[0]                               # (B*Lk, D)
        emb = memblk_ref[1]
        pos = memblk_ref[2]
        Lk = mem.shape[0] // batch

        k_base = mem
        if divide_norm:
            k_base = mem * lax.rsqrt(jnp.sum(mem * mem, axis=-1, keepdims=True))

        wq = w_attn_ref[4 * br + 0]
        wk = w_attn_ref[4 * br + 1]
        wv = w_attn_ref[4 * br + 2]
        wo = w_attn_ref[4 * br + 3]
        bq = b_attn_ref[4 * br + 0:4 * br + 1, :]         # (1, D)
        bk = b_attn_ref[4 * br + 1:4 * br + 2, :]
        bv = b_attn_ref[4 * br + 2:4 * br + 3, :]
        bo = b_attn_ref[4 * br + 3:4 * br + 4, :]

        # Batch-folded projections: one (B*L, D) @ (D, D) matmul each.
        q = (_mm(q_base, wq) + bq) * scale                # (B*Lq, D) f32 (pre-scaled)
        k = _mm(k_base + pos, wk) + bk                    # (B*Lk, D)
        v = _mm(mem + emb, wv) + bv                       # (B*Lk, D)

        madd_all = msk_ref[...]                           # (B, Lk) additive mask

        # Raw correlation maps per (batch, head) plus the transposed slab that
        # feeds the batched AiA inner projections.  kh @ qh^T == logits.T, so no
        # XLU transposes are needed.
        logits_list = []
        mt_list = []
        for b in range(batch):
            qb = q[b * Lq:(b + 1) * Lq, :]
            kb = k[b * Lk:(b + 1) * Lk, :]
            for h in range(nhead):
                sl = slice(h * hd, (h + 1) * hd)
                qh = qb[:, sl]
                kh = kb[:, sl]
                logits_list.append(_mm(qh, kh, _NT))      # (Lq, Lk)
                if use_aia:
                    mt_list.append(_mm(kh, qh, _NT))      # (Lk, Lq)

        if use_aia:
            wqi = w_inner_ref[2 * br + 0]                 # (Lq, match)
            wki = w_inner_ref[2 * br + 1]
            bqi = b_inner_ref[2 * br + 0:2 * br + 1, :]   # (1, match)
            bki = b_inner_ref[2 * br + 1:2 * br + 2, :]
            mt_slab = jnp.concatenate(mt_list, axis=0)    # (B*nhead*Lk, Lq)
            qi_all = _mm(mt_slab, wqi) + bqi              # (B*nhead*Lk, match)
            ki_all = _mm(mt_slab, wki) + bki

        # Mask- / memory-dependent attention core (per batch, per head).
        per_batch = []
        for b in range(batch):
            row = madd_all[b:b + 1, :]                    # (1, Lk)
            madd_q = jnp.broadcast_to(row, (Lq, Lk))      # hoisted out of head loop
            madd_k = jnp.broadcast_to(row, (Lk, Lk))
            vb = v[b * Lk:(b + 1) * Lk, :]
            heads = []
            for h in range(nhead):
                idx = b * nhead + h
                logits = logits_list[idx]                 # (Lq, Lk) f32
                if use_aia:
                    off = idx * Lk
                    qi = qi_all[off:off + Lk, :]
                    ki = ki_all[off:off + Lk, :]
                    il = _mm(qi, ki, _NT) * inner_scale + madd_k
                    ia = _softmax_rows(il)                # (Lk, Lk)
                    logits = logits + _mm(logits, ia, _NT)    # += logits @ ia.T
                p = _softmax_rows(logits + madd_q)        # (Lq, Lk)
                heads.append(_mm(p, vb[:, h * hd:(h + 1) * hd]))   # (Lq, hd)
            per_batch.append(jnp.concatenate(heads, axis=-1))       # (Lq, D)
        attn = jnp.concatenate(per_batch, axis=0)                    # (B*Lq, D)
        # Single K=D output projection for the whole branch / batch.
        return _mm(attn, wo) + bo

    long_out = run_branch(0, memblk_l_ref, msk_l_ref)
    short_out = run_branch(1, memblk_s_ref, msk_s_ref)

    g1 = nm_ref[0:1, :]
    be1 = nm_ref[1:2, :]
    g2 = nm_ref[2:3, :]
    be2 = nm_ref[3:4, :]
    b2 = nm_ref[4:5, :]

    # tgt = norm1(tgt + dropout(long) + dropout(short)); dropout == identity.
    x = _layernorm(tgt + long_out + short_out, g1, be1, eps)
    # FFN: linear2(relu(linear1(x)))
    hmid = jnp.maximum(_mm(x, w1_ref[...]) + b1_ref[...], 0.0)
    t2 = _mm(hmid, w2_ref[...]) + b2
    x = _layernorm(x + t2, g2, be2, eps)
    o_ref[...] = x.astype(o_ref.dtype)


# ----------------------------------------------------------------------------
# pallas_call wrapper (single fused kernel, no grid — one step, all VMEM)
# ----------------------------------------------------------------------------
def decoder_layer_pallas(tgt2d, memblk_l, madd_l, memblk_s, madd_s, sp, *,
                         batch, nhead, use_aia, divide_norm, scale_factor, eps=1e-5):
    N, D = tgt2d.shape
    Lq = N // batch
    Lk1 = memblk_l.shape[1] // batch
    Lk2 = memblk_s.shape[1] // batch
    hd = D // nhead
    match = sp['w_inner'].shape[-1]
    dff = sp['w1'].shape[-1]

    args = (tgt2d, memblk_l, madd_l, memblk_s, madd_s,
            sp['w_attn'], sp['b_attn'], sp['w_inner'], sp['b_inner'],
            sp['w1'], sp['b1'], sp['w2'], sp['nm'])

    # Rough cost estimate so XLA schedules sensibly around the fused call.
    flops = 0
    transc = 0
    for Lk in (Lk1, Lk2):
        flops += 2 * 2 * N * D * D                          # q proj + output proj
        flops += 2 * 2 * (batch * Lk) * D * D               # k, v proj
        per_bh = 2 * Lq * hd * Lk + 2 * Lq * Lk * hd        # scores + PV
        if use_aia:
            per_bh += 2 * Lk * hd * Lq                      # transposed scores
            per_bh += 2 * Lk * match * Lk                   # inner attention
            per_bh += 2 * Lq * Lk * Lk                      # refinement
        flops += batch * nhead * per_bh
        if use_aia:
            flops += 2 * 2 * (batch * nhead * Lk) * Lq * match   # batched qi/ki proj
        transc += batch * nhead * (Lq * Lk + (Lk * Lk if use_aia else 0))
    flops += 2 * 2 * N * D * dff                            # FFN
    bytes_accessed = sum(int(a.size) * a.dtype.itemsize for a in args) + N * D * 4

    kernel = partial(_decoder_layer_kernel, batch=batch, nhead=nhead,
                     use_aia=use_aia, divide_norm=divide_norm,
                     scale_factor=scale_factor, eps=eps)

    vmem_spec = pl.BlockSpec(memory_space=pltpu.MemorySpace.VMEM)
    return pl.pallas_call(
        kernel,
        out_shape=jax.ShapeDtypeStruct((N, D), jnp.float32),
        in_specs=[vmem_spec] * len(args),
        out_specs=vmem_spec,
        cost_estimate=pl.CostEstimate(flops=int(flops),
                                      transcendentals=int(transc),
                                      bytes_accessed=int(bytes_accessed)),
    )(*args)


# ----------------------------------------------------------------------------
# Module forward (glue: layout folding, concatenation, parameter stacking)
# ----------------------------------------------------------------------------
def transformer_decoder_layer_forward(p, tgt, refer_mem_list, refer_emb_list,
                                      refer_pos_list, refer_msk_list,
                                      *, nhead, use_aia=True, divide_norm=False,
                                      scale_factor=1.0):
    Lq, B, D = tgt.shape
    bf16 = jnp.bfloat16

    def fold(x):  # (L, B, D) -> (B*L, D), batch-major rows
        return jnp.transpose(x, (1, 0, 2)).reshape(-1, D)

    def branch_blk(mems, embs, poss):  # stack mem/emb/pos into one (3, B*Lk, D)
        mem = jnp.concatenate(mems, axis=0)
        emb = jnp.concatenate(embs, axis=0)
        pos = jnp.concatenate(poss, axis=0)
        return jnp.stack([fold(mem), fold(emb), fold(pos)], axis=0)

    def add_mask(msk):  # (B, Lk) bool -> additive f32
        return jnp.where(msk, -1e9, 0.0).astype(jnp.float32)

    # Long-term branch: first reference only (torch.cat(list[0:1], dim=0)).
    memblk_l = branch_blk(refer_mem_list[0:1], refer_emb_list[0:1], refer_pos_list[0:1])
    madd_l = add_mask(jnp.concatenate(refer_msk_list[0:1], axis=1))
    # Short-term branch: remaining references concatenated along sequence.
    memblk_s = branch_blk(refer_mem_list[1:], refer_emb_list[1:], refer_pos_list[1:])
    madd_s = add_mask(jnp.concatenate(refer_msk_list[1:], axis=1))

    pl_, ps_ = p['long'], p['short']
    w_attn = jnp.stack([pl_['wq'], pl_['wk'], pl_['wv'], pl_['wo'],
                        ps_['wq'], ps_['wk'], ps_['wv'], ps_['wo']], axis=0).astype(bf16)
    b_attn = jnp.stack([pl_['bq'], pl_['bk'], pl_['bv'], pl_['bo'],
                        ps_['bq'], ps_['bk'], ps_['bv'], ps_['bo']], axis=0)
    w_inner = jnp.stack([pl_['wqi'], pl_['wki'], ps_['wqi'], ps_['wki']], axis=0).astype(bf16)
    b_inner = jnp.stack([pl_['bqi'], pl_['bki'], ps_['bqi'], ps_['bki']], axis=0)
    nm = jnp.stack([p['norm1_g'], p['norm1_b'], p['norm2_g'], p['norm2_b'], p['b2']], axis=0)

    sp = {'w_attn': w_attn, 'b_attn': b_attn, 'w_inner': w_inner, 'b_inner': b_inner,
          'w1': p['w1'].astype(bf16), 'b1': p['b1'][None, :],
          'w2': p['w2'].astype(bf16), 'nm': nm}

    out2d = decoder_layer_pallas(fold(tgt), memblk_l, madd_l, memblk_s, madd_s, sp,
                                 batch=B, nhead=nhead, use_aia=use_aia,
                                 divide_norm=divide_norm, scale_factor=scale_factor)
    return jnp.transpose(out2d.reshape(B, Lq, D), (1, 0, 2))  # back to (L, B, D)


# ----------------------------------------------------------------------------
# Deterministic parameter initialization
# ----------------------------------------------------------------------------
def _init_linear(key, fan_in, fan_out, scale=0.05):
    kw, kb = jax.random.split(key)
    w = scale * jax.random.normal(kw, (fan_in, fan_out), jnp.float32)
    b = scale * jax.random.normal(kb, (fan_out,), jnp.float32)
    return w, b


def init_aia_params(key, d_model, match_dim, feat_size):
    ks = jax.random.split(key, 6)
    p = {}
    p['wq'], p['bq'] = _init_linear(ks[0], d_model, d_model)
    p['wk'], p['bk'] = _init_linear(ks[1], d_model, d_model)
    p['wv'], p['bv'] = _init_linear(ks[2], d_model, d_model)
    p['wo'], p['bo'] = _init_linear(ks[3], d_model, d_model)
    p['wqi'], p['bqi'] = _init_linear(ks[4], feat_size, match_dim)
    p['wki'], p['bki'] = _init_linear(ks[5], feat_size, match_dim)
    return p


def init_decoder_params(key, d_model, dim_ff, match_dim, feat_size):
    ks = jax.random.split(key, 4)
    p = {'long': init_aia_params(ks[0], d_model, match_dim, feat_size),
         'short': init_aia_params(ks[1], d_model, match_dim, feat_size)}
    p['w1'], p['b1'] = _init_linear(ks[2], d_model, dim_ff)
    p['w2'], p['b2'] = _init_linear(ks[3], dim_ff, d_model)
    p['norm1_g'] = jnp.ones((d_model,), jnp.float32)
    p['norm1_b'] = jnp.zeros((d_model,), jnp.float32)
    p['norm2_g'] = jnp.ones((d_model,), jnp.float32)
    p['norm2_b'] = jnp.zeros((d_model,), jnp.float32)
    return p


# ----------------------------------------------------------------------------
if __name__ == "__main__":
    d_model, nhead, dim_ff = 32, 4, 64
    match_dim = 8
    L_q, B, L_k, n_refs = 16, 2, 16, 3
    feat_size = L_q  # feat_size == number of query positions for the inner attention

    root = jax.random.PRNGKey(0)
    k_param, k_data = jax.random.split(root)
    params = init_decoder_params(k_param, d_model, dim_ff, match_dim, feat_size)

    dkeys = jax.random.split(k_data, 1 + 3 * n_refs)
    tgt = jax.random.normal(dkeys[0], (L_q, B, d_model), jnp.float32)
    refer_mem_list = [jax.random.normal(dkeys[1 + i], (L_k, B, d_model), jnp.float32)
                      for i in range(n_refs)]
    refer_emb_list = [jax.random.normal(dkeys[1 + n_refs + i], (L_k, B, d_model), jnp.float32)
                      for i in range(n_refs)]
    refer_pos_list = [jax.random.normal(dkeys[1 + 2 * n_refs + i], (L_k, B, d_model), jnp.float32)
                      for i in range(n_refs)]
    msk = jnp.zeros((B, L_k), dtype=bool).at[:, L_k - 2:].set(True)
    refer_msk_list = [msk for _ in range(n_refs)]

    out = transformer_decoder_layer_forward(
        params, tgt, refer_mem_list, refer_emb_list, refer_pos_list, refer_msk_list,
        nhead=nhead, use_aia=True, divide_norm=False,
        scale_factor=float(d_model // nhead) ** 0.5)
    jax.block_until_ready(out)
    assert out.shape == (L_q, B, d_model)
    assert bool(jnp.all(jnp.isfinite(out)))
    print("KERNEL_OK")
</pallas_src>

<mosaic_0001>
module attributes {stable_mosaic.version = 11 : i64} {
  func.func @_decoder_layer_kernel(%arg0: memref<32x32xf32, #tpu.memory_space<vmem>>, %arg1: memref<3x32x32xf32, #tpu.memory_space<vmem>>, %arg2: memref<2x16xf32, #tpu.memory_space<vmem>>, %arg3: memref<3x64x32xf32, #tpu.memory_space<vmem>>, %arg4: memref<2x32xf32, #tpu.memory_space<vmem>>, %arg5: memref<8x32x32xbf16, #tpu.memory_space<vmem>>, %arg6: memref<8x32xf32, #tpu.memory_space<vmem>>, %arg7: memref<4x16x8xbf16, #tpu.memory_space<vmem>>, %arg8: memref<4x8xf32, #tpu.memory_space<vmem>>, %arg9: memref<32x64xbf16, #tpu.memory_space<vmem>>, %arg10: memref<1x64xf32, #tpu.memory_space<vmem>>, %arg11: memref<64x32xbf16, #tpu.memory_space<vmem>>, %arg12: memref<5x32xf32, #tpu.memory_space<vmem>>, %arg13: memref<32x32xf32, #tpu.memory_space<vmem>>) attributes {dimension_semantics = [], scalar_prefetch = 0 : i64, scratch_operands = 0 : i64, tpu.core_type = #tpu.core_type<tc>} {
    %c0 = arith.constant 0 : index
    %c0_0 = arith.constant 0 : index
    %0 = vector.load %arg0[%c0, %c0_0] : memref<32x32xf32, #tpu.memory_space<vmem>>, vector<32x32xf32>
    %c0_1 = arith.constant 0 : index
    %c0_2 = arith.constant 0 : index
    %c0_3 = arith.constant 0 : index
    %1 = vector.load %arg1[%c0_1, %c0_2, %c0_3] : memref<3x32x32xf32, #tpu.memory_space<vmem>>, vector<1x32x32xf32>
    %2 = vector.shape_cast %1 : vector<1x32x32xf32> to vector<32x32xf32>
    %c1 = arith.constant 1 : index
    %c0_4 = arith.constant 0 : index
    %c0_5 = arith.constant 0 : index
    %3 = vector.load %arg1[%c1, %c0_4, %c0_5] : memref<3x32x32xf32, #tpu.memory_space<vmem>>, vector<1x32x32xf32>
    %4 = vector.shape_cast %3 : vector<1x32x32xf32> to vector<32x32xf32>
    %c2 = arith.constant 2 : index
    %c0_6 = arith.constant 0 : index
    %c0_7 = arith.constant 0 : index
    %5 = vector.load %arg1[%c2, %c0_6, %c0_7] : memref<3x32x32xf32, #tpu.memory_space<vmem>>, vector<1x32x32xf32>
    %6 = vector.shape_cast %5 : vector<1x32x32xf32> to vector<32x32xf32>
    %c0_8 = arith.constant 0 : index
    %c0_9 = arith.constant 0 : index
    %c0_10 = arith.constant 0 : index
    %7 = vector.load %arg5[%c0_8, %c0_9, %c0_10] : memref<8x32x32xbf16, #tpu.memory_space<vmem>>, vector<1x32x32xbf16>
    %8 = vector.shape_cast %7 : vector<1x32x32xbf16> to vector<32x32xbf16>
    %c1_11 = arith.constant 1 : index
    %c0_12 = arith.constant 0 : index
    %c0_13 = arith.constant 0 : index
    %9 = vector.load %arg5[%c1_11, %c0_12, %c0_13] : memref<8x32x32xbf16, #tpu.memory_space<vmem>>, vector<1x32x32xbf16>
    %10 = vector.shape_cast %9 : vector<1x32x32xbf16> to vector<32x32xbf16>
    %c2_14 = arith.constant 2 : index
    %c0_15 = arith.constant 0 : index
    %c0_16 = arith.constant 0 : index
    %11 = vector.load %arg5[%c2_14, %c0_15, %c0_16] : memref<8x32x32xbf16, #tpu.memory_space<vmem>>, vector<1x32x32xbf16>
    %12 = vector.shape_cast %11 : vector<1x32x32xbf16> to vector<32x32xbf16>
    %c3 = arith.constant 3 : index
    %c0_17 = arith.constant 0 : index
    %c0_18 = arith.constant 0 : index
    %13 = vector.load %arg5[%c3, %c0_17, %c0_18] : memref<8x32x32xbf16, #tpu.memory_space<vmem>>, vector<1x32x32xbf16>
    %14 = vector.shape_cast %13 : vector<1x32x32xbf16> to vector<32x32xbf16>
    %c0_19 = arith.constant 0 : index
    %c0_20 = arith.constant 0 : index
    %15 = vector.load %arg6[%c0_19, %c0_20] : memref<8x32xf32, #tpu.memory_space<vmem>>, vector<1x32xf32>
    %c1_21 = arith.constant 1 : index
    %c0_22 = arith.constant 0 : index
    %16 = vector.load %arg6[%c1_21, %c0_22] : memref<8x32xf32, #tpu.memory_space<vmem>>, vector<1x32xf32>
    %c2_23 = arith.constant 2 : index
    %c0_24 = arith.constant 0 : index
    %17 = vector.load %arg6[%c2_23, %c0_24] : memref<8x32xf32, #tpu.memory_space<vmem>>, vector<1x32xf32>
    %c3_25 = arith.constant 3 : index
    %c0_26 = arith.constant 0 : index
    %18 = vector.load %arg6[%c3_25, %c0_26] : memref<8x32xf32, #tpu.memory_space<vmem>>, vector<1x32xf32>
    %19 = arith.truncf %0 : vector<32x32xf32> to vector<32x32xbf16>
    %cst = arith.constant dense<0.000000e+00> : vector<32x32xf32>
    %20 = tpu.matmul %19, %8, %cst {dimension_numbers = #tpu.dot_dimension_numbers<[1], [0], [0], [1], [0, 0, 1, 1], [], []>} : vector<32x32xbf16>, vector<32x32xbf16>, vector<32x32xf32> -> vector<32x32xf32>
    %21 = vector.broadcast %15 : vector<1x32xf32> to vector<32x32xf32>
    %22 = arith.addf %20, %21 : vector<32x32xf32>
    %cst_27 = arith.constant 0.353553385 : f32
    %23 = vector.broadcast %cst_27 : f32 to vector<32x32xf32>
    %24 = arith.mulf %22, %23 : vector<32x32xf32>
    %25 = arith.addf %2, %6 : vector<32x32xf32>
    %26 = arith.truncf %25 : vector<32x32xf32> to vector<32x32xbf16>
    %cst_28 = arith.constant dense<0.000000e+00> : vector<32x32xf32>
    %27 = tpu.matmul %26, %10, %cst_28 {dimension_numbers = #tpu.dot_dimension_numbers<[1], [0], [0], [1], [0, 0, 1, 1], [], []>} : vector<32x32xbf16>, vector<32x32xbf16>, vector<32x32xf32> -> vector<32x32xf32>
    %28 = vector.broadcast %16 : vector<1x32xf32> to vector<32x32xf32>
    %29 = arith.addf %27, %28 : vector<32x32xf32>
    %30 = arith.addf %2, %4 : vector<32x32xf32>
    %31 = arith.truncf %30 : vector<32x32xf32> to vector<32x32xbf16>
    %cst_29 = arith.constant dense<0.000000e+00> : vector<32x32xf32>
    %32 = tpu.matmul %31, %12, %cst_29 {dimension_numbers = #tpu.dot_dimension_numbers<[1], [0], [0], [1], [0, 0, 1, 1], [], []>} : vector<32x32xbf16>, vector<32x32xbf16>, vector<32x32xf32> -> vector<32x32xf32>
    %33 = vector.broadcast %17 : vector<1x32xf32> to vector<32x32xf32>
    %34 = arith.addf %32, %33 : vector<32x32xf32>
    %c0_30 = arith.constant 0 : index
    %c0_31 = arith.constant 0 : index
    %35 = vector.load %arg2[%c0_30, %c0_31] : memref<2x16xf32, #tpu.memory_space<vmem>>, vector<2x16xf32>
    %36 = vector.extract_strided_slice %24 {offsets = [0, 0], sizes = [16, 32], strides = [1, 1]} : vector<32x32xf32> to vector<16x32xf32>
    %37 = vector.extract_strided_slice %29 {offsets = [0, 0], sizes = [16, 32], strides = [1, 1]} : vector<32x32xf32> to vector<16x32xf32>
    %38 = vector.extract_strided_slice %36 {offsets = [0, 0], sizes = [16, 8], strides = [1, 1]} : vector<16x32xf32> to vector<16x8xf32>
    %39 = vector.extract_strided_slice %37 {offsets = [0, 0], sizes = [16, 8], strides = [1, 1]} : vector<16x32xf32> to vector<16x8xf32>
    %40 = arith.truncf %38 : vector<16x8xf32> to vector<16x8xbf16>
    %41 = arith.truncf %39 : vector<16x8xf32> to vector<16x8xbf16>
    %cst_32 = arith.constant dense<0.000000e+00> : vector<16x16xf32>
    %42 = tpu.matmul %40, %41, %cst_32 {dimension_numbers = #tpu.dot_dimension_numbers<[1], [1], [0], [0], [0, 0, 1, 0], [], []>} : vector<16x8xbf16>, vector<16x8xbf16>, vector<16x16xf32> -> vector<16x16xf32>
    %43 = arith.truncf %39 : vector<16x8xf32> to vector<16x8xbf16>
    %44 = arith.truncf %38 : vector<16x8xf32> to vector<16x8xbf16>
    %cst_33 = arith.constant dense<0.000000e+00> : vector<16x16xf32>
    %45 = tpu.matmul %43, %44, %cst_33 {dimension_numbers = #tpu.dot_dimension_numbers<[1], [1], [0], [0], [0, 0, 1, 0], [], []>} : vector<16x8xbf16>, vector<16x8xbf16>, vector<16x16xf32> -> vector<16x16xf32>
    %46 = vector.extract_strided_slice %36 {offsets = [0, 8], sizes = [16, 8], strides = [1, 1]} : vector<16x32xf32> to vector<16x8xf32>
    %47 = vector.extract_strided_slice %37 {offsets = [0, 8], sizes = [16, 8], strides = [1, 1]} : vector<16x32xf32> to vector<16x8xf32>
    %48 = arith.truncf %46 : vector<16x8xf32> to vector<16x8xbf16>
    %49 = arith.truncf %47 : vector<16x8xf32> to vector<16x8xbf16>
    %cst_34 = arith.constant dense<0.000000e+00> : vector<16x16xf32>
    %50 = tpu.matmul %48, %49, %cst_34 {dimension_numbers = #tpu.dot_dimension_numbers<[1], [1], [0], [0], [0, 0, 1, 0], [], []>} : vector<16x8xbf16>, vector<16x8xbf16>, vector<16x16xf32> -> vector<16x16xf32>
    %51 = arith.truncf %47 : vector<16x8xf32> to vector<16x8xbf16>
    %52 = arith.truncf %46 : vector<16x8xf32> to vector<16x8xbf16>
    %cst_35 = arith.constant dense<0.000000e+00> : vector<16x16xf32>
    %53 = tpu.matmul %51, %52, %cst_35 {dimension_numbers = #tpu.dot_dimension_numbers<[1], [1], [0], [0], [0, 0, 1, 0], [], []>} : vector<16x8xbf16>, vector<16x8xbf16>, vector<16x16xf32> -> vector<16x16xf32>
    %54 = vector.extract_strided_slice %36 {offsets = [0, 16], sizes = [16, 8], strides = [1, 1]} : vector<16x32xf32> to vector<16x8xf32>
    %55 = vector.extract_strided_slice %37 {offsets = [0, 16], sizes = [16, 8], strides = [1, 1]} : vector<16x32xf32> to vector<16x8xf32>
    %56 = arith.truncf %54 : vector<16x8xf32> to vector<16x8xbf16>
    %57 = arith.truncf %55 : vector<16x8xf32> to vector<16x8xbf16>
    %cst_36 = arith.constant dense<0.000000e+00> : vector<16x16xf32>
    %58 = tpu.matmul %56, %57, %cst_36 {dimension_numbers = #tpu.dot_dimension_numbers<[1], [1], [0], [0], [0, 0, 1, 0], [], []>} : vector<16x8xbf16>, vector<16x8xbf16>, vector<16x16xf32> -> vector<16x16xf32>
    %59 = arith.truncf %55 : vector<16x8xf32> to vector<16x8xbf16>
    %60 = arith.truncf %54 : vector<16x8xf32> to vector<16x8xbf16>
    %cst_37 = arith.constant dense<0.000000e+00> : vector<16x16xf32>
    %61 = tpu.matmul %59, %60, %cst_37 {dimension_numbers = #tpu.dot_dimension_numbers<[1], [1], [0], [0], [0, 0, 1, 0], [], []>} : vector<16x8xbf16>, vector<16x8xbf16>, vector<16x16xf32> -> vector<16x16xf32>
    %62 = vector.extract_strided_slice %36 {offsets = [0, 24], sizes = [16, 8], strides = [1, 1]} : vector<16x32xf32> to vector<16x8xf32>
    %63 = vector.extract_strided_slice %37 {offsets = [0, 24], sizes = [16, 8], strides = [1, 1]} : vector<16x32xf32> to vector<16x8xf32>
    %64 = arith.truncf %62 : vector<16x8xf32> to vector<16x8xbf16>
    %65 = arith.truncf %63 : vector<16x8xf32> to vector<16x8xbf16>
    %cst_38 = arith.constant dense<0.000000e+00> : vector<16x16xf32>
    %66 = tpu.matmul %64, %65, %cst_38 {dimension_numbers = #tpu.dot_dimension_numbers<[1], [1], [0], [0], [0, 0, 1, 0], [], []>} : vector<16x8xbf16>, vector<16x8xbf16>, vector<16x16xf32> -> vector<16x16xf32>
    %67 = arith.truncf %63 : vector<16x8xf32> to vector<16x8xbf16>
    %68 = arith.truncf %62 : vector<16x8xf32> to vector<16x8xbf16>
    %cst_39 = arith.constant dense<0.000000e+00> : vector<16x16xf32>
    %69 = tpu.matmul %67, %68, %cst_39 {dimension_numbers = #tpu.dot_dimension_numbers<[1], [1], [0], [0], [0, 0, 1, 0], [], []>} : vector<16x8xbf16>, vector<16x8xbf16>, vector<16x16xf32> -> vector<16x16xf32>
    %70 = vector.extract_strided_slice %24 {offsets = [16, 0], sizes = [16, 32], strides = [1, 1]} : vector<32x32xf32> to vector<16x32xf32>
    %71 = vector.extract_strided_slice %29 {offsets = [16, 0], sizes = [16, 32], strides = [1, 1]} : vector<32x32xf32> to vector<16x32xf32>
    %72 = vector.extract_strided_slice %70 {offsets = [0, 0], sizes = [16, 8], strides = [1, 1]} : vector<16x32xf32> to vector<16x8xf32>
    %73 = vector.extract_strided_slice %71 {offsets = [0, 0], sizes = [16, 8], strides = [1, 1]} : vector<16x32xf32> to vector<16x8xf32>
    %74 = arith.truncf %72 : vector<16x8xf32> to vector<16x8xbf16>
    %75 = arith.truncf %73 : vector<16x8xf32> to vector<16x8xbf16>
    %cst_40 = arith.constant dense<0.000000e+00> : vector<16x16xf32>
    %76 = tpu.matmul %74, %75, %cst_40 {dimension_numbers = #tpu.dot_dimension_numbers<[1], [1], [0], [0], [0, 0, 1, 0], [], []>} : vector<16x8xbf16>, vector<16x8xbf16>, vector<16x16xf32> -> vector<16x16xf32>
    %77 = arith.truncf %73 : vector<16x8xf32> to vector<16x8xbf16>
    %78 = arith.truncf %72 : vector<16x8xf32> to vector<16x8xbf16>
    %cst_41 = arith.constant dense<0.000000e+00> : vector<16x16xf32>
    %79 = tpu.matmul %77, %78, %cst_41 {dimension_numbers = #tpu.dot_dimension_numbers<[1], [1], [0], [0], [0, 0, 1, 0], [], []>} : vector<16x8xbf16>, vector<16x8xbf16>, vector<16x16xf32> -> vector<16x16xf32>
    %80 = vector.extract_strided_slice %70 {offsets = [0, 8], sizes = [16, 8], strides = [1, 1]} : vector<16x32xf32> to vector<16x8xf32>
    %81 = vector.extract_strided_slice %71 {offsets = [0, 8], sizes = [16, 8], strides = [1, 1]} : vector<16x32xf32> to vector<16x8xf32>
    %82 = arith.truncf %80 : vector<16x8xf32> to vector<16x8xbf16>
    %83 = arith.truncf %81 : vector<16x8xf32> to vector<16x8xbf16>
    %cst_42 = arith.constant dense<0.000000e+00> : vector<16x16xf32>
    %84 = tpu.matmul %82, %83, %cst_42 {dimension_numbers = #tpu.dot_dimension_numbers<[1], [1], [0], [0], [0, 0, 1, 0], [], []>} : vector<16x8xbf16>, vector<16x8xbf16>, vector<16x16xf32> -> vector<16x16xf32>
    %85 = arith.truncf %81 : vector<16x8xf32> to vector<16x8xbf16>
    %86 = arith.truncf %80 : vector<16x8xf32> to vector<16x8xbf16>
    %cst_43 = arith.constant dense<0.000000e+00> : vector<16x16xf32>
    %87 = tpu.matmul %85, %86, %cst_43 {dimension_numbers = #tpu.dot_dimension_numbers<[1], [1], [0], [0], [0, 0, 1, 0], [], []>} : vector<16x8xbf16>, vector<16x8xbf16>, vector<16x16xf32> -> vector<16x16xf32>
    %88 = vector.extract_strided_slice %70 {offsets = [0, 16], sizes = [16, 8], strides = [1, 1]} : vector<16x32xf32> to vector<16x8xf32>
    %89 = vector.extract_strided_slice %71 {offsets = [0, 16], sizes = [16, 8], strides = [1, 1]} : vector<16x32xf32> to vector<16x8xf32>
    %90 = arith.truncf %88 : vector<16x8xf32> to vector<16x8xbf16>
    %91 = arith.truncf %89 : vector<16x8xf32> to vector<16x8xbf16>
    %cst_44 = arith.constant dense<0.000000e+00> : vector<16x16xf32>
    %92 = tpu.matmul %90, %91, %cst_44 {dimension_numbers = #tpu.dot_dimension_numbers<[1], [1], [0], [0], [0, 0, 1, 0], [], []>} : vector<16x8xbf16>, vector<16x8xbf16>, vector<16x16xf32> -> vector<16x16xf32>
    %93 = arith.truncf %89 : vector<16x8xf32> to vector<16x8xbf16>
    %94 = arith.truncf %88 : vector<16x8xf32> to vector<16x8xbf16>
    %cst_45 = arith.constant dense<0.000000e+00> : vector<16x16xf32>
    %95 = tpu.matmul %93, %94, %cst_45 {dimension_numbers = #tpu.dot_dimension_numbers<[1], [1], [0], [0], [0, 0, 1, 0], [], []>} : vector<16x8xbf16>, vector<16x8xbf16>, vector<16x16xf32> -> vector<16x16xf32>
    %96 = vector.extract_strided_slice %70 {offsets = [0, 24], sizes = [16, 8], strides = [1, 1]} : vector<16x32xf32> to vector<16x8xf32>
    %97 = vector.extract_strided_slice %71 {offsets = [0, 24], sizes = [16, 8], strides = [1, 1]} : vector<16x32xf32> to vector<16x8xf32>
    %98 = arith.truncf %96 : vector<16x8xf32> to vector<16x8xbf16>
    %99 = arith.truncf %97 : vector<16x8xf32> to vector<16x8xbf16>
    %cst_46 = arith.constant dense<0.000000e+00> : vector<16x16xf32>
    %100 = tpu.matmul %98, %99, %cst_46 {dimension_numbers = #tpu.dot_dimension_numbers<[1], [1], [0], [0], [0, 0, 1, 0], [], []>} : vector<16x8xbf16>, vector<16x8xbf16>, vector<16x16xf32> -> vector<16x16xf32>
    %101 = arith.truncf %97 : vector<16x8xf32> to vector<16x8xbf16>
    %102 = arith.truncf %96 : vector<16x8xf32> to vector<16x8xbf16>
    %cst_47 = arith.constant dense<0.000000e+00> : vector<16x16xf32>
    %103 = tpu.matmul %101, %102, %cst_47 {dimension_numbers = #tpu.dot_dimension_numbers<[1], [1], [0], [0], [0, 0, 1, 0], [], []>} : vector<16x8xbf16>, vector<16x8xbf16>, vector<16x16xf32> -> vector<16x16xf32>
    %c0_48 = arith.constant 0 : index
    %c0_49 = arith.constant 0 : index
    %c0_50 = arith.constant 0 : index
    %104 = vector.load %arg7[%c0_48, %c0_49, %c0_50] : memref<4x16x8xbf16, #tpu.memory_space<vmem>>, vector<1x16x8xbf16>
    %105 = vector.shape_cast %104 : vector<1x16x8xbf16> to vector<16x8xbf16>
    %c1_51 = arith.constant 1 : index
    %c0_52 = arith.constant 0 : index
    %c0_53 = arith.constant 0 : index
    %106 = vector.load %arg7[%c1_51, %c0_52, %c0_53] : memref<4x16x8xbf16, #tpu.memory_space<vmem>>, vector<1x16x8xbf16>
    %107 = vector.shape_cast %106 : vector<1x16x8xbf16> to vector<16x8xbf16>
    %c0_54 = arith.constant 0 : index
    %c0_55 = arith.constant 0 : index
    %108 = vector.load %arg8[%c0_54, %c0_55] : memref<4x8xf32, #tpu.memory_space<vmem>>, vector<1x8xf32>
    %c1_56 = arith.constant 1 : index
    %c0_57 = arith.constant 0 : index
    %109 = vector.load %arg8[%c1_56, %c0_57] : memref<4x8xf32, #tpu.memory_space<vmem>>, vector<1x8xf32>
    %110 = tpu.concatenate %45, %53, %61, %69, %79, %87, %95, %103 in 0 : vector<16x16xf32>, vector<16x16xf32>, vector<16x16xf32>, vector<16x16xf32>, vector<16x16xf32>, vector<16x16xf32>, vector<16x16xf32>, vector<16x16xf32> -> vector<128x16xf32>
    %111 = arith.truncf %110 : vector<128x16xf32> to vector<128x16xbf16>
    %cst_58 = arith.constant dense<0.000000e+00> : vector<128x8xf32>
    %112 = tpu.matmul %111, %105, %cst_58 {dimension_numbers = #tpu.dot_dimension_numbers<[1], [0], [0], [1], [0, 0, 1, 1], [], []>} : vector<128x16xbf16>, vector<16x8xbf16>, vector<128x8xf32> -> vector<128x8xf32>
    %113 = vector.broadcast %108 : vector<1x8xf32> to vector<128x8xf32>
    %114 = arith.addf %112, %113 : vector<128x8xf32>
    %115 = arith.truncf %110 : vector<128x16xf32> to vector<128x16xbf16>
    %cst_59 = arith.constant dense<0.000000e+00> : vector<128x8xf32>
    %116 = tpu.matmul %115, %107, %cst_59 {dimension_numbers = #tpu.dot_dimension_numbers<[1], [0], [0], [1], [0, 0, 1, 1], [], []>} : vector<128x16xbf16>, vector<16x8xbf16>, vector<128x8xf32> -> vector<128x8xf32>
    %117 = vector.broadcast %109 : vector<1x8xf32> to vector<128x8xf32>
    %118 = arith.addf %116, %117 : vector<128x8xf32>
    %119 = vector.extract_strided_slice %35 {offsets = [0, 0], sizes = [1, 16], strides = [1, 1]} : vector<2x16xf32> to vector<1x16xf32>
    %120 = vector.shape_cast %119 : vector<1x16xf32> to vector<1x16xf32>
    %121 = vector.broadcast %120 : vector<1x16xf32> to vector<16x16xf32>
    %122 = vector.shape_cast %119 : vector<1x16xf32> to vector<1x16xf32>
    %123 = vector.broadcast %122 : vector<1x16xf32> to vector<16x16xf32>
    %124 = vector.extract_strided_slice %34 {offsets = [0, 0], sizes = [16, 32], strides = [1, 1]} : vector<32x32xf32> to vector<16x32xf32>
    %125 = vector.extract_strided_slice %114 {offsets = [0, 0], sizes = [16, 8], strides = [1, 1]} : vector<128x8xf32> to vector<16x8xf32>
    %126 = vector.extract_strided_slice %118 {offsets = [0, 0], sizes = [16, 8], strides = [1, 1]} : vector<128x8xf32> to vector<16x8xf32>
    %127 = arith.truncf %125 : vector<16x8xf32> to vector<16x8xbf16>
    %128 = arith.truncf %126 : vector<16x8xf32> to vector<16x8xbf16>
    %cst_60 = arith.constant dense<0.000000e+00> : vector<16x16xf32>
    %129 = tpu.matmul %127, %128, %cst_60 {dimension_numbers = #tpu.dot_dimension_numbers<[1], [1], [0], [0], [0, 0, 1, 0], [], []>} : vector<16x8xbf16>, vector<16x8xbf16>, vector<16x16xf32> -> vector<16x16xf32>
    %cst_61 = arith.constant 0.353553385 : f32
    %130 = vector.broadcast %cst_61 : f32 to vector<16x16xf32>
    %131 = arith.mulf %129, %130 : vector<16x16xf32>
    %132 = arith.addf %131, %123 : vector<16x16xf32>
    %cst_62 = arith.constant dense<0xFF800000> : vector<16xf32>
    %133 = vector.multi_reduction <maximumf>, %132, %cst_62 [1] : vector<16x16xf32> to vector<16xf32>
    %134 = vector.shape_cast %133 : vector<16xf32> to vector<16x1xf32>
    %135 = vector.broadcast %134 : vector<16x1xf32> to vector<16x16xf32>
    %136 = arith.subf %132, %135 : vector<16x16xf32>
    %137 = math.exp %136 : vector<16x16xf32>
    %cst_63 = arith.constant dense<0.000000e+00> : vector<16xf32>
    %138 = vector.multi_reduction <add>, %137, %cst_63 [1] : vector<16x16xf32> to vector<16xf32>
    %139 = vector.shape_cast %138 : vector<16xf32> to vector<16x1xf32>
    %140 = tpu.reciprocal %139 {approx = true} : vector<16x1xf32> -> vector<16x1xf32>
    %141 = vector.broadcast %140 : vector<16x1xf32> to vector<16x16xf32>
    %142 = arith.mulf %137, %141 : vector<16x16xf32>
    %143 = arith.truncf %42 : vector<16x16xf32> to vector<16x16xbf16>
    %144 = arith.truncf %142 : vector<16x16xf32> to vector<16x16xbf16>
    %cst_64 = arith.constant dense<0.000000e+00> : vector<16x16xf32>
    %145 = tpu.matmul %143, %144, %cst_64 {dimension_numbers = #tpu.dot_dimension_numbers<[1], [1], [0], [0], [0, 0, 1, 0], [], []>} : vector<16x16xbf16>, vector<16x16xbf16>, vector<16x16xf32> -> vector<16x16xf32>
    %146 = arith.addf %42, %145 : vector<16x16xf32>
    %147 = arith.addf %146, %121 : vector<16x16xf32>
    %cst_65 = arith.constant dense<0xFF800000> : vector<16xf32>
    %148 = vector.multi_reduction <maximumf>, %147, %cst_65 [1] : vector<16x16xf32> to vector<16xf32>
    %149 = vector.shape_cast %148 : vector<16xf32> to vector<16x1xf32>
    %150 = vector.broadcast %149 : vector<16x1xf32> to vector<16x16xf32>
    %151 = arith.subf %147, %150 : vector<16x16xf32>
    %152 = math.exp %151 : vector<16x16xf32>
    %cst_66 = arith.constant dense<0.000000e+00> : vector<16xf32>
    %153 = vector.multi_reduction <add>, %152, %cst_66 [1] : vector<16x16xf32> to vector<16xf32>
    %154 = vector.shape_cast %153 : vector<16xf32> to vector<16x1xf32>
    %155 = tpu.reciprocal %154 {approx = true} : vector<16x1xf32> -> vector<16x1xf32>
    %156 = vector.broadcast %155 : vector<16x1xf32> to vector<16x16xf32>
    %157 = arith.mulf %152, %156 : vector<16x16xf32>
    %158 = vector.extract_strided_slice %124 {offsets = [0, 0], sizes = [16, 8], strides = [1, 1]} : vector<16x32xf32> to vector<16x8xf32>
    %159 = arith.truncf %157 : vector<16x16xf32> to vector<16x16xbf16>
    %160 = arith.truncf %158 : vector<16x8xf32> to vector<16x8xbf16>
    %cst_67 = arith.constant dense<0.000000e+00> : vector<16x8xf32>
    %161 = tpu.matmul %159, %160, %cst_67 {dimension_numbers = #tpu.dot_dimension_numbers<[1], [0], [0], [1], [0, 0, 1, 1], [], []>} : vector<16x16xbf16>, vector<16x8xbf16>, vector<16x8xf32> -> vector<16x8xf32>
    %162 = vector.extract_strided_slice %114 {offsets = [16, 0], sizes = [16, 8], strides = [1, 1]} : vector<128x8xf32> to vector<16x8xf32>
    %163 = vector.extract_strided_slice %118 {offsets = [16, 0], sizes = [16, 8], strides = [1, 1]} : vector<128x8xf32> to vector<16x8xf32>
    %164 = arith.truncf %162 : vector<16x8xf32> to vector<16x8xbf16>
    %165 = arith.truncf %163 : vector<16x8xf32> to vector<16x8xbf16>
    %cst_68 = arith.constant dense<0.000000e+00> : vector<16x16xf32>
    %166 = tpu.matmul %164, %165, %cst_68 {dimension_numbers = #tpu.dot_dimension_numbers<[1], [1], [0], [0], [0, 0, 1, 0], [], []>} : vector<16x8xbf16>, vector<16x8xbf16>, vector<16x16xf32> -> vector<16x16xf32>
    %cst_69 = arith.constant 0.353553385 : f32
    %167 = vector.broadcast %cst_69 : f32 to vector<16x16xf32>
    %168 = arith.mulf %166, %167 : vector<16x16xf32>
    %169 = arith.addf %168, %123 : vector<16x16xf32>
    %cst_70 = arith.constant dense<0xFF800000> : vector<16xf32>
    %170 = vector.multi_reduction <maximumf>, %169, %cst_70 [1] : vector<16x16xf32> to vector<16xf32>
    %171 = vector.shape_cast %170 : vector<16xf32> to vector<16x1xf32>
    %172 = vector.broadcast %171 : vector<16x1xf32> to vector<16x16xf32>
    %173 = arith.subf %169, %172 : vector<16x16xf32>
    %174 = math.exp %173 : vector<16x16xf32>
    %cst_71 = arith.constant dense<0.000000e+00> : vector<16xf32>
    %175 = vector.multi_reduction <add>, %174, %cst_71 [1] : vector<16x16xf32> to vector<16xf32>
    %176 = vector.shape_cast %175 : vector<16xf32> to vector<16x1xf32>
    %177 = tpu.reciprocal %176 {approx = true} : vector<16x1xf32> -> vector<16x1xf32>
    %178 = vector.broadcast %177 : vector<16x1xf32> to vector<16x16xf32>
    %179 = arith.mulf %174, %178 : vector<16x16xf32>
    %180 = arith.truncf %50 : vector<16x16xf32> to vector<16x16xbf16>
    %181 = arith.truncf %179 : vector<16x16xf32> to vector<16x16xbf16>
    %cst_72 = arith.constant dense<0.000000e+00> : vector<16x16xf32>
    %182 = tpu.matmul %180, %181, %cst_72 {dimension_numbers = #tpu.dot_dimension_numbers<[1], [1], [0], [0], [0, 0, 1, 0], [], []>} : vector<16x16xbf16>, vector<16x16xbf16>, vector<16x16xf32> -> vector<16x16xf32>
    %183 = arith.addf %50, %182 : vector<16x16xf32>
    %184 = arith.addf %183, %121 : vector<16x16xf32>
    %cst_73 = arith.constant dense<0xFF800000> : vector<16xf32>
    %185 = vector.multi_reduction <maximumf>, %184, %cst_73 [1] : vector<16x16xf32> to vector<16xf32>
    %186 = vector.shape_cast %185 : vector<16xf32> to vector<16x1xf32>
    %187 = vector.broadcast %186 : vector<16x1xf32> to vector<16x16xf32>
    %188 = arith.subf %184, %187 : vector<16x16xf32>
    %189 = math.exp %188 : vector<16x16xf32>
    %cst_74 = arith.constant dense<0.000000e+00> : vector<16xf32>
    %190 = vector.multi_reduction <add>, %189, %cst_74 [1] : vector<16x16xf32> to vector<16xf32>
    %191 = vector.shape_cast %190 : vector<16xf32> to vector<16x1xf32>
    %192 = tpu.reciprocal %191 {approx = true} : vector<16x1xf32> -> vector<16x1xf32>
    %193 = vector.broadcast %192 : vector<16x1xf32> to vector<16x16xf32>
    %194 = arith.mulf %189, %193 : vector<16x16xf32>
    %195 = vector.extract_strided_slice %124 {offsets = [0, 8], sizes = [16, 8], strides = [1, 1]} : vector<16x32xf32> to vector<16x8xf32>
    %196 = arith.truncf %194 : vector<16x16xf32> to vector<16x16xbf16>
    %197 = arith.truncf %195 : vector<16x8xf32> to vector<16x8xbf16>
    %cst_75 = arith.constant dense<0.000000e+00> : vector<16x8xf32>
    %198 = tpu.matmul %196, %197, %cst_75 {dimension_numbers = #tpu.dot_dimension_numbers<[1], [0], [0], [1], [0, 0, 1, 1], [], []>} : vector<16x16xbf16>, vector<16x8xbf16>, vector<16x8xf32> -> vector<16x8xf32>
    %199 = vector.extract_strided_slice %114 {offsets = [32, 0], sizes = [16, 8], strides = [1, 1]} : vector<128x8xf32> to vector<16x8xf32>
    %200 = vector.extract_strided_slice %118 {offsets = [32, 0], sizes = [16, 8], strides = [1, 1]} : vector<128x8xf32> to vector<16x8xf32>
    %201 = arith.truncf %199 : vector<16x8xf32> to vector<16x8xbf16>
    %202 = arith.truncf %200 : vector<16x8xf32> to vector<16x8xbf16>
    %cst_76 = arith.constant dense<0.000000e+00> : vector<16x16xf32>
    %203 = tpu.matmul %201, %202, %cst_76 {dimension_numbers = #tpu.dot_dimension_numbers<[1], [1], [0], [0], [0, 0, 1, 0], [], []>} : vector<16x8xbf16>, vector<16x8xbf16>, vector<16x16xf32> -> vector<16x16xf32>
    %cst_77 = arith.constant 0.353553385 : f32
    %204 = vector.broadcast %cst_77 : f32 to vector<16x16xf32>
    %205 = arith.mulf %203, %204 : vector<16x16xf32>
    %206 = arith.addf %205, %123 : vector<16x16xf32>
    %cst_78 = arith.constant dense<0xFF800000> : vector<16xf32>
    %207 = vector.multi_reduction <maximumf>, %206, %cst_78 [1] : vector<16x16xf32> to vector<16xf32>
    %208 = vector.shape_cast %207 : vector<16xf32> to vector<16x1xf32>
    %209 = vector.broadcast %208 : vector<16x1xf32> to vector<16x16xf32>
    %210 = arith.subf %206, %209 : vector<16x16xf32>
    %211 = math.exp %210 : vector<16x16xf32>
    %cst_79 = arith.constant dense<0.000000e+00> : vector<16xf32>
    %212 = vector.multi_reduction <add>, %211, %cst_79 [1] : vector<16x16xf32> to vector<16xf32>
    %213 = vector.shape_cast %212 : vector<16xf32> to vector<16x1xf32>
    %214 = tpu.reciprocal %213 {approx = true} : vector<16x1xf32> -> vector<16x1xf32>
    %215 = vector.broadcast %214 : vector<16x1xf32> to vector<16x16xf32>
    %216 = arith.mulf %211, %215 : vector<16x16xf32>
    %217 = arith.truncf %58 : vector<16x16xf32> to vector<16x16xbf16>
    %218 = arith.truncf %216 : vector<16x16xf32> to vector<16x16xbf16>
    %cst_80 = arith.constant dense<0.000000e+00> : vector<16x16xf32>
    %219 = tpu.matmul %217, %218, %cst_80 {dimension_numbers = #tpu.dot_dimension_numbers<[1], [1], [0], [0], [0, 0, 1, 0], [], []>} : vector<16x16xbf16>, vector<16x16xbf16>, vector<16x16xf32> -> vector<16x16xf32>
    %220 = arith.addf %58, %219 : vector<16x16xf32>
    %221 = arith.addf %220, %121 : vector<16x16xf32>
    %cst_81 = arith.constant dense<0xFF800000> : vector<16xf32>
    %222 = vector.multi_reduction <maximumf>, %221, %cst_81 [1] : vector<16x16xf32> to vector<16xf32>
    %223 = vector.shape_cast %222 : vector<16xf32> to vector<16x1xf32>
    %224 = vector.broadcast %223 : vector<16x1xf32> to vector<16x16xf32>
    %225 = arith.subf %221, %224 : vector<16x16xf32>
    %226 = math.exp %225 : vector<16x16xf32>
    %cst_82 = arith.constant dense<0.000000e+00> : vector<16xf32>
    %227 = vector.multi_reduction <add>, %226, %cst_82 [1] : vector<16x16xf32> to vector<16xf32>
    %228 = vector.shape_cast %227 : vector<16xf32> to vector<16x1xf32>
    %229 = tpu.reciprocal %228 {approx = true} : vector<16x1xf32> -> vector<16x1xf32>
    %230 = vector.broadcast %229 : vector<16x1xf32> to vector<16x16xf32>
    %231 = arith.mulf %226, %230 : vector<16x16xf32>
    %232 = vector.extract_strided_slice %124 {offsets = [0, 16], sizes = [16, 8], strides = [1, 1]} : vector<16x32xf32> to vector<16x8xf32>
    %233 = arith.truncf %231 : vector<16x16xf32> to vector<16x16xbf16>
    %234 = arith.truncf %232 : vector<16x8xf32> to vector<16x8xbf16>
    %cst_83 = arith.constant dense<0.000000e+00> : vector<16x8xf32>
    %235 = tpu.matmul %233, %234, %cst_83 {dimension_numbers = #tpu.dot_dimension_numbers<[1], [0], [0], [1], [0, 0, 1, 1], [], []>} : vector<16x16xbf16>, vector<16x8xbf16>, vector<16x8xf32> -> vector<16x8xf32>
    %236 = vector.extract_strided_slice %114 {offsets = [48, 0], sizes = [16, 8], strides = [1, 1]} : vector<128x8xf32> to vector<16x8xf32>
    %237 = vector.extract_strided_slice %118 {offsets = [48, 0], sizes = [16, 8], strides = [1, 1]} : vector<128x8xf32> to vector<16x8xf32>
    %238 = arith.truncf %236 : vector<16x8xf32> to vector<16x8xbf16>
    %239 = arith.truncf %237 : vector<16x8xf32> to vector<16x8xbf16>
    %cst_84 = arith.constant dense<0.000000e+00> : vector<16x16xf32>
    %240 = tpu.matmul %238, %239, %cst_84 {dimension_numbers = #tpu.dot_dimension_numbers<[1], [1], [0], [0], [0, 0, 1, 0], [], []>} : vector<16x8xbf16>, vector<16x8xbf16>, vector<16x16xf32> -> vector<16x16xf32>
    %cst_85 = arith.constant 0.353553385 : f32
    %241 = vector.broadcast %cst_85 : f32 to vector<16x16xf32>
    %242 = arith.mulf %240, %241 : vector<16x16xf32>
    %243 = arith.addf %242, %123 : vector<16x16xf32>
    %cst_86 = arith.constant dense<0xFF800000> : vector<16xf32>
    %244 = vector.multi_reduction <maximumf>, %243, %cst_86 [1] : vector<16x16xf32> to vector<16xf32>
    %245 = vector.shape_cast %244 : vector<16xf32> to vector<16x1xf32>
    %246 = vector.broadcast %245 : vector<16x1xf32> to vector<16x16xf32>
    %247 = arith.subf %243, %246 : vector<16x16xf32>
    %248 = math.exp %247 : vector<16x16xf32>
    %cst_87 = arith.constant dense<0.000000e+00> : vector<16xf32>
    %249 = vector.multi_reduction <add>, %248, %cst_87 [1] : vector<16x16xf32> to vector<16xf32>
    %250 = vector.shape_cast %249 : vector<16xf32> to vector<16x1xf32>
    %251 = tpu.reciprocal %250 {approx = true} : vector<16x1xf32> -> vector<16x1xf32>
    %252 = vector.broadcast %251 : vector<16x1xf32> to vector<16x16xf32>
    %253 = arith.mulf %248, %252 : vector<16x16xf32>
    %254 = arith.truncf %66 : vector<16x16xf32> to vector<16x16xbf16>
    %255 = arith.truncf %253 : vector<16x16xf32> to vector<16x16xbf16>
    %cst_88 = arith.constant dense<0.000000e+00> : vector<16x16xf32>
    %256 = tpu.matmul %254, %255, %cst_88 {dimension_numbers = #tpu.dot_dimension_numbers<[1], [1], [0], [0], [0, 0, 1, 0], [], []>} : vector<16x16xbf16>, vector<16x16xbf16>, vector<16x16xf32> -> vector<16x16xf32>
    %257 = arith.addf %66, %256 : vector<16x16xf32>
    %258 = arith.addf %257, %121 : vector<16x16xf32>
    %cst_89 = arith.constant dense<0xFF800000> : vector<16xf32>
    %259 = vector.multi_reduction <maximumf>, %258, %cst_89 [1] : vector<16x16xf32> to vector<16xf32>
    %260 = vector.shape_cast %259 : vector<16xf32> to vector<16x1xf32>
    %261 = vector.broadcast %260 : vector<16x1xf32> to vector<16x16xf32>
    %262 = arith.subf %258, %261 : vector<16x16xf32>
    %263 = math.exp %262 : vector<16x16xf32>
    %cst_90 = arith.constant dense<0.000000e+00> : vector<16xf32>
    %264 = vector.multi_reduction <add>, %263, %cst_90 [1] : vector<16x16xf32> to vector<16xf32>
    %265 = vector.shape_cast %264 : vector<16xf32> to vector<16x1xf32>
    %266 = tpu.reciprocal %265 {approx = true} : vector<16x1xf32> -> vector<16x1xf32>
    %267 = vector.broadcast %266 : vector<16x1xf32> to vector<16x16xf32>
    %268 = arith.mulf %263, %267 : vector<16x16xf32>
    %269 = vector.extract_strided_slice %124 {offsets = [0, 24], sizes = [16, 8], strides = [1, 1]} : vector<16x32xf32> to vector<16x8xf32>
    %270 = arith.truncf %268 : vector<16x16xf32> to vector<16x16xbf16>
    %271 = arith.truncf %269 : vector<16x8xf32> to vector<16x8xbf16>
    %cst_91 = arith.constant dense<0.000000e+00> : vector<16x8xf32>
    %272 = tpu.matmul %270, %271, %cst_91 {dimension_numbers = #tpu.dot_dimension_numbers<[1], [0], [0], [1], [0, 0, 1, 1], [], []>} : vector<16x16xbf16>, vector<16x8xbf16>, vector<16x8xf32> -> vector<16x8xf32>
    %273 = tpu.concatenate %161, %198, %235, %272 in 1 : vector<16x8xf32>, vector<16x8xf32>, vector<16x8xf32>, vector<16x8xf32> -> vector<16x32xf32>
    %274 = vector.extract_strided_slice %35 {offsets = [1, 0], sizes = [1, 16], strides = [1, 1]} : vector<2x16xf32> to vector<1x16xf32>
    %275 = vector.shape_cast %274 : vector<1x16xf32> to vector<1x16xf32>
    %276 = vector.broadcast %275 : vector<1x16xf32> to vector<16x16xf32>
    %277 = vector.shape_cast %274 : vector<1x16xf32> to vector<1x16xf32>
    %278 = vector.broadcast %277 : vector<1x16xf32> to vector<16x16xf32>
    %279 = vector.extract_strided_slice %34 {offsets = [16, 0], sizes = [16, 32], strides = [1, 1]} : vector<32x32xf32> to vector<16x32xf32>
    %280 = vector.extract_strided_slice %114 {offsets = [64, 0], sizes = [16, 8], strides = [1, 1]} : vector<128x8xf32> to vector<16x8xf32>
    %281 = vector.extract_strided_slice %118 {offsets = [64, 0], sizes = [16, 8], strides = [1, 1]} : vector<128x8xf32> to vector<16x8xf32>
    %282 = arith.truncf %280 : vector<16x8xf32> to vector<16x8xbf16>
    %283 = arith.truncf %281 : vector<16x8xf32> to vector<16x8xbf16>
    %cst_92 = arith.constant dense<0.000000e+00> : vector<16x16xf32>
    %284 = tpu.matmul %282, %283, %cst_92 {dimension_numbers = #tpu.dot_dimension_numbers<[1], [1], [0], [0], [0, 0, 1, 0], [], []>} : vector<16x8xbf16>, vector<16x8xbf16>, vector<16x16xf32> -> vector<16x16xf32>
    %cst_93 = arith.constant 0.353553385 : f32
    %285 = vector.broadcast %cst_93 : f32 to vector<16x16xf32>
    %286 = arith.mulf %284, %285 : vector<16x16xf32>
    %287 = arith.addf %286, %278 : vector<16x16xf32>
    %cst_94 = arith.constant dense<0xFF800000> : vector<16xf32>
    %288 = vector.multi_reduction <maximumf>, %287, %cst_94 [1] : vector<16x16xf32> to vector<16xf32>
    %289 = vector.shape_cast %288 : vector<16xf32> to vector<16x1xf32>
    %290 = vector.broadcast %289 : vector<16x1xf32> to vector<16x16xf32>
    %291 = arith.subf %287, %290 : vector<16x16xf32>
    %292 = math.exp %291 : vector<16x16xf32>
    %cst_95 = arith.constant dense<0.000000e+00> : vector<16xf32>
    %293 = vector.multi_reduction <add>, %292, %cst_95 [1] : vector<16x16xf32> to vector<16xf32>
    %294 = vector.shape_cast %293 : vector<16xf32> to vector<16x1xf32>
    %295 = tpu.reciprocal %294 {approx = true} : vector<16x1xf32> -> vector<16x1xf32>
    %296 = vector.broadcast %295 : vector<16x1xf32> to vector<16x16xf32>
    %297 = arith.mulf %292, %296 : vector<16x16xf32>
    %298 = arith.truncf %76 : vector<16x16xf32> to vector<16x16xbf16>
    %299 = arith.truncf %297 : vector<16x16xf32> to vector<16x16xbf16>
    %cst_96 = arith.constant dense<0.000000e+00> : vector<16x16xf32>
    %300 = tpu.matmul %298, %299, %cst_96 {dimension_numbers = #tpu.dot_dimension_numbers<[1], [1], [0], [0], [0, 0, 1, 0], [], []>} : vector<16x16xbf16>, vector<16x16xbf16>, vector<16x16xf32> -> vector<16x16xf32>
    %301 = arith.addf %76, %300 : vector<16x16xf32>
    %302 = arith.addf %301, %276 : vector<16x16xf32>
    %cst_97 = arith.constant dense<0xFF800000> : vector<16xf32>
    %303 = vector.multi_reduction <maximumf>, %302, %cst_97 [1] : vector<16x16xf32> to vector<16xf32>
    %304 = vector.shape_cast %303 : vector<16xf32> to vector<16x1xf32>
    %305 = vector.broadcast %304 : vector<16x1xf32> to vector<16x16xf32>
    %306 = arith.subf %302, %305 : vector<16x16xf32>
    %307 = math.exp %306 : vector<16x16xf32>
    %cst_98 = arith.constant dense<0.000000e+00> : vector<16xf32>
    %308 = vector.multi_reduction <add>, %307, %cst_98 [1] : vector<16x16xf32> to vector<16xf32>
    %309 = vector.shape_cast %308 : vector<16xf32> to vector<16x1xf32>
    %310 = tpu.reciprocal %309 {approx = true} : vector<16x1xf32> -> vector<16x1xf32>
    %311 = vector.broadcast %310 : vector<16x1xf32> to vector<16x16xf32>
    %312 = arith.mulf %307, %311 : vector<16x16xf32>
    %313 = vector.extract_strided_slice %279 {offsets = [0, 0], sizes = [16, 8], strides = [1, 1]} : vector<16x32xf32> to vector<16x8xf32>
    %314 = arith.truncf %312 : vector<16x16xf32> to vector<16x16xbf16>
    %315 = arith.truncf %313 : vector<16x8xf32> to vector<16x8xbf16>
    %cst_99 = arith.constant dense<0.000000e+00> : vector<16x8xf32>
    %316 = tpu.matmul %314, %315, %cst_99 {dimension_numbers = #tpu.dot_dimension_numbers<[1], [0], [0], [1], [0, 0, 1, 1], [], []>} : vector<16x16xbf16>, vector<16x8xbf16>, vector<16x8xf32> -> vector<16x8xf32>
    %317 = vector.extract_strided_slice %114 {offsets = [80, 0], sizes = [16, 8], strides = [1, 1]} : vector<128x8xf32> to vector<16x8xf32>
    %318 = vector.extract_strided_slice %118 {offsets = [80, 0], sizes = [16, 8], strides = [1, 1]} : vector<128x8xf32> to vector<16x8xf32>
    %319 = arith.truncf %317 : vector<16x8xf32> to vector<16x8xbf16>
    %320 = arith.truncf %318 : vector<16x8xf32> to vector<16x8xbf16>
    %cst_100 = arith.constant dense<0.000000e+00> : vector<16x16xf32>
    %321 = tpu.matmul %319, %320, %cst_100 {dimension_numbers = #tpu.dot_dimension_numbers<[1], [1], [0], [0], [0, 0, 1, 0], [], []>} : vector<16x8xbf16>, vector<16x8xbf16>, vector<16x16xf32> -> vector<16x16xf32>
    %cst_101 = arith.constant 0.353553385 : f32
    %322 = vector.broadcast %cst_101 : f32 to vector<16x16xf32>
    %323 = arith.mulf %321, %322 : vector<16x16xf32>
    %324 = arith.addf %323, %278 : vector<16x16xf32>
    %cst_102 = arith.constant dense<0xFF800000> : vector<16xf32>
    %325 = vector.multi_reduction <maximumf>, %324, %cst_102 [1] : vector<16x16xf32> to vector<16xf32>
    %326 = vector.shape_cast %325 : vector<16xf32> to vector<16x1xf32>
    %327 = vector.broadcast %326 : vector<16x1xf32> to vector<16x16xf32>
    %328 = arith.subf %324, %327 : vector<16x16xf32>
    %329 = math.exp %328 : vector<16x16xf32>
    %cst_103 = arith.constant dense<0.000000e+00> : vector<16xf32>
    %330 = vector.multi_reduction <add>, %329, %cst_103 [1] : vector<16x16xf32> to vector<16xf32>
    %331 = vector.shape_cast %330 : vector<16xf32> to vector<16x1xf32>
    %332 = tpu.reciprocal %331 {approx = true} : vector<16x1xf32> -> vector<16x1xf32>
    %333 = vector.broadcast %332 : vector<16x1xf32> to vector<16x16xf32>
    %334 = arith.mulf %329, %333 : vector<16x16xf32>
    %335 = arith.truncf %84 : vector<16x16xf32> to vector<16x16xbf16>
    %336 = arith.truncf %334 : vector<16x16xf32> to vector<16x16xbf16>
    %cst_104 = arith.constant dense<0.000000e+00> : vector<16x16xf32>
    %337 = tpu.matmul %335, %336, %cst_104 {dimension_numbers = #tpu.dot_dimension_numbers<[1], [1], [0], [0], [0, 0, 1, 0], [], []>} : vector<16x16xbf16>, vector<16x16xbf16>, vector<16x16xf32> -> vector<16x16xf32>
    %338 = arith.addf %84, %337 : vector<16x16xf32>
    %339 = arith.addf %338, %276 : vector<16x16xf32>
    %cst_105 = arith.constant dense<0xFF800000> : vector<16xf32>
    %340 = vector.multi_reduction <maximumf>, %339, %cst_105 [1] : vector<16x16xf32> to vector<16xf32>
    %341 = vector.shape_cast %340 : vector<16xf32> to vector<16x1xf32>
    %342 = vector.broadcast %341 : vector<16x1xf32> to vector<16x16xf32>
    %343 = arith.subf %339, %342 : vector<16x16xf32>
    %344 = math.exp %343 : vector<16x16xf32>
    %cst_106 = arith.constant dense<0.000000e+00> : vector<16xf32>
    %345 = vector.multi_reduction <add>, %344, %cst_106 [1] : vector<16x16xf32> to vector<16xf32>
    %346 = vector.shape_cast %345 : vector<16xf32> to vector<16x1xf32>
    %347 = tpu.reciprocal %346 {approx = true} : vector<16x1xf32> -> vector<16x1xf32>
    %348 = vector.broadcast %347 : vector<16x1xf32> to vector<16x16xf32>
    %349 = arith.mulf %344, %348 : vector<16x16xf32>
    %350 = vector.extract_strided_slice %279 {offsets = [0, 8], sizes = [16, 8], strides = [1, 1]} : vector<16x32xf32> to vector<16x8xf32>
    %351 = arith.truncf %349 : vector<16x16xf32> to vector<16x16xbf16>
    %352 = arith.truncf %350 : vector<16x8xf32> to vector<16x8xbf16>
    %cst_107 = arith.constant dense<0.000000e+00> : vector<16x8xf32>
    %353 = tpu.matmul %351, %352, %cst_107 {dimension_numbers = #tpu.dot_dimension_numbers<[1], [0], [0], [1], [0, 0, 1, 1], [], []>} : vector<16x16xbf16>, vector<16x8xbf16>, vector<16x8xf32> -> vector<16x8xf32>
    %354 = vector.extract_strided_slice %114 {offsets = [96, 0], sizes = [16, 8], strides = [1, 1]} : vector<128x8xf32> to vector<16x8xf32>
    %355 = vector.extract_strided_slice %118 {offsets = [96, 0], sizes = [16, 8], strides = [1, 1]} : vector<128x8xf32> to vector<16x8xf32>
    %356 = arith.truncf %354 : vector<16x8xf32> to vector<16x8xbf16>
    %357 = arith.truncf %355 : vector<16x8xf32> to vector<16x8xbf16>
    %cst_108 = arith.constant dense<0.000000e+00> : vector<16x16xf32>
    %358 = tpu.matmul %356, %357, %cst_108 {dimension_numbers = #tpu.dot_dimension_numbers<[1], [1], [0], [0], [0, 0, 1, 0], [], []>} : vector<16x8xbf16>, vector<16x8xbf16>, vector<16x16xf32> -> vector<16x16xf32>
    %cst_109 = arith.constant 0.353553385 : f32
    %359 = vector.broadcast %cst_109 : f32 to vector<16x16xf32>
    %360 = arith.mulf %358, %359 : vector<16x16xf32>
    %361 = arith.addf %360, %278 : vector<16x16xf32>
    %cst_110 = arith.constant dense<0xFF800000> : vector<16xf32>
    %362 = vector.multi_reduction <maximumf>, %361, %cst_110 [1] : vector<16x16xf32> to vector<16xf32>
    %363 = vector.shape_cast %362 : vector<16xf32> to vector<16x1xf32>
    %364 = vector.broadcast %363 : vector<16x1xf32> to vector<16x16xf32>
    %365 = arith.subf %361, %364 : vector<16x16xf32>
    %366 = math.exp %365 : vector<16x16xf32>
    %cst_111 = arith.constant dense<0.000000e+00> : vector<16xf32>
    %367 = vector.multi_reduction <add>, %366, %cst_111 [1] : vector<16x16xf32> to vector<16xf32>
    %368 = vector.shape_cast %367 : vector<16xf32> to vector<16x1xf32>
    %369 = tpu.reciprocal %368 {approx = true} : vector<16x1xf32> -> vector<16x1xf32>
    %370 = vector.broadcast %369 : vector<16x1xf32> to vector<16x16xf32>
    %371 = arith.mulf %366, %370 : vector<16x16xf32>
    %372 = arith.truncf %92 : vector<16x16xf32> to vector<16x16xbf16>
    %373 = arith.truncf %371 : vector<16x16xf32> to vector<16x16xbf16>
    %cst_112 = arith.constant dense<0.000000e+00> : vector<16x16xf32>
    %374 = tpu.matmul %372, %373, %cst_112 {dimension_numbers = #tpu.dot_dimension_numbers<[1], [1], [0], [0], [0, 0, 1, 0], [], []>} : vector<16x16xbf16>, vector<16x16xbf16>, vector<16x16xf32> -> vector<16x16xf32>
    %375 = arith.addf %92, %374 : vector<16x16xf32>
    %376 = arith.addf %375, %276 : vector<16x16xf32>
    %cst_113 = arith.constant dense<0xFF800000> : vector<16xf32>
    %377 = vector.multi_reduction <maximumf>, %376, %cst_113 [1] : vector<16x16xf32> to vector<16xf32>
    %378 = vector.shape_cast %377 : vector<16xf32> to vector<16x1xf32>
    %379 = vector.broadcast %378 : vector<16x1xf32> to vector<16x16xf32>
    %380 = arith.subf %376, %379 : vector<16x16xf32>
    %381 = math.exp %380 : vector<16x16xf32>
    %cst_114 = arith.constant dense<0.000000e+00> : vector<16xf32>
    %382 = vector.multi_reduction <add>, %381, %cst_114 [1] : vector<16x16xf32> to vector<16xf32>
    %383 = vector.shape_cast %382 : vector<16xf32> to vector<16x1xf32>
    %384 = tpu.reciprocal %383 {approx = true} : vector<16x1xf32> -> vector<16x1xf32>
    %385 = vector.broadcast %384 : vector<16x1xf32> to vector<16x16xf32>
    %386 = arith.mulf %381, %385 : vector<16x16xf32>
    %387 = vector.extract_strided_slice %279 {offsets = [0, 16], sizes = [16, 8], strides = [1, 1]} : vector<16x32xf32> to vector<16x8xf32>
    %388 = arith.truncf %386 : vector<16x16xf32> to vector<16x16xbf16>
    %389 = arith.truncf %387 : vector<16x8xf32> to vector<16x8xbf16>
    %cst_115 = arith.constant dense<0.000000e+00> : vector<16x8xf32>
    %390 = tpu.matmul %388, %389, %cst_115 {dimension_numbers = #tpu.dot_dimension_numbers<[1], [0], [0], [1], [0, 0, 1, 1], [], []>} : vector<16x16xbf16>, vector<16x8xbf16>, vector<16x8xf32> -> vector<16x8xf32>
    %391 = vector.extract_strided_slice %114 {offsets = [112, 0], sizes = [16, 8], strides = [1, 1]} : vector<128x8xf32> to vector<16x8xf32>
    %392 = vector.extract_strided_slice %118 {offsets = [112, 0], sizes = [16, 8], strides = [1, 1]} : vector<128x8xf32> to vector<16x8xf32>
    %393 = arith.truncf %391 : vector<16x8xf32> to vector<16x8xbf16>
    %394 = arith.truncf %392 : vector<16x8xf32> to vector<16x8xbf16>
    %cst_116 = arith.constant dense<0.000000e+00> : vector<16x16xf32>
    %395 = tpu.matmul %393, %394, %cst_116 {dimension_numbers = #tpu.dot_dimension_numbers<[1], [1], [0], [0], [0, 0, 1, 0], [], []>} : vector<16x8xbf16>, vector<16x8xbf16>, vector<16x16xf32> -> vector<16x16xf32>
    %cst_117 = arith.constant 0.353553385 : f32
    %396 = vector.broadcast %cst_117 : f32 to vector<16x16xf32>
    %397 = arith.mulf %395, %396 : vector<16x16xf32>
    %398 = arith.addf %397, %278 : vector<16x16xf32>
    %cst_118 = arith.constant dense<0xFF800000> : vector<16xf32>
    %399 = vector.multi_reduction <maximumf>, %398, %cst_118 [1] : vector<16x16xf32> to vector<16xf32>
    %400 = vector.shape_cast %399 : vector<16xf32> to vector<16x1xf32>
    %401 = vector.broadcast %400 : vector<16x1xf32> to vector<16x16xf32>
    %402 = arith.subf %398, %401 : vector<16x16xf32>
    %403 = math.exp %402 : vector<16x16xf32>
    %cst_119 = arith.constant dense<0.000000e+00> : vector<16xf32>
    %404 = vector.multi_reduction <add>, %403, %cst_119 [1] : vector<16x16xf32> to vector<16xf32>
    %405 = vector.shape_cast %404 : vector<16xf32> to vector<16x1xf32>
    %406 = tpu.reciprocal %405 {approx = true} : vector<16x1xf32> -> vector<16x1xf32>
    %407 = vector.broadcast %406 : vector<16x1xf32> to vector<16x16xf32>
    %408 = arith.mulf %403, %407 : vector<16x16xf32>
    %409 = arith.truncf %100 : vector<16x16xf32> to vector<16x16xbf16>
    %410 = arith.truncf %408 : vector<16x16xf32> to vector<16x16xbf16>
    %cst_120 = arith.constant dense<0.000000e+00> : vector<16x16xf32>
    %411 = tpu.matmul %409, %410, %cst_120 {dimension_numbers = #tpu.dot_dimension_numbers<[1], [1], [0], [0], [0, 0, 1, 0], [], []>} : vector<16x16xbf16>, vector<16x16xbf16>, vector<16x16xf32> -> vector<16x16xf32>
    %412 = arith.addf %100, %411 : vector<16x16xf32>
    %413 = arith.addf %412, %276 : vector<16x16xf32>
    %cst_121 = arith.constant dense<0xFF800000> : vector<16xf32>
    %414 = vector.multi_reduction <maximumf>, %413, %cst_121 [1] : vector<16x16xf32> to vector<16xf32>
    %415 = vector.shape_cast %414 : vector<16xf32> to vector<16x1xf32>
    %416 = vector.broadcast %415 : vector<16x1xf32> to vector<16x16xf32>
    %417 = arith.subf %413, %416 : vector<16x16xf32>
    %418 = math.exp %417 : vector<16x16xf32>
    %cst_122 = arith.constant dense<0.000000e+00> : vector<16xf32>
    %419 = vector.multi_reduction <add>, %418, %cst_122 [1] : vector<16x16xf32> to vector<16xf32>
    %420 = vector.shape_cast %419 : vector<16xf32> to vector<16x1xf32>
    %421 = tpu.reciprocal %420 {approx = true} : vector<16x1xf32> -> vector<16x1xf32>
    %422 = vector.broadcast %421 : vector<16x1xf32> to vector<16x16xf32>
    %423 = arith.mulf %418, %422 : vector<16x16xf32>
    %424 = vector.extract_strided_slice %279 {offsets = [0, 24], sizes = [16, 8], strides = [1, 1]} : vector<16x32xf32> to vector<16x8xf32>
    %425 = arith.truncf %423 : vector<16x16xf32> to vector<16x16xbf16>
    %426 = arith.truncf %424 : vector<16x8xf32> to vector<16x8xbf16>
    %cst_123 = arith.constant dense<0.000000e+00> : vector<16x8xf32>
    %427 = tpu.matmul %425, %426, %cst_123 {dimension_numbers = #tpu.dot_dimension_numbers<[1], [0], [0], [1], [0, 0, 1, 1], [], []>} : vector<16x16xbf16>, vector<16x8xbf16>, vector<16x8xf32> -> vector<16x8xf32>
    %428 = tpu.concatenate %316, %353, %390, %427 in 1 : vector<16x8xf32>, vector<16x8xf32>, vector<16x8xf32>, vector<16x8xf32> -> vector<16x32xf32>
    %429 = tpu.concatenate %273, %428 in 0 : vector<16x32xf32>, vector<16x32xf32> -> vector<32x32xf32>
    %430 = arith.truncf %429 : vector<32x32xf32> to vector<32x32xbf16>
    %cst_124 = arith.constant dense<0.000000e+00> : vector<32x32xf32>
    %431 = tpu.matmul %430, %14, %cst_124 {dimension_numbers = #tpu.dot_dimension_numbers<[1], [0], [0], [1], [0, 0, 1, 1], [], []>} : vector<32x32xbf16>, vector<32x32xbf16>, vector<32x32xf32> -> vector<32x32xf32>
    %432 = vector.broadcast %18 : vector<1x32xf32> to vector<32x32xf32>
    %433 = arith.addf %431, %432 : vector<32x32xf32>
    %c0_125 = arith.constant 0 : index
    %c0_126 = arith.constant 0 : index
    %c0_127 = arith.constant 0 : index
    %434 = vector.load %arg3[%c0_125, %c0_126, %c0_127] : memref<3x64x32xf32, #tpu.memory_space<vmem>>, vector<1x64x32xf32>
    %435 = vector.shape_cast %434 : vector<1x64x32xf32> to vector<64x32xf32>
    %c1_128 = arith.constant 1 : index
    %c0_129 = arith.constant 0 : index
    %c0_130 = arith.constant 0 : index
    %436 = vector.load %arg3[%c1_128, %c0_129, %c0_130] : memref<3x64x32xf32, #tpu.memory_space<vmem>>, vector<1x64x32xf32>
    %437 = vector.shape_cast %436 : vector<1x64x32xf32> to vector<64x32xf32>
    %c2_131 = arith.constant 2 : index
    %c0_132 = arith.constant 0 : index
    %c0_133 = arith.constant 0 : index
    %438 = vector.load %arg3[%c2_131, %c0_132, %c0_133] : memref<3x64x32xf32, #tpu.memory_space<vmem>>, vector<1x64x32xf32>
    %439 = vector.shape_cast %438 : vector<1x64x32xf32> to vector<64x32xf32>
    %c4 = arith.constant 4 : index
    %c0_134 = arith.constant 0 : index
    %c0_135 = arith.constant 0 : index
    %440 = vector.load %arg5[%c4, %c0_134, %c0_135] : memref<8x32x32xbf16, #tpu.memory_space<vmem>>, vector<1x32x32xbf16>
    %441 = vector.shape_cast %440 : vector<1x32x32xbf16> to vector<32x32xbf16>
    %c5 = arith.constant 5 : index
    %c0_136 = arith.constant 0 : index
    %c0_137 = arith.constant 0 : index
    %442 = vector.load %arg5[%c5, %c0_136, %c0_137] : memref<8x32x32xbf16, #tpu.memory_space<vmem>>, vector<1x32x32xbf16>
    %443 = vector.shape_cast %442 : vector<1x32x32xbf16> to vector<32x32xbf16>
    %c6 = arith.constant 6 : index
    %c0_138 = arith.constant 0 : index
    %c0_139 = arith.constant 0 : index
    %444 = vector.load %arg5[%c6, %c0_138, %c0_139] : memref<8x32x32xbf16, #tpu.memory_space<vmem>>, vector<1x32x32xbf16>
    %445 = vector.shape_cast %444 : vector<1x32x32xbf16> to vector<32x32xbf16>
    %c7 = arith.constant 7 : index
    %c0_140 = arith.constant 0 : index
    %c0_141 = arith.constant 0 : index
    %446 = vector.load %arg5[%c7, %c0_140, %c0_141] : memref<8x32x32xbf16, #tpu.memory_space<vmem>>, vector<1x32x32xbf16>
    %447 = vector.shape_cast %446 : vector<1x32x32xbf16> to vector<32x32xbf16>
    %c4_142 = arith.constant 4 : index
    %c0_143 = arith.constant 0 : index
    %448 = vector.load %arg6[%c4_142, %c0_143] : memref<8x32xf32, #tpu.memory_space<vmem>>, vector<1x32xf32>
    %c5_144 = arith.constant 5 : index
    %c0_145 = arith.constant 0 : index
    %449 = vector.load %arg6[%c5_144, %c0_145] : memref<8x32xf32, #tpu.memory_space<vmem>>, vector<1x32xf32>
    %c6_146 = arith.constant 6 : index
    %c0_147 = arith.constant 0 : index
    %450 = vector.load %arg6[%c6_146, %c0_147] : memref<8x32xf32, #tpu.memory_space<vmem>>, vector<1x32xf32>
    %c7_148 = arith.constant 7 : index
    %c0_149 = arith.constant 0 : index
    %451 = vector.load %arg6[%c7_148, %c0_149] : memref<8x32xf32, #tpu.memory_space<vmem>>, vector<1x32xf32>
    %452 = arith.truncf %0 : vector<32x32xf32> to vector<32x32xbf16>
    %cst_150 = arith.constant dense<0.000000e+00> : vector<32x32xf32>
    %453 = tpu.matmul %452, %441, %cst_150 {dimension_numbers = #tpu.dot_dimension_numbers<[1], [0], [0], [1], [0, 0, 1, 1], [], []>} : vector<32x32xbf16>, vector<32x32xbf16>, vector<32x32xf32> -> vector<32x32xf32>
    %454 = vector.broadcast %448 : vector<1x32xf32> to vector<32x32xf32>
    %455 = arith.addf %453, %454 : vector<32x32xf32>
    %cst_151 = arith.constant 0.353553385 : f32
    %456 = vector.broadcast %cst_151 : f32 to vector<32x32xf32>
    %457 = arith.mulf %455, %456 : vector<32x32xf32>
    %458 = arith.addf %435, %439 : vector<64x32xf32>
    %459 = arith.truncf %458 : vector<64x32xf32> to vector<64x32xbf16>
    %cst_152 = arith.constant dense<0.000000e+00> : vector<64x32xf32>
    %460 = tpu.matmul %459, %443, %cst_152 {dimension_numbers = #tpu.dot_dimension_numbers<[1], [0], [0], [1], [0, 0, 1, 1], [], []>} : vector<64x32xbf16>, vector<32x32xbf16>, vector<64x32xf32> -> vector<64x32xf32>
    %461 = vector.broadcast %449 : vector<1x32xf32> to vector<64x32xf32>
    %462 = arith.addf %460, %461 : vector<64x32xf32>
    %463 = arith.addf %435, %437 : vector<64x32xf32>
    %464 = arith.truncf %463 : vector<64x32xf32> to vector<64x32xbf16>
    %cst_153 = arith.constant dense<0.000000e+00> : vector<64x32xf32>
    %465 = tpu.matmul %464, %445, %cst_153 {dimension_numbers = #tpu.dot_dimension_numbers<[1], [0], [0], [1], [0, 0, 1, 1], [], []>} : vector<64x32xbf16>, vector<32x32xbf16>, vector<64x32xf32> -> vector<64x32xf32>
    %466 = vector.broadcast %450 : vector<1x32xf32> to vector<64x32xf32>
    %467 = arith.addf %465, %466 : vector<64x32xf32>
    %c0_154 = arith.constant 0 : index
    %c0_155 = arith.constant 0 : index
    %468 = vector.load %arg4[%c0_154, %c0_155] : memref<2x32xf32, #tpu.memory_space<vmem>>, vector<2x32xf32>
    %469 = vector.extract_strided_slice %457 {offsets = [0, 0], sizes = [16, 32], strides = [1, 1]} : vector<32x32xf32> to vector<16x32xf32>
    %470 = vector.extract_strided_slice %462 {offsets = [0, 0], sizes = [32, 32], strides = [1, 1]} : vector<64x32xf32> to vector<32x32xf32>
    %471 = vector.extract_strided_slice %469 {offsets = [0, 0], sizes = [16, 8], strides = [1, 1]} : vector<16x32xf32> to vector<16x8xf32>
    %472 = vector.extract_strided_slice %470 {offsets = [0, 0], sizes = [32, 8], strides = [1, 1]} : vector<32x32xf32> to vector<32x8xf32>
    %473 = arith.truncf %471 : vector<16x8xf32> to vector<16x8xbf16>
    %474 = arith.truncf %472 : vector<32x8xf32> to vector<32x8xbf16>
    %cst_156 = arith.constant dense<0.000000e+00> : vector<16x32xf32>
    %475 = tpu.matmul %473, %474, %cst_156 {dimension_numbers = #tpu.dot_dimension_numbers<[1], [1], [0], [0], [0, 0, 1, 0], [], []>} : vector<16x8xbf16>, vector<32x8xbf16>, vector<16x32xf32> -> vector<16x32xf32>
    %476 = arith.truncf %472 : vector<32x8xf32> to vector<32x8xbf16>
    %477 = arith.truncf %471 : vector<16x8xf32> to vector<16x8xbf16>
    %cst_157 = arith.constant dense<0.000000e+00> : vector<32x16xf32>
    %478 = tpu.matmul %476, %477, %cst_157 {dimension_numbers = #tpu.dot_dimension_numbers<[1], [1], [0], [0], [0, 0, 1, 0], [], []>} : vector<32x8xbf16>, vector<16x8xbf16>, vector<32x16xf32> -> vector<32x16xf32>
    %479 = vector.extract_strided_slice %469 {offsets = [0, 8], sizes = [16, 8], strides = [1, 1]} : vector<16x32xf32> to vector<16x8xf32>
    %480 = vector.extract_strided_slice %470 {offsets = [0, 8], sizes = [32, 8], strides = [1, 1]} : vector<32x32xf32> to vector<32x8xf32>
    %481 = arith.truncf %479 : vector<16x8xf32> to vector<16x8xbf16>
    %482 = arith.truncf %480 : vector<32x8xf32> to vector<32x8xbf16>
    %cst_158 = arith.constant dense<0.000000e+00> : vector<16x32xf32>
    %483 = tpu.matmul %481, %482, %cst_158 {dimension_numbers = #tpu.dot_dimension_numbers<[1], [1], [0], [0], [0, 0, 1, 0], [], []>} : vector<16x8xbf16>, vector<32x8xbf16>, vector<16x32xf32> -> vector<16x32xf32>
    %484 = arith.truncf %480 : vector<32x8xf32> to vector<32x8xbf16>
    %485 = arith.truncf %479 : vector<16x8xf32> to vector<16x8xbf16>
    %cst_159 = arith.constant dense<0.000000e+00> : vector<32x16xf32>
    %486 = tpu.matmul %484, %485, %cst_159 {dimension_numbers = #tpu.dot_dimension_numbers<[1], [1], [0], [0], [0, 0, 1, 0], [], []>} : vector<32x8xbf16>, vector<16x8xbf16>, vector<32x16xf32> -> vector<32x16xf32>
    %487 = vector.extract_strided_slice %469 {offsets = [0, 16], sizes = [16, 8], strides = [1, 1]} : vector<16x32xf32> to vector<16x8xf32>
    %488 = vector.extract_strided_slice %470 {offsets = [0, 16], sizes = [32, 8], strides = [1, 1]} : vector<32x32xf32> to vector<32x8xf32>
    %489 = arith.truncf %487 : vector<16x8xf32> to vector<16x8xbf16>
    %490 = arith.truncf %488 : vector<32x8xf32> to vector<32x8xbf16>
    %cst_160 = arith.constant dense<0.000000e+00> : vector<16x32xf32>
    %491 = tpu.matmul %489, %490, %cst_160 {dimension_numbers = #tpu.dot_dimension_numbers<[1], [1], [0], [0], [0, 0, 1, 0], [], []>} : vector<16x8xbf16>, vector<32x8xbf16>, vector<16x32xf32> -> vector<16x32xf32>
    %492 = arith.truncf %488 : vector<32x8xf32> to vector<32x8xbf16>
    %493 = arith.truncf %487 : vector<16x8xf32> to vector<16x8xbf16>
    %cst_161 = arith.constant dense<0.000000e+00> : vector<32x16xf32>
    %494 = tpu.matmul %492, %493, %cst_161 {dimension_numbers = #tpu.dot_dimension_numbers<[1], [1], [0], [0], [0, 0, 1, 0], [], []>} : vector<32x8xbf16>, vector<16x8xbf16>, vector<32x16xf32> -> vector<32x16xf32>
    %495 = vector.extract_strided_slice %469 {offsets = [0, 24], sizes = [16, 8], strides = [1, 1]} : vector<16x32xf32> to vector<16x8xf32>
    %496 = vector.extract_strided_slice %470 {offsets = [0, 24], sizes = [32, 8], strides = [1, 1]} : vector<32x32xf32> to vector<32x8xf32>
    %497 = arith.truncf %495 : vector<16x8xf32> to vector<16x8xbf16>
    %498 = arith.truncf %496 : vector<32x8xf32> to vector<32x8xbf16>
    %cst_162 = arith.constant dense<0.000000e+00> : vector<16x32xf32>
    %499 = tpu.matmul %497, %498, %cst_162 {dimension_numbers = #tpu.dot_dimension_numbers<[1], [1], [0], [0], [0, 0, 1, 0], [], []>} : vector<16x8xbf16>, vector<32x8xbf16>, vector<16x32xf32> -> vector<16x32xf32>
    %500 = arith.truncf %496 : vector<32x8xf32> to vector<32x8xbf16>
    %501 = arith.truncf %495 : vector<16x8xf32> to vector<16x8xbf16>
    %cst_163 = arith.constant dense<0.000000e+00> : vector<32x16xf32>
    %502 = tpu.matmul %500, %501, %cst_163 {dimension_numbers = #tpu.dot_dimension_numbers<[1], [1], [0], [0], [0, 0, 1, 0], [], []>} : vector<32x8xbf16>, vector<16x8xbf16>, vector<32x16xf32> -> vector<32x16xf32>
    %503 = vector.extract_strided_slice %457 {offsets = [16, 0], sizes = [16, 32], strides = [1, 1]} : vector<32x32xf32> to vector<16x32xf32>
    %504 = vector.extract_strided_slice %462 {offsets = [32, 0], sizes = [32, 32], strides = [1, 1]} : vector<64x32xf32> to vector<32x32xf32>
    %505 = vector.extract_strided_slice %503 {offsets = [0, 0], sizes = [16, 8], strides = [1, 1]} : vector<16x32xf32> to vector<16x8xf32>
    %506 = vector.extract_strided_slice %504 {offsets = [0, 0], sizes = [32, 8], strides = [1, 1]} : vector<32x32xf32> to vector<32x8xf32>
    %507 = arith.truncf %505 : vector<16x8xf32> to vector<16x8xbf16>
    %508 = arith.truncf %506 : vector<32x8xf32> to vector<32x8xbf16>
    %cst_164 = arith.constant dense<0.000000e+00> : vector<16x32xf32>
    %509 = tpu.matmul %507, %508, %cst_164 {dimension_numbers = #tpu.dot_dimension_numbers<[1], [1], [0], [0], [0, 0, 1, 0], [], []>} : vector<16x8xbf16>, vector<32x8xbf16>, vector<16x32xf32> -> vector<16x32xf32>
    %510 = arith.truncf %506 : vector<32x8xf32> to vector<32x8xbf16>
    %511 = arith.truncf %505 : vector<16x8xf32> to vector<16x8xbf16>
    %cst_165 = arith.constant dense<0.000000e+00> : vector<32x16xf32>
    %512 = tpu.matmul %510, %511, %cst_165 {dimension_numbers = #tpu.dot_dimension_numbers<[1], [1], [0], [0], [0, 0, 1, 0], [], []>} : vector<32x8xbf16>, vector<16x8xbf16>, vector<32x16xf32> -> vector<32x16xf32>
    %513 = vector.extract_strided_slice %503 {offsets = [0, 8], sizes = [16, 8], strides = [1, 1]} : vector<16x32xf32> to vector<16x8xf32>
    %514 = vector.extract_strided_slice %504 {offsets = [0, 8], sizes = [32, 8], strides = [1, 1]} : vector<32x32xf32> to vector<32x8xf32>
    %515 = arith.truncf %513 : vector<16x8xf32> to vector<16x8xbf16>
    %516 = arith.truncf %514 : vector<32x8xf32> to vector<32x8xbf16>
    %cst_166 = arith.constant dense<0.000000e+00> : vector<16x32xf32>
    %517 = tpu.matmul %515, %516, %cst_166 {dimension_numbers = #tpu.dot_dimension_numbers<[1], [1], [0], [0], [0, 0, 1, 0], [], []>} : vector<16x8xbf16>, vector<32x8xbf16>, vector<16x32xf32> -> vector<16x32xf32>
    %518 = arith.truncf %514 : vector<32x8xf32> to vector<32x8xbf16>
    %519 = arith.truncf %513 : vector<16x8xf32> to vector<16x8xbf16>
    %cst_167 = arith.constant dense<0.000000e+00> : vector<32x16xf32>
    %520 = tpu.matmul %518, %519, %cst_167 {dimension_numbers = #tpu.dot_dimension_numbers<[1], [1], [0], [0], [0, 0, 1, 0], [], []>} : vector<32x8xbf16>, vector<16x8xbf16>, vector<32x16xf32> -> vector<32x16xf32>
    %521 = vector.extract_strided_slice %503 {offsets = [0, 16], sizes = [16, 8], strides = [1, 1]} : vector<16x32xf32> to vector<16x8xf32>
    %522 = vector.extract_strided_slice %504 {offsets = [0, 16], sizes = [32, 8], strides = [1, 1]} : vector<32x32xf32> to vector<32x8xf32>
    %523 = arith.truncf %521 : vector<16x8xf32> to vector<16x8xbf16>
    %524 = arith.truncf %522 : vector<32x8xf32> to vector<32x8xbf16>
    %cst_168 = arith.constant dense<0.000000e+00> : vector<16x32xf32>
    %525 = tpu.matmul %523, %524, %cst_168 {dimension_numbers = #tpu.dot_dimension_numbers<[1], [1], [0], [0], [0, 0, 1, 0], [], []>} : vector<16x8xbf16>, vector<32x8xbf16>, vector<16x32xf32> -> vector<16x32xf32>
    %526 = arith.truncf %522 : vector<32x8xf32> to vector<32x8xbf16>
    %527 = arith.truncf %521 : vector<16x8xf32> to vector<16x8xbf16>
    %cst_169 = arith.constant dense<0.000000e+00> : vector<32x16xf32>
    %528 = tpu.matmul %526, %527, %cst_169 {dimension_numbers = #tpu.dot_dimension_numbers<[1], [1], [0], [0], [0, 0, 1, 0], [], []>} : vector<32x8xbf16>, vector<16x8xbf16>, vector<32x16xf32> -> vector<32x16xf32>
    %529 = vector.extract_strided_slice %503 {offsets = [0, 24], sizes = [16, 8], strides = [1, 1]} : vector<16x32xf32> to vector<16x8xf32>
    %530 = vector.extract_strided_slice %504 {offsets = [0, 24], sizes = [32, 8], strides = [1, 1]} : vector<32x32xf32> to vector<32x8xf32>
    %531 = arith.truncf %529 : vector<16x8xf32> to vector<16x8xbf16>
    %532 = arith.truncf %530 : vector<32x8xf32> to vector<32x8xbf16>
    %cst_170 = arith.constant dense<0.000000e+00> : vector<16x32xf32>
    %533 = tpu.matmul %531, %532, %cst_170 {dimension_numbers = #tpu.dot_dimension_numbers<[1], [1], [0], [0], [0, 0, 1, 0], [], []>} : vector<16x8xbf16>, vector<32x8xbf16>, vector<16x32xf32> -> vector<16x32xf32>
    %534 = arith.truncf %530 : vector<32x8xf32> to vector<32x8xbf16>
    %535 = arith.truncf %529 : vector<16x8xf32> to vector<16x8xbf16>
    %cst_171 = arith.constant dense<0.000000e+00> : vector<32x16xf32>
    %536 = tpu.matmul %534, %535, %cst_171 {dimension_numbers = #tpu.dot_dimension_numbers<[1], [1], [0], [0], [0, 0, 1, 0], [], []>} : vector<32x8xbf16>, vector<16x8xbf16>, vector<32x16xf32> -> vector<32x16xf32>
    %c2_172 = arith.constant 2 : index
    %c0_173 = arith.constant 0 : index
    %c0_174 = arith.constant 0 : index
    %537 = vector.load %arg7[%c2_172, %c0_173, %c0_174] : memref<4x16x8xbf16, #tpu.memory_space<vmem>>, vector<1x16x8xbf16>
    %538 = vector.shape_cast %537 : vector<1x16x8xbf16> to vector<16x8xbf16>
    %c3_175 = arith.constant 3 : index
    %c0_176 = arith.constant 0 : index
    %c0_177 = arith.constant 0 : index
    %539 = vector.load %arg7[%c3_175, %c0_176, %c0_177] : memref<4x16x8xbf16, #tpu.memory_space<vmem>>, vector<1x16x8xbf16>
    %540 = vector.shape_cast %539 : vector<1x16x8xbf16> to vector<16x8xbf16>
    %c2_178 = arith.constant 2 : index
    %c0_179 = arith.constant 0 : index
    %541 = vector.load %arg8[%c2_178, %c0_179] : memref<4x8xf32, #tpu.memory_space<vmem>>, vector<1x8xf32>
    %c3_180 = arith.constant 3 : index
    %c0_181 = arith.constant 0 : index
    %542 = vector.load %arg8[%c3_180, %c0_181] : memref<4x8xf32, #tpu.memory_space<vmem>>, vector<1x8xf32>
    %543 = tpu.concatenate %478, %486, %494, %502, %512, %520, %528, %536 in 0 : vector<32x16xf32>, vector<32x16xf32>, vector<32x16xf32>, vector<32x16xf32>, vector<32x16xf32>, vector<32x16xf32>, vector<32x16xf32>, vector<32x16xf32> -> vector<256x16xf32>
    %544 = arith.truncf %543 : vector<256x16xf32> to vector<256x16xbf16>
    %cst_182 = arith.constant dense<0.000000e+00> : vector<256x8xf32>
    %545 = tpu.matmul %544, %538, %cst_182 {dimension_numbers = #tpu.dot_dimension_numbers<[1], [0], [0], [1], [0, 0, 1, 1], [], []>} : vector<256x16xbf16>, vector<16x8xbf16>, vector<256x8xf32> -> vector<256x8xf32>
    %546 = vector.broadcast %541 : vector<1x8xf32> to vector<256x8xf32>
    %547 = arith.addf %545, %546 : vector<256x8xf32>
    %548 = arith.truncf %543 : vector<256x16xf32> to vector<256x16xbf16>
    %cst_183 = arith.constant dense<0.000000e+00> : vector<256x8xf32>
    %549 = tpu.matmul %548, %540, %cst_183 {dimension_numbers = #tpu.dot_dimension_numbers<[1], [0], [0], [1], [0, 0, 1, 1], [], []>} : vector<256x16xbf16>, vector<16x8xbf16>, vector<256x8xf32> -> vector<256x8xf32>
    %550 = vector.broadcast %542 : vector<1x8xf32> to vector<256x8xf32>
    %551 = arith.addf %549, %550 : vector<256x8xf32>
    %552 = vector.extract_strided_slice %468 {offsets = [0, 0], sizes = [1, 32], strides = [1, 1]} : vector<2x32xf32> to vector<1x32xf32>
    %553 = vector.shape_cast %552 : vector<1x32xf32> to vector<1x32xf32>
    %554 = vector.broadcast %553 : vector<1x32xf32> to vector<16x32xf32>
    %555 = vector.shape_cast %552 : vector<1x32xf32> to vector<1x32xf32>
    %556 = vector.broadcast %555 : vector<1x32xf32> to vector<32x32xf32>
    %557 = vector.extract_strided_slice %467 {offsets = [0, 0], sizes = [32, 32], strides = [1, 1]} : vector<64x32xf32> to vector<32x32xf32>
    %558 = vector.extract_strided_slice %547 {offsets = [0, 0], sizes = [32, 8], strides = [1, 1]} : vector<256x8xf32> to vector<32x8xf32>
    %559 = vector.extract_strided_slice %551 {offsets = [0, 0], sizes = [32, 8], strides = [1, 1]} : vector<256x8xf32> to vector<32x8xf32>
    %560 = arith.truncf %558 : vector<32x8xf32> to vector<32x8xbf16>
    %561 = arith.truncf %559 : vector<32x8xf32> to vector<32x8xbf16>
    %cst_184 = arith.constant dense<0.000000e+00> : vector<32x32xf32>
    %562 = tpu.matmul %560, %561, %cst_184 {dimension_numbers = #tpu.dot_dimension_numbers<[1], [1], [0], [0], [0, 0, 1, 0], [], []>} : vector<32x8xbf16>, vector<32x8xbf16>, vector<32x32xf32> -> vector<32x32xf32>
    %cst_185 = arith.constant 0.353553385 : f32
    %563 = vector.broadcast %cst_185 : f32 to vector<32x32xf32>
    %564 = arith.mulf %562, %563 : vector<32x32xf32>
    %565 = arith.addf %564, %556 : vector<32x32xf32>
    %cst_186 = arith.constant dense<0xFF800000> : vector<32xf32>
    %566 = vector.multi_reduction <maximumf>, %565, %cst_186 [1] : vector<32x32xf32> to vector<32xf32>
    %567 = vector.shape_cast %566 : vector<32xf32> to vector<32x1xf32>
    %568 = vector.broadcast %567 : vector<32x1xf32> to vector<32x32xf32>
    %569 = arith.subf %565, %568 : vector<32x32xf32>
    %570 = math.exp %569 : vector<32x32xf32>
    %cst_187 = arith.constant dense<0.000000e+00> : vector<32xf32>
    %571 = vector.multi_reduction <add>, %570, %cst_187 [1] : vector<32x32xf32> to vector<32xf32>
    %572 = vector.shape_cast %571 : vector<32xf32> to vector<32x1xf32>
    %573 = tpu.reciprocal %572 {approx = true} : vector<32x1xf32> -> vector<32x1xf32>
    %574 = vector.broadcast %573 : vector<32x1xf32> to vector<32x32xf32>
    %575 = arith.mulf %570, %574 : vector<32x32xf32>
    %576 = arith.truncf %475 : vector<16x32xf32> to vector<16x32xbf16>
    %577 = arith.truncf %575 : vector<32x32xf32> to vector<32x32xbf16>
    %cst_188 = arith.constant dense<0.000000e+00> : vector<16x32xf32>
    %578 = tpu.matmul %576, %577, %cst_188 {dimension_numbers = #tpu.dot_dimension_numbers<[1], [1], [0], [0], [0, 0, 1, 0], [], []>} : vector<16x32xbf16>, vector<32x32xbf16>, vector<16x32xf32> -> vector<16x32xf32>
    %579 = arith.addf %475, %578 : vector<16x32xf32>
    %580 = arith.addf %579, %554 : vector<16x32xf32>
    %cst_189 = arith.constant dense<0xFF800000> : vector<16xf32>
    %581 = vector.multi_reduction <maximumf>, %580, %cst_189 [1] : vector<16x32xf32> to vector<16xf32>
    %582 = vector.shape_cast %581 : vector<16xf32> to vector<16x1xf32>
    %583 = vector.broadcast %582 : vector<16x1xf32> to vector<16x32xf32>
    %584 = arith.subf %580, %583 : vector<16x32xf32>
    %585 = math.exp %584 : vector<16x32xf32>
    %cst_190 = arith.constant dense<0.000000e+00> : vector<16xf32>
    %586 = vector.multi_reduction <add>, %585, %cst_190 [1] : vector<16x32xf32> to vector<16xf32>
    %587 = vector.shape_cast %586 : vector<16xf32> to vector<16x1xf32>
    %588 = tpu.reciprocal %587 {approx = true} : vector<16x1xf32> -> vector<16x1xf32>
    %589 = vector.broadcast %588 : vector<16x1xf32> to vector<16x32xf32>
    %590 = arith.mulf %585, %589 : vector<16x32xf32>
    %591 = vector.extract_strided_slice %557 {offsets = [0, 0], sizes = [32, 8], strides = [1, 1]} : vector<32x32xf32> to vector<32x8xf32>
    %592 = arith.truncf %590 : vector<16x32xf32> to vector<16x32xbf16>
    %593 = arith.truncf %591 : vector<32x8xf32> to vector<32x8xbf16>
    %cst_191 = arith.constant dense<0.000000e+00> : vector<16x8xf32>
    %594 = tpu.matmul %592, %593, %cst_191 {dimension_numbers = #tpu.dot_dimension_numbers<[1], [0], [0], [1], [0, 0, 1, 1], [], []>} : vector<16x32xbf16>, vector<32x8xbf16>, vector<16x8xf32> -> vector<16x8xf32>
    %595 = vector.extract_strided_slice %547 {offsets = [32, 0], sizes = [32, 8], strides = [1, 1]} : vector<256x8xf32> to vector<32x8xf32>
    %596 = vector.extract_strided_slice %551 {offsets = [32, 0], sizes = [32, 8], strides = [1, 1]} : vector<256x8xf32> to vector<32x8xf32>
    %597 = arith.truncf %595 : vector<32x8xf32> to vector<32x8xbf16>
    %598 = arith.truncf %596 : vector<32x8xf32> to vector<32x8xbf16>
    %cst_192 = arith.constant dense<0.000000e+00> : vector<32x32xf32>
    %599 = tpu.matmul %597, %598, %cst_192 {dimension_numbers = #tpu.dot_dimension_numbers<[1], [1], [0], [0], [0, 0, 1, 0], [], []>} : vector<32x8xbf16>, vector<32x8xbf16>, vector<32x32xf32> -> vector<32x32xf32>
    %cst_193 = arith.constant 0.353553385 : f32
    %600 = vector.broadcast %cst_193 : f32 to vector<32x32xf32>
    %601 = arith.mulf %599, %600 : vector<32x32xf32>
    %602 = arith.addf %601, %556 : vector<32x32xf32>
    %cst_194 = arith.constant dense<0xFF800000> : vector<32xf32>
    %603 = vector.multi_reduction <maximumf>, %602, %cst_194 [1] : vector<32x32xf32> to vector<32xf32>
    %604 = vector.shape_cast %603 : vector<32xf32> to vector<32x1xf32>
    %605 = vector.broadcast %604 : vector<32x1xf32> to vector<32x32xf32>
    %606 = arith.subf %602, %605 : vector<32x32xf32>
    %607 = math.exp %606 : vector<32x32xf32>
    %cst_195 = arith.constant dense<0.000000e+00> : vector<32xf32>
    %608 = vector.multi_reduction <add>, %607, %cst_195 [1] : vector<32x32xf32> to vector<32xf32>
    %609 = vector.shape_cast %608 : vector<32xf32> to vector<32x1xf32>
    %610 = tpu.reciprocal %609 {approx = true} : vector<32x1xf32> -> vector<32x1xf32>
    %611 = vector.broadcast %610 : vector<32x1xf32> to vector<32x32xf32>
    %612 = arith.mulf %607, %611 : vector<32x32xf32>
    %613 = arith.truncf %483 : vector<16x32xf32> to vector<16x32xbf16>
    %614 = arith.truncf %612 : vector<32x32xf32> to vector<32x32xbf16>
    %cst_196 = arith.constant dense<0.000000e+00> : vector<16x32xf32>
    %615 = tpu.matmul %613, %614, %cst_196 {dimension_numbers = #tpu.dot_dimension_numbers<[1], [1], [0], [0], [0, 0, 1, 0], [], []>} : vector<16x32xbf16>, vector<32x32xbf16>, vector<16x32xf32> -> vector<16x32xf32>
    %616 = arith.addf %483, %615 : vector<16x32xf32>
    %617 = arith.addf %616, %554 : vector<16x32xf32>
    %cst_197 = arith.constant dense<0xFF800000> : vector<16xf32>
    %618 = vector.multi_reduction <maximumf>, %617, %cst_197 [1] : vector<16x32xf32> to vector<16xf32>
    %619 = vector.shape_cast %618 : vector<16xf32> to vector<16x1xf32>
    %620 = vector.broadcast %619 : vector<16x1xf32> to vector<16x32xf32>
    %621 = arith.subf %617, %620 : vector<16x32xf32>
    %622 = math.exp %621 : vector<16x32xf32>
    %cst_198 = arith.constant dense<0.000000e+00> : vector<16xf32>
    %623 = vector.multi_reduction <add>, %622, %cst_198 [1] : vector<16x32xf32> to vector<16xf32>
    %624 = vector.shape_cast %623 : vector<16xf32> to vector<16x1xf32>
    %625 = tpu.reciprocal %624 {approx = true} : vector<16x1xf32> -> vector<16x1xf32>
    %626 = vector.broadcast %625 : vector<16x1xf32> to vector<16x32xf32>
    %627 = arith.mulf %622, %626 : vector<16x32xf32>
    %628 = vector.extract_strided_slice %557 {offsets = [0, 8], sizes = [32, 8], strides = [1, 1]} : vector<32x32xf32> to vector<32x8xf32>
    %629 = arith.truncf %627 : vector<16x32xf32> to vector<16x32xbf16>
    %630 = arith.truncf %628 : vector<32x8xf32> to vector<32x8xbf16>
    %cst_199 = arith.constant dense<0.000000e+00> : vector<16x8xf32>
    %631 = tpu.matmul %629, %630, %cst_199 {dimension_numbers = #tpu.dot_dimension_numbers<[1], [0], [0], [1], [0, 0, 1, 1], [], []>} : vector<16x32xbf16>, vector<32x8xbf16>, vector<16x8xf32> -> vector<16x8xf32>
    %632 = vector.extract_strided_slice %547 {offsets = [64, 0], sizes = [32, 8], strides = [1, 1]} : vector<256x8xf32> to vector<32x8xf32>
    %633 = vector.extract_strided_slice %551 {offsets = [64, 0], sizes = [32, 8], strides = [1, 1]} : vector<256x8xf32> to vector<32x8xf32>
    %634 = arith.truncf %632 : vector<32x8xf32> to vector<32x8xbf16>
    %635 = arith.truncf %633 : vector<32x8xf32> to vector<32x8xbf16>
    %cst_200 = arith.constant dense<0.000000e+00> : vector<32x32xf32>
    %636 = tpu.matmul %634, %635, %cst_200 {dimension_numbers = #tpu.dot_dimension_numbers<[1], [1], [0], [0], [0, 0, 1, 0], [], []>} : vector<32x8xbf16>, vector<32x8xbf16>, vector<32x32xf32> -> vector<32x32xf32>
    %cst_201 = arith.constant 0.353553385 : f32
    %637 = vector.broadcast %cst_201 : f32 to vector<32x32xf32>
    %638 = arith.mulf %636, %637 : vector<32x32xf32>
    %639 = arith.addf %638, %556 : vector<32x32xf32>
    %cst_202 = arith.constant dense<0xFF800000> : vector<32xf32>
    %640 = vector.multi_reduction <maximumf>, %639, %cst_202 [1] : vector<32x32xf32> to vector<32xf32>
    %641 = vector.shape_cast %640 : vector<32xf32> to vector<32x1xf32>
    %642 = vector.broadcast %641 : vector<32x1xf32> to vector<32x32xf32>
    %643 = arith.subf %639, %642 : vector<32x32xf32>
    %644 = math.exp %643 : vector<32x32xf32>
    %cst_203 = arith.constant dense<0.000000e+00> : vector<32xf32>
    %645 = vector.multi_reduction <add>, %644, %cst_203 [1] : vector<32x32xf32> to vector<32xf32>
    %646 = vector.shape_cast %645 : vector<32xf32> to vector<32x1xf32>
    %647 = tpu.reciprocal %646 {approx = true} : vector<32x1xf32> -> vector<32x1xf32>
    %648 = vector.broadcast %647 : vector<32x1xf32> to vector<32x32xf32>
    %649 = arith.mulf %644, %648 : vector<32x32xf32>
    %650 = arith.truncf %491 : vector<16x32xf32> to vector<16x32xbf16>
    %651 = arith.truncf %649 : vector<32x32xf32> to vector<32x32xbf16>
    %cst_204 = arith.constant dense<0.000000e+00> : vector<16x32xf32>
    %652 = tpu.matmul %650, %651, %cst_204 {dimension_numbers = #tpu.dot_dimension_numbers<[1], [1], [0], [0], [0, 0, 1, 0], [], []>} : vector<16x32xbf16>, vector<32x32xbf16>, vector<16x32xf32> -> vector<16x32xf32>
    %653 = arith.addf %491, %652 : vector<16x32xf32>
    %654 = arith.addf %653, %554 : vector<16x32xf32>
    %cst_205 = arith.constant dense<0xFF800000> : vector<16xf32>
    %655 = vector.multi_reduction <maximumf>, %654, %cst_205 [1] : vector<16x32xf32> to vector<16xf32>
    %656 = vector.shape_cast %655 : vector<16xf32> to vector<16x1xf32>
    %657 = vector.broadcast %656 : vector<16x1xf32> to vector<16x32xf32>
    %658 = arith.subf %654, %657 : vector<16x32xf32>
    %659 = math.exp %658 : vector<16x32xf32>
    %cst_206 = arith.constant dense<0.000000e+00> : vector<16xf32>
    %660 = vector.multi_reduction <add>, %659, %cst_206 [1] : vector<16x32xf32> to vector<16xf32>
    %661 = vector.shape_cast %660 : vector<16xf32> to vector<16x1xf32>
    %662 = tpu.reciprocal %661 {approx = true} : vector<16x1xf32> -> vector<16x1xf32>
    %663 = vector.broadcast %662 : vector<16x1xf32> to vector<16x32xf32>
    %664 = arith.mulf %659, %663 : vector<16x32xf32>
    %665 = vector.extract_strided_slice %557 {offsets = [0, 16], sizes = [32, 8], strides = [1, 1]} : vector<32x32xf32> to vector<32x8xf32>
    %666 = arith.truncf %664 : vector<16x32xf32> to vector<16x32xbf16>
    %667 = arith.truncf %665 : vector<32x8xf32> to vector<32x8xbf16>
    %cst_207 = arith.constant dense<0.000000e+00> : vector<16x8xf32>
    %668 = tpu.matmul %666, %667, %cst_207 {dimension_numbers = #tpu.dot_dimension_numbers<[1], [0], [0], [1], [0, 0, 1, 1], [], []>} : vector<16x32xbf16>, vector<32x8xbf16>, vector<16x8xf32> -> vector<16x8xf32>
    %669 = vector.extract_strided_slice %547 {offsets = [96, 0], sizes = [32, 8], strides = [1, 1]} : vector<256x8xf32> to vector<32x8xf32>
    %670 = vector.extract_strided_slice %551 {offsets = [96, 0], sizes = [32, 8], strides = [1, 1]} : vector<256x8xf32> to vector<32x8xf32>
    %671 = arith.truncf %669 : vector<32x8xf32> to vector<32x8xbf16>
    %672 = arith.truncf %670 : vector<32x8xf32> to vector<32x8xbf16>
    %cst_208 = arith.constant dense<0.000000e+00> : vector<32x32xf32>
    %673 = tpu.matmul %671, %672, %cst_208 {dimension_numbers = #tpu.dot_dimension_numbers<[1], [1], [0], [0], [0, 0, 1, 0], [], []>} : vector<32x8xbf16>, vector<32x8xbf16>, vector<32x32xf32> -> vector<32x32xf32>
    %cst_209 = arith.constant 0.353553385 : f32
    %674 = vector.broadcast %cst_209 : f32 to vector<32x32xf32>
    %675 = arith.mulf %673, %674 : vector<32x32xf32>
    %676 = arith.addf %675, %556 : vector<32x32xf32>
    %cst_210 = arith.constant dense<0xFF800000> : vector<32xf32>
    %677 = vector.multi_reduction <maximumf>, %676, %cst_210 [1] : vector<32x32xf32> to vector<32xf32>
    %678 = vector.shape_cast %677 : vector<32xf32> to vector<32x1xf32>
    %679 = vector.broadcast %678 : vector<32x1xf32> to vector<32x32xf32>
    %680 = arith.subf %676, %679 : vector<32x32xf32>
    %681 = math.exp %680 : vector<32x32xf32>
    %cst_211 = arith.constant dense<0.000000e+00> : vector<32xf32>
    %682 = vector.multi_reduction <add>, %681, %cst_211 [1] : vector<32x32xf32> to vector<32xf32>
    %683 = vector.shape_cast %682 : vector<32xf32> to vector<32x1xf32>
    %684 = tpu.reciprocal %683 {approx = true} : vector<32x1xf32> -> vector<32x1xf32>
    %685 = vector.broadcast %684 : vector<32x1xf32> to vector<32x32xf32>
    %686 = arith.mulf %681, %685 : vector<32x32xf32>
    %687 = arith.truncf %499 : vector<16x32xf32> to vector<16x32xbf16>
    %688 = arith.truncf %686 : vector<32x32xf32> to vector<32x32xbf16>
    %cst_212 = arith.constant dense<0.000000e+00> : vector<16x32xf32>
    %689 = tpu.matmul %687, %688, %cst_212 {dimension_numbers = #tpu.dot_dimension_numbers<[1], [1], [0], [0], [0, 0, 1, 0], [], []>} : vector<16x32xbf16>, vector<32x32xbf16>, vector<16x32xf32> -> vector<16x32xf32>
    %690 = arith.addf %499, %689 : vector<16x32xf32>
    %691 = arith.addf %690, %554 : vector<16x32xf32>
    %cst_213 = arith.constant dense<0xFF800000> : vector<16xf32>
    %692 = vector.multi_reduction <maximumf>, %691, %cst_213 [1] : vector<16x32xf32> to vector<16xf32>
    %693 = vector.shape_cast %692 : vector<16xf32> to vector<16x1xf32>
    %694 = vector.broadcast %693 : vector<16x1xf32> to vector<16x32xf32>
    %695 = arith.subf %691, %694 : vector<16x32xf32>
    %696 = math.exp %695 : vector<16x32xf32>
    %cst_214 = arith.constant dense<0.000000e+00> : vector<16xf32>
    %697 = vector.multi_reduction <add>, %696, %cst_214 [1] : vector<16x32xf32> to vector<16xf32>
    %698 = vector.shape_cast %697 : vector<16xf32> to vector<16x1xf32>
    %699 = tpu.reciprocal %698 {approx = true} : vector<16x1xf32> -> vector<16x1xf32>
    %700 = vector.broadcast %699 : vector<16x1xf32> to vector<16x32xf32>
    %701 = arith.mulf %696, %700 : vector<16x32xf32>
    %702 = vector.extract_strided_slice %557 {offsets = [0, 24], sizes = [32, 8], strides = [1, 1]} : vector<32x32xf32> to vector<32x8xf32>
    %703 = arith.truncf %701 : vector<16x32xf32> to vector<16x32xbf16>
    %704 = arith.truncf %702 : vector<32x8xf32> to vector<32x8xbf16>
    %cst_215 = arith.constant dense<0.000000e+00> : vector<16x8xf32>
    %705 = tpu.matmul %703, %704, %cst_215 {dimension_numbers = #tpu.dot_dimension_numbers<[1], [0], [0], [1], [0, 0, 1, 1], [], []>} : vector<16x32xbf16>, vector<32x8xbf16>, vector<16x8xf32> -> vector<16x8xf32>
    %706 = tpu.concatenate %594, %631, %668, %705 in 1 : vector<16x8xf32>, vector<16x8xf32>, vector<16x8xf32>, vector<16x8xf32> -> vector<16x32xf32>
    %707 = vector.extract_strided_slice %468 {offsets = [1, 0], sizes = [1, 32], strides = [1, 1]} : vector<2x32xf32> to vector<1x32xf32>
    %708 = vector.shape_cast %707 : vector<1x32xf32> to vector<1x32xf32>
    %709 = vector.broadcast %708 : vector<1x32xf32> to vector<16x32xf32>
    %710 = vector.shape_cast %707 : vector<1x32xf32> to vector<1x32xf32>
    %711 = vector.broadcast %710 : vector<1x32xf32> to vector<32x32xf32>
    %712 = vector.extract_strided_slice %467 {offsets = [32, 0], sizes = [32, 32], strides = [1, 1]} : vector<64x32xf32> to vector<32x32xf32>
    %713 = vector.extract_strided_slice %547 {offsets = [128, 0], sizes = [32, 8], strides = [1, 1]} : vector<256x8xf32> to vector<32x8xf32>
    %714 = vector.extract_strided_slice %551 {offsets = [128, 0], sizes = [32, 8], strides = [1, 1]} : vector<256x8xf32> to vector<32x8xf32>
    %715 = arith.truncf %713 : vector<32x8xf32> to vector<32x8xbf16>
    %716 = arith.truncf %714 : vector<32x8xf32> to vector<32x8xbf16>
    %cst_216 = arith.constant dense<0.000000e+00> : vector<32x32xf32>
    %717 = tpu.matmul %715, %716, %cst_216 {dimension_numbers = #tpu.dot_dimension_numbers<[1], [1], [0], [0], [0, 0, 1, 0], [], []>} : vector<32x8xbf16>, vector<32x8xbf16>, vector<32x32xf32> -> vector<32x32xf32>
    %cst_217 = arith.constant 0.353553385 : f32
    %718 = vector.broadcast %cst_217 : f32 to vector<32x32xf32>
    %719 = arith.mulf %717, %718 : vector<32x32xf32>
    %720 = arith.addf %719, %711 : vector<32x32xf32>
    %cst_218 = arith.constant dense<0xFF800000> : vector<32xf32>
    %721 = vector.multi_reduction <maximumf>, %720, %cst_218 [1] : vector<32x32xf32> to vector<32xf32>
    %722 = vector.shape_cast %721 : vector<32xf32> to vector<32x1xf32>
    %723 = vector.broadcast %722 : vector<32x1xf32> to vector<32x32xf32>
    %724 = arith.subf %720, %723 : vector<32x32xf32>
    %725 = math.exp %724 : vector<32x32xf32>
    %cst_219 = arith.constant dense<0.000000e+00> : vector<32xf32>
    %726 = vector.multi_reduction <add>, %725, %cst_219 [1] : vector<32x32xf32> to vector<32xf32>
    %727 = vector.shape_cast %726 : vector<32xf32> to vector<32x1xf32>
    %728 = tpu.reciprocal %727 {approx = true} : vector<32x1xf32> -> vector<32x1xf32>
    %729 = vector.broadcast %728 : vector<32x1xf32> to vector<32x32xf32>
    %730 = arith.mulf %725, %729 : vector<32x32xf32>
    %731 = arith.truncf %509 : vector<16x32xf32> to vector<16x32xbf16>
    %732 = arith.truncf %730 : vector<32x32xf32> to vector<32x32xbf16>
    %cst_220 = arith.constant dense<0.000000e+00> : vector<16x32xf32>
    %733 = tpu.matmul %731, %732, %cst_220 {dimension_numbers = #tpu.dot_dimension_numbers<[1], [1], [0], [0], [0, 0, 1, 0], [], []>} : vector<16x32xbf16>, vector<32x32xbf16>, vector<16x32xf32> -> vector<16x32xf32>
    %734 = arith.addf %509, %733 : vector<16x32xf32>
    %735 = arith.addf %734, %709 : vector<16x32xf32>
    %cst_221 = arith.constant dense<0xFF800000> : vector<16xf32>
    %736 = vector.multi_reduction <maximumf>, %735, %cst_221 [1] : vector<16x32xf32> to vector<16xf32>
    %737 = vector.shape_cast %736 : vector<16xf32> to vector<16x1xf32>
    %738 = vector.broadcast %737 : vector<16x1xf32> to vector<16x32xf32>
    %739 = arith.subf %735, %738 : vector<16x32xf32>
    %740 = math.exp %739 : vector<16x32xf32>
    %cst_222 = arith.constant dense<0.000000e+00> : vector<16xf32>
    %741 = vector.multi_reduction <add>, %740, %cst_222 [1] : vector<16x32xf32> to vector<16xf32>
    %742 = vector.shape_cast %741 : vector<16xf32> to vector<16x1xf32>
    %743 = tpu.reciprocal %742 {approx = true} : vector<16x1xf32> -> vector<16x1xf32>
    %744 = vector.broadcast %743 : vector<16x1xf32> to vector<16x32xf32>
    %745 = arith.mulf %740, %744 : vector<16x32xf32>
    %746 = vector.extract_strided_slice %712 {offsets = [0, 0], sizes = [32, 8], strides = [1, 1]} : vector<32x32xf32> to vector<32x8xf32>
    %747 = arith.truncf %745 : vector<16x32xf32> to vector<16x32xbf16>
    %748 = arith.truncf %746 : vector<32x8xf32> to vector<32x8xbf16>
    %cst_223 = arith.constant dense<0.000000e+00> : vector<16x8xf32>
    %749 = tpu.matmul %747, %748, %cst_223 {dimension_numbers = #tpu.dot_dimension_numbers<[1], [0], [0], [1], [0, 0, 1, 1], [], []>} : vector<16x32xbf16>, vector<32x8xbf16>, vector<16x8xf32> -> vector<16x8xf32>
    %750 = vector.extract_strided_slice %547 {offsets = [160, 0], sizes = [32, 8], strides = [1, 1]} : vector<256x8xf32> to vector<32x8xf32>
    %751 = vector.extract_strided_slice %551 {offsets = [160, 0], sizes = [32, 8], strides = [1, 1]} : vector<256x8xf32> to vector<32x8xf32>
    %752 = arith.truncf %750 : vector<32x8xf32> to vector<32x8xbf16>
    %753 = arith.truncf %751 : vector<32x8xf32> to vector<32x8xbf16>
    %cst_224 = arith.constant dense<0.000000e+00> : vector<32x32xf32>
    %754 = tpu.matmul %752, %753, %cst_224 {dimension_numbers = #tpu.dot_dimension_numbers<[1], [1], [0], [0], [0, 0, 1, 0], [], []>} : vector<32x8xbf16>, vector<32x8xbf16>, vector<32x32xf32> -> vector<32x32xf32>
    %cst_225 = arith.constant 0.353553385 : f32
    %755 = vector.broadcast %cst_225 : f32 to vector<32x32xf32>
    %756 = arith.mulf %754, %755 : vector<32x32xf32>
    %757 = arith.addf %756, %711 : vector<32x32xf32>
    %cst_226 = arith.constant dense<0xFF800000> : vector<32xf32>
    %758 = vector.multi_reduction <maximumf>, %757, %cst_226 [1] : vector<32x32xf32> to vector<32xf32>
    %759 = vector.shape_cast %758 : vector<32xf32> to vector<32x1xf32>
    %760 = vector.broadcast %759 : vector<32x1xf32> to vector<32x32xf32>
    %761 = arith.subf %757, %760 : vector<32x32xf32>
    %762 = math.exp %761 : vector<32x32xf32>
    %cst_227 = arith.constant dense<0.000000e+00> : vector<32xf32>
    %763 = vector.multi_reduction <add>, %762, %cst_227 [1] : vector<32x32xf32> to vector<32xf32>
    %764 = vector.shape_cast %763 : vector<32xf32> to vector<32x1xf32>
    %765 = tpu.reciprocal %764 {approx = true} : vector<32x1xf32> -> vector<32x1xf32>
    %766 = vector.broadcast %765 : vector<32x1xf32> to vector<32x32xf32>
    %767 = arith.mulf %762, %766 : vector<32x32xf32>
    %768 = arith.truncf %517 : vector<16x32xf32> to vector<16x32xbf16>
    %769 = arith.truncf %767 : vector<32x32xf32> to vector<32x32xbf16>
    %cst_228 = arith.constant dense<0.000000e+00> : vector<16x32xf32>
    %770 = tpu.matmul %768, %769, %cst_228 {dimension_numbers = #tpu.dot_dimension_numbers<[1], [1], [0], [0], [0, 0, 1, 0], [], []>} : vector<16x32xbf16>, vector<32x32xbf16>, vector<16x32xf32> -> vector<16x32xf32>
    %771 = arith.addf %517, %770 : vector<16x32xf32>
    %772 = arith.addf %771, %709 : vector<16x32xf32>
    %cst_229 = arith.constant dense<0xFF800000> : vector<16xf32>
    %773 = vector.multi_reduction <maximumf>, %772, %cst_229 [1] : vector<16x32xf32> to vector<16xf32>
    %774 = vector.shape_cast %773 : vector<16xf32> to vector<16x1xf32>
    %775 = vector.broadcast %774 : vector<16x1xf32> to vector<16x32xf32>
    %776 = arith.subf %772, %775 : vector<16x32xf32>
    %777 = math.exp %776 : vector<16x32xf32>
    %cst_230 = arith.constant dense<0.000000e+00> : vector<16xf32>
    %778 = vector.multi_reduction <add>, %777, %cst_230 [1] : vector<16x32xf32> to vector<16xf32>
    %779 = vector.shape_cast %778 : vector<16xf32> to vector<16x1xf32>
    %780 = tpu.reciprocal %779 {approx = true} : vector<16x1xf32> -> vector<16x1xf32>
    %781 = vector.broadcast %780 : vector<16x1xf32> to vector<16x32xf32>
    %782 = arith.mulf %777, %781 : vector<16x32xf32>
    %783 = vector.extract_strided_slice %712 {offsets = [0, 8], sizes = [32, 8], strides = [1, 1]} : vector<32x32xf32> to vector<32x8xf32>
    %784 = arith.truncf %782 : vector<16x32xf32> to vector<16x32xbf16>
    %785 = arith.truncf %783 : vector<32x8xf32> to vector<32x8xbf16>
    %cst_231 = arith.constant dense<0.000000e+00> : vector<16x8xf32>
    %786 = tpu.matmul %784, %785, %cst_231 {dimension_numbers = #tpu.dot_dimension_numbers<[1], [0], [0], [1], [0, 0, 1, 1], [], []>} : vector<16x32xbf16>, vector<32x8xbf16>, vector<16x8xf32> -> vector<16x8xf32>
    %787 = vector.extract_strided_slice %547 {offsets = [192, 0], sizes = [32, 8], strides = [1, 1]} : vector<256x8xf32> to vector<32x8xf32>
    %788 = vector.extract_strided_slice %551 {offsets = [192, 0], sizes = [32, 8], strides = [1, 1]} : vector<256x8xf32> to vector<32x8xf32>
    %789 = arith.truncf %787 : vector<32x8xf32> to vector<32x8xbf16>
    %790 = arith.truncf %788 : vector<32x8xf32> to vector<32x8xbf16>
    %cst_232 = arith.constant dense<0.000000e+00> : vector<32x32xf32>
    %791 = tpu.matmul %789, %790, %cst_232 {dimension_numbers = #tpu.dot_dimension_numbers<[1], [1], [0], [0], [0, 0, 1, 0], [], []>} : vector<32x8xbf16>, vector<32x8xbf16>, vector<32x32xf32> -> vector<32x32xf32>
    %cst_233 = arith.constant 0.353553385 : f32
    %792 = vector.broadcast %cst_233 : f32 to vector<32x32xf32>
    %793 = arith.mulf %791, %792 : vector<32x32xf32>
    %794 = arith.addf %793, %711 : vector<32x32xf32>
    %cst_234 = arith.constant dense<0xFF800000> : vector<32xf32>
    %795 = vector.multi_reduction <maximumf>, %794, %cst_234 [1] : vector<32x32xf32> to vector<32xf32>
    %796 = vector.shape_cast %795 : vector<32xf32> to vector<32x1xf32>
    %797 = vector.broadcast %796 : vector<32x1xf32> to vector<32x32xf32>
    %798 = arith.subf %794, %797 : vector<32x32xf32>
    %799 = math.exp %798 : vector<32x32xf32>
    %cst_235 = arith.constant dense<0.000000e+00> : vector<32xf32>
    %800 = vector.multi_reduction <add>, %799, %cst_235 [1] : vector<32x32xf32> to vector<32xf32>
    %801 = vector.shape_cast %800 : vector<32xf32> to vector<32x1xf32>
    %802 = tpu.reciprocal %801 {approx = true} : vector<32x1xf32> -> vector<32x1xf32>
    %803 = vector.broadcast %802 : vector<32x1xf32> to vector<32x32xf32>
    %804 = arith.mulf %799, %803 : vector<32x32xf32>
    %805 = arith.truncf %525 : vector<16x32xf32> to vector<16x32xbf16>
    %806 = arith.truncf %804 : vector<32x32xf32> to vector<32x32xbf16>
    %cst_236 = arith.constant dense<0.000000e+00> : vector<16x32xf32>
    %807 = tpu.matmul %805, %806, %cst_236 {dimension_numbers = #tpu.dot_dimension_numbers<[1], [1], [0], [0], [0, 0, 1, 0], [], []>} : vector<16x32xbf16>, vector<32x32xbf16>, vector<16x32xf32> -> vector<16x32xf32>
    %808 = arith.addf %525, %807 : vector<16x32xf32>
    %809 = arith.addf %808, %709 : vector<16x32xf32>
    %cst_237 = arith.constant dense<0xFF800000> : vector<16xf32>
    %810 = vector.multi_reduction <maximumf>, %809, %cst_237 [1] : vector<16x32xf32> to vector<16xf32>
    %811 = vector.shape_cast %810 : vector<16xf32> to vector<16x1xf32>
    %812 = vector.broadcast %811 : vector<16x1xf32> to vector<16x32xf32>
    %813 = arith.subf %809, %812 : vector<16x32xf32>
    %814 = math.exp %813 : vector<16x32xf32>
    %cst_238 = arith.constant dense<0.000000e+00> : vector<16xf32>
    %815 = vector.multi_reduction <add>, %814, %cst_238 [1] : vector<16x32xf32> to vector<16xf32>
    %816 = vector.shape_cast %815 : vector<16xf32> to vector<16x1xf32>
    %817 = tpu.reciprocal %816 {approx = true} : vector<16x1xf32> -> vector<16x1xf32>
    %818 = vector.broadcast %817 : vector<16x1xf32> to vector<16x32xf32>
    %819 = arith.mulf %814, %818 : vector<16x32xf32>
    %820 = vector.extract_strided_slice %712 {offsets = [0, 16], sizes = [32, 8], strides = [1, 1]} : vector<32x32xf32> to vector<32x8xf32>
    %821 = arith.truncf %819 : vector<16x32xf32> to vector<16x32xbf16>
    %822 = arith.truncf %820 : vector<32x8xf32> to vector<32x8xbf16>
    %cst_239 = arith.constant dense<0.000000e+00> : vector<16x8xf32>
    %823 = tpu.matmul %821, %822, %cst_239 {dimension_numbers = #tpu.dot_dimension_numbers<[1], [0], [0], [1], [0, 0, 1, 1], [], []>} : vector<16x32xbf16>, vector<32x8xbf16>, vector<16x8xf32> -> vector<16x8xf32>
    %824 = vector.extract_strided_slice %547 {offsets = [224, 0], sizes = [32, 8], strides = [1, 1]} : vector<256x8xf32> to vector<32x8xf32>
    %825 = vector.extract_strided_slice %551 {offsets = [224, 0], sizes = [32, 8], strides = [1, 1]} : vector<256x8xf32> to vector<32x8xf32>
    %826 = arith.truncf %824 : vector<32x8xf32> to vector<32x8xbf16>
    %827 = arith.truncf %825 : vector<32x8xf32> to vector<32x8xbf16>
    %cst_240 = arith.constant dense<0.000000e+00> : vector<32x32xf32>
    %828 = tpu.matmul %826, %827, %cst_240 {dimension_numbers = #tpu.dot_dimension_numbers<[1], [1], [0], [0], [0, 0, 1, 0], [], []>} : vector<32x8xbf16>, vector<32x8xbf16>, vector<32x32xf32> -> vector<32x32xf32>
    %cst_241 = arith.constant 0.353553385 : f32
    %829 = vector.broadcast %cst_241 : f32 to vector<32x32xf32>
    %830 = arith.mulf %828, %829 : vector<32x32xf32>
    %831 = arith.addf %830, %711 : vector<32x32xf32>
    %cst_242 = arith.constant dense<0xFF800000> : vector<32xf32>
    %832 = vector.multi_reduction <maximumf>, %831, %cst_242 [1] : vector<32x32xf32> to vector<32xf32>
    %833 = vector.shape_cast %832 : vector<32xf32> to vector<32x1xf32>
    %834 = vector.broadcast %833 : vector<32x1xf32> to vector<32x32xf32>
    %835 = arith.subf %831, %834 : vector<32x32xf32>
    %836 = math.exp %835 : vector<32x32xf32>
    %cst_243 = arith.constant dense<0.000000e+00> : vector<32xf32>
    %837 = vector.multi_reduction <add>, %836, %cst_243 [1] : vector<32x32xf32> to vector<32xf32>
    %838 = vector.shape_cast %837 : vector<32xf32> to vector<32x1xf32>
    %839 = tpu.reciprocal %838 {approx = true} : vector<32x1xf32> -> vector<32x1xf32>
    %840 = vector.broadcast %839 : vector<32x1xf32> to vector<32x32xf32>
    %841 = arith.mulf %836, %840 : vector<32x32xf32>
    %842 = arith.truncf %533 : vector<16x32xf32> to vector<16x32xbf16>
    %843 = arith.truncf %841 : vector<32x32xf32> to vector<32x32xbf16>
    %cst_244 = arith.constant dense<0.000000e+00> : vector<16x32xf32>
    %844 = tpu.matmul %842, %843, %cst_244 {dimension_numbers = #tpu.dot_dimension_numbers<[1], [1], [0], [0], [0, 0, 1, 0], [], []>} : vector<16x32xbf16>, vector<32x32xbf16>, vector<16x32xf32> -> vector<16x32xf32>
    %845 = arith.addf %533, %844 : vector<16x32xf32>
    %846 = arith.addf %845, %709 : vector<16x32xf32>
    %cst_245 = arith.constant dense<0xFF800000> : vector<16xf32>
    %847 = vector.multi_reduction <maximumf>, %846, %cst_245 [1] : vector<16x32xf32> to vector<16xf32>
    %848 = vector.shape_cast %847 : vector<16xf32> to vector<16x1xf32>
    %849 = vector.broadcast %848 : vector<16x1xf32> to vector<16x32xf32>
    %850 = arith.subf %846, %849 : vector<16x32xf32>
    %851 = math.exp %850 : vector<16x32xf32>
    %cst_246 = arith.constant dense<0.000000e+00> : vector<16xf32>
    %852 = vector.multi_reduction <add>, %851, %cst_246 [1] : vector<16x32xf32> to vector<16xf32>
    %853 = vector.shape_cast %852 : vector<16xf32> to vector<16x1xf32>
    %854 = tpu.reciprocal %853 {approx = true} : vector<16x1xf32> -> vector<16x1xf32>
    %855 = vector.broadcast %854 : vector<16x1xf32> to vector<16x32xf32>
    %856 = arith.mulf %851, %855 : vector<16x32xf32>
    %857 = vector.extract_strided_slice %712 {offsets = [0, 24], sizes = [32, 8], strides = [1, 1]} : vector<32x32xf32> to vector<32x8xf32>
    %858 = arith.truncf %856 : vector<16x32xf32> to vector<16x32xbf16>
    %859 = arith.truncf %857 : vector<32x8xf32> to vector<32x8xbf16>
    %cst_247 = arith.constant dense<0.000000e+00> : vector<16x8xf32>
    %860 = tpu.matmul %858, %859, %cst_247 {dimension_numbers = #tpu.dot_dimension_numbers<[1], [0], [0], [1], [0, 0, 1, 1], [], []>} : vector<16x32xbf16>, vector<32x8xbf16>, vector<16x8xf32> -> vector<16x8xf32>
    %861 = tpu.concatenate %749, %786, %823, %860 in 1 : vector<16x8xf32>, vector<16x8xf32>, vector<16x8xf32>, vector<16x8xf32> -> vector<16x32xf32>
    %862 = tpu.concatenate %706, %861 in 0 : vector<16x32xf32>, vector<16x32xf32> -> vector<32x32xf32>
    %863 = arith.truncf %862 : vector<32x32xf32> to vector<32x32xbf16>
    %cst_248 = arith.constant dense<0.000000e+00> : vector<32x32xf32>
    %864 = tpu.matmul %863, %447, %cst_248 {dimension_numbers = #tpu.dot_dimension_numbers<[1], [0], [0], [1], [0, 0, 1, 1], [], []>} : vector<32x32xbf16>, vector<32x32xbf16>, vector<32x32xf32> -> vector<32x32xf32>
    %865 = vector.broadcast %451 : vector<1x32xf32> to vector<32x32xf32>
    %866 = arith.addf %864, %865 : vector<32x32xf32>
    %c0_249 = arith.constant 0 : index
    %c0_250 = arith.constant 0 : index
    %867 = vector.load %arg12[%c0_249, %c0_250] : memref<5x32xf32, #tpu.memory_space<vmem>>, vector<1x32xf32>
    %c1_251 = arith.constant 1 : index
    %c0_252 = arith.constant 0 : index
    %868 = vector.load %arg12[%c1_251, %c0_252] : memref<5x32xf32, #tpu.memory_space<vmem>>, vector<1x32xf32>
    %c2_253 = arith.constant 2 : index
    %c0_254 = arith.constant 0 : index
    %869 = vector.load %arg12[%c2_253, %c0_254] : memref<5x32xf32, #tpu.memory_space<vmem>>, vector<1x32xf32>
    %c3_255 = arith.constant 3 : index
    %c0_256 = arith.constant 0 : index
    %870 = vector.load %arg12[%c3_255, %c0_256] : memref<5x32xf32, #tpu.memory_space<vmem>>, vector<1x32xf32>
    %c4_257 = arith.constant 4 : index
    %c0_258 = arith.constant 0 : index
    %871 = vector.load %arg12[%c4_257, %c0_258] : memref<5x32xf32, #tpu.memory_space<vmem>>, vector<1x32xf32>
    %872 = arith.addf %0, %433 : vector<32x32xf32>
    %873 = arith.addf %872, %866 : vector<32x32xf32>
    %cst_259 = arith.constant dense<0.000000e+00> : vector<32xf32>
    %874 = vector.multi_reduction <add>, %873, %cst_259 [1] : vector<32x32xf32> to vector<32xf32>
    %875 = vector.shape_cast %874 : vector<32xf32> to vector<32x1xf32>
    %cst_260 = arith.constant 3.200000e+01 : f32
    %876 = vector.broadcast %cst_260 : f32 to vector<32x1xf32>
    %877 = arith.divf %875, %876 : vector<32x1xf32>
    %878 = vector.broadcast %877 : vector<32x1xf32> to vector<32x32xf32>
    %879 = arith.subf %873, %878 : vector<32x32xf32>
    %880 = arith.mulf %879, %879 : vector<32x32xf32>
    %cst_261 = arith.constant dense<0.000000e+00> : vector<32xf32>
    %881 = vector.multi_reduction <add>, %880, %cst_261 [1] : vector<32x32xf32> to vector<32xf32>
    %882 = vector.shape_cast %881 : vector<32xf32> to vector<32x1xf32>
    %cst_262 = arith.constant 3.200000e+01 : f32
    %883 = vector.broadcast %cst_262 : f32 to vector<32x1xf32>
    %884 = arith.divf %882, %883 : vector<32x1xf32>
    %885 = vector.broadcast %877 : vector<32x1xf32> to vector<32x32xf32>
    %886 = arith.subf %873, %885 : vector<32x32xf32>
    %cst_263 = arith.constant 9.99999974E-6 : f32
    %887 = vector.broadcast %cst_263 : f32 to vector<32x1xf32>
    %888 = arith.addf %884, %887 : vector<32x1xf32>
    %889 = math.rsqrt %888 : vector<32x1xf32>
    %890 = vector.broadcast %889 : vector<32x1xf32> to vector<32x32xf32>
    %891 = arith.mulf %886, %890 : vector<32x32xf32>
    %892 = vector.broadcast %867 : vector<1x32xf32> to vector<32x32xf32>
    %893 = arith.mulf %891, %892 : vector<32x32xf32>
    %894 = vector.broadcast %868 : vector<1x32xf32> to vector<32x32xf32>
    %895 = arith.addf %893, %894 : vector<32x32xf32>
    %c0_264 = arith.constant 0 : index
    %c0_265 = arith.constant 0 : index
    %896 = vector.load %arg9[%c0_264, %c0_265] : memref<32x64xbf16, #tpu.memory_space<vmem>>, vector<32x64xbf16>
    %897 = arith.truncf %895 : vector<32x32xf32> to vector<32x32xbf16>
    %cst_266 = arith.constant dense<0.000000e+00> : vector<32x64xf32>
    %898 = tpu.matmul %897, %896, %cst_266 {dimension_numbers = #tpu.dot_dimension_numbers<[1], [0], [0], [1], [0, 0, 1, 1], [], []>} : vector<32x32xbf16>, vector<32x64xbf16>, vector<32x64xf32> -> vector<32x64xf32>
    %c0_267 = arith.constant 0 : index
    %c0_268 = arith.constant 0 : index
    %899 = vector.load %arg10[%c0_267, %c0_268] : memref<1x64xf32, #tpu.memory_space<vmem>>, vector<1x64xf32>
    %900 = vector.broadcast %899 : vector<1x64xf32> to vector<32x64xf32>
    %901 = arith.addf %898, %900 : vector<32x64xf32>
    %cst_269 = arith.constant 0.000000e+00 : f32
    %902 = vector.broadcast %cst_269 : f32 to vector<32x64xf32>
    %903 = arith.maximumf %901, %902 : vector<32x64xf32>
    %c0_270 = arith.constant 0 : index
    %c0_271 = arith.constant 0 : index
    %904 = vector.load %arg11[%c0_270, %c0_271] : memref<64x32xbf16, #tpu.memory_space<vmem>>, vector<64x32xbf16>
    %905 = arith.truncf %903 : vector<32x64xf32> to vector<32x64xbf16>
    %cst_272 = arith.constant dense<0.000000e+00> : vector<32x32xf32>
    %906 = tpu.matmul %905, %904, %cst_272 {dimension_numbers = #tpu.dot_dimension_numbers<[1], [0], [0], [1], [0, 0, 1, 1], [], []>} : vector<32x64xbf16>, vector<64x32xbf16>, vector<32x32xf32> -> vector<32x32xf32>
    %907 = vector.broadcast %871 : vector<1x32xf32> to vector<32x32xf32>
    %908 = arith.addf %906, %907 : vector<32x32xf32>
    %909 = arith.addf %895, %908 : vector<32x32xf32>
    %cst_273 = arith.constant dense<0.000000e+00> : vector<32xf32>
    %910 = vector.multi_reduction <add>, %909, %cst_273 [1] : vector<32x32xf32> to vector<32xf32>
    %911 = vector.shape_cast %910 : vector<32xf32> to vector<32x1xf32>
    %cst_274 = arith.constant 3.200000e+01 : f32
    %912 = vector.broadcast %cst_274 : f32 to vector<32x1xf32>
    %913 = arith.divf %911, %912 : vector<32x1xf32>
    %914 = vector.broadcast %913 : vector<32x1xf32> to vector<32x32xf32>
    %915 = arith.subf %909, %914 : vector<32x32xf32>
    %916 = arith.mulf %915, %915 : vector<32x32xf32>
    %cst_275 = arith.constant dense<0.000000e+00> : vector<32xf32>
    %917 = vector.multi_reduction <add>, %916, %cst_275 [1] : vector<32x32xf32> to vector<32xf32>
    %918 = vector.shape_cast %917 : vector<32xf32> to vector<32x1xf32>
    %cst_276 = arith.constant 3.200000e+01 : f32
    %919 = vector.broadcast %cst_276 : f32 to vector<32x1xf32>
    %920 = arith.divf %918, %919 : vector<32x1xf32>
    %921 = vector.broadcast %913 : vector<32x1xf32> to vector<32x32xf32>
    %922 = arith.subf %909, %921 : vector<32x32xf32>
    %cst_277 = arith.constant 9.99999974E-6 : f32
    %923 = vector.broadcast %cst_277 : f32 to vector<32x1xf32>
    %924 = arith.addf %920, %923 : vector<32x1xf32>
    %925 = math.rsqrt %924 : vector<32x1xf32>
    %926 = vector.broadcast %925 : vector<32x1xf32> to vector<32x32xf32>
    %927 = arith.mulf %922, %926 : vector<32x32xf32>
    %928 = vector.broadcast %869 : vector<1x32xf32> to vector<32x32xf32>
    %929 = arith.mulf %927, %928 : vector<32x32xf32>
    %930 = vector.broadcast %870 : vector<1x32xf32> to vector<32x32xf32>
    %931 = arith.addf %929, %930 : vector<32x32xf32>
    %c0_278 = arith.constant 0 : index
    %c0_279 = arith.constant 0 : index
    %932 = vector.load %arg13[%c0_278, %c0_279] : memref<32x32xf32, #tpu.memory_space<vmem>>, vector<32x32xf32>
    tpu.vector_store %arg13[%c0_278, %c0_279], %931 {strides = array<i32>} : memref<32x32xf32, #tpu.memory_space<vmem>>, vector<32x32xf32>,
    return
  }
}

</mosaic_0001>

<bundles_post_ra>
// kernel: tpu_custom_call.1
= control target key start
LH: loop header
LB: loop body
LE: loop exit
PB: predicated region body
PF: predicated region fallthrough
CT: control target
= control target key end

     0   :  { %18 = vsyncpa [#allocation3], 0  ;;  %s11032_s0 = inlined_call_operand.vmem [shape: f32[32,32], index: 0, kind: input, shape index: {}]   ;;  %s11033_s1 = inlined_call_operand.vmem [shape: f32[3,32,32], index: 1, kind: input, shape index: {}]   ;;  %s11034_s2 = inlined_call_operand.vmem [shape: f32[2,16], index: 2, kind: input, shape index: {}]   ;;  %s11035_s3 = inlined_call_operand.vmem [shape: f32[3,64,32], index: 3, kind: input, shape index: {}]   ;;  %s11036_s4 = inlined_call_operand.hbm [shape: f32[2,32], index: 4, kind: input, shape index: {}]   ;;  %s11037_s5 = inlined_call_operand.vmem [shape: bf16[8,32,32], index: 5, kind: input, shape index: {}]   ;;  %s11038_s6 = inlined_call_operand.vmem [shape: f32[8,32], index: 6, kind: input, shape index: {}]   ;;  %s11039_s7 = inlined_call_operand.vmem [shape: bf16[4,16,8], index: 7, kind: input, shape index: {}]   ;;  %s11040_s8 = inlined_call_operand.hbm [shape: f32[4,8], index: 8, kind: input, shape index: {}]   ;;  %s11041_s9 = inlined_call_operand.vmem [shape: bf16[32,64], index: 9, kind: input, shape index: {}]   ;;  %s11042_s10 = inlined_call_operand.vmem [shape: f32[1,64], index: 10, kind: input, shape index: {}]   ;;  %s11043_s11 = inlined_call_operand.vmem [shape: bf16[64,32], index: 11, kind: input, shape index: {}]   ;;  %s11044_s12 = inlined_call_operand.vmem [shape: f32[5,32], index: 12, kind: input, shape index: {}]   ;;  %s11045_s13 = inlined_call_operand.hbm [shape: f32[32,32], index: 13, kind: output, shape index: {}]  }
   0x1   :  { %19 = vsyncpa [#allocation6], 0 }
   0x2   :  { %20 = vsyncpa [#allocation4], 0  ;;  %s8976_s25 = smov [#allocation2]   ;;  %s8977_s27 = smov [#allocation5]  }
   0x3   :  { %s35_s26 = sshll.u32 %s8976_s25, 4  ;;  %s51_s28 = sshll.u32 %s8977_s27, 4  ;;  %s36_s26 = int_to_ptr.vmem [resolvable:$true] %s35_s26  ;;  %s52_s28 = int_to_ptr.vmem [resolvable:$true] %s51_s28 }
   0x4   :  { %s8904_s14 = scalar_lea.hbm %s11036_s4, 32 }
   0x5   :  { %p8905_p0 = scmp.ne.s32.totalorder %s11036_s4, %s8904_s14  ;;  %p8908_p1 = scmp.lt.u32.totalorder %s8904_s14, %s11036_s4 }
   0x7   :  { %p8910_p2 = pnand %p8908_p1, %p8905_p0 }
   0x9   :  { %8913 = shalt.err (!%p8910_p2)
}
   0xa   :  { %s8914_s19 = scalar_lea.vmem %s36_s26, 32  ;;  %p8919_p4 = scmp.lt.s32.totalorder %s36_s26, %s36_s26 }
   0xb   :  { %p8915_p3 = scmp.ne.s32.totalorder %s36_s26, %s8914_s19  ;;  %p8920_p5 = scmp.lt.s32.totalorder %s8914_s19, %s8914_s19 }
   0xd   :  { %p8921_p6 = por %p8920_p5, %p8919_p4 }
   0xf   :  { %p8922_p7 = pnand %p8921_p6, %p8915_p3 }
  0x11   :  { %8925 = shalt.err (!%p8922_p7)
}
  0x12   :  { %38 = dma.hbm_to_vmem [thread:$0]  %s11036_s4, 32, %s36_s26, [#allocation3]  }
  0x13   :  { %s8926_s24 = scalar_lea.hbm %s11040_s8, 64 }
  0x14   :  { %p8927_p8 = scmp.ne.s32.totalorder %s11040_s8, %s8926_s24  ;;  %p8930_p9 = scmp.lt.u32.totalorder %s8926_s24, %s11040_s8 }
  0x16   :  { %p8932_p10 = pnand %p8930_p9, %p8927_p8 }
  0x18   :  { %8935 = shalt.err (!%p8932_p10)
}
  0x19   :  { %s8936_s14 = scalar_lea.vmem %s52_s28, 64  ;;  %p8941_p12 = scmp.lt.s32.totalorder %s52_s28, %s52_s28 }
  0x1a   :  { %p8937_p11 = scmp.ne.s32.totalorder %s52_s28, %s8936_s14  ;;  %p8942_p13 = scmp.lt.s32.totalorder %s8936_s14, %s8936_s14 }
  0x1c   :  { %p8943_p0 = por %p8942_p13, %p8941_p12 }
  0x1e   :  { %p8944_p1 = pnand %p8943_p0, %p8937_p11 }
  0x20   :  { %8947 = shalt.err (!%p8944_p1)
}
  0x21   :  { %54 = dma.hbm_to_vmem [thread:$0]  %s11040_s8, 64, %s52_s28, [#allocation6]  }
  0x22   :  { %8970 = dma.done.wait [#allocation3], 32  }
  0x23   :  { %8971 = vsyncadd [#allocation3], 4294967264 }
  0x24   :  { %8972 = dma.done.wait [#allocation6], 64  }
  0x25   :  { %8973 = vsyncadd [#allocation6], 4294967232  ;;  %v8538_v0 = vld [vmem:[%s11037_s5] sm:$0xff]   ;;  %v8539_v1 = vld [vmem:[%s11037_s5 + $0x8] sm:$0xff]   ;;  %vm129_vm0 = vcmask 261120   ;;  %v11046_v36 = vmov 0.0  }
  0x26   :  { %7686 = vmatprep.subr.bf16.mxu1 %v8538_v0  ;;  %v70_v2 = vld [vmem:[%s11032_s0] sm:$0xff]  ;;  %v71_v3 = vld [vmem:[%s11032_s0 + $0x8] sm:$0xff]  ;;  %v72_v5 = vld [vmem:[%s11032_s0 + $0x10] sm:$0xff]  ;;  %vm8979_vm1 = vmmov 0   ;;  %vm346_vm2 = vcmask 64512   ;;  %s8980_s28 = smov 112  }
  0x27   :  { %7687 = vmatpush3.bf16.msra.mxu1 %v8538_v0  ;;  %v9094_v4 = vpack.c.bf16 %v71_v3, %v70_v2  ;;  %v73_v6 = vld [vmem:[%s11032_s0 + $0x18] sm:$0xff]  ;;  %v8540_v7 = vld [vmem:[%s11037_s5 + $0x10] sm:$0xff]   ;;  %v74_v8 = vld [vmem:[%s11033_s1] sm:$0xff]  ;;  %s8981_s23 = smov 120   ;;  %s8982_s24 = smov 104   ;;  %vm1106_vm3 = vcmask 130048  }
  0x28   :  { %7688 = vmatprep.subr.bf16.mxu1 %v8539_v1  ;;  %v9110_v9 = vpack.c.bf16 %v73_v6, %v72_v5  ;;  %v8541_v10 = vld [vmem:[%s11037_s5 + $0x18] sm:$0xff]   ;;  %v75_v11 = vld [vmem:[%s11033_s1 + $0x8] sm:$0xff]  ;;  %v7114_v12 = vld [vmem:[%s11033_s1 + $0x40] sm:$0xff]  ;;  %s8984_s16 = smov 8   ;;  %s8985_s17 = smov 24   ;;  %vm2158_vm4 = vcmask 195584  }
  0x29   :  { %11079 = vst [vmem:[#allocation11_spill] sm:$0xff] %v9094_v4  ;;  %7690 = vmatprep.mubr.msk.bf16.mxu1 %vm129_vm0, %v9094_v4  ;;  %v7115_v13 = vld [vmem:[%s11033_s1 + $0x48] sm:$0xff]  ;;  %v189_v14 = vadd.f32 %v7114_v12, %v74_v8  ;;  %v76_v16 = vld [vmem:[%s11033_s1 + $0x10] sm:$0xff]  ;;  %v77_v17 = vld [vmem:[%s11033_s1 + $0x18] sm:$0xff]  ;;  %vm6960_vm5 = vcmask 523264  }
  0x2a   :  { %11080 = vst [vmem:[#allocation12_spill] sm:$0xff] %v9110_v9  ;;  %v190_v15 = vadd.f32 %v7115_v13, %v75_v11  ;;  %v7116_v18 = vld [vmem:[%s11033_s1 + $0x50] sm:$0xff]  ;;  %v7117_v19 = vld [vmem:[%s11033_s1 + $0x58] sm:$0xff]  ;;  %v8542_v21 = vld [vmem:[%s11037_s5 + $0x20] sm:$0xff]  }
  0x2b   :  { %7689 = vmatpush3.bf16.msra.mxu1 %v8539_v1  ;;  %v191_v22 = vadd.f32 %v7116_v18, %v76_v16  ;;  %v192_v23 = vadd.f32 %v7117_v19, %v77_v17  ;;  %7702 = vmatprep.subr.bf16.mxu0 %v8542_v21  ;;  %v8543_v25 = vld [vmem:[%s11037_s5 + $0x28] sm:$0xff]   ;;  %v7110_v26 = vld [vmem:[%s11033_s1 + $0x20] sm:$0xff]  ;;  %v7112_v30 = vld [vmem:[%s11033_s1 + $0x30] sm:$0xff] }
  0x2c   :  { %7694 = vmatprep.subr.bf16.mxu1 %v8540_v7  ;;  %v193_v20 = vpack.c.bf16 %v190_v15, %v189_v14  ;;  %7703 = vmatpush3.bf16.msra.mxu0 %v8542_v21  ;;  %v7111_v27 = vld [vmem:[%s11033_s1 + $0x28] sm:$0xff]  ;;  %v266_v28 = vadd.f32 %v7110_v26, %v74_v8  ;;  %v7113_v31 = vld [vmem:[%s11033_s1 + $0x38] sm:$0xff]  ;;  %v268_v32 = vadd.f32 %v7112_v30, %v76_v16  ;;  %v7130_v37 = vld [vmem:[%s11038_s6] ss:$0 sm:$0xff]  ;;  %s8986_s1 = smov [#allocation7]  }
  0x2d   :  { %v194_v24 = vpack.c.bf16 %v192_v23, %v191_v22  ;;  %7704 = vmatprep.subr.bf16.mxu0 %v8543_v25  ;;  %v267_v29 = vadd.f32 %v7111_v27, %v75_v11  ;;  %v269_v33 = vadd.f32 %v7113_v31, %v77_v17  ;;  %v7135_v50 = vld [vmem:[%s11038_s6 + $0x1] ss:$0 sm:$0xff]  ;;  %v7140_v1 = vld [vmem:[%s11038_s6 + $0x2] ss:$0 sm:$0xff] }
  0x2e   :  { %7691 = vmatmul.mubr.msk.bf16.vlgmr.msra.gmra.mrb[0].mxu1 %vm129_vm0, %v9110_v9 }
  0x2f   :  { %7695 = vmatpush3.bf16.msra.mxu1 %v8540_v7  ;;  %7698 = vmatprep.mubr.msk.bf16.mxu1 %vm129_vm0, %v193_v20  ;;  %v270_v34 = vpack.c.bf16 %v267_v29, %v266_v28  ;;  %v271_v35 = vpack.c.bf16 %v269_v33, %v268_v32 }
  0x30   :  { %7696 = vmatprep.subr.bf16.mxu1 %v8541_v10  ;;  %7705 = vmatpush3.bf16.msra.mxu0 %v8543_v25 }
  0x31   :  { %7706 = vmatprep.mubr.msk.bf16.mxu0 %vm129_vm0, %v270_v34  ;;  %7716 = vmatprep.subr.bf16.mxu0 %v11046_v36 }
  0x33   :  { %7697 = vmatpush3.bf16.msra.mxu1 %v8541_v10  ;;  %7707 = vmatmul.mubr.msk.bf16.vlgmr.msra.gmra.mrb[0].mxu0 %vm129_vm0, %v271_v35 }
  0x34   :  { %7710 = vmatprep.subr.bf16.mxu1 %v11046_v36  ;;  %7718 = vmatprep.mubr.msk.bf16.mxu0 %vm8979_vm1, %v11046_v36 }
  0x36   :  { %7699 = vmatmul.mubr.msk.bf16.vlgmr.msra.gmra.mrb[4].mxu1 %vm129_vm0, %v194_v24 }
  0x37   :  { %7712 = vmatprep.mubr.msk.bf16.mxu1 %vm8979_vm1, %v11046_v36 }
 0x101   :  { %v7692_v38 = vpop.f32.mrb[0].mxu1 }
 0x102   :  { %v179_v39 = vadd.f32 %v7692_v38, %v7130_v37  ;;  %v170_v40 = vpop.f32.mrb[1].mxu1 }
 0x103   :  { %v171_v41 = vadd.f32 %v7130_v37, %v170_v40  ;;  %v7693_v42 = vpop.f32.mrb[2].mxu1 }
 0x104   :  { %v182_v43 = vadd.f32 %v7693_v42, %v7130_v37  ;;  %v173_v44 = vpop.f32.mrb[3].mxu1  ;;  %v187_v46 = vmul.f32 0.35355338, %v179_v39  ;;  %v8545_v42 = vld [vmem:[%s11039_s7 + $0x8] sm:$0xff]  }
 0x105   :  { %v174_v45 = vadd.f32 %v7130_v37, %v173_v44  ;;  %v185_v48 = vmul.f32 0.35355338, %v171_v41  ;;  %v8544_v41 = vld [vmem:[%s11039_s7] sm:$0xff]  }
 0x106   :  { %v188_v47 = vmul.f32 0.35355338, %v182_v43  ;;  %v7708_v2 = vpop.f32.mrb[0].mxu0 }
 0x107   :  { %v186_v49 = vmul.f32 0.35355338, %v174_v45  ;;  %v337_v3 = vadd.f32 %v7708_v2, %v7140_v1  ;;  %v328_v5 = vpop.f32.mrb[1].mxu0 }
 0x108   :  { %v9172_v51 = vpack.c.bf16 %v188_v47, %v187_v46  ;;  %v329_v6 = vadd.f32 %v7140_v1, %v328_v5  ;;  %v7709_v7 = vpop.f32.mrb[2].mxu0 }
 0x109   :  { %v344_v52 = vpack.c.bf16 %v186_v49, %v185_v48  ;;  %v7700_v53 = vpop.f32.mrb[4].mxu1  ;;  %v340_v8 = vadd.f32 %v7709_v7, %v7140_v1  ;;  %v331_v10 = vpop.f32.mrb[3].mxu0 }
 0x10a   :  { %v260_v54 = vadd.f32 %v7700_v53, %v7135_v50  ;;  %v251_v55 = vpop.f32.mrb[5].mxu1  ;;  %v332_v11 = vadd.f32 %v7140_v1, %v331_v10  ;;  %v716_v26 = vsel %vm346_vm2, %v9172_v51, 0  ;;  %v1335_v10 = vlaneseq }
 0x10b   :  { %v252_v56 = vadd.f32 %v7135_v50, %v251_v55  ;;  %v7701_v57 = vpop.f32.mrb[6].mxu1  ;;  %529 = vrot.lane.b32.xlu1 %v344_v52, %s8980_s28  ;;  %436 = vrot.lane.b32.xlu0 %v344_v52, %s8981_s23  ;;  %v348_v58 = vsel %vm346_vm2, %v344_v52, 0  ;;  %v9207_v12 = vpack.c.bf16 %v340_v8, %v337_v3 }
 0x10c   :  { %v263_v59 = vadd.f32 %v7701_v57, %v7135_v50  ;;  %v254_v60 = vpop.f32.mrb[7].mxu1  ;;  %7717 = vmatpush3.bf16.xpose.msra.mxu0 %v348_v58  ;;  %v9209_v13 = vpack.c.bf16 %v332_v11, %v329_v6 }
 0x10d   :  { %v255_v61 = vadd.f32 %v7135_v50, %v254_v60  ;;  %7728 = vmatprep.subr.bf16.mxu0 %v11046_v36 }
 0x10e   :  { %v9178_v62 = vpack.c.bf16 %v263_v59, %v260_v54 }
 0x10f   :  { %v345_v63 = vpack.c.bf16 %v255_v61, %v252_v56 }
 0x110   :  { %v719_v28 = vsel %vm346_vm2, %v9178_v62, 0 }
 0x111   :  { %531 = vrot.lane.b32.xlu1 %v345_v63, %s8980_s28  ;;  %439 = vrot.lane.b32.xlu0 %v345_v63, %s8981_s23  ;;  %v351_v0 = vsel %vm346_vm2, %v345_v63, 0 }
 0x112   :  { %7711 = vmatpush3.bf16.xpose.msra.mxu1 %v351_v0 }
 0x113   :  { %7719 = vmatmul.mubr.msk.bf16.vlgmr.msra.gmra.mrb[4].mxu0 %vm346_vm2, %v345_v63  ;;  %7722 = vmatprep.subr.bf16.mxu1 %v11046_v36 }
 0x114   :  { %7730 = vmatprep.mubr.msk.bf16.mxu0 %vm8979_vm1, %v11046_v36 }
 0x115   :  { %623 = vrot.lane.b32.xlu1 %v345_v63, %s8982_s24  ;;  %621 = vrot.lane.b32.xlu0 %v344_v52, %s8982_s24 }
 0x119   :  { %807 = vrot.lane.b32.xlu1 %v9178_v62, %s8981_s23  ;;  %804 = vrot.lane.b32.xlu0 %v9172_v51, %s8981_s23 }
 0x11a   :  { %7713 = vmatmul.mubr.msk.bf16.vlgmr.msra.gmra.mrb[8].mxu1 %vm346_vm2, %v344_v52 }
 0x11b   :  { %7724 = vmatprep.mubr.msk.bf16.mxu1 %vm8979_vm1, %v11046_v36 }
 0x11d   :  { %899 = vrot.lane.b32.xlu1 %v9178_v62, %s8980_s28  ;;  %897 = vrot.lane.b32.xlu0 %v9172_v51, %s8980_s28 }
 0x121   :  { %991 = vrot.lane.b32.xlu1 %v9178_v62, %s8982_s24  ;;  %989 = vrot.lane.b32.xlu0 %v9172_v51, %s8982_s24 }
 0x17d   :  { %v437_v14 = vpop.permute.xlu0 %436  ;;  %v530_v16 = vpop.permute.xlu1 %529 }
 0x17e   :  { %v442_v15 = vsel %vm346_vm2, %v437_v14, 0  ;;  %v534_v19 = vsel %vm346_vm2, %v530_v16, 0 }
 0x17f   :  { %7729 = vmatpush3.bf16.xpose.msra.mxu0 %v442_v15 }
 0x180   :  { %7740 = vmatprep.subr.bf16.mxu0 %v11046_v36 }
 0x183   :  { %v440_v17 = vpop.permute.xlu0 %439  ;;  %v532_v20 = vpop.permute.xlu1 %531 }
 0x184   :  { %v445_v18 = vsel %vm346_vm2, %v440_v17, 0  ;;  %v537_v22 = vsel %vm346_vm2, %v532_v20, 0 }
 0x185   :  { %7723 = vmatpush3.bf16.xpose.msra.mxu1 %v445_v18 }
 0x186   :  { %7731 = vmatmul.mubr.msk.bf16.vlgmr.msra.gmra.mrb[8].mxu0 %vm346_vm2, %v440_v17  ;;  %7734 = vmatprep.subr.bf16.mxu1 %v11046_v36 }
 0x187   :  { %7741 = vmatpush3.bf16.xpose.msra.mxu0 %v534_v19  ;;  %7742 = vmatprep.mubr.msk.bf16.mxu0 %vm8979_vm1, %v11046_v36  ;;  %v622_v21 = vpop.permute.xlu0 %621  ;;  %v624_v24 = vpop.permute.xlu1 %623 }
 0x188   :  { %7752 = vmatprep.subr.bf16.mxu0 %v11046_v36  ;;  %v626_v23 = vsel %vm346_vm2, %v622_v21, 0  ;;  %v629_v25 = vsel %vm346_vm2, %v624_v24, 0 }
 0x18b   :  { %v805_v27 = vpop.permute.xlu0 %804  ;;  %v808_v30 = vpop.permute.xlu1 %807 }
 0x18c   :  { %7725 = vmatmul.mubr.msk.bf16.vlgmr.msra.gmra.mrb[12].mxu1 %vm346_vm2, %v437_v14  ;;  %v810_v29 = vsel %vm346_vm2, %v805_v27, 0  ;;  %v813_v32 = vsel %vm346_vm2, %v808_v30, 0 }
 0x18d   :  { %7735 = vmatpush3.bf16.xpose.msra.mxu1 %v537_v22  ;;  %7736 = vmatprep.mubr.msk.bf16.mxu1 %vm8979_vm1, %v11046_v36 }
 0x18e   :  { %7743 = vmatmul.mubr.msk.bf16.vlgmr.msra.gmra.mrb[12].mxu0 %vm346_vm2, %v532_v20  ;;  %7746 = vmatprep.subr.bf16.mxu1 %v11046_v36 }
 0x18f   :  { %7753 = vmatpush3.bf16.xpose.msra.mxu0 %v626_v23  ;;  %7754 = vmatprep.mubr.msk.bf16.mxu0 %vm8979_vm1, %v11046_v36  ;;  %v898_v31 = vpop.permute.xlu0 %897  ;;  %v900_v34 = vpop.permute.xlu1 %899 }
 0x190   :  { %7764 = vmatprep.subr.bf16.mxu0 %v11046_v36  ;;  %v902_v33 = vsel %vm346_vm2, %v898_v31, 0  ;;  %v905_v37 = vsel %vm346_vm2, %v900_v34, 0 }
 0x193   :  { %v990_v35 = vpop.permute.xlu0 %989  ;;  %v992_v39 = vpop.permute.xlu1 %991 }
 0x194   :  { %7737 = vmatmul.mubr.msk.bf16.vlgmr.msra.gmra.mrb[16].mxu1 %vm346_vm2, %v530_v16  ;;  %v994_v38 = vsel %vm346_vm2, %v990_v35, 0  ;;  %v997_v40 = vsel %vm346_vm2, %v992_v39, 0 }
 0x195   :  { %7747 = vmatpush3.bf16.xpose.msra.mxu1 %v629_v25  ;;  %7748 = vmatprep.mubr.msk.bf16.mxu1 %vm8979_vm1, %v11046_v36 }
 0x196   :  { %7755 = vmatmul.mubr.msk.bf16.vlgmr.msra.gmra.mrb[16].mxu0 %vm346_vm2, %v624_v24  ;;  %7758 = vmatprep.subr.bf16.mxu1 %v11046_v36 }
 0x197   :  { %7765 = vmatpush3.bf16.xpose.msra.mxu0 %v716_v26  ;;  %7766 = vmatprep.mubr.msk.bf16.mxu0 %vm8979_vm1, %v11046_v36 }
 0x198   :  { %7776 = vmatprep.subr.bf16.mxu0 %v11046_v36 }
 0x19c   :  { %7749 = vmatmul.mubr.msk.bf16.vlgmr.msra.gmra.mrb[20].mxu1 %vm346_vm2, %v622_v21 }
 0x19d   :  { %7759 = vmatpush3.bf16.xpose.msra.mxu1 %v719_v28  ;;  %7760 = vmatprep.mubr.msk.bf16.mxu1 %vm8979_vm1, %v11046_v36 }
 0x19e   :  { %7767 = vmatmul.mubr.msk.bf16.vlgmr.msra.gmra.mrb[20].mxu0 %vm346_vm2, %v9178_v62  ;;  %7770 = vmatprep.subr.bf16.mxu1 %v11046_v36 }
 0x19f   :  { %7777 = vmatpush3.bf16.xpose.msra.mxu0 %v810_v29  ;;  %7778 = vmatprep.mubr.msk.bf16.mxu0 %vm8979_vm1, %v11046_v36 }
 0x1a0   :  { %7788 = vmatprep.subr.bf16.mxu0 %v11046_v36 }
 0x1a4   :  { %7761 = vmatmul.mubr.msk.bf16.vlgmr.msra.gmra.mrb[24].mxu1 %vm346_vm2, %v9172_v51 }
 0x1a5   :  { %7771 = vmatpush3.bf16.xpose.msra.mxu1 %v813_v32  ;;  %7772 = vmatprep.mubr.msk.bf16.mxu1 %vm8979_vm1, %v11046_v36 }
 0x1a6   :  { %7779 = vmatmul.mubr.msk.bf16.vlgmr.msra.gmra.mrb[24].mxu0 %vm346_vm2, %v808_v30  ;;  %7782 = vmatprep.subr.bf16.mxu1 %v11046_v36 }
 0x1a7   :  { %7789 = vmatpush3.bf16.xpose.msra.mxu0 %v902_v33  ;;  %7790 = vmatprep.mubr.msk.bf16.mxu0 %vm8979_vm1, %v11046_v36 }
 0x1a8   :  { %7800 = vmatprep.subr.bf16.mxu0 %v11046_v36 }
 0x1ac   :  { %7773 = vmatmul.mubr.msk.bf16.vlgmr.msra.gmra.mrb[28].mxu1 %vm346_vm2, %v805_v27 }
 0x1ad   :  { %7783 = vmatpush3.bf16.xpose.msra.mxu1 %v905_v37  ;;  %7784 = vmatprep.mubr.msk.bf16.mxu1 %vm8979_vm1, %v11046_v36 }
 0x1ae   :  { %7791 = vmatmul.mubr.msk.bf16.vlgmr.msra.gmra.mrb[28].mxu0 %vm346_vm2, %v900_v34  ;;  %7794 = vmatprep.subr.bf16.mxu1 %v11046_v36 }
 0x1af   :  { %7801 = vmatpush3.bf16.xpose.msra.mxu0 %v994_v38  ;;  %7802 = vmatprep.mubr.msk.bf16.mxu0 %vm8979_vm1, %v11046_v36 }
 0x1b0   :  { %7824 = vmatprep.subr.bf16.mxu0 %v8545_v42 }
 0x1b4   :  { %7785 = vmatmul.mubr.msk.bf16.vlgmr.msra.gmra.mrb[32].mxu1 %vm346_vm2, %v898_v31 }
 0x1b5   :  { %7795 = vmatpush3.bf16.xpose.msra.mxu1 %v997_v40  ;;  %7796 = vmatprep.mubr.msk.bf16.mxu1 %vm8979_vm1, %v11046_v36 }
 0x1b6   :  { %7803 = vmatmul.mubr.msk.bf16.vlgmr.msra.gmra.mrb[32].mxu0 %vm346_vm2, %v992_v39  ;;  %7806 = vmatprep.subr.bf16.mxu1 %v8544_v41 }
 0x1b7   :  { %7825 = vmatpush3.bf16.msra.mxu0 %v8545_v42 }
 0x1b8   :  { %7848 = vmatprep.subr.bf16.mxu0 %v11046_v36 }
 0x1bc   :  { %7797 = vmatmul.mubr.msk.bf16.vlgmr.msra.gmra.mrb[36].mxu1 %vm346_vm2, %v990_v35 }
 0x1bd   :  { %7807 = vmatpush3.bf16.msra.mxu1 %v8544_v41 }
 0x1be   :  { %7842 = vmatprep.subr.bf16.mxu1 %v11046_v36 }
 0x1e6   :  { %v428_v43 = vpop.f32.mrb[4].mxu0 }
 0x1e7   :  { %v7720_v44 = vpop.f32.mrb[5].mxu0 }
 0x1e8   :  { %v431_v45 = vpop.f32.mrb[6].mxu0 }
 0x1e9   :  { %v1088_v46 = vpack.c.bf16 %v431_v45, %v428_v43  ;;  %v7721_v47 = vpop.f32.mrb[7].mxu0 }
 0x1eb   :  { %7808 = vmatprep.mubr.msk.bf16.mxu1 %vm1106_vm3, %v1088_v46  ;;  %7826 = vmatprep.mubr.msk.bf16.mxu0 %vm1106_vm3, %v1088_v46 }
 0x1ed   :  { %v9289_v48 = vpop.f32.mrb[8].mxu1 }
 0x1ee   :  { %v7714_v49 = vpop.f32.mrb[9].mxu1 }
 0x1ef   :  { %v9291_v50 = vpop.f32.mrb[10].mxu1 }
 0x1f0   :  { %v7715_v52 = vpop.f32.mrb[11].mxu1 }
 0x259   :  { %v522_v53 = vpop.f32.mrb[8].mxu0 }
 0x25a   :  { %v7732_v54 = vpop.f32.mrb[9].mxu0 }
 0x25b   :  { %v525_v55 = vpop.f32.mrb[10].mxu0 }
 0x25c   :  { %v1089_v56 = vpack.c.bf16 %v525_v55, %v522_v53  ;;  %v7733_v57 = vpop.f32.mrb[11].mxu0 }
 0x25e   :  { %7809 = vmatmul.mubr.msk.bf16.vlgmr.msra.gmra.mrb[40].mxu1 %vm1106_vm3, %v1089_v56  ;;  %7827 = vmatmul.mubr.msk.bf16.vlgmr.msra.gmra.mrb[36].mxu0 %vm1106_vm3, %v1089_v56 }
 0x25f   :  { %v9297_v58 = vpop.f32.mrb[12].mxu1 }
 0x260   :  { %v7726_v59 = vpop.f32.mrb[13].mxu1 }
 0x261   :  { %v9299_v60 = vpop.f32.mrb[14].mxu1  ;;  %v614_v61 = vpop.f32.mrb[12].mxu0 }
 0x262   :  { %v7727_v63 = vpop.f32.mrb[15].mxu1  ;;  %v7744_v0 = vpop.f32.mrb[13].mxu0 }
 0x263   :  { %v617_v1 = vpop.f32.mrb[14].mxu0 }
 0x264   :  { %v1090_v2 = vpack.c.bf16 %v617_v1, %v614_v61  ;;  %v7745_v3 = vpop.f32.mrb[15].mxu0 }
 0x266   :  { %7812 = vmatprep.mubr.msk.bf16.mxu1 %vm1106_vm3, %v1090_v2  ;;  %7830 = vmatprep.mubr.msk.bf16.mxu0 %vm1106_vm3, %v1090_v2 }
 0x267   :  { %v9305_v5 = vpop.f32.mrb[16].mxu1 }
 0x268   :  { %v7738_v6 = vpop.f32.mrb[17].mxu1 }
 0x269   :  { %v9307_v7 = vpop.f32.mrb[18].mxu1  ;;  %v706_v8 = vpop.f32.mrb[16].mxu0 }
 0x26a   :  { %v7739_v11 = vpop.f32.mrb[19].mxu1  ;;  %v7756_v14 = vpop.f32.mrb[17].mxu0 }
 0x26b   :  { %v709_v15 = vpop.f32.mrb[18].mxu0  ;;  %v9355_v11 = vld [vmem:[#allocation5] ss:$0 sm:$0xff]  ;;  %v9357_v14 = vld [vmem:[#allocation5 + $0x1] ss:$0 sm:$0xff] }
 0x26c   :  { %v1091_v16 = vpack.c.bf16 %v709_v15, %v706_v8  ;;  %v7757_v17 = vpop.f32.mrb[19].mxu0 }
 0x26e   :  { %7813 = vmatmul.mubr.msk.bf16.gmra.mrb[44].mxu1 %vm1106_vm3, %v1091_v16  ;;  %7831 = vmatmul.mubr.msk.bf16.gmra.mrb[40].mxu0 %vm1106_vm3, %v1091_v16 }
 0x26f   :  { %v9313_v18 = vpop.f32.mrb[20].mxu1 }
 0x270   :  { %v7750_v19 = vpop.f32.mrb[21].mxu1 }
 0x271   :  { %v9315_v20 = vpop.f32.mrb[22].mxu1  ;;  %v796_v21 = vpop.f32.mrb[20].mxu0 }
 0x272   :  { %v7751_v23 = vpop.f32.mrb[23].mxu1  ;;  %v7768_v24 = vpop.f32.mrb[21].mxu0 }
 0x273   :  { %v799_v25 = vpop.f32.mrb[22].mxu0 }
 0x274   :  { %v1092_v26 = vpack.c.bf16 %v799_v25, %v796_v21  ;;  %v7769_v27 = vpop.f32.mrb[23].mxu0 }
 0x276   :  { %7816 = vmatprep.mubr.msk.bf16.mxu1 %vm1106_vm3, %v1092_v26  ;;  %7834 = vmatprep.mubr.msk.bf16.mxu0 %vm1106_vm3, %v1092_v26 }
 0x277   :  { %v9321_v28 = vpop.f32.mrb[24].mxu1 }
 0x278   :  { %v7762_v29 = vpop.f32.mrb[25].mxu1 }
 0x279   :  { %v9323_v30 = vpop.f32.mrb[26].mxu1  ;;  %v890_v31 = vpop.f32.mrb[24].mxu0 }
 0x27a   :  { %v7763_v33 = vpop.f32.mrb[27].mxu1  ;;  %v7780_v34 = vpop.f32.mrb[25].mxu0 }
 0x27b   :  { %v893_v35 = vpop.f32.mrb[26].mxu0 }
 0x27c   :  { %v1093_v37 = vpack.c.bf16 %v893_v35, %v890_v31  ;;  %v7781_v38 = vpop.f32.mrb[27].mxu0 }
 0x27e   :  { %7817 = vmatmul.mubr.msk.bf16.gmra.mrb[48].mxu1 %vm1106_vm3, %v1093_v37  ;;  %7835 = vmatmul.mubr.msk.bf16.gmra.mrb[44].mxu0 %vm1106_vm3, %v1093_v37 }
 0x27f   :  { %v9329_v39 = vpop.f32.mrb[28].mxu1 }
 0x280   :  { %v7774_v40 = vpop.f32.mrb[29].mxu1 }
 0x281   :  { %v9331_v41 = vpop.f32.mrb[30].mxu1  ;;  %v982_v42 = vpop.f32.mrb[28].mxu0 }
 0x282   :  { %v7775_v44 = vpop.f32.mrb[31].mxu1  ;;  %v7792_v45 = vpop.f32.mrb[29].mxu0 }
 0x283   :  { %v985_v46 = vpop.f32.mrb[30].mxu0 }
 0x284   :  { %v1094_v47 = vpack.c.bf16 %v985_v46, %v982_v42  ;;  %v7793_v49 = vpop.f32.mrb[31].mxu0 }
 0x286   :  { %7820 = vmatprep.mubr.msk.bf16.mxu1 %vm1106_vm3, %v1094_v47  ;;  %7838 = vmatprep.mubr.msk.bf16.mxu0 %vm1106_vm3, %v1094_v47 }
 0x287   :  { %v9337_v52 = vpop.f32.mrb[32].mxu1 }
 0x288   :  { %v7786_v53 = vpop.f32.mrb[33].mxu1 }
 0x289   :  { %v9339_v54 = vpop.f32.mrb[34].mxu1  ;;  %v1074_v55 = vpop.f32.mrb[32].mxu0 }
 0x28a   :  { %v7787_v57 = vpop.f32.mrb[35].mxu1  ;;  %v7804_v59 = vpop.f32.mrb[33].mxu0 }
 0x28b   :  { %v1077_v61 = vpop.f32.mrb[34].mxu0 }
 0x28c   :  { %v1095_v63 = vpack.c.bf16 %v1077_v61, %v1074_v55  ;;  %v7805_v0 = vpop.f32.mrb[35].mxu0 }
 0x28e   :  { %7821 = vmatmul.mubr.msk.bf16.gmra.mrb[52].mxu1 %vm1106_vm3, %v1095_v63  ;;  %7839 = vmatmul.mubr.msk.bf16.gmra.mrb[48].mxu0 %vm1106_vm3, %v1095_v63 }
 0x28f   :  { %v9345_v1 = vpop.f32.mrb[36].mxu1  ;;  %7844 = vmatprep.mubr.msk.bf16.mxu1 %vm8979_vm1, %v11046_v36  ;;  %7850 = vmatprep.mubr.msk.bf16.mxu0 %vm8979_vm1, %v11046_v36 }
 0x290   :  { %v7798_v2 = vpop.f32.mrb[37].mxu1 }
 0x291   :  { %v9351_v3 = vpop.f32.mrb[38].mxu1 }
 0x292   :  { %v7799_v8 = vpop.f32.mrb[39].mxu1 }
 0x331   :  { %v7810_v15 = vpop.f32.mrb[40].mxu1  ;;  %v7828_v16 = vpop.f32.mrb[36].mxu0 }
 0x332   :  { %v9360_v17 = vadd.f32 %v7810_v15, %v9355_v11  ;;  %v9363_v19 = vadd.f32 %v7828_v16, %v9357_v14  ;;  %v1165_v21 = vpop.f32.mrb[41].mxu1  ;;  %v1272_v23 = vpop.f32.mrb[37].mxu0 }
 0x333   :  { %v7811_v24 = vpop.f32.mrb[42].mxu1  ;;  %v7829_v25 = vpop.f32.mrb[38].mxu0  ;;  %v1166_v33 = vadd.f32 %v9355_v11, %v1165_v21  ;;  %v1273_v34 = vadd.f32 %v9357_v14, %v1272_v23 }
 0x334   :  { %v9366_v26 = vadd.f32 %v7811_v24, %v9355_v11  ;;  %v9369_v27 = vadd.f32 %v7829_v25, %v9357_v14  ;;  %v1168_v29 = vpop.f32.mrb[43].mxu1  ;;  %v1275_v31 = vpop.f32.mrb[39].mxu0 }
 0x335   :  { %v1169_v35 = vadd.f32 %v9355_v11, %v1168_v29  ;;  %v1276_v37 = vadd.f32 %v9357_v14, %v1275_v31  ;;  %v9482_v29 = vshrl.u32 %v1335_v10, 7 }
 0x337   :  { %v1339_v42 = vpack.c.bf16 %v1169_v35, %v1166_v33  ;;  %v1340_v44 = vpack.c.bf16 %v1276_v37, %v1273_v34 }
 0x339   :  { %v1345_v45 = vsel %vm346_vm2, %v1340_v44, 0 }
 0x33a   :  { %7843 = vmatpush3.bf16.xpose.msra.mxu1 %v1345_v45 }
 0x33b   :  { %7854 = vmatprep.subr.bf16.mxu1 %v11046_v36 }
 0x341   :  { %v7814_v46 = vpop.f32.mrb[44].mxu1  ;;  %v7832_v47 = vpop.f32.mrb[40].mxu0  ;;  %7845 = vmatmul.mubr.msk.bf16.vlgmr.msra.gmra.mrb[56].mxu1 %vm346_vm2, %v1339_v42 }
 0x342   :  { %v9383_v49 = vadd.f32 %v7814_v46, %v9355_v11  ;;  %v9386_v53 = vadd.f32 %v7832_v47, %v9357_v14  ;;  %v1181_v55 = vpop.f32.mrb[45].mxu1  ;;  %v1288_v57 = vpop.f32.mrb[41].mxu0  ;;  %7855 = vmatpush3.bf16.msra.mxu1 %v9209_v13  ;;  %7856 = vmatprep.mubr.msk.bf16.mxu1 %vm8979_vm1, %v11046_v36 }
 0x343   :  { %v9392_v59 = vadd.f32 %v9355_v11, %v1181_v55  ;;  %v9395_v61 = vadd.f32 %v9357_v14, %v1288_v57  ;;  %v7815_v63 = vpop.f32.mrb[46].mxu1  ;;  %v7833_v0 = vpop.f32.mrb[42].mxu0  ;;  %7866 = vmatprep.subr.bf16.mxu1 %v11046_v36 }
 0x344   :  { %v9399_v2 = vadd.f32 %v7815_v63, %v9355_v11  ;;  %v9402_v8 = vadd.f32 %v7833_v0, %v9357_v14  ;;  %v1184_v15 = vpop.f32.mrb[47].mxu1  ;;  %v1291_v16 = vpop.f32.mrb[43].mxu0 }
 0x345   :  { %v9405_v21 = vadd.f32 %v9355_v11, %v1184_v15  ;;  %v9408_v23 = vadd.f32 %v9357_v14, %v1291_v16 }
 0x351   :  { %v7818_v33 = vpop.f32.mrb[48].mxu1  ;;  %v7836_v34 = vpop.f32.mrb[44].mxu0 }
 0x352   :  { %v9419_v35 = vadd.f32 %v7818_v33, %v9355_v11  ;;  %v9422_v37 = vadd.f32 %v7836_v34, %v9357_v14  ;;  %v1197_v42 = vpop.f32.mrb[49].mxu1  ;;  %v1304_v44 = vpop.f32.mrb[45].mxu0 }
 0x353   :  { %v9425_v45 = vadd.f32 %v9355_v11, %v1197_v42  ;;  %v9428_v46 = vadd.f32 %v9357_v14, %v1304_v44  ;;  %v7819_v47 = vpop.f32.mrb[50].mxu1  ;;  %v7837_v55 = vpop.f32.mrb[46].mxu0 }
 0x354   :  { %v9431_v57 = vadd.f32 %v7819_v47, %v9355_v11  ;;  %v9434_v63 = vadd.f32 %v7837_v55, %v9357_v14  ;;  %v1200_v0 = vpop.f32.mrb[51].mxu1  ;;  %v1307_v15 = vpop.f32.mrb[47].mxu0 }
 0x355   :  { %v9437_v16 = vadd.f32 %v9355_v11, %v1200_v0  ;;  %v9440_v33 = vadd.f32 %v9357_v14, %v1307_v15 }
 0x361   :  { %v7822_v55 = vpop.f32.mrb[52].mxu1  ;;  %v7840_v6 = vpop.f32.mrb[48].mxu0 }
 0x362   :  { %v9451_v0 = vadd.f32 %v7822_v55, %v9355_v11  ;;  %v9454_v15 = vadd.f32 %v7840_v6, %v9357_v14  ;;  %v1213_v56 = vpop.f32.mrb[53].mxu1  ;;  %v1320_v43 = vpop.f32.mrb[49].mxu0 }
 0x363   :  { %v9457_v34 = vadd.f32 %v9355_v11, %v1213_v56  ;;  %v9460_v42 = vadd.f32 %v9357_v14, %v1320_v43  ;;  %v7823_v32 = vpop.f32.mrb[54].mxu1  ;;  %v7841_v44 = vpop.f32.mrb[50].mxu0 }
 0x364   :  { %v9463_v47 = vadd.f32 %v7823_v32, %v9355_v11  ;;  %v9466_v22 = vadd.f32 %v7841_v44, %v9357_v14  ;;  %v1216_v55 = vpop.f32.mrb[55].mxu1  ;;  %v1323_v24 = vpop.f32.mrb[51].mxu0 }
 0x365   :  { %v9469_v6 = vadd.f32 %v9355_v11, %v1216_v55  ;;  %v9472_v25 = vadd.f32 %v9357_v14, %v1323_v24  ;;  %v11048_v11 = vsub.s32 0, %v9482_v29  ;;  %v9488_v14 = vld [vmem:[%s11034_s2] sm:$0x3]  ;;  %s8983_s2 = smov 16  }
 0x367   :  { %v9493_v24 = vrot.slane %v9488_v14, %v11048_v11 }
 0x414   :  { %v1381_v55 = vpop.f32.mrb[56].mxu1 }
 0x415   :  { %v1388_v43 = vmul.f32 0.35355338, %v1381_v55  ;;  %v7846_v56 = vpop.f32.mrb[57].mxu1 }
 0x416   :  { %v1384_v32 = vpop.f32.mrb[58].mxu1 }
 0x417   :  { %v1389_v44 = vmul.f32 0.35355338, %v1384_v32  ;;  %v7847_v31 = vpop.f32.mrb[59].mxu1  ;;  %v1390_v10 = vadd.f32 %v1388_v43, %v9493_v24 }
 0x419   :  { %v1392_v62 = vsel %vm1106_vm3, %v1390_v10, -inf  ;;  %v1391_v38 = vadd.f32 %v1389_v44, %v9493_v24 }
 0x41a   :  { %1393 = vmax.xlane.f32.xlu0 %v1392_v62 }
 0x41b   :  { %v1395_v40 = vsel %vm1106_vm3, %v1391_v38, -inf }
 0x41c   :  { %1396 = vmax.xlane.f32.xlu1 %v1395_v40 }
 0x4a7   :  { %v1394_v51 = vpop.xlane.xlu0 %1393 }
 0x4a8   :  { %v1398_v36 = vsub.f32 %v1390_v10, %v1394_v51 }
 0x4a9   :  { %v1397_v11 = vpop.xlane.xlu1 %1396 }
 0x4aa   :  { %v1400_v9 = vmul.f32 1.442695, %v1398_v36  ;;  %v1399_v4 = vsub.f32 %v1391_v38, %v1397_v11  ;;  %v11082_v11 = vpack.c.bf16 %v9291_v50, %v9289_v48 }
 0x4ac   :  { %8564 = vpow2.f32 %v1400_v9  ;;  %v1402_v56 = vmul.f32 1.442695, %v1399_v4  ;;  %v11081_v9 = vmov 0.0  }
 0x4ae   :  { %8566 = vpow2.f32 %v1402_v56  ;;  %v11083_v56 = vpack.c.bf16 %v9369_v27, %v9363_v19 }
 0x4b6   :  { %v8565_v32 = vpop.eup %8564 }
 0x4b7   :  { %v1404_v31 = vsel %vm1106_vm3, %v8565_v32, 0.0 }
 0x4b8   :  { %v8567_v43 = vpop.eup %8566  ;;  %1405 = vadd.xlane.f32.xlu0 %v1404_v31  ;;  %v1541_v31 = vsel %vm346_vm2, %v11083_v56, 0 }
 0x4b9   :  { %v1407_v55 = vsel %vm1106_vm3, %v8567_v43, 0.0 }
 0x4bc   :  { %1408 = vadd.xlane.f32.xlu0 %v1407_v55 }
 0x545   :  { %v1406_v62 = vpop.xlane.xlu0 %1405 }
 0x546   :  { %8568 = vrcp.f32 %v1406_v62 }
 0x549   :  { %v1409_v44 = vpop.xlane.xlu0 %1408 }
 0x54a   :  { %8570 = vrcp.f32 %v1409_v44 }
 0x550   :  { %v8569_v40 = vpop.eup %8568 }
 0x551   :  { %v1412_v10 = vmul.f32 %v8569_v40, %v8565_v32  ;;  %v11084_v32 = vpack.c.bf16 %v9366_v26, %v9360_v17 }
 0x554   :  { %v8571_v51 = vpop.eup %8570 }
 0x555   :  { %v1413_v36 = vmul.f32 %v8571_v51, %v8567_v43 }
 0x557   :  { %v1415_v38 = vpack.c.bf16 %v1413_v36, %v1412_v10 }
 0x559   :  { %v1420_v4 = vsel %vm1106_vm3, %v1415_v38, 0 }
 0x55a   :  { %7849 = vmatpush3.bf16.xpose.msra.mxu0 %v1420_v4 }
 0x55b   :  { %7860 = vmatprep.subr.bf16.mxu0 %v11081_v9 }
 0x561   :  { %7851 = vmatmul.mubr.msk.bf16.vlgmr.msra.gmra.mrb[52].mxu0 %vm1106_vm3, %v11082_v11 }
 0x562   :  { %7861 = vmatpush3.bf16.xpose.msra.mxu0 %v1541_v31  ;;  %7862 = vmatprep.mubr.msk.bf16.mxu0 %vm8979_vm1, %v11081_v9 }
 0x563   :  { %7872 = vmatprep.subr.bf16.mxu0 %v11081_v9 }
 0x569   :  { %7863 = vmatmul.mubr.msk.bf16.vlgmr.msra.gmra.mrb[56].mxu0 %vm346_vm2, %v11084_v32 }
 0x56a   :  { %7874 = vmatprep.mubr.msk.bf16.mxu0 %vm8979_vm1, %v11081_v9 }
 0x634   :  { %v1456_v43 = vpop.f32.mrb[52].mxu0 }
 0x635   :  { %v1463_v55 = vadd.f32 %v1456_v43, %v9289_v48  ;;  %v7852_v19 = vpop.f32.mrb[53].mxu0 }
 0x636   :  { %v1459_v27 = vpop.f32.mrb[54].mxu0 }
 0x637   :  { %v1464_v62 = vadd.f32 %v1459_v27, %v9291_v50  ;;  %v7853_v44 = vpop.f32.mrb[55].mxu0  ;;  %v1465_v40 = vadd.f32 %v1463_v55, %v9493_v24 }
 0x639   :  { %v1467_v51 = vsel %vm1106_vm3, %v1465_v40, -inf  ;;  %v1466_v10 = vadd.f32 %v1464_v62, %v9493_v24 }
 0x63a   :  { %1468 = vmax.xlane.f32.xlu1 %v1467_v51 }
 0x63b   :  { %v1470_v17 = vsel %vm1106_vm3, %v1466_v10, -inf }
 0x63c   :  { %1471 = vmax.xlane.f32.xlu0 %v1470_v17  ;;  %v1577_v26 = vpop.f32.mrb[56].mxu0 }
 0x63d   :  { %v1584_v36 = vmul.f32 0.35355338, %v1577_v26  ;;  %v7864_v38 = vpop.f32.mrb[57].mxu0 }
 0x63e   :  { %v1580_v4 = vpop.f32.mrb[58].mxu0 }
 0x63f   :  { %v1585_v48 = vmul.f32 0.35355338, %v1580_v4  ;;  %v7865_v11 = vpop.f32.mrb[59].mxu0  ;;  %v1586_v56 = vadd.f32 %v1584_v36, %v9493_v24 }
 0x641   :  { %v1588_v50 = vsel %vm1106_vm3, %v1586_v56, -inf  ;;  %v1587_v31 = vadd.f32 %v1585_v48, %v9493_v24 }
 0x642   :  { %1589 = vmax.xlane.f32.xlu1 %v1588_v50 }
 0x643   :  { %v1591_v32 = vsel %vm1106_vm3, %v1587_v31, -inf }
 0x644   :  { %1592 = vmax.xlane.f32.xlu0 %v1591_v32 }
 0x6c7   :  { %v1469_v43 = vpop.xlane.xlu1 %1468 }
 0x6c8   :  { %v1473_v55 = vsub.f32 %v1465_v40, %v1469_v43 }
 0x6c9   :  { %v1472_v19 = vpop.xlane.xlu0 %1471 }
 0x6ca   :  { %v1475_v27 = vmul.f32 1.442695, %v1473_v55  ;;  %v1474_v62 = vsub.f32 %v1466_v10, %v1472_v19 }
 0x6cc   :  { %8572 = vpow2.f32 %v1475_v27  ;;  %v1477_v44 = vmul.f32 1.442695, %v1474_v62 }
 0x6ce   :  { %8574 = vpow2.f32 %v1477_v44 }
 0x6cf   :  { %v1590_v51 = vpop.xlane.xlu1 %1589 }
 0x6d0   :  { %v1594_v17 = vsub.f32 %v1586_v56, %v1590_v51 }
 0x6d1   :  { %v1593_v26 = vpop.xlane.xlu0 %1592 }
 0x6d2   :  { %v1596_v36 = vmul.f32 1.442695, %v1594_v17  ;;  %v1595_v38 = vsub.f32 %v1587_v31, %v1593_v26 }
 0x6d4   :  { %8576 = vpow2.f32 %v1596_v36  ;;  %v1598_v4 = vmul.f32 1.442695, %v1595_v38 }
 0x6d6   :  { %v8573_v48 = vpop.eup %8572  ;;  %8578 = vpow2.f32 %v1598_v4 }
 0x6d7   :  { %v1479_v11 = vsel %vm1106_vm3, %v8573_v48, 0.0 }
 0x6d8   :  { %v8575_v50 = vpop.eup %8574  ;;  %1480 = vadd.xlane.f32.xlu1 %v1479_v11 }
 0x6d9   :  { %v1482_v40 = vsel %vm1106_vm3, %v8575_v50, 0.0 }
 0x6da   :  { %1483 = vadd.xlane.f32.xlu0 %v1482_v40 }
 0x6de   :  { %v8577_v10 = vpop.eup %8576 }
 0x6df   :  { %v1600_v32 = vsel %vm1106_vm3, %v8577_v10, 0.0 }
 0x6e0   :  { %v8579_v43 = vpop.eup %8578  ;;  %1601 = vadd.xlane.f32.xlu1 %v1600_v32 }
 0x6e1   :  { %v1603_v56 = vsel %vm1106_vm3, %v8579_v43, 0.0 }
 0x6e2   :  { %1604 = vadd.xlane.f32.xlu0 %v1603_v56 }
 0x765   :  { %v1481_v31 = vpop.xlane.xlu1 %1480 }
 0x766   :  { %8580 = vrcp.f32 %v1481_v31 }
 0x767   :  { %v1484_v55 = vpop.xlane.xlu0 %1483 }
 0x768   :  { %8582 = vrcp.f32 %v1484_v55 }
 0x76d   :  { %v1602_v19 = vpop.xlane.xlu1 %1601 }
 0x76e   :  { %8584 = vrcp.f32 %v1602_v19 }
 0x76f   :  { %v1605_v27 = vpop.xlane.xlu0 %1604 }
 0x770   :  { %v8581_v62 = vpop.eup %8580  ;;  %8586 = vrcp.f32 %v1605_v27 }
 0x771   :  { %v1487_v51 = vmul.f32 %v8581_v62, %v8573_v48  ;;  %v11085_v48 = vpack.c.bf16 %v9299_v60, %v9297_v58 }
 0x772   :  { %v8583_v44 = vpop.eup %8582 }
 0x773   :  { %v1488_v17 = vmul.f32 %v8583_v44, %v8575_v50  ;;  %v11086_v50 = vpack.c.bf16 %v9408_v23, %v9395_v61 }
 0x775   :  { %v1489_v26 = vpack.c.bf16 %v1488_v17, %v1487_v51  ;;  %v1740_v56 = vsel %vm346_vm2, %v11086_v50, 0 }
 0x777   :  { %7857 = vmatmul.mubr.msk.bf16.vlgmr.msra.gmra.mrb[60].mxu1 %vm1106_vm3, %v1489_v26 }
 0x778   :  { %v8585_v36 = vpop.eup %8584  ;;  %7868 = vmatprep.mubr.msk.bf16.mxu1 %vm8979_vm1, %v11081_v9 }
 0x779   :  { %v1608_v4 = vmul.f32 %v8585_v36, %v8577_v10  ;;  %v11087_v10 = vpack.c.bf16 %v9405_v21, %v9392_v59 }
 0x77a   :  { %v8587_v38 = vpop.eup %8586 }
 0x77b   :  { %v1609_v11 = vmul.f32 %v8587_v38, %v8579_v43 }
 0x77d   :  { %v1611_v40 = vpack.c.bf16 %v1609_v11, %v1608_v4 }
 0x77f   :  { %v1616_v32 = vsel %vm1106_vm3, %v1611_v40, 0 }
 0x780   :  { %7867 = vmatpush3.bf16.xpose.msra.mxu1 %v1616_v32 }
 0x781   :  { %7878 = vmatprep.subr.bf16.mxu1 %v11081_v9 }
 0x787   :  { %7869 = vmatmul.mubr.msk.bf16.vlgmr.msra.gmra.mrb[64].mxu1 %vm1106_vm3, %v11085_v48 }
 0x788   :  { %7879 = vmatpush3.bf16.xpose.msra.mxu1 %v1740_v56  ;;  %7880 = vmatprep.mubr.msk.bf16.mxu1 %vm8979_vm1, %v11081_v9 }
 0x789   :  { %7890 = vmatprep.subr.bf16.mxu1 %v11081_v9 }
 0x78f   :  { %7881 = vmatmul.mubr.msk.bf16.vlgmr.msra.gmra.mrb[68].mxu1 %vm346_vm2, %v11087_v10 }
 0x790   :  { %7892 = vmatprep.mubr.msk.bf16.mxu1 %vm8979_vm1, %v11081_v9 }
 0x84a   :  { %v9556_v43 = vpop.f32.mrb[60].mxu1 }
 0x84b   :  { %v7858_v31 = vpop.f32.mrb[61].mxu1 }
 0x84c   :  { %v9558_v61 = vpop.f32.mrb[62].mxu1 }
 0x84d   :  { %v7859_v23 = vpop.f32.mrb[63].mxu1 }
 0x85a   :  { %v1652_v55 = vpop.f32.mrb[64].mxu1 }
 0x85b   :  { %v1659_v19 = vadd.f32 %v1652_v55, %v9297_v58  ;;  %v7870_v27 = vpop.f32.mrb[65].mxu1 }
 0x85c   :  { %v1655_v62 = vpop.f32.mrb[66].mxu1 }
 0x85d   :  { %v1660_v44 = vadd.f32 %v1655_v62, %v9299_v60  ;;  %v7871_v51 = vpop.f32.mrb[67].mxu1  ;;  %v1661_v59 = vadd.f32 %v1659_v19, %v9493_v24 }
 0x85f   :  { %v1663_v21 = vsel %vm1106_vm3, %v1661_v59, -inf  ;;  %v1662_v17 = vadd.f32 %v1660_v44, %v9493_v24 }
 0x860   :  { %1664 = vmax.xlane.f32.xlu1 %v1663_v21 }
 0x861   :  { %v1666_v26 = vsel %vm1106_vm3, %v1662_v17, -inf }
 0x862   :  { %1667 = vmax.xlane.f32.xlu0 %v1666_v26  ;;  %v1776_v36 = vpop.f32.mrb[68].mxu1 }
 0x863   :  { %v1783_v38 = vmul.f32 0.35355338, %v1776_v36  ;;  %v7882_v4 = vpop.f32.mrb[69].mxu1 }
 0x864   :  { %v1779_v11 = vpop.f32.mrb[70].mxu1 }
 0x865   :  { %v1784_v58 = vmul.f32 0.35355338, %v1779_v11  ;;  %v7883_v40 = vpop.f32.mrb[71].mxu1  ;;  %v1785_v32 = vadd.f32 %v1783_v38, %v9493_v24 }
 0x867   :  { %v1787_v60 = vsel %vm1106_vm3, %v1785_v32, -inf  ;;  %v1786_v48 = vadd.f32 %v1784_v58, %v9493_v24 }
 0x868   :  { %1788 = vmax.xlane.f32.xlu1 %v1787_v60 }
 0x869   :  { %v1790_v50 = vsel %vm1106_vm3, %v1786_v48, -inf }
 0x86a   :  { %1791 = vmax.xlane.f32.xlu0 %v1790_v50 }
 0x8ed   :  { %v1665_v56 = vpop.xlane.xlu1 %1664 }
 0x8ee   :  { %v1669_v10 = vsub.f32 %v1661_v59, %v1665_v56 }
 0x8ef   :  { %v1668_v31 = vpop.xlane.xlu0 %1667 }
 0x8f0   :  { %v1671_v23 = vmul.f32 1.442695, %v1669_v10  ;;  %v1670_v55 = vsub.f32 %v1662_v17, %v1668_v31 }
 0x8f2   :  { %8588 = vpow2.f32 %v1671_v23  ;;  %v1673_v19 = vmul.f32 1.442695, %v1670_v55 }
 0x8f4   :  { %8590 = vpow2.f32 %v1673_v19 }
 0x8f5   :  { %v1789_v27 = vpop.xlane.xlu1 %1788 }
 0x8f6   :  { %v1793_v62 = vsub.f32 %v1785_v32, %v1789_v27 }
 0x8f7   :  { %v1792_v44 = vpop.xlane.xlu0 %1791 }
 0x8f8   :  { %v1795_v51 = vmul.f32 1.442695, %v1793_v62  ;;  %v1794_v21 = vsub.f32 %v1786_v48, %v1792_v44 }
 0x8fa   :  { %8592 = vpow2.f32 %v1795_v51  ;;  %v1797_v26 = vmul.f32 1.442695, %v1794_v21 }
 0x8fc   :  { %v8589_v36 = vpop.eup %8588  ;;  %8594 = vpow2.f32 %v1797_v26 }
 0x8fd   :  { %v1675_v38 = vsel %vm1106_vm3, %v8589_v36, 0.0 }
 0x8fe   :  { %v8591_v4 = vpop.eup %8590  ;;  %1676 = vadd.xlane.f32.xlu1 %v1675_v38  ;;  %v11089_v38 = vpack.c.bf16 %v9402_v8, %v9386_v53 }
 0x8ff   :  { %v1678_v59 = vsel %vm1106_vm3, %v8591_v4, 0.0 }
 0x900   :  { %1679 = vadd.xlane.f32.xlu0 %v1678_v59  ;;  %v11090_v59 = vpack.c.bf16 %v9399_v2, %v9383_v49 }
 0x904   :  { %v8593_v17 = vpop.eup %8592 }
 0x905   :  { %v1799_v11 = vsel %vm1106_vm3, %v8593_v17, 0.0 }
 0x906   :  { %v8595_v58 = vpop.eup %8594  ;;  %1800 = vadd.xlane.f32.xlu1 %v1799_v11 }
 0x907   :  { %v1802_v40 = vsel %vm1106_vm3, %v8595_v58, 0.0 }
 0x908   :  { %1803 = vadd.xlane.f32.xlu0 %v1802_v40 }
 0x917   :  { %1687 = vrot.lane.b32.xlu1 %v9209_v13, %s8981_s23 }
 0x98b   :  { %v1677_v32 = vpop.xlane.xlu1 %1676 }
 0x98c   :  { %8596 = vrcp.f32 %v1677_v32 }
 0x98d   :  { %v1680_v60 = vpop.xlane.xlu0 %1679 }
 0x98e   :  { %8598 = vrcp.f32 %v1680_v60 }
 0x993   :  { %v1801_v48 = vpop.xlane.xlu1 %1800 }
 0x994   :  { %8600 = vrcp.f32 %v1801_v48 }
 0x995   :  { %v1804_v50 = vpop.xlane.xlu0 %1803 }
 0x996   :  { %v8597_v56 = vpop.eup %8596  ;;  %8602 = vrcp.f32 %v1804_v50 }
 0x997   :  { %v1688_v10 = vpop.permute.xlu1 %1687  ;;  %v1683_v23 = vmul.f32 %v8597_v56, %v8589_v36  ;;  %v11088_v36 = vpack.c.bf16 %v9307_v7, %v9305_v5 }
 0x998   :  { %v8599_v31 = vpop.eup %8598  ;;  %7873 = vmatpush3.bf16.msra.mxu0 %v1688_v10 }
 0x999   :  { %v1684_v55 = vmul.f32 %v8599_v31, %v8591_v4  ;;  %7884 = vmatprep.subr.bf16.mxu0 %v11081_v9  ;;  %v1938_v4 = vsel %vm346_vm2, %v11089_v38, 0 }
 0x99b   :  { %v1685_v19 = vpack.c.bf16 %v1684_v55, %v1683_v23 }
 0x99d   :  { %7875 = vmatmul.mubr.msk.bf16.vlgmr.msra.gmra.mrb[60].mxu0 %vm1106_vm3, %v1685_v19 }
 0x99e   :  { %v8601_v27 = vpop.eup %8600  ;;  %7886 = vmatprep.mubr.msk.bf16.mxu0 %vm8979_vm1, %v11081_v9 }
 0x99f   :  { %v1807_v44 = vmul.f32 %v8601_v27, %v8593_v17 }
 0x9a0   :  { %v8603_v62 = vpop.eup %8602 }
 0x9a1   :  { %v1808_v51 = vmul.f32 %v8603_v62, %v8595_v58 }
 0x9a3   :  { %v1810_v21 = vpack.c.bf16 %v1808_v51, %v1807_v44 }
 0x9a5   :  { %v1815_v26 = vsel %vm1106_vm3, %v1810_v21, 0 }
 0x9a6   :  { %7885 = vmatpush3.bf16.xpose.msra.mxu0 %v1815_v26 }
 0x9a7   :  { %7896 = vmatprep.subr.bf16.mxu0 %v11081_v9 }
 0x9ad   :  { %7887 = vmatmul.mubr.msk.bf16.vlgmr.msra.gmra.mrb[64].mxu0 %vm1106_vm3, %v11088_v36 }
 0x9ae   :  { %7897 = vmatpush3.bf16.xpose.msra.mxu0 %v1938_v4  ;;  %7898 = vmatprep.mubr.msk.bf16.mxu0 %vm8979_vm1, %v11081_v9 }
 0x9af   :  { %7908 = vmatprep.subr.bf16.mxu0 %v11081_v9 }
 0x9b5   :  { %7899 = vmatmul.mubr.msk.bf16.vlgmr.msra.gmra.mrb[68].mxu0 %vm346_vm2, %v11090_v59 }
 0x9b6   :  { %7910 = vmatprep.mubr.msk.bf16.mxu0 %vm8979_vm1, %v11081_v9 }
 0xa70   :  { %v9599_v17 = vpop.f32.mrb[60].mxu0 }
 0xa71   :  { %v7876_v11 = vpop.f32.mrb[61].mxu0 }
 0xa72   :  { %v9601_v53 = vpop.f32.mrb[62].mxu0 }
 0xa73   :  { %v8478_v8 = vpack.i.bf16 %v9601_v53, %v9599_v17  ;;  %v7877_v58 = vpop.f32.mrb[63].mxu0 }
 0xa80   :  { %v1851_v40 = vpop.f32.mrb[64].mxu0 }
 0xa81   :  { %v1858_v32 = vadd.f32 %v1851_v40, %v9305_v5  ;;  %v7888_v60 = vpop.f32.mrb[65].mxu0 }
 0xa82   :  { %v1854_v48 = vpop.f32.mrb[66].mxu0 }
 0xa83   :  { %v1859_v49 = vadd.f32 %v1854_v48, %v9307_v7  ;;  %v7889_v2 = vpop.f32.mrb[67].mxu0  ;;  %v1860_v50 = vadd.f32 %v1858_v32, %v9493_v24 }
 0xa85   :  { %v1862_v56 = vsel %vm1106_vm3, %v1860_v50, -inf  ;;  %v1861_v10 = vadd.f32 %v1859_v49, %v9493_v24 }
 0xa86   :  { %1863 = vmax.xlane.f32.xlu0 %v1862_v56 }
 0xa87   :  { %v1865_v19 = vsel %vm1106_vm3, %v1861_v10, -inf }
 0xa88   :  { %v1974_v31 = vpop.f32.mrb[68].mxu0 }
 0xa89   :  { %v1981_v23 = vmul.f32 0.35355338, %v1974_v31  ;;  %v7900_v55 = vpop.f32.mrb[69].mxu0 }
 0xa8a   :  { %1866 = vmax.xlane.f32.xlu0 %v1865_v19  ;;  %v1977_v27 = vpop.f32.mrb[70].mxu0 }
 0xa8b   :  { %v1982_v5 = vmul.f32 0.35355338, %v1977_v27  ;;  %v7901_v62 = vpop.f32.mrb[71].mxu0  ;;  %v1983_v44 = vadd.f32 %v1981_v23, %v9493_v24 }
 0xa8d   :  { %v1985_v7 = vsel %vm1106_vm3, %v1983_v44, -inf  ;;  %v1984_v51 = vadd.f32 %v1982_v5, %v9493_v24 }
 0xa8e   :  { %1986 = vmax.xlane.f32.xlu0 %v1985_v7 }
 0xa8f   :  { %v1988_v21 = vsel %vm1106_vm3, %v1984_v51, -inf }
 0xa92   :  { %1989 = vmax.xlane.f32.xlu0 %v1988_v21 }
 0xb13   :  { %v1864_v26 = vpop.xlane.xlu0 %1863 }
 0xb14   :  { %v1868_v36 = vsub.f32 %v1860_v50, %v1864_v26 }
 0xb16   :  { %v1870_v38 = vmul.f32 1.442695, %v1868_v36 }
 0xb17   :  { %v1867_v4 = vpop.xlane.xlu0 %1866 }
 0xb18   :  { %8604 = vpow2.f32 %v1870_v38  ;;  %v1869_v59 = vsub.f32 %v1861_v10, %v1867_v4 }
 0xb1a   :  { %v1872_v11 = vmul.f32 1.442695, %v1869_v59 }
 0xb1b   :  { %v1987_v58 = vpop.xlane.xlu0 %1986 }
 0xb1c   :  { %8606 = vpow2.f32 %v1872_v11  ;;  %v1991_v40 = vsub.f32 %v1983_v44, %v1987_v58 }
 0xb1e   :  { %v1993_v32 = vmul.f32 1.442695, %v1991_v40 }
 0xb1f   :  { %v1990_v60 = vpop.xlane.xlu0 %1989 }
 0xb20   :  { %8608 = vpow2.f32 %v1993_v32  ;;  %v1992_v48 = vsub.f32 %v1984_v51, %v1990_v60  ;;  %v11091_v60 = vpack.c.bf16 %v9315_v20, %v9313_v18 }
 0xb22   :  { %v8605_v49 = vpop.eup %8604  ;;  %v1995_v2 = vmul.f32 1.442695, %v1992_v48  ;;  %v11092_v48 = vpack.c.bf16 %v9440_v33, %v9428_v46 }
 0xb23   :  { %v1874_v56 = vsel %vm1106_vm3, %v8605_v49, 0.0 }
 0xb24   :  { %8610 = vpow2.f32 %v1995_v2  ;;  %1875 = vadd.xlane.f32.xlu1 %v1874_v56  ;;  %v11093_v2 = vpack.c.bf16 %v9437_v16, %v9425_v45 }
 0xb26   :  { %v8607_v31 = vpop.eup %8606 }
 0xb27   :  { %v1877_v50 = vsel %vm1106_vm3, %v8607_v31, 0.0 }
 0xb28   :  { %1878 = vadd.xlane.f32.xlu0 %v1877_v50 }
 0xb2a   :  { %v8609_v23 = vpop.eup %8608 }
 0xb2b   :  { %v1997_v10 = vsel %vm1106_vm3, %v8609_v23, 0.0 }
 0xb2c   :  { %1998 = vadd.xlane.f32.xlu0 %v1997_v10 }
 0xb2e   :  { %v8611_v55 = vpop.eup %8610 }
 0xb2f   :  { %v2000_v19 = vsel %vm1106_vm3, %v8611_v55, 0.0 }
 0xb30   :  { %2001 = vadd.xlane.f32.xlu0 %v2000_v19 }
 0xb46   :  { %1885 = vrot.lane.b32.xlu0 %v9209_v13, %s8980_s28 }
 0xbb1   :  { %v1876_v27 = vpop.xlane.xlu1 %1875 }
 0xbb2   :  { %8612 = vrcp.f32 %v1876_v27 }
 0xbb5   :  { %v1879_v5 = vpop.xlane.xlu0 %1878 }
 0xbb6   :  { %8614 = vrcp.f32 %v1879_v5  ;;  %v11051_v5 = vsub.s32 1, %v9482_v29 }
 0xbb9   :  { %v1999_v62 = vpop.xlane.xlu0 %1998 }
 0xbba   :  { %8616 = vrcp.f32 %v1999_v62 }
 0xbbc   :  { %v8613_v7 = vpop.eup %8612 }
 0xbbd   :  { %v2002_v44 = vpop.xlane.xlu0 %2001  ;;  %v1882_v21 = vmul.f32 %v8613_v7, %v8605_v49  ;;  %v2171_v49 = vsel %vm346_vm2, %v11092_v48, 0 }
 0xbbe   :  { %8618 = vrcp.f32 %v2002_v44 }
 0xbc0   :  { %v8615_v51 = vpop.eup %8614 }
 0xbc1   :  { %v1883_v26 = vmul.f32 %v8615_v51, %v8607_v31  ;;  %v1886_v36 = vpop.permute.xlu0 %1885 }
 0xbc2   :  { %7891 = vmatpush3.bf16.msra.mxu1 %v1886_v36 }
 0xbc3   :  { %v1884_v38 = vpack.c.bf16 %v1883_v26, %v1882_v21  ;;  %7902 = vmatprep.subr.bf16.mxu1 %v11081_v9 }
 0xbc4   :  { %v8617_v4 = vpop.eup %8616 }
 0xbc5   :  { %7893 = vmatmul.mubr.msk.bf16.vlgmr.msra.gmra.mrb[72].mxu1 %vm1106_vm3, %v1884_v38  ;;  %v2005_v11 = vmul.f32 %v8617_v4, %v8609_v23 }
 0xbc6   :  { %7904 = vmatprep.mubr.msk.bf16.mxu1 %vm8979_vm1, %v11081_v9 }
 0xbc8   :  { %v8619_v59 = vpop.eup %8618 }
 0xbc9   :  { %v2006_v58 = vmul.f32 %v8619_v59, %v8611_v55 }
 0xbcb   :  { %v2008_v40 = vpack.c.bf16 %v2006_v58, %v2005_v11 }
 0xbcd   :  { %v2013_v32 = vsel %vm1106_vm3, %v2008_v40, 0 }
 0xbce   :  { %7903 = vmatpush3.bf16.xpose.msra.mxu1 %v2013_v32 }
 0xbcf   :  { %7914 = vmatprep.subr.bf16.mxu1 %v11081_v9 }
 0xbd5   :  { %7905 = vmatmul.mubr.msk.bf16.vlgmr.msra.gmra.mrb[76].mxu1 %vm1106_vm3, %v11091_v60 }
 0xbd6   :  { %7915 = vmatpush3.bf16.xpose.msra.mxu1 %v2171_v49  ;;  %7916 = vmatprep.mubr.msk.bf16.mxu1 %vm8979_vm1, %v11081_v9 }
 0xbd7   :  { %7926 = vmatprep.subr.bf16.mxu1 %v11081_v9 }
 0xbdd   :  { %7917 = vmatmul.mubr.msk.bf16.vlgmr.msra.gmra.mrb[80].mxu1 %vm346_vm2, %v11093_v2 }
 0xbde   :  { %7927 = vmatpush3.bf16.msra.mxu1 %v9207_v12  ;;  %7928 = vmatprep.mubr.msk.bf16.mxu1 %vm8979_vm1, %v11081_v9 }
 0xbdf   :  { %7938 = vmatprep.subr.bf16.mxu1 %v11081_v9 }
 0xc98   :  { %v9646_v46 = vpop.f32.mrb[72].mxu1 }
 0xc99   :  { %v7894_v33 = vpop.f32.mrb[73].mxu1 }
 0xc9a   :  { %v9648_v56 = vpop.f32.mrb[74].mxu1 }
 0xc9b   :  { %v8483_v31 = vpack.i.bf16 %v9648_v56, %v9646_v46  ;;  %v7895_v50 = vpop.f32.mrb[75].mxu1 }
 0xca8   :  { %v2049_v23 = vpop.f32.mrb[76].mxu1 }
 0xca9   :  { %v2056_v45 = vadd.f32 %v2049_v23, %v9313_v18  ;;  %v7906_v16 = vpop.f32.mrb[77].mxu1  ;;  %v9662_v18 = vrot.slane %v9488_v14, %v11051_v5 }
 0xcaa   :  { %v2052_v10 = vpop.f32.mrb[78].mxu1 }
 0xcab   :  { %v2057_v55 = vadd.f32 %v2052_v10, %v9315_v20  ;;  %v7907_v19 = vpop.f32.mrb[79].mxu1  ;;  %v2058_v27 = vadd.f32 %v2056_v45, %v9493_v24 }
 0xcad   :  { %v2060_v62 = vsel %vm1106_vm3, %v2058_v27, -inf  ;;  %v2059_v44 = vadd.f32 %v2057_v55, %v9493_v24 }
 0xcae   :  { %2061 = vmax.xlane.f32.xlu0 %v2060_v62 }
 0xcaf   :  { %v2063_v7 = vsel %vm1106_vm3, %v2059_v44, -inf }
 0xcb0   :  { %2064 = vmax.xlane.f32.xlu1 %v2063_v7  ;;  %v2207_v51 = vpop.f32.mrb[80].mxu1 }
 0xcb1   :  { %v2214_v20 = vmul.f32 0.35355338, %v2207_v51  ;;  %v7918_v21 = vpop.f32.mrb[81].mxu1 }
 0xcb2   :  { %v2210_v26 = vpop.f32.mrb[82].mxu1 }
 0xcb3   :  { %v2215_v36 = vmul.f32 0.35355338, %v2210_v26  ;;  %v7919_v38 = vpop.f32.mrb[83].mxu1  ;;  %v2216_v4 = vadd.f32 %v2214_v20, %v9662_v18 }
 0xcb5   :  { %v2218_v59 = vsel %vm1106_vm3, %v2216_v4, -inf  ;;  %v2217_v24 = vadd.f32 %v2215_v36, %v9662_v18 }
 0xcb6   :  { %2219 = vmax.xlane.f32.xlu1 %v2218_v59 }
 0xcb7   :  { %v2221_v11 = vsel %vm1106_vm3, %v2217_v24, -inf }
 0xcba   :  { %2222 = vmax.xlane.f32.xlu1 %v2221_v11 }
 0xd3b   :  { %v2062_v58 = vpop.xlane.xlu0 %2061 }
 0xd3c   :  { %v2066_v14 = vsub.f32 %v2058_v27, %v2062_v58 }
 0xd3d   :  { %v2065_v40 = vpop.xlane.xlu1 %2064 }
 0xd3e   :  { %v2068_v32 = vmul.f32 1.442695, %v2066_v14  ;;  %v2067_v60 = vsub.f32 %v2059_v44, %v2065_v40 }
 0xd40   :  { %8620 = vpow2.f32 %v2068_v32  ;;  %v2070_v48 = vmul.f32 1.442695, %v2067_v60 }
 0xd42   :  { %8622 = vpow2.f32 %v2070_v48  ;;  %v11094_v48 = vpack.c.bf16 %v9323_v30, %v9321_v28 }
 0xd43   :  { %v2220_v49 = vpop.xlane.xlu1 %2219 }
 0xd44   :  { %v2224_v2 = vsub.f32 %v2216_v4, %v2220_v49  ;;  %v11095_v49 = vpack.c.bf16 %v9434_v63, %v9422_v37 }
 0xd46   :  { %v2226_v33 = vmul.f32 1.442695, %v2224_v2  ;;  %v2367_v2 = vsel %vm346_vm2, %v11095_v49, 0 }
 0xd47   :  { %v2223_v50 = vpop.xlane.xlu1 %2222 }
 0xd48   :  { %8624 = vpow2.f32 %v2226_v33  ;;  %v2225_v23 = vsub.f32 %v2217_v24, %v2223_v50  ;;  %v11096_v33 = vpack.c.bf16 %v9431_v57, %v9419_v35 }
 0xd4a   :  { %v8621_v45 = vpop.eup %8620  ;;  %v2228_v16 = vmul.f32 1.442695, %v2225_v23 }
 0xd4b   :  { %v2072_v10 = vsel %vm1106_vm3, %v8621_v45, 0.0 }
 0xd4c   :  { %v8623_v55 = vpop.eup %8622  ;;  %8626 = vpow2.f32 %v2228_v16  ;;  %2073 = vadd.xlane.f32.xlu1 %v2072_v10 }
 0xd4d   :  { %v2075_v19 = vsel %vm1106_vm3, %v8623_v55, 0.0 }
 0xd50   :  { %2076 = vadd.xlane.f32.xlu1 %v2075_v19 }
 0xd52   :  { %v8625_v27 = vpop.eup %8624 }
 0xd53   :  { %v2230_v62 = vsel %vm1106_vm3, %v8625_v27, 0.0 }
 0xd54   :  { %2231 = vadd.xlane.f32.xlu1 %v2230_v62 }
 0xd56   :  { %v8627_v44 = vpop.eup %8626 }
 0xd57   :  { %v2233_v7 = vsel %vm1106_vm3, %v8627_v44, 0.0 }
 0xd58   :  { %2234 = vadd.xlane.f32.xlu1 %v2233_v7 }
 0xd69   :  { %2083 = vrot.lane.b32.xlu1 %v9209_v13, %s8982_s24 }
 0xdd9   :  { %v2074_v51 = vpop.xlane.xlu1 %2073 }
 0xdda   :  { %8628 = vrcp.f32 %v2074_v51 }
 0xddd   :  { %v2077_v20 = vpop.xlane.xlu1 %2076 }
 0xdde   :  { %8630 = vrcp.f32 %v2077_v20 }
 0xde1   :  { %v2232_v21 = vpop.xlane.xlu1 %2231 }
 0xde2   :  { %8632 = vrcp.f32 %v2232_v21 }
 0xde4   :  { %v8629_v36 = vpop.eup %8628 }
 0xde5   :  { %v2235_v26 = vpop.xlane.xlu1 %2234  ;;  %v2080_v4 = vmul.f32 %v8629_v36, %v8621_v45 }
 0xde6   :  { %8634 = vrcp.f32 %v2235_v26 }
 0xde8   :  { %v8631_v38 = vpop.eup %8630 }
 0xde9   :  { %v2081_v59 = vmul.f32 %v8631_v38, %v8623_v55  ;;  %v2084_v24 = vpop.permute.xlu1 %2083 }
 0xdea   :  { %7909 = vmatpush3.bf16.msra.mxu0 %v2084_v24 }
 0xdeb   :  { %v2082_v11 = vpack.c.bf16 %v2081_v59, %v2080_v4  ;;  %7920 = vmatprep.subr.bf16.mxu0 %v11081_v9 }
 0xdec   :  { %v8633_v13 = vpop.eup %8632 }
 0xded   :  { %7911 = vmatmul.mubr.msk.bf16.vlgmr.msra.gmra.mrb[72].mxu0 %vm1106_vm3, %v2082_v11  ;;  %v2238_v14 = vmul.f32 %v8633_v13, %v8625_v27 }
 0xdee   :  { %7922 = vmatprep.mubr.msk.bf16.mxu0 %vm8979_vm1, %v11081_v9 }
 0xdf0   :  { %v8635_v58 = vpop.eup %8634 }
 0xdf1   :  { %v2239_v40 = vmul.f32 %v8635_v58, %v8627_v44 }
 0xdf3   :  { %v2241_v32 = vpack.c.bf16 %v2239_v40, %v2238_v14 }
 0xdf5   :  { %v2246_v60 = vsel %vm1106_vm3, %v2241_v32, 0 }
 0xdf6   :  { %7921 = vmatpush3.bf16.xpose.msra.mxu0 %v2246_v60 }
 0xdf7   :  { %7932 = vmatprep.subr.bf16.mxu0 %v11081_v9 }
 0xdfd   :  { %7923 = vmatmul.mubr.msk.bf16.vlgmr.msra.gmra.mrb[76].mxu0 %vm1106_vm3, %v11094_v48 }
 0xdfe   :  { %7933 = vmatpush3.bf16.xpose.msra.mxu0 %v2367_v2  ;;  %7934 = vmatprep.mubr.msk.bf16.mxu0 %vm8979_vm1, %v11081_v9 }
 0xdff   :  { %7944 = vmatprep.subr.bf16.mxu0 %v11081_v9 }
 0xe05   :  { %7935 = vmatmul.mubr.msk.bf16.vlgmr.msra.gmra.mrb[80].mxu0 %vm346_vm2, %v11096_v33 }
 0xe06   :  { %7946 = vmatprep.mubr.msk.bf16.mxu0 %vm8979_vm1, %v11081_v9 }
 0xec0   :  { %v9697_v50 = vpop.f32.mrb[72].mxu0 }
 0xec1   :  { %v7912_v23 = vpop.f32.mrb[73].mxu0 }
 0xec2   :  { %v9699_v37 = vpop.f32.mrb[74].mxu0 }
 0xec3   :  { %v8493_v63 = vpack.i.bf16 %v9699_v37, %v9697_v50  ;;  %v7913_v45 = vpop.f32.mrb[75].mxu0 }
 0xed0   :  { %v2282_v16 = vpop.f32.mrb[76].mxu0 }
 0xed1   :  { %v2289_v10 = vadd.f32 %v2282_v16, %v9321_v28  ;;  %v7924_v55 = vpop.f32.mrb[77].mxu0 }
 0xed2   :  { %v2285_v19 = vpop.f32.mrb[78].mxu0 }
 0xed3   :  { %v2290_v35 = vadd.f32 %v2285_v19, %v9323_v30  ;;  %v7925_v57 = vpop.f32.mrb[79].mxu0  ;;  %v2291_v27 = vadd.f32 %v2289_v10, %v9662_v18 }
 0xed5   :  { %v2293_v62 = vsel %vm1106_vm3, %v2291_v27, -inf  ;;  %v2292_v44 = vadd.f32 %v2290_v35, %v9662_v18 }
 0xed6   :  { %2294 = vmax.xlane.f32.xlu0 %v2293_v62 }
 0xed7   :  { %v2296_v21 = vsel %vm1106_vm3, %v2292_v44, -inf }
 0xed8   :  { %v2403_v7 = vpop.f32.mrb[80].mxu0 }
 0xed9   :  { %v2410_v51 = vmul.f32 0.35355338, %v2403_v7  ;;  %v7936_v20 = vpop.f32.mrb[81].mxu0 }
 0xeda   :  { %2297 = vmax.xlane.f32.xlu0 %v2296_v21  ;;  %v2406_v26 = vpop.f32.mrb[82].mxu0 }
 0xedb   :  { %v2411_v28 = vmul.f32 0.35355338, %v2406_v26  ;;  %v7937_v36 = vpop.f32.mrb[83].mxu0  ;;  %v2412_v38 = vadd.f32 %v2410_v51, %v9662_v18 }
 0xedd   :  { %v2414_v30 = vsel %vm1106_vm3, %v2412_v38, -inf  ;;  %v2413_v4 = vadd.f32 %v2411_v28, %v9662_v18 }
 0xede   :  { %2415 = vmax.xlane.f32.xlu0 %v2414_v30 }
 0xedf   :  { %v2417_v59 = vsel %vm1106_vm3, %v2413_v4, -inf }
 0xee2   :  { %2418 = vmax.xlane.f32.xlu0 %v2417_v59 }
 0xf63   :  { %v2295_v24 = vpop.xlane.xlu0 %2294 }
 0xf64   :  { %v2299_v11 = vsub.f32 %v2291_v27, %v2295_v24 }
 0xf66   :  { %v2301_v13 = vmul.f32 1.442695, %v2299_v11  ;;  %v11097_v11 = vpack.c.bf16 %v9331_v41, %v9329_v39 }
 0xf67   :  { %v2298_v58 = vpop.xlane.xlu0 %2297 }
 0xf68   :  { %8636 = vpow2.f32 %v2301_v13  ;;  %v2300_v14 = vsub.f32 %v2292_v44, %v2298_v58  ;;  %v11098_v13 = vpack.c.bf16 %v9472_v25, %v9460_v42 }
 0xf6a   :  { %v2303_v40 = vmul.f32 1.442695, %v2300_v14  ;;  %v2566_v58 = vsel %vm346_vm2, %v11098_v13, 0  ;;  %v11099_v14 = vpack.c.bf16 %v9469_v6, %v9457_v34 }
 0xf6b   :  { %v2416_v32 = vpop.xlane.xlu0 %2415 }
 0xf6c   :  { %8638 = vpow2.f32 %v2303_v40  ;;  %v2420_v60 = vsub.f32 %v2412_v38, %v2416_v32 }
 0xf6e   :  { %v2422_v48 = vmul.f32 1.442695, %v2420_v60 }
 0xf6f   :  { %v2419_v49 = vpop.xlane.xlu0 %2418 }
 0xf70   :  { %8640 = vpow2.f32 %v2422_v48  ;;  %v2421_v2 = vsub.f32 %v2413_v4, %v2419_v49 }
 0xf72   :  { %v8637_v33 = vpop.eup %8636  ;;  %v2424_v23 = vmul.f32 1.442695, %v2421_v2 }
 0xf73   :  { %v2305_v45 = vsel %vm1106_vm3, %v8637_v33, 0.0 }
 0xf74   :  { %8642 = vpow2.f32 %v2424_v23  ;;  %2306 = vadd.xlane.f32.xlu1 %v2305_v45 }
 0xf76   :  { %v8639_v16 = vpop.eup %8638 }
 0xf77   :  { %v2308_v10 = vsel %vm1106_vm3, %v8639_v16, 0.0 }
 0xf78   :  { %2309 = vadd.xlane.f32.xlu0 %v2308_v10 }
 0xf7a   :  { %v8641_v55 = vpop.eup %8640 }
 0xf7b   :  { %v2426_v19 = vsel %vm1106_vm3, %v8641_v55, 0.0 }
 0xf7c   :  { %2427 = vadd.xlane.f32.xlu0 %v2426_v19 }
 0xf7e   :  { %v8643_v35 = vpop.eup %8642 }
 0xf7f   :  { %v2429_v57 = vsel %vm1106_vm3, %v8643_v35, 0.0 }
 0xf80   :  { %2430 = vadd.xlane.f32.xlu0 %v2429_v57 }
0x1001   :  { %v2307_v27 = vpop.xlane.xlu1 %2306 }
0x1002   :  { %8644 = vrcp.f32 %v2307_v27 }
0x1005   :  { %v2310_v62 = vpop.xlane.xlu0 %2309 }
0x1006   :  { %8646 = vrcp.f32 %v2310_v62 }
0x1009   :  { %v2428_v44 = vpop.xlane.xlu0 %2427 }
0x100a   :  { %8648 = vrcp.f32 %v2428_v44 }
0x100c   :  { %v8645_v51 = vpop.eup %8644 }
0x100d   :  { %v2431_v7 = vpop.xlane.xlu0 %2430  ;;  %v2313_v21 = vmul.f32 %v8645_v51, %v8637_v33 }
0x100e   :  { %8650 = vrcp.f32 %v2431_v7 }
0x1010   :  { %v8647_v20 = vpop.eup %8646 }
0x1011   :  { %v2314_v26 = vmul.f32 %v8647_v20, %v8639_v16 }
0x1013   :  { %v2315_v28 = vpack.c.bf16 %v2314_v26, %v2313_v21 }
0x1014   :  { %v8649_v36 = vpop.eup %8648 }
0x1015   :  { %7929 = vmatmul.mubr.msk.bf16.vlgmr.msra.gmra.mrb[84].mxu1 %vm1106_vm3, %v2315_v28  ;;  %v2434_v30 = vmul.f32 %v8649_v36, %v8641_v55 }
0x1016   :  { %7940 = vmatprep.mubr.msk.bf16.mxu1 %vm8979_vm1, %v11081_v9 }
0x1018   :  { %v8651_v38 = vpop.eup %8650 }
0x1019   :  { %v2435_v4 = vmul.f32 %v8651_v38, %v8643_v35 }
0x101b   :  { %v2437_v59 = vpack.c.bf16 %v2435_v4, %v2434_v30 }
0x101d   :  { %v2442_v24 = vsel %vm1106_vm3, %v2437_v59, 0 }
0x101e   :  { %7939 = vmatpush3.bf16.xpose.msra.mxu1 %v2442_v24 }
0x101f   :  { %7950 = vmatprep.subr.bf16.mxu1 %v11081_v9 }
0x1025   :  { %7941 = vmatmul.mubr.msk.bf16.vlgmr.msra.gmra.mrb[88].mxu1 %vm1106_vm3, %v11097_v11 }
0x1026   :  { %7951 = vmatpush3.bf16.xpose.msra.mxu1 %v2566_v58  ;;  %7952 = vmatprep.mubr.msk.bf16.mxu1 %vm8979_vm1, %v11081_v9 }
0x1027   :  { %7962 = vmatprep.subr.bf16.mxu1 %v11081_v9 }
0x102d   :  { %7953 = vmatmul.mubr.msk.bf16.vlgmr.msra.gmra.mrb[92].mxu1 %vm346_vm2, %v11099_v14 }
0x102e   :  { %7964 = vmatprep.mubr.msk.bf16.mxu1 %vm8979_vm1, %v11081_v9 }
0x10e8   :  { %v9739_v40 = vpop.f32.mrb[84].mxu1 }
0x10e9   :  { %v7930_v32 = vpop.f32.mrb[85].mxu1 }
0x10ea   :  { %v9741_v25 = vpop.f32.mrb[86].mxu1 }
0x10eb   :  { %v7931_v42 = vpop.f32.mrb[87].mxu1 }
0x10f8   :  { %v2478_v60 = vpop.f32.mrb[88].mxu1 }
0x10f9   :  { %v2485_v48 = vadd.f32 %v2478_v60, %v9329_v39  ;;  %v7942_v49 = vpop.f32.mrb[89].mxu1 }
0x10fa   :  { %v2481_v2 = vpop.f32.mrb[90].mxu1 }
0x10fb   :  { %v2486_v33 = vadd.f32 %v2481_v2, %v9331_v41  ;;  %v7943_v23 = vpop.f32.mrb[91].mxu1  ;;  %v2487_v34 = vadd.f32 %v2485_v48, %v9662_v18 }
0x10fd   :  { %v2489_v6 = vsel %vm1106_vm3, %v2487_v34, -inf  ;;  %v2488_v45 = vadd.f32 %v2486_v33, %v9662_v18 }
0x10fe   :  { %2490 = vmax.xlane.f32.xlu0 %v2489_v6 }
0x10ff   :  { %v2492_v19 = vsel %vm1106_vm3, %v2488_v45, -inf }
0x1100   :  { %v2602_v16 = vpop.f32.mrb[92].mxu1 }
0x1101   :  { %v2609_v10 = vmul.f32 0.35355338, %v2602_v16  ;;  %v7954_v55 = vpop.f32.mrb[93].mxu1 }
0x1102   :  { %2493 = vmax.xlane.f32.xlu0 %v2492_v19  ;;  %v2605_v35 = vpop.f32.mrb[94].mxu1 }
0x1103   :  { %v2610_v39 = vmul.f32 0.35355338, %v2605_v35  ;;  %v7955_v57 = vpop.f32.mrb[95].mxu1  ;;  %v2611_v27 = vadd.f32 %v2609_v10, %v9662_v18 }
0x1105   :  { %v2613_v41 = vsel %vm1106_vm3, %v2611_v27, -inf  ;;  %v2612_v62 = vadd.f32 %v2610_v39, %v9662_v18 }
0x1106   :  { %2614 = vmax.xlane.f32.xlu0 %v2613_v41 }
0x1107   :  { %v2616_v44 = vsel %vm1106_vm3, %v2612_v62, -inf }
0x110a   :  { %2617 = vmax.xlane.f32.xlu0 %v2616_v44  ;;  %v11101_v44 = vpack.c.bf16 %v9466_v22, %v9454_v15 }
0x118b   :  { %v2491_v7 = vpop.xlane.xlu0 %2490 }
0x118c   :  { %v2495_v51 = vsub.f32 %v2487_v34, %v2491_v7  ;;  %v2764_v7 = vsel %vm346_vm2, %v11101_v44, 0 }
0x118e   :  { %v2497_v20 = vmul.f32 1.442695, %v2495_v51  ;;  %v11102_v51 = vpack.c.bf16 %v9463_v47, %v9451_v0 }
0x118f   :  { %v2494_v21 = vpop.xlane.xlu0 %2493 }
0x1190   :  { %8652 = vpow2.f32 %v2497_v20  ;;  %v2496_v26 = vsub.f32 %v2488_v45, %v2494_v21 }
0x1192   :  { %v2499_v28 = vmul.f32 1.442695, %v2496_v26 }
0x1193   :  { %v2615_v36 = vpop.xlane.xlu0 %2614 }
0x1194   :  { %8654 = vpow2.f32 %v2499_v28  ;;  %v2619_v38 = vsub.f32 %v2611_v27, %v2615_v36 }
0x1196   :  { %v2621_v30 = vmul.f32 1.442695, %v2619_v38 }
0x1197   :  { %v2618_v4 = vpop.xlane.xlu0 %2617 }
0x1198   :  { %8656 = vpow2.f32 %v2621_v30  ;;  %v2620_v59 = vsub.f32 %v2612_v62, %v2618_v4  ;;  %v11100_v62 = vpack.c.bf16 %v9339_v54, %v9337_v52 }
0x119a   :  { %v8653_v24 = vpop.eup %8652  ;;  %v2623_v11 = vmul.f32 1.442695, %v2620_v59 }
0x119b   :  { %v2501_v13 = vsel %vm1106_vm3, %v8653_v24, 0.0 }
0x119c   :  { %8658 = vpow2.f32 %v2623_v11  ;;  %2502 = vadd.xlane.f32.xlu0 %v2501_v13 }
0x119e   :  { %v8655_v58 = vpop.eup %8654 }
0x119f   :  { %v2504_v14 = vsel %vm1106_vm3, %v8655_v58, 0.0 }
0x11a0   :  { %2505 = vadd.xlane.f32.xlu0 %v2504_v14 }
0x11a2   :  { %v8657_v32 = vpop.eup %8656 }
0x11a3   :  { %v2625_v42 = vsel %vm1106_vm3, %v8657_v32, 0.0 }
0x11a4   :  { %2626 = vadd.xlane.f32.xlu1 %v2625_v42 }
0x11a6   :  { %v8659_v60 = vpop.eup %8658 }
0x11a7   :  { %v2628_v48 = vsel %vm1106_vm3, %v8659_v60, 0.0 }
0x11a8   :  { %2629 = vadd.xlane.f32.xlu0 %v2628_v48 }
0x11b5   :  { %2513 = vrot.lane.b32.xlu1 %v9207_v12, %s8981_s23 }
0x1229   :  { %v2503_v49 = vpop.xlane.xlu0 %2502 }
0x122a   :  { %8660 = vrcp.f32 %v2503_v49 }
0x122d   :  { %v2506_v2 = vpop.xlane.xlu0 %2505 }
0x122e   :  { %8662 = vrcp.f32 %v2506_v2 }
0x1231   :  { %v2627_v33 = vpop.xlane.xlu1 %2626 }
0x1232   :  { %8664 = vrcp.f32 %v2627_v33 }
0x1234   :  { %v8661_v6 = vpop.eup %8660 }
0x1235   :  { %v2514_v23 = vpop.permute.xlu1 %2513  ;;  %v2630_v34 = vpop.xlane.xlu0 %2629  ;;  %v2509_v16 = vmul.f32 %v8661_v6, %v8653_v24 }
0x1236   :  { %8666 = vrcp.f32 %v2630_v34  ;;  %7945 = vmatpush3.bf16.msra.mxu0 %v2514_v23 }
0x1237   :  { %7956 = vmatprep.subr.bf16.mxu0 %v11081_v9 }
0x1238   :  { %v8663_v45 = vpop.eup %8662 }
0x1239   :  { %v2510_v10 = vmul.f32 %v8663_v45, %v8655_v58 }
0x123b   :  { %v2511_v55 = vpack.c.bf16 %v2510_v10, %v2509_v16 }
0x123c   :  { %v8665_v19 = vpop.eup %8664 }
0x123d   :  { %7947 = vmatmul.mubr.msk.bf16.vlgmr.msra.gmra.mrb[84].mxu0 %vm1106_vm3, %v2511_v55  ;;  %v2633_v39 = vmul.f32 %v8665_v19, %v8657_v32 }
0x123e   :  { %7958 = vmatprep.mubr.msk.bf16.mxu0 %vm8979_vm1, %v11081_v9 }
0x1240   :  { %v8667_v35 = vpop.eup %8666 }
0x1241   :  { %v2634_v57 = vmul.f32 %v8667_v35, %v8659_v60 }
0x1243   :  { %v2636_v27 = vpack.c.bf16 %v2634_v57, %v2633_v39 }
0x1245   :  { %v2641_v41 = vsel %vm1106_vm3, %v2636_v27, 0 }
0x1246   :  { %7957 = vmatpush3.bf16.xpose.msra.mxu0 %v2641_v41 }
0x1247   :  { %7968 = vmatprep.subr.bf16.mxu0 %v11081_v9 }
0x124d   :  { %7959 = vmatmul.mubr.msk.bf16.vlgmr.msra.gmra.mrb[88].mxu0 %vm1106_vm3, %v11100_v62 }
0x124e   :  { %7969 = vmatpush3.bf16.xpose.msra.mxu0 %v2764_v7  ;;  %7970 = vmatprep.mubr.msk.bf16.mxu0 %vm8979_vm1, %v11081_v9 }
0x124f   :  { %7980 = vmatprep.subr.bf16.mxu0 %v11081_v9 }
0x1255   :  { %7971 = vmatmul.mubr.msk.bf16.vlgmr.msra.gmra.mrb[92].mxu0 %vm346_vm2, %v11102_v51 }
0x1256   :  { %7982 = vmatprep.mubr.msk.bf16.mxu0 %vm8979_vm1, %v11081_v9 }
0x1310   :  { %v9782_v20 = vpop.f32.mrb[84].mxu0 }
0x1311   :  { %v7948_v21 = vpop.f32.mrb[85].mxu0 }
0x1312   :  { %v9784_v22 = vpop.f32.mrb[86].mxu0 }
0x1313   :  { %v8488_v15 = vpack.i.bf16 %v9784_v22, %v9782_v20  ;;  %v7949_v26 = vpop.f32.mrb[87].mxu0 }
0x1320   :  { %v2677_v28 = vpop.f32.mrb[88].mxu0 }
0x1321   :  { %v2684_v36 = vadd.f32 %v2677_v28, %v9337_v52  ;;  %v7960_v38 = vpop.f32.mrb[89].mxu0 }
0x1322   :  { %v2680_v30 = vpop.f32.mrb[90].mxu0 }
0x1323   :  { %v2685_v47 = vadd.f32 %v2680_v30, %v9339_v54  ;;  %v7961_v0 = vpop.f32.mrb[91].mxu0  ;;  %v2686_v4 = vadd.f32 %v2684_v36, %v9662_v18 }
0x1325   :  { %v2688_v59 = vsel %vm1106_vm3, %v2686_v4, -inf  ;;  %v2687_v24 = vadd.f32 %v2685_v47, %v9662_v18 }
0x1326   :  { %2689 = vmax.xlane.f32.xlu0 %v2688_v59 }
0x1327   :  { %v2691_v14 = vsel %vm1106_vm3, %v2687_v24, -inf }
0x1328   :  { %v2800_v11 = vpop.f32.mrb[92].mxu0 }
0x1329   :  { %v2807_v13 = vmul.f32 0.35355338, %v2800_v11  ;;  %v7972_v58 = vpop.f32.mrb[93].mxu0 }
0x132a   :  { %2692 = vmax.xlane.f32.xlu0 %v2691_v14  ;;  %v2803_v32 = vpop.f32.mrb[94].mxu0 }
0x132b   :  { %v2808_v52 = vmul.f32 0.35355338, %v2803_v32  ;;  %v7973_v42 = vpop.f32.mrb[95].mxu0  ;;  %v2809_v60 = vadd.f32 %v2807_v13, %v9662_v18 }
0x132c   :  { %v11103_v42 = vpack.c.bf16 %v9351_v3, %v9345_v1 }
0x132d   :  { %v2811_v54 = vsel %vm1106_vm3, %v2809_v60, -inf  ;;  %v2810_v48 = vadd.f32 %v2808_v52, %v9662_v18 }
0x132e   :  { %2812 = vmax.xlane.f32.xlu0 %v2811_v54 }
0x132f   :  { %v2814_v49 = vsel %vm1106_vm3, %v2810_v48, -inf }
0x1332   :  { %2815 = vmax.xlane.f32.xlu0 %v2814_v49 }
0x13b3   :  { %v2690_v2 = vpop.xlane.xlu0 %2689 }
0x13b4   :  { %v2694_v33 = vsub.f32 %v2686_v4, %v2690_v2 }
0x13b6   :  { %v2696_v23 = vmul.f32 1.442695, %v2694_v33 }
0x13b7   :  { %v2693_v34 = vpop.xlane.xlu0 %2692 }
0x13b8   :  { %8668 = vpow2.f32 %v2696_v23  ;;  %v2695_v6 = vsub.f32 %v2687_v24, %v2693_v34 }
0x13ba   :  { %v2698_v45 = vmul.f32 1.442695, %v2695_v6 }
0x13bb   :  { %v2813_v16 = vpop.xlane.xlu0 %2812 }
0x13bc   :  { %8670 = vpow2.f32 %v2698_v45  ;;  %v2817_v10 = vsub.f32 %v2809_v60, %v2813_v16 }
0x13be   :  { %v2819_v55 = vmul.f32 1.442695, %v2817_v10 }
0x13bf   :  { %v2816_v19 = vpop.xlane.xlu0 %2815 }
0x13c0   :  { %8672 = vpow2.f32 %v2819_v55  ;;  %v2818_v35 = vsub.f32 %v2810_v48, %v2816_v19 }
0x13c2   :  { %v8669_v39 = vpop.eup %8668  ;;  %v2821_v57 = vmul.f32 1.442695, %v2818_v35 }
0x13c3   :  { %v2700_v27 = vsel %vm1106_vm3, %v8669_v39, 0.0 }
0x13c4   :  { %8674 = vpow2.f32 %v2821_v57  ;;  %2701 = vadd.xlane.f32.xlu1 %v2700_v27 }
0x13c6   :  { %v8671_v41 = vpop.eup %8670 }
0x13c7   :  { %v2703_v62 = vsel %vm1106_vm3, %v8671_v41, 0.0 }
0x13c8   :  { %2704 = vadd.xlane.f32.xlu0 %v2703_v62 }
0x13ca   :  { %v8673_v44 = vpop.eup %8672 }
0x13cb   :  { %v2823_v7 = vsel %vm1106_vm3, %v8673_v44, 0.0 }
0x13cc   :  { %2824 = vadd.xlane.f32.xlu0 %v2823_v7 }
0x13ce   :  { %v8675_v51 = vpop.eup %8674 }
0x13cf   :  { %v2826_v21 = vsel %vm1106_vm3, %v8675_v51, 0.0 }
0x13d0   :  { %2827 = vadd.xlane.f32.xlu0 %v2826_v21 }
0x13e6   :  { %2711 = vrot.lane.b32.xlu0 %v9207_v12, %s8980_s28 }
0x1451   :  { %v2702_v26 = vpop.xlane.xlu1 %2701 }
0x1452   :  { %8676 = vrcp.f32 %v2702_v26 }
0x1455   :  { %v2705_v28 = vpop.xlane.xlu0 %2704 }
0x1456   :  { %8678 = vrcp.f32 %v2705_v28 }
0x1459   :  { %v2825_v36 = vpop.xlane.xlu0 %2824 }
0x145a   :  { %8680 = vrcp.f32 %v2825_v36 }
0x145c   :  { %v8677_v30 = vpop.eup %8676 }
0x145d   :  { %v2828_v38 = vpop.xlane.xlu0 %2827  ;;  %v2708_v0 = vmul.f32 %v8677_v30, %v8669_v39 }
0x145e   :  { %8682 = vrcp.f32 %v2828_v38 }
0x1460   :  { %v8679_v47 = vpop.eup %8678 }
0x1461   :  { %v2709_v4 = vmul.f32 %v8679_v47, %v8671_v41  ;;  %v2712_v59 = vpop.permute.xlu0 %2711  ;;  %v11104_v47 = vld [vmem:[#allocation11_spill] sm:$0xff] }
0x1462   :  { %7963 = vmatpush3.bf16.msra.mxu1 %v2712_v59 }
0x1463   :  { %v2710_v24 = vpack.c.bf16 %v2709_v4, %v2708_v0  ;;  %7974 = vmatprep.subr.bf16.mxu1 %v11081_v9 }
0x1464   :  { %v8681_v11 = vpop.eup %8680 }
0x1465   :  { %7965 = vmatmul.mubr.msk.bf16.vlgmr.msra.gmra.mrb[96].mxu1 %vm1106_vm3, %v2710_v24  ;;  %v2831_v58 = vmul.f32 %v8681_v11, %v8673_v44  ;;  %v8546_v24 = vld [vmem:[%s11037_s5 + $0x40] sm:$0xff]   ;;  %v8547_v11 = vld [vmem:[%s11037_s5 + $0x30] sm:$0xff]  }
0x1466   :  { %7976 = vmatprep.mubr.msk.bf16.mxu1 %vm8979_vm1, %v11081_v9 }
0x1468   :  { %v8683_v13 = vpop.eup %8682 }
0x1469   :  { %v2832_v14 = vmul.f32 %v8683_v13, %v8675_v51  ;;  %v8548_v13 = vld [vmem:[%s11037_s5 + $0x48] sm:$0xff]  }
0x146b   :  { %v2834_v32 = vpack.c.bf16 %v2832_v14, %v2831_v58  ;;  %v11105_v58 = vld [vmem:[#allocation12_spill] sm:$0xff]  ;;  %v8549_v14 = vld [vmem:[%s11037_s5 + $0x38] sm:$0xff]  }
0x146d   :  { %v2839_v52 = vsel %vm1106_vm3, %v2834_v32, 0  ;;  %v9871_v32 = vld [vmem:[%s11037_s5 + $0x50] sm:$0xff]  }
0x146e   :  { %7975 = vmatpush3.bf16.xpose.msra.mxu1 %v2839_v52 }
0x146f   :  { %7986 = vmatprep.subr.bf16.mxu1 %v8547_v11 }
0x1475   :  { %7977 = vmatmul.mubr.msk.bf16.vlgmr.msra.gmra.mrb[100].mxu1 %vm1106_vm3, %v11103_v42  ;;  %v3059_v42 = vld [vmem:[%s11035_s3] sm:$0xff] }
0x1476   :  { %7987 = vmatpush3.bf16.msra.mxu1 %v8547_v11 }
0x1477   :  { %7988 = vmatprep.subr.bf16.mxu1 %v8549_v14 }
0x147a   :  { %7989 = vmatpush3.bf16.msra.mxu1 %v8549_v14 }
0x147b   :  { %8002 = vmatprep.subr.bf16.mxu1 %v9871_v32 }
0x1538   :  { %v2751_v60 = vpop.f32.mrb[96].mxu1 }
0x1539   :  { %v7966_v54 = vpop.f32.mrb[97].mxu1 }
0x153a   :  { %v2754_v48 = vpop.f32.mrb[98].mxu1  ;;  %v7220_v54 = vld [vmem:[%s11035_s3 + $0x80] sm:$0xff] }
0x153b   :  { %v8498_v49 = vpack.i.bf16 %v2754_v48, %v2751_v60  ;;  %v7967_v2 = vpop.f32.mrb[99].mxu1  ;;  %v3060_v60 = vld [vmem:[%s11035_s3 + $0x8] sm:$0xff] }
0x153c   :  { %v9886_v2 = vadd.f32 %v7220_v54, %v3059_v42 }
0x1548   :  { %v2875_v33 = vpop.f32.mrb[100].mxu1 }
0x1549   :  { %v2882_v23 = vadd.f32 %v2875_v33, %v9345_v1  ;;  %v7978_v34 = vpop.f32.mrb[101].mxu1  ;;  %v3061_v33 = vld [vmem:[%s11035_s3 + $0x10] sm:$0xff] }
0x154a   :  { %v2878_v6 = vpop.f32.mrb[102].mxu1 }
0x154b   :  { %v2883_v45 = vadd.f32 %v2878_v6, %v9351_v3  ;;  %v7979_v16 = vpop.f32.mrb[103].mxu1  ;;  %v2884_v10 = vadd.f32 %v2882_v23, %v9662_v18  ;;  %v3062_v23 = vld [vmem:[%s11035_s3 + $0x18] sm:$0xff] }
0x154c   :  { %v7223_v16 = vld [vmem:[%s11035_s3 + $0x98] sm:$0xff] }
0x154d   :  { %v2886_v55 = vsel %vm1106_vm3, %v2884_v10, -inf  ;;  %v2885_v19 = vadd.f32 %v2883_v45, %v9662_v18  ;;  %v7222_v45 = vld [vmem:[%s11035_s3 + $0x90] sm:$0xff] }
0x154e   :  { %2887 = vmax.xlane.f32.xlu0 %v2886_v55 }
0x154f   :  { %v2889_v35 = vsel %vm1106_vm3, %v2885_v19, -inf }
0x1550   :  { %2890 = vmax.xlane.f32.xlu1 %v2889_v35  ;;  %v9904_v35 = vadd.f32 %v7223_v16, %v3062_v23 }
0x1564   :  { %8484 = vrot.lane.b32.xlu0 %v8483_v31, %s8983_s2 }
0x15db   :  { %v2888_v1 = vpop.xlane.xlu0 %2887 }
0x15dc   :  { %v2892_v39 = vsub.f32 %v2884_v10, %v2888_v1 }
0x15dd   :  { %v2891_v3 = vpop.xlane.xlu1 %2890 }
0x15de   :  { %v2894_v57 = vmul.f32 1.442695, %v2892_v39  ;;  %v2893_v27 = vsub.f32 %v2885_v19, %v2891_v3  ;;  %v9902_v19 = vadd.f32 %v7222_v45, %v3061_v33  ;;  %v3063_v3 = vld [vmem:[%s11035_s3 + $0x20] sm:$0xff] }
0x15df   :  { %v8485_v21 = vpop.permute.xlu0 %8484 }
0x15e0   :  { %8684 = vpow2.f32 %v2894_v57  ;;  %v2896_v41 = vmul.f32 1.442695, %v2893_v27  ;;  %v8487_v26 = vunpack.i.h.bf16 %v8485_v21  ;;  %v8486_v28 = vunpack.i.l.bf16 %v8485_v21  ;;  %v3064_v57 = vld [vmem:[%s11035_s3 + $0x28] sm:$0xff]  ;;  %v7224_v27 = vld [vmem:[%s11035_s3 + $0xa0] sm:$0xff]  ;;  %v7214_v21 = vld [vmem:[%s11035_s3 + $0x50] sm:$0xff] }
0x15e1   :  { %v3187_v39 = vpack.c.bf16 %v9904_v35, %v9902_v19 }
0x15e2   :  { %8686 = vpow2.f32 %v2896_v41  ;;  %v7225_v41 = vld [vmem:[%s11035_s3 + $0xa8] sm:$0xff] }
0x15ea   :  { %v8685_v62 = vpop.eup %8684 }
0x15eb   :  { %v2898_v18 = vsel %vm1106_vm3, %v8685_v62, 0.0 }
0x15ec   :  { %v8687_v44 = vpop.eup %8686  ;;  %2899 = vadd.xlane.f32.xlu1 %v2898_v18  ;;  %v3065_v18 = vld [vmem:[%s11035_s3 + $0x30] sm:$0xff] }
0x15ed   :  { %v2901_v7 = vsel %vm1106_vm3, %v8687_v44, 0.0 }
0x15f0   :  { %2902 = vadd.xlane.f32.xlu1 %v2901_v7  ;;  %v9931_v7 = vadd.f32 %v7225_v41, %v3064_v57 }
0x1601   :  { %2909 = vrot.lane.b32.xlu1 %v9207_v12, %s8982_s24 }
0x1605   :  { %8479 = vrot.lane.b32.xlu1 %v8478_v8, %s8984_s16 }
0x1609   :  { %8489 = vrot.lane.b32.xlu1 %v8488_v15, %s8984_s16 }
0x160d   :  { %8494 = vrot.lane.b32.xlu1 %v8493_v63, %s8985_s17 }
0x1611   :  { %8499 = vrot.lane.b32.xlu1 %v8498_v49, %s8983_s2  ;;  %v7221_v49 = vld [vmem:[%s11035_s3 + $0x88] sm:$0xff] }
0x1612   :  { %v9894_v6 = vadd.f32 %v7221_v49, %v3060_v60 }
0x1614   :  { %v3186_v1 = vpack.c.bf16 %v9894_v6, %v9886_v2 }
0x1679   :  { %v2900_v12 = vpop.xlane.xlu1 %2899 }
0x167a   :  { %8688 = vrcp.f32 %v2900_v12  ;;  %v7226_v12 = vld [vmem:[%s11035_s3 + $0xb0] sm:$0xff] }
0x167d   :  { %v2903_v46 = vpop.xlane.xlu1 %2902 }
0x167e   :  { %8690 = vrcp.f32 %v2903_v46  ;;  %v7227_v46 = vld [vmem:[%s11035_s3 + $0xb8] sm:$0xff] }
0x1681   :  { %v2910_v56 = vpop.permute.xlu1 %2909 }
0x1682   :  { %7981 = vmatpush3.bf16.msra.mxu0 %v2910_v56  ;;  %v9939_v56 = vadd.f32 %v7226_v12, %v3065_v18 }
0x1683   :  { %7994 = vmatprep.subr.bf16.mxu0 %v8546_v24 }
0x1684   :  { %v8689_v53 = vpop.eup %8688 }
0x1685   :  { %v8480_v17 = vpop.permute.xlu1 %8479  ;;  %v2906_v22 = vmul.f32 %v8689_v53, %v8685_v62  ;;  %v9923_v62 = vadd.f32 %v7224_v27, %v3063_v3 }
0x1686   :  { %v8482_v31 = vunpack.i.h.bf16 %v8480_v17  ;;  %v8481_v20 = vunpack.i.l.bf16 %v8480_v17 }
0x1687   :  { %v3188_v53 = vpack.c.bf16 %v9931_v7, %v9923_v62 }
0x1688   :  { %v8691_v8 = vpop.eup %8690  ;;  %v2155_v37 = vsel %vm346_vm2, %v9558_v61, %v8482_v31  ;;  %v2154_v63 = vsel %vm346_vm2, %v9556_v43, %v8481_v20  ;;  %v8552_v31 = vld [vmem:[%s11037_s5 + $0x60] sm:$0xff]   ;;  %v8553_v20 = vld [vmem:[%s11037_s5 + $0x68] sm:$0xff]  }
0x1689   :  { %v2907_v15 = vmul.f32 %v8691_v8, %v8687_v44  ;;  %v9840_v51 = vpop.permute.xlu1 %8489  ;;  %v2156_v0 = vsel %vm1106_vm3, %v2154_v63, %v8486_v28  ;;  %v2157_v4 = vsel %vm1106_vm3, %v2155_v37, %v8487_v26  ;;  %v3066_v44 = vld [vmem:[%s11035_s3 + $0x38] sm:$0xff]  ;;  %v3285_v26 = vadd.f32 %v7214_v21, %v3061_v33  ;;  %v7216_v28 = vld [vmem:[%s11035_s3 + $0x60] sm:$0xff] }
0x168a   :  { %v9941_v17 = vadd.f32 %v7227_v46, %v3066_v44  ;;  %v7215_v63 = vld [vmem:[%s11035_s3 + $0x58] sm:$0xff]  ;;  %v8492_v27 = vunpack.i.h.bf16 %v9840_v51  ;;  %v8491_v41 = vunpack.i.l.bf16 %v9840_v51 }
0x168b   :  { %v2908_v50 = vpack.c.bf16 %v2907_v15, %v2906_v22  ;;  %v7212_v22 = vld [vmem:[%s11035_s3 + $0x40] sm:$0xff]  ;;  %v7213_v15 = vld [vmem:[%s11035_s3 + $0x48] sm:$0xff] }
0x168c   :  { %v3189_v8 = vpack.c.bf16 %v9941_v17, %v9939_v56  ;;  %v3284_v37 = vadd.f32 %v7213_v15, %v3060_v60  ;;  %v2981_v46 = vsel %vm346_vm2, %v9741_v25, %v8492_v27  ;;  %v7249_v25 = vld [vmem:[%s11038_s6 + $0x5] ss:$0 sm:$0xff] }
0x168d   :  { %7983 = vmatmul.mubr.msk.bf16.vlgmr.msra.gmra.mrb[96].mxu0 %vm1106_vm3, %v2908_v50  ;;  %v8495_v36 = vpop.permute.xlu1 %8494  ;;  %v3283_v50 = vadd.f32 %v7212_v22, %v3059_v42 }
0x168e   :  { %v8497_v38 = vunpack.i.h.bf16 %v8495_v36  ;;  %v8496_v30 = vunpack.i.l.bf16 %v8495_v36  ;;  %7998 = vmatprep.mubr.msk.bf16.mxu0 %vm129_vm0, %v11104_v47  ;;  %7995 = vmatpush3.bf16.msra.mxu0 %v8546_v24  ;;  %v7217_v36 = vld [vmem:[%s11035_s3 + $0x68] sm:$0xff] }
0x168f   :  { %7996 = vmatprep.subr.bf16.mxu0 %v8548_v13  ;;  %v3288_v47 = vadd.f32 %v7217_v36, %v3064_v57 }
0x1690   :  { %v2159_v61 = vsel %vm2158_vm4, %v2156_v0, %v8496_v30  ;;  %v2160_v59 = vsel %vm2158_vm4, %v2157_v4, %v8497_v38  ;;  %v3286_v38 = vadd.f32 %v7215_v63, %v3062_v23  ;;  %v3287_v30 = vadd.f32 %v7216_v28, %v3063_v3  ;;  %v8551_v63 = vld [vmem:[%s11037_s5 + $0x58] sm:$0xff]  }
0x1691   :  { %v2986_v43 = vpack.c.bf16 %v2160_v59, %v2159_v61  ;;  %v3291_v0 = vpack.c.bf16 %v3284_v37, %v3283_v50  ;;  %v7218_v59 = vld [vmem:[%s11035_s3 + $0x70] sm:$0xff]  ;;  %v8500_v57 = vpop.permute.xlu1 %8499 }
0x1692   :  { %7997 = vmatpush3.bf16.msra.mxu0 %v8548_v13  ;;  %v3292_v4 = vpack.c.bf16 %v3286_v38, %v3285_v26  ;;  %v3293_v61 = vpack.c.bf16 %v3288_v47, %v3287_v30  ;;  %v3289_v24 = vadd.f32 %v7218_v59, %v3065_v18  ;;  %v8502_v18 = vunpack.i.h.bf16 %v8500_v57  ;;  %v7256_v59 = vld [vmem:[%s11038_s6 + $0x6] ss:$0 sm:$0xff] }
0x1693   :  { %7990 = vmatprep.mubr.msk.bf16.mxu1 %vm129_vm0, %v2986_v43  ;;  %8014 = vmatprep.subr.bf16.mxu0 %v8552_v31  ;;  %v7219_v43 = vld [vmem:[%s11035_s3 + $0x78] sm:$0xff]  ;;  %s7097_s3 = sshll.u32 %s8986_s1, 4  ;;  %s7098_s3 = int_to_ptr.vmem [resolvable:$true] %s7097_s3 }
0x1694   :  { %v3290_v11 = vadd.f32 %v7219_v43, %v3066_v44  ;;  %v8501_v44 = vunpack.i.l.bf16 %v8500_v57  ;;  %v2983_v21 = vsel %vm1106_vm3, %v2981_v46, %v8502_v18  ;;  %p8953_p3 = scmp.lt.s32.totalorder %s7098_s3, %s7098_s3 }
0x1695   :  { %7999 = vmatmul.mubr.msk.bf16.vlgmr.msra.gmra.mrb[100].mxu0 %vm129_vm0, %v11105_v58  ;;  %v7244_v58 = vld [vmem:[%s11038_s6 + $0x4] ss:$0 sm:$0xff] }
0x1696   :  { %8015 = vmatpush3.bf16.msra.mxu0 %v8552_v31  ;;  %8018 = vmatprep.mubr.msk.bf16.mxu0 %vm129_vm0, %v3291_v0  ;;  %v3294_v13 = vpack.c.bf16 %v3290_v11, %v3289_v24  ;;  %v2980_v31 = vsel %vm346_vm2, %v9739_v40, %v8491_v41 }
0x1697   :  { %8016 = vmatprep.subr.bf16.mxu0 %v8553_v20  ;;  %v2982_v15 = vsel %vm1106_vm3, %v2980_v31, %v8501_v44 }
0x169a   :  { %8017 = vmatpush3.bf16.msra.mxu0 %v8553_v20 }
0x169d   :  { %8019 = vmatmul.mubr.msk.bf16.vlgmr.msra.gmra.mrb[104].mxu0 %vm129_vm0, %v3292_v4 }
0x169e   :  { %8022 = vmatprep.mubr.msk.bf16.mxu0 %vm129_vm0, %v3293_v61 }
0x16a5   :  { %8023 = vmatmul.mubr.msk.bf16.gmra.mrb[108].mxu0 %vm129_vm0, %v3294_v13 }
0x1760   :  { %v2949_v52 = vpop.f32.mrb[96].mxu0 }
0x1761   :  { %v7984_v48 = vpop.f32.mrb[97].mxu0 }
0x1762   :  { %v2952_v34 = vpop.f32.mrb[98].mxu0 }
0x1763   :  { %v8503_v10 = vpack.i.bf16 %v2952_v34, %v2949_v52  ;;  %v7985_v55 = vpop.f32.mrb[99].mxu0 }
0x1765   :  { %8504 = vrot.lane.b32.xlu1 %v8503_v10, %s8985_s17 }
0x1768   :  { %v8000_v14 = vpop.f32.mrb[100].mxu0 }
0x1769   :  { %v3168_v52 = vadd.f32 %v8000_v14, %v7244_v58  ;;  %v3159_v42 = vpop.f32.mrb[101].mxu0 }
0x176a   :  { %v3160_v60 = vadd.f32 %v7244_v58, %v3159_v42  ;;  %v8001_v54 = vpop.f32.mrb[102].mxu0 }
0x176b   :  { %v3176_v48 = vmul.f32 0.35355338, %v3168_v52  ;;  %v3171_v49 = vadd.f32 %v8001_v54, %v7244_v58  ;;  %v3162_v33 = vpop.f32.mrb[103].mxu0 }
0x176c   :  { %v3174_v23 = vmul.f32 0.35355338, %v3160_v60  ;;  %v3163_v34 = vadd.f32 %v7244_v58, %v3162_v33 }
0x176d   :  { %v3177_v45 = vmul.f32 0.35355338, %v3171_v49 }
0x176e   :  { %v3175_v16 = vmul.f32 0.35355338, %v3163_v34 }
0x176f   :  { %v9984_v10 = vpack.c.bf16 %v3177_v45, %v3176_v48 }
0x1770   :  { %v9986_v55 = vpack.c.bf16 %v3175_v16, %v3174_v23  ;;  %v8020_v61 = vpop.f32.mrb[104].mxu0 }
0x1771   :  { %v3366_v43 = vadd.f32 %v8020_v61, %v7256_v59  ;;  %v3357_v24 = vpop.f32.mrb[105].mxu0 }
0x1772   :  { %8442 = vmatprep.subr.msk.bf16.mxu0 %vm346_vm2, %v9986_v55  ;;  %v3393_v3 = vsel %vm346_vm2, %v9986_v55, 0  ;;  %v3358_v11 = vadd.f32 %v7256_v59, %v3357_v24  ;;  %v8021_v13 = vpop.f32.mrb[106].mxu0 }
0x1773   :  { %8035 = vmatpush3.bf16.xpose.msra.mxu0 %v3393_v3  ;;  %v3369_v58 = vadd.f32 %v8021_v13, %v7256_v59  ;;  %v3360_v14 = vpop.f32.mrb[107].mxu0 }
0x1774   :  { %v3361_v52 = vadd.f32 %v7256_v59, %v3360_v14 }
0x1775   :  { %v10076_v42 = vpack.c.bf16 %v3369_v58, %v3366_v43 }
0x1776   :  { %v10078_v60 = vpack.c.bf16 %v3361_v52, %v3358_v11 }
0x1778   :  { %v8024_v54 = vpop.f32.mrb[108].mxu0 }
0x1779   :  { %v3382_v48 = vadd.f32 %v8024_v54, %v7256_v59  ;;  %v3373_v49 = vpop.f32.mrb[109].mxu0 }
0x177a   :  { %v3374_v33 = vadd.f32 %v7256_v59, %v3373_v49  ;;  %v8025_v23 = vpop.f32.mrb[110].mxu0 }
0x177b   :  { %v3385_v34 = vadd.f32 %v8025_v23, %v7256_v59  ;;  %v3376_v16 = vpop.f32.mrb[111].mxu0 }
0x177d   :  { %v10080_v45 = vpack.c.bf16 %v3385_v34, %v3382_v48 }
0x17d7   :  { %v8505_v12 = vpop.permute.xlu1 %8504 }
0x17d8   :  { %v8507_v20 = vunpack.i.h.bf16 %v8505_v12  ;;  %v8506_v22 = vunpack.i.l.bf16 %v8505_v12 }
0x17da   :  { %v2984_v50 = vsel %vm2158_vm4, %v2982_v15, %v8506_v22  ;;  %v2985_v37 = vsel %vm2158_vm4, %v2983_v21, %v8507_v20 }
0x17db   :  { %v2987_v51 = vpack.c.bf16 %v2985_v37, %v2984_v50 }
0x17dd   :  { %7991 = vmatmul.mubr.msk.bf16.vlgmr.msra.gmra.mrb[104].mxu1 %vm129_vm0, %v2987_v51 }
0x17de   :  { %8003 = vmatpush3.bf16.msra.mxu1 %v9871_v32  ;;  %8006 = vmatprep.mubr.msk.bf16.mxu1 %vm129_vm0, %v3186_v1 }
0x17df   :  { %8004 = vmatprep.subr.bf16.mxu1 %v8551_v63 }
0x17e2   :  { %8005 = vmatpush3.bf16.msra.mxu1 %v8551_v63 }
0x17e3   :  { %8026 = vmatprep.subr.bf16.mxu1 %v11081_v9 }
0x17e5   :  { %8007 = vmatmul.mubr.msk.bf16.vlgmr.msra.gmra.mrb[108].mxu1 %vm129_vm0, %v3187_v39 }
0x17e6   :  { %8010 = vmatprep.mubr.msk.bf16.mxu1 %vm129_vm0, %v3188_v53 }
0x17ed   :  { %8011 = vmatmul.mubr.msk.bf16.gmra.mrb[112].mxu1 %vm129_vm0, %v3189_v8 }
0x17ee   :  { %8030 = vmatprep.mubr.msk.bf16.mxu1 %vm8979_vm1, %v11081_v9 }
0x18b8   :  { %v8008_v40 = vpop.f32.mrb[108].mxu1 }
0x18b9   :  { %v3252_v32 = vpop.f32.mrb[109].mxu1  ;;  %v3261_v6 = vadd.f32 %v8008_v40, %v7249_v25 }
0x18ba   :  { %v8009_v2 = vpop.f32.mrb[110].mxu1  ;;  %v3253_v1 = vadd.f32 %v7249_v25, %v3252_v32 }
0x18bb   :  { %v3264_v19 = vadd.f32 %v8009_v2, %v7249_v25  ;;  %v3255_v35 = vpop.f32.mrb[111].mxu1 }
0x18bc   :  { %v3256_v39 = vadd.f32 %v7249_v25, %v3255_v35 }
0x18bd   :  { %v3391_v62 = vpack.c.bf16 %v3264_v19, %v3261_v6  ;;  %v3813_v6 = vsel %vm346_vm2, %v9984_v10, 0 }
0x18be   :  { %v3390_v7 = vpack.c.bf16 %v3256_v39, %v3253_v1 }
0x18bf   :  { %3498 = vrot.lane.b32.xlu0 %v3391_v62, %s8981_s23  ;;  %v3399_v4 = vsel %vm346_vm2, %v3391_v62, 0 }
0x18c0   :  { %3496 = vrot.lane.b32.xlu1 %v3390_v7, %s8981_s23  ;;  %8036 = vmatprep.mubr.msk.bf16.mxu0 %vm346_vm2, %v3390_v7  ;;  %v3396_v56 = vsel %vm346_vm2, %v3390_v7, 0  ;;  %v8012_v17 = vpop.f32.mrb[112].mxu1 }
0x18c1   :  { %8027 = vmatpush3.bf16.xpose.msra.mxu1 %v3396_v56  ;;  %8037 = vmatmul.mubr.msk.bf16.vlgmr.msra.gmra.mrb[112].mxu0 %vm346_vm2, %v3391_v62  ;;  %v3277_v53 = vadd.f32 %v8012_v17, %v7249_v25  ;;  %v3268_v8 = vpop.f32.mrb[113].mxu1 }
0x18c2   :  { %v3269_v26 = vadd.f32 %v7249_v25, %v3268_v8  ;;  %8028 = vmatprep.subr.bf16.mxu1 %v11081_v9  ;;  %v8013_v28 = vpop.f32.mrb[114].mxu1 }
0x18c3   :  { %3492 = vrot.lane.b32.xlu0 %v9986_v55, %s8981_s23  ;;  %v3280_v36 = vadd.f32 %v8013_v28, %v7249_v25  ;;  %v3271_v38 = vpop.f32.mrb[115].mxu1 }
0x18c4   :  { %3599 = vrot.lane.b32.xlu1 %v9986_v55, %s8980_s28  ;;  %v3272_v30 = vadd.f32 %v7249_v25, %v3271_v38 }
0x18c5   :  { %v10039_v47 = vpack.c.bf16 %v3280_v36, %v3277_v53 }
0x18c6   :  { %v10041_v0 = vpack.c.bf16 %v3272_v30, %v3269_v26  ;;  %v8554_v30 = vld [vmem:[%s11039_s7 + $0x10] sm:$0xff]  }
0x18c7   :  { %3706 = vrot.lane.b32.xlu0 %v3390_v7, %s8982_s24  ;;  %v3819_v19 = vsel %vm346_vm2, %v10039_v47, 0 }
0x18c8   :  { %3601 = vrot.lane.b32.xlu1 %v3390_v7, %s8980_s28  ;;  %v3816_v32 = vsel %vm346_vm2, %v10041_v0, 0 }
0x18c9   :  { %8029 = vmatpush3.bf16.xpose.msra.mxu1 %v3399_v4  ;;  %v8555_v4 = vld [vmem:[%s11039_s7 + $0x18] sm:$0xff]  }
0x18ca   :  { %8040 = vmatprep.subr.bf16.mxu1 %v11081_v9 }
0x18cb   :  { %3708 = vrot.lane.b32.xlu0 %v3391_v62, %s8982_s24 }
0x18cc   :  { %3603 = vrot.lane.b32.xlu1 %v3391_v62, %s8980_s28 }
0x18cf   :  { %3916 = vrot.lane.b32.xlu0 %v10041_v0, %s8981_s23 }
0x18d0   :  { %3704 = vrot.lane.b32.xlu1 %v9986_v55, %s8982_s24  ;;  %8031 = vmatmul.mubr.msk.bf16.vlgmr.msra.gmra.mrb[116].mxu1 %vm346_vm2, %v9986_v55  ;;  %v3377_v55 = vadd.f32 %v7256_v59, %v3376_v16 }
0x18d1   :  { %8044 = vmatprep.mubr.msk.bf16.mxu1 %vm8979_vm1, %v11081_v9 }
0x18d2   :  { %v10082_v3 = vpack.c.bf16 %v3377_v55, %v3374_v33 }
0x18d3   :  { %4019 = vrot.lane.b32.xlu0 %v9984_v10, %s8980_s28 }
0x18d4   :  { %3918 = vrot.lane.b32.xlu1 %v10039_v47, %s8981_s23 }
0x18d7   :  { %4021 = vrot.lane.b32.xlu0 %v10041_v0, %s8980_s28 }
0x18d8   :  { %3912 = vrot.lane.b32.xlu1 %v9984_v10, %s8981_s23 }
0x18db   :  { %4023 = vrot.lane.b32.xlu0 %v10039_v47, %s8980_s28 }
0x18dc   :  { %4126 = vrot.lane.b32.xlu1 %v10041_v0, %s8982_s24 }
0x18df   :  { %4124 = vrot.lane.b32.xlu0 %v9984_v10, %s8982_s24 }
0x18e0   :  { %4128 = vrot.lane.b32.xlu1 %v10039_v47, %s8982_s24 }
0x1931   :  { %v3499_v57 = vpop.permute.xlu0 %3498 }
0x1932   :  { %v3497_v27 = vpop.permute.xlu1 %3496  ;;  %v3507_v31 = vsel %vm346_vm2, %v3499_v57, 0 }
0x1933   :  { %8050 = vmatprep.mubr.msk.bf16.mxu0 %vm346_vm2, %v3497_v27  ;;  %v3504_v41 = vsel %vm346_vm2, %v3497_v27, 0 }
0x1934   :  { %8041 = vmatpush3.bf16.xpose.msra.mxu1 %v3504_v41 }
0x1935   :  { %v3493_v18 = vpop.permute.xlu0 %3492  ;;  %8042 = vmatprep.subr.bf16.mxu1 %v11081_v9 }
0x1936   :  { %8443 = vmatprep.subr.msk.bf16.mxu0 %vm346_vm2, %v3493_v18  ;;  %v3600_v44 = vpop.permute.xlu1 %3599  ;;  %v3501_v12 = vsel %vm346_vm2, %v3493_v18, 0 }
0x1937   :  { %8049 = vmatpush3.bf16.xpose.msra.mxu0 %v3501_v12  ;;  %v3606_v15 = vsel %vm346_vm2, %v3600_v44, 0 }
0x1938   :  { %8054 = vmatprep.subr.bf16.mxu0 %v11081_v9 }
0x1939   :  { %v3707_v37 = vpop.permute.xlu0 %3706 }
0x193a   :  { %v3602_v46 = vpop.permute.xlu1 %3601  ;;  %v3714_v51 = vsel %vm346_vm2, %v3707_v37, 0 }
0x193b   :  { %v3609_v20 = vsel %vm346_vm2, %v3602_v46, 0 }
0x193c   :  { %8043 = vmatpush3.bf16.xpose.msra.mxu1 %v3507_v31 }
0x193d   :  { %8444 = vmatprep.subr.msk.bf16.mxu1 %vm346_vm2, %v3600_v44  ;;  %v3709_v40 = vpop.permute.xlu0 %3708 }
0x193e   :  { %8051 = vmatmul.mubr.msk.bf16.vlgmr.msra.gmra.mrb[116].mxu0 %vm346_vm2, %v3499_v57  ;;  %v3604_v22 = vpop.permute.xlu1 %3603  ;;  %v3717_v25 = vsel %vm346_vm2, %v3709_v40, 0 }
0x193f   :  { %8055 = vmatpush3.bf16.xpose.msra.mxu0 %v3609_v20  ;;  %8058 = vmatprep.mubr.msk.bf16.mxu0 %vm8979_vm1, %v11081_v9  ;;  %v3612_v21 = vsel %vm346_vm2, %v3604_v22, 0 }
0x1940   :  { %8056 = vmatprep.subr.bf16.mxu0 %v11081_v9 }
0x1941   :  { %v3917_v35 = vpop.permute.xlu0 %3916 }
0x1942   :  { %v3705_v50 = vpop.permute.xlu1 %3704  ;;  %v3924_v39 = vsel %vm346_vm2, %v3917_v35, 0 }
0x1943   :  { %8045 = vmatmul.mubr.msk.bf16.vlgmr.msra.gmra.mrb[120].mxu1 %vm346_vm2, %v3493_v18  ;;  %v3711_v63 = vsel %vm346_vm2, %v3705_v50, 0 }
0x1944   :  { %8063 = vmatpush3.bf16.xpose.msra.mxu1 %v3606_v15  ;;  %8064 = vmatprep.mubr.msk.bf16.mxu1 %vm346_vm2, %v3602_v46 }
0x1945   :  { %8068 = vmatprep.subr.bf16.mxu1 %v11081_v9  ;;  %v4020_v62 = vpop.permute.xlu0 %4019 }
0x1946   :  { %v3919_v2 = vpop.permute.xlu1 %3918  ;;  %v4026_v8 = vsel %vm346_vm2, %v4020_v62, 0 }
0x1947   :  { %8057 = vmatpush3.bf16.xpose.msra.mxu0 %v3612_v21  ;;  %v3927_v17 = vsel %vm346_vm2, %v3919_v2, 0 }
0x1948   :  { %8445 = vmatprep.subr.msk.bf16.mxu0 %vm346_vm2, %v3705_v50 }
0x1949   :  { %v4022_v56 = vpop.permute.xlu0 %4021 }
0x194a   :  { %v3913_v1 = vpop.permute.xlu1 %3912  ;;  %v4029_v53 = vsel %vm346_vm2, %v4022_v56, 0 }
0x194b   :  { %8065 = vmatmul.mubr.msk.bf16.vlgmr.msra.gmra.mrb[124].mxu1 %vm346_vm2, %v3604_v22  ;;  %v3921_v7 = vsel %vm346_vm2, %v3913_v1, 0 }
0x194c   :  { %8069 = vmatpush3.bf16.xpose.msra.mxu1 %v3714_v51  ;;  %8072 = vmatprep.mubr.msk.bf16.mxu1 %vm8979_vm1, %v11081_v9 }
0x194d   :  { %8070 = vmatprep.subr.bf16.mxu1 %v11081_v9 }
0x194e   :  { %8059 = vmatmul.mubr.msk.bf16.vlgmr.msra.gmra.mrb[120].mxu0 %vm346_vm2, %v3600_v44  ;;  %v4127_v36 = vpop.permute.xlu1 %4126 }
0x194f   :  { %8077 = vmatpush3.bf16.xpose.msra.mxu0 %v3711_v63  ;;  %8078 = vmatprep.mubr.msk.bf16.mxu0 %vm346_vm2, %v3707_v37  ;;  %v4134_v38 = vsel %vm346_vm2, %v4127_v36, 0 }
0x1950   :  { %8082 = vmatprep.subr.bf16.mxu0 %v11081_v9 }
0x1954   :  { %8071 = vmatpush3.bf16.xpose.msra.mxu1 %v3717_v25 }
0x1955   :  { %8446 = vmatprep.subr.msk.bf16.mxu1 %vm346_vm2, %v9984_v10 }
0x1956   :  { %8079 = vmatmul.mubr.msk.bf16.vlgmr.msra.gmra.mrb[124].mxu0 %vm346_vm2, %v3709_v40 }
0x1957   :  { %8083 = vmatpush3.bf16.xpose.msra.mxu0 %v3816_v32  ;;  %8086 = vmatprep.mubr.msk.bf16.mxu0 %vm8979_vm1, %v11081_v9 }
0x1958   :  { %8084 = vmatprep.subr.bf16.mxu0 %v11081_v9 }
0x195b   :  { %8073 = vmatmul.mubr.msk.bf16.vlgmr.msra.gmra.mrb[128].mxu1 %vm346_vm2, %v3705_v50 }
0x195c   :  { %8091 = vmatpush3.bf16.xpose.msra.mxu1 %v3813_v6  ;;  %8092 = vmatprep.mubr.msk.bf16.mxu1 %vm346_vm2, %v10041_v0  ;;  %v4129_v0 = vpop.permute.xlu1 %4128 }
0x195d   :  { %8096 = vmatprep.subr.bf16.mxu1 %v11081_v9  ;;  %v4137_v61 = vsel %vm346_vm2, %v4129_v0, 0 }
0x195f   :  { %8085 = vmatpush3.bf16.xpose.msra.mxu0 %v3819_v19 }
0x1960   :  { %8447 = vmatprep.subr.msk.bf16.mxu0 %vm346_vm2, %v3913_v1 }
0x1963   :  { %8093 = vmatmul.mubr.msk.bf16.vlgmr.msra.gmra.mrb[132].mxu1 %vm346_vm2, %v10039_v47 }
0x1964   :  { %8097 = vmatpush3.bf16.xpose.msra.mxu1 %v3924_v39  ;;  %8100 = vmatprep.mubr.msk.bf16.mxu1 %vm8979_vm1, %v11081_v9 }
0x1965   :  { %8098 = vmatprep.subr.bf16.mxu1 %v11081_v9 }
0x1966   :  { %8087 = vmatmul.mubr.msk.bf16.vlgmr.msra.gmra.mrb[128].mxu0 %vm346_vm2, %v9984_v10  ;;  %v4024_v10 = vpop.permute.xlu0 %4023 }
0x1967   :  { %8105 = vmatpush3.bf16.xpose.msra.mxu0 %v3921_v7  ;;  %8106 = vmatprep.mubr.msk.bf16.mxu0 %vm346_vm2, %v3917_v35  ;;  %v4032_v26 = vsel %vm346_vm2, %v4024_v10, 0 }
0x1968   :  { %8110 = vmatprep.subr.bf16.mxu0 %v11081_v9 }
0x196a   :  { %v4125_v28 = vpop.permute.xlu0 %4124 }
0x196b   :  { %v4131_v47 = vsel %vm346_vm2, %v4125_v28, 0 }
0x196c   :  { %8099 = vmatpush3.bf16.xpose.msra.mxu1 %v3927_v17 }
0x196d   :  { %8448 = vmatprep.subr.msk.bf16.mxu1 %vm346_vm2, %v4020_v62 }
0x196e   :  { %8107 = vmatmul.mubr.msk.bf16.vlgmr.msra.gmra.mrb[132].mxu0 %vm346_vm2, %v3919_v2 }
0x196f   :  { %8111 = vmatpush3.bf16.xpose.msra.mxu0 %v4029_v53  ;;  %8114 = vmatprep.mubr.msk.bf16.mxu0 %vm8979_vm1, %v11081_v9 }
0x1970   :  { %8112 = vmatprep.subr.bf16.mxu0 %v11081_v9 }
0x1973   :  { %8101 = vmatmul.mubr.msk.bf16.vlgmr.msra.gmra.mrb[136].mxu1 %vm346_vm2, %v3913_v1 }
0x1974   :  { %8119 = vmatpush3.bf16.xpose.msra.mxu1 %v4026_v8  ;;  %8120 = vmatprep.mubr.msk.bf16.mxu1 %vm346_vm2, %v4022_v56 }
0x1975   :  { %8124 = vmatprep.subr.bf16.mxu1 %v11081_v9 }
0x1977   :  { %8113 = vmatpush3.bf16.xpose.msra.mxu0 %v4032_v26 }
0x1978   :  { %8449 = vmatprep.subr.msk.bf16.mxu0 %vm346_vm2, %v4125_v28 }
0x197b   :  { %8121 = vmatmul.mubr.msk.bf16.vlgmr.msra.gmra.mrb[140].mxu1 %vm346_vm2, %v4024_v10 }
0x197c   :  { %8125 = vmatpush3.bf16.xpose.msra.mxu1 %v4134_v38  ;;  %8128 = vmatprep.mubr.msk.bf16.mxu1 %vm8979_vm1, %v11081_v9 }
0x197d   :  { %8126 = vmatprep.subr.bf16.mxu1 %v11081_v9 }
0x197e   :  { %8115 = vmatmul.mubr.msk.bf16.vlgmr.msra.gmra.mrb[136].mxu0 %vm346_vm2, %v4020_v62 }
0x197f   :  { %8133 = vmatpush3.bf16.xpose.msra.mxu0 %v4131_v47  ;;  %8134 = vmatprep.mubr.msk.bf16.mxu0 %vm346_vm2, %v4127_v36 }
0x1980   :  { %8138 = vmatprep.subr.bf16.mxu0 %v8554_v30 }
0x1984   :  { %8127 = vmatpush3.bf16.xpose.msra.mxu1 %v4137_v61 }
0x1985   :  { %8172 = vmatprep.subr.bf16.mxu1 %v8555_v4 }
0x1986   :  { %8135 = vmatmul.mubr.msk.bf16.vlgmr.msra.gmra.mrb[140].mxu0 %vm346_vm2, %v4129_v0 }
0x1987   :  { %8139 = vmatpush3.bf16.msra.mxu0 %v8554_v30 }
0x198b   :  { %8129 = vmatmul.mubr.msk.bf16.vlgmr.msra.gmra.mrb[144].mxu1 %vm346_vm2, %v4125_v28 }
0x198c   :  { %8173 = vmatpush3.bf16.msra.mxu1 %v8555_v4 }
0x198d   :  { %8214 = vmatprep.subr.bf16.mxu1 %v11081_v9 }
0x1994   :  { %v8038_v59 = vpop.f32.mrb[112].mxu0 }
0x1995   :  { %v3476_v43 = vpop.f32.mrb[113].mxu0 }
0x1996   :  { %v8039_v24 = vpop.f32.mrb[114].mxu0 }
0x1997   :  { %v4238_v11 = vpack.c.bf16 %v8039_v24, %v8038_v59  ;;  %v3479_v13 = vpop.f32.mrb[115].mxu0 }
0x1998   :  { %v4237_v58 = vpack.c.bf16 %v3479_v13, %v3476_v43 }
0x199a   :  { %8140 = vmatprep.mubr.msk.bf16.mxu0 %vm1106_vm3, %v4237_v58  ;;  %8174 = vmatprep.mubr.msk.bf16.mxu1 %vm1106_vm3, %v4237_v58 }
0x199b   :  { %8141 = vmatmul.mubr.msk.bf16.vlgmr.msra.gmra.mrb[144].mxu0 %vm1106_vm3, %v4238_v11  ;;  %8175 = vmatmul.mubr.msk.bf16.vlgmr.msra.gmra.mrb[148].mxu1 %vm1106_vm3, %v4238_v11 }
0x19a3   :  { %v10176_v14 = vpop.f32.mrb[116].mxu1 }
0x19a4   :  { %v8032_v52 = vpop.f32.mrb[117].mxu1 }
0x19a5   :  { %v10178_v54 = vpop.f32.mrb[118].mxu1 }
0x19a6   :  { %v8033_v49 = vpop.f32.mrb[119].mxu1 }
0x1a11   :  { %v8052_v33 = vpop.f32.mrb[116].mxu0 }
0x1a12   :  { %v3584_v23 = vpop.f32.mrb[117].mxu0 }
0x1a13   :  { %v8053_v34 = vpop.f32.mrb[118].mxu0 }
0x1a14   :  { %v4240_v16 = vpack.c.bf16 %v8053_v34, %v8052_v33  ;;  %v3587_v55 = vpop.f32.mrb[119].mxu0 }
0x1a15   :  { %v4239_v57 = vpack.c.bf16 %v3587_v55, %v3584_v23 }
0x1a16   :  { %v10182_v27 = vpop.f32.mrb[120].mxu1 }
0x1a17   :  { %v8046_v41 = vpop.f32.mrb[121].mxu1  ;;  %8144 = vmatprep.mubr.msk.bf16.mxu0 %vm1106_vm3, %v4239_v57  ;;  %8178 = vmatprep.mubr.msk.bf16.mxu1 %vm1106_vm3, %v4239_v57 }
0x1a18   :  { %v10186_v18 = vpop.f32.mrb[122].mxu1  ;;  %8145 = vmatmul.mubr.msk.bf16.gmra.mrb[148].mxu0 %vm1106_vm3, %v4240_v16  ;;  %8179 = vmatmul.mubr.msk.bf16.gmra.mrb[152].mxu1 %vm1106_vm3, %v4240_v16 }
0x1a19   :  { %v8047_v12 = vpop.f32.mrb[123].mxu1 }
0x1a1e   :  { %v8066_v46 = vpop.f32.mrb[124].mxu1 }
0x1a1f   :  { %v3689_v31 = vpop.f32.mrb[125].mxu1 }
0x1a20   :  { %v8067_v20 = vpop.f32.mrb[126].mxu1 }
0x1a21   :  { %v4242_v22 = vpack.c.bf16 %v8067_v20, %v8066_v46  ;;  %v10192_v15 = vpop.f32.mrb[120].mxu0  ;;  %v3692_v21 = vpop.f32.mrb[127].mxu1 }
0x1a22   :  { %v4241_v50 = vpack.c.bf16 %v3692_v21, %v3689_v31  ;;  %v8060_v37 = vpop.f32.mrb[121].mxu0 }
0x1a23   :  { %v10194_v51 = vpop.f32.mrb[122].mxu0 }
0x1a24   :  { %v8061_v40 = vpop.f32.mrb[123].mxu0  ;;  %8148 = vmatprep.mubr.msk.bf16.mxu0 %vm1106_vm3, %v4241_v50  ;;  %8182 = vmatprep.mubr.msk.bf16.mxu1 %vm1106_vm3, %v4241_v50 }
0x1a25   :  { %8149 = vmatmul.mubr.msk.bf16.gmra.mrb[152].mxu0 %vm1106_vm3, %v4242_v22  ;;  %8183 = vmatmul.mubr.msk.bf16.gmra.mrb[156].mxu1 %vm1106_vm3, %v4242_v22 }
0x1a29   :  { %v8080_v25 = vpop.f32.mrb[124].mxu0 }
0x1a2a   :  { %v3794_v32 = vpop.f32.mrb[125].mxu0 }
0x1a2b   :  { %v8081_v2 = vpop.f32.mrb[126].mxu0 }
0x1a2c   :  { %v4244_v6 = vpack.c.bf16 %v8081_v2, %v8080_v25  ;;  %v3797_v19 = vpop.f32.mrb[127].mxu0 }
0x1a2d   :  { %v4243_v35 = vpack.c.bf16 %v3797_v19, %v3794_v32 }
0x1a2e   :  { %v10202_v1 = vpop.f32.mrb[128].mxu1 }
0x1a2f   :  { %v8074_v39 = vpop.f32.mrb[129].mxu1  ;;  %8152 = vmatprep.mubr.msk.bf16.mxu0 %vm1106_vm3, %v4243_v35  ;;  %8186 = vmatprep.mubr.msk.bf16.mxu1 %vm1106_vm3, %v4243_v35 }
0x1a30   :  { %v10206_v62 = vpop.f32.mrb[130].mxu1  ;;  %8153 = vmatmul.mubr.msk.bf16.gmra.mrb[156].mxu0 %vm1106_vm3, %v4244_v6  ;;  %8187 = vmatmul.mubr.msk.bf16.gmra.mrb[160].mxu1 %vm1106_vm3, %v4244_v6 }
0x1a31   :  { %v8075_v56 = vpop.f32.mrb[131].mxu1 }
0x1a36   :  { %v8094_v17 = vpop.f32.mrb[132].mxu1 }
0x1a37   :  { %v3896_v53 = vpop.f32.mrb[133].mxu1 }
0x1a38   :  { %v8095_v10 = vpop.f32.mrb[134].mxu1 }
0x1a39   :  { %v4246_v8 = vpack.c.bf16 %v8095_v10, %v8094_v17  ;;  %v10212_v26 = vpop.f32.mrb[128].mxu0  ;;  %v3899_v28 = vpop.f32.mrb[135].mxu1  ;;  %v10254_v17 = vld [vmem:[#allocation5 + $0x2] ss:$0 sm:$0xff]  ;;  %v10256_v10 = vld [vmem:[#allocation5 + $0x3] ss:$0 sm:$0xff] }
0x1a3a   :  { %v4245_v36 = vpack.c.bf16 %v3899_v28, %v3896_v53  ;;  %v8088_v38 = vpop.f32.mrb[129].mxu0 }
0x1a3b   :  { %v10214_v30 = vpop.f32.mrb[130].mxu0 }
0x1a3c   :  { %v8089_v0 = vpop.f32.mrb[131].mxu0  ;;  %8156 = vmatprep.mubr.msk.bf16.mxu0 %vm1106_vm3, %v4245_v36  ;;  %8190 = vmatprep.mubr.msk.bf16.mxu1 %vm1106_vm3, %v4245_v36 }
0x1a3d   :  { %8157 = vmatmul.mubr.msk.bf16.gmra.mrb[160].mxu0 %vm1106_vm3, %v4246_v8  ;;  %8191 = vmatmul.mubr.msk.bf16.gmra.mrb[164].mxu1 %vm1106_vm3, %v4246_v8 }
0x1a41   :  { %v8108_v4 = vpop.f32.mrb[132].mxu0 }
0x1a42   :  { %v4004_v61 = vpop.f32.mrb[133].mxu0 }
0x1a43   :  { %v8109_v59 = vpop.f32.mrb[134].mxu0 }
0x1a44   :  { %v4248_v43 = vpack.c.bf16 %v8109_v59, %v8108_v4  ;;  %v4007_v24 = vpop.f32.mrb[135].mxu0 }
0x1a45   :  { %v4247_v11 = vpack.c.bf16 %v4007_v24, %v4004_v61 }
0x1a46   :  { %v10222_v13 = vpop.f32.mrb[136].mxu1 }
0x1a47   :  { %11106 = vst [vmem:[#allocation11_spill] sm:$0xff] %v10222_v13  ;;  %v8102_v58 = vpop.f32.mrb[137].mxu1  ;;  %8160 = vmatprep.mubr.msk.bf16.mxu0 %vm1106_vm3, %v4247_v11  ;;  %8194 = vmatprep.mubr.msk.bf16.mxu1 %vm1106_vm3, %v4247_v11 }
0x1a48   :  { %v10226_v52 = vpop.f32.mrb[138].mxu1  ;;  %8161 = vmatmul.mubr.msk.bf16.gmra.mrb[164].mxu0 %vm1106_vm3, %v4248_v43  ;;  %8195 = vmatmul.mubr.msk.bf16.gmra.mrb[168].mxu1 %vm1106_vm3, %v4248_v43 }
0x1a49   :  { %11107 = vst [vmem:[#allocation12_spill] sm:$0xff] %v10226_v52  ;;  %v8103_v33 = vpop.f32.mrb[139].mxu1 }
0x1a4e   :  { %v8122_v23 = vpop.f32.mrb[140].mxu1 }
0x1a4f   :  { %v4109_v34 = vpop.f32.mrb[141].mxu1 }
0x1a50   :  { %v8123_v16 = vpop.f32.mrb[142].mxu1 }
0x1a51   :  { %v4250_v55 = vpack.c.bf16 %v8123_v16, %v8122_v23  ;;  %v10232_v57 = vpop.f32.mrb[136].mxu0  ;;  %v4112_v41 = vpop.f32.mrb[143].mxu1 }
0x1a52   :  { %11108 = vst [vmem:[#allocation13_spill] sm:$0xff] %v10232_v57  ;;  %v4249_v12 = vpack.c.bf16 %v4112_v41, %v4109_v34  ;;  %v8116_v46 = vpop.f32.mrb[137].mxu0 }
0x1a53   :  { %v10234_v31 = vpop.f32.mrb[138].mxu0 }
0x1a54   :  { %11109 = vst [vmem:[#allocation14_spill] sm:$0xff] %v10234_v31  ;;  %v8117_v22 = vpop.f32.mrb[139].mxu0  ;;  %8164 = vmatprep.mubr.msk.bf16.mxu0 %vm1106_vm3, %v4249_v12  ;;  %8198 = vmatprep.mubr.msk.bf16.mxu1 %vm1106_vm3, %v4249_v12 }
0x1a55   :  { %8165 = vmatmul.mubr.msk.bf16.gmra.mrb[168].mxu0 %vm1106_vm3, %v4250_v55  ;;  %8199 = vmatmul.mubr.msk.bf16.gmra.mrb[172].mxu1 %vm1106_vm3, %v4250_v55 }
0x1a59   :  { %v8136_v21 = vpop.f32.mrb[140].mxu0 }
0x1a5a   :  { %v4214_v50 = vpop.f32.mrb[141].mxu0 }
0x1a5b   :  { %v8137_v37 = vpop.f32.mrb[142].mxu0 }
0x1a5c   :  { %v4252_v40 = vpack.c.bf16 %v8137_v37, %v8136_v21  ;;  %v4217_v25 = vpop.f32.mrb[143].mxu0 }
0x1a5d   :  { %v4251_v32 = vpack.c.bf16 %v4217_v25, %v4214_v50 }
0x1a5e   :  { %v10242_v2 = vpop.f32.mrb[144].mxu1 }
0x1a5f   :  { %11110 = vst [vmem:[#allocation15_spill] sm:$0xff] %v10242_v2  ;;  %v8130_v6 = vpop.f32.mrb[145].mxu1  ;;  %8168 = vmatprep.mubr.msk.bf16.mxu0 %vm1106_vm3, %v4251_v32  ;;  %8202 = vmatprep.mubr.msk.bf16.mxu1 %vm1106_vm3, %v4251_v32 }
0x1a60   :  { %v10246_v19 = vpop.f32.mrb[146].mxu1  ;;  %8169 = vmatmul.mubr.msk.bf16.gmra.mrb[172].mxu0 %vm1106_vm3, %v4252_v40  ;;  %8203 = vmatmul.mubr.msk.bf16.gmra.mrb[176].mxu1 %vm1106_vm3, %v4252_v40 }
0x1a61   :  { %11111 = vst [vmem:[#allocation16_spill] sm:$0xff] %v10246_v19  ;;  %v8131_v39 = vpop.f32.mrb[147].mxu1  ;;  %8218 = vmatprep.mubr.msk.bf16.mxu1 %vm8979_vm1, %v11081_v9 }
0x1a6e   :  { %v8142_v56 = vpop.f32.mrb[144].mxu0  ;;  %v8176_v53 = vpop.f32.mrb[148].mxu1 }
0x1a6f   :  { %v4345_v8 = vpop.f32.mrb[145].mxu0  ;;  %v4516_v28 = vpop.f32.mrb[149].mxu1  ;;  %v4354_v0 = vadd.f32 %v8142_v56, %v10254_v17  ;;  %v4525_v4 = vadd.f32 %v8176_v53, %v10256_v10 }
0x1a70   :  { %v8143_v36 = vpop.f32.mrb[146].mxu0  ;;  %v8177_v38 = vpop.f32.mrb[150].mxu1  ;;  %v4346_v11 = vadd.f32 %v10254_v17, %v4345_v8  ;;  %v4517_v58 = vadd.f32 %v10256_v10, %v4516_v28 }
0x1a71   :  { %v4357_v61 = vadd.f32 %v8143_v36, %v10254_v17  ;;  %v4528_v59 = vadd.f32 %v8177_v38, %v10256_v10  ;;  %v4348_v43 = vpop.f32.mrb[147].mxu0  ;;  %v4519_v24 = vpop.f32.mrb[151].mxu1 }
0x1a72   :  { %v4349_v33 = vadd.f32 %v10254_v17, %v4348_v43  ;;  %v4520_v23 = vadd.f32 %v10256_v10, %v4519_v24 }
0x1a73   :  { %v4648_v34 = vpack.c.bf16 %v4357_v61, %v4354_v0  ;;  %v4650_v16 = vpack.c.bf16 %v4528_v59, %v4525_v4 }
0x1a74   :  { %v4647_v55 = vpack.c.bf16 %v4349_v33, %v4346_v11  ;;  %v4649_v41 = vpack.c.bf16 %v4520_v23, %v4517_v58 }
0x1a75   :  { %v4661_v46 = vsel %vm346_vm2, %v4650_v16, 0 }
0x1a76   :  { %8450 = vmatprep.subr.msk.bf16.mxu0 %vm346_vm2, %v4649_v41  ;;  %8210 = vmatprep.mubr.msk.bf16.mxu0 %vm346_vm2, %v4647_v55  ;;  %v4658_v12 = vsel %vm346_vm2, %v4649_v41, 0 }
0x1a77   :  { %8207 = vmatpush3.bf16.xpose.msra.mxu0 %v4658_v12 }
0x1a78   :  { %8451 = vmatprep.subr.msk.bf16.mxu0 %vm346_vm2, %v4650_v16 }
0x1a7f   :  { %8209 = vmatpush3.bf16.xpose.msra.mxu0 %v4661_v46 }
0x1a80   :  { %8222 = vmatprep.subr.bf16.mxu0 %v11081_v9 }
0x1a86   :  { %8211 = vmatmul.mubr.msk.bf16.vlgmr.msra.gmra.mrb[176].mxu0 %vm346_vm2, %v4648_v34 }
0x1a87   :  { %8223 = vmatpush3.bf16.msra.mxu0 %v10078_v60  ;;  %8226 = vmatprep.mubr.msk.bf16.mxu0 %vm8979_vm1, %v11081_v9 }
0x1a88   :  { %8224 = vmatprep.subr.bf16.mxu0 %v11081_v9 }
0x1a8b   :  { %8225 = vmatpush3.bf16.msra.mxu0 %v10076_v42 }
0x1a8c   :  { %8238 = vmatprep.subr.bf16.mxu0 %v11081_v9 }
0x1aeb   :  { %v8146_v22 = vpop.f32.mrb[148].mxu0  ;;  %v8180_v21 = vpop.f32.mrb[152].mxu1 }
0x1aec   :  { %v4361_v50 = vpop.f32.mrb[149].mxu0  ;;  %v4532_v37 = vpop.f32.mrb[153].mxu1  ;;  %v10280_v32 = vadd.f32 %v8146_v22, %v10254_v17  ;;  %v4541_v6 = vadd.f32 %v8180_v21, %v10256_v10 }
0x1aed   :  { %v8147_v40 = vpop.f32.mrb[150].mxu0  ;;  %v8181_v25 = vpop.f32.mrb[154].mxu1  ;;  %v10288_v28 = vadd.f32 %v10254_v17, %v4361_v50  ;;  %v4533_v36 = vadd.f32 %v10256_v10, %v4532_v37 }
0x1aee   :  { %v10284_v39 = vadd.f32 %v8147_v40, %v10254_v17  ;;  %v4544_v56 = vadd.f32 %v8181_v25, %v10256_v10  ;;  %v4364_v53 = vpop.f32.mrb[151].mxu0  ;;  %v4535_v8 = vpop.f32.mrb[155].mxu1 }
0x1aef   :  { %v10292_v38 = vadd.f32 %v10254_v17, %v4364_v53  ;;  %v4536_v0 = vadd.f32 %v10256_v10, %v4535_v8 }
0x1af0   :  { %v10297_v61 = vpack.c.bf16 %v4544_v56, %v4541_v6 }
0x1af1   :  { %v10301_v43 = vpack.c.bf16 %v4536_v0, %v4533_v36 }
0x1af8   :  { %v8150_v24 = vpop.f32.mrb[152].mxu0  ;;  %v8184_v11 = vpop.f32.mrb[156].mxu1 }
0x1af9   :  { %v4377_v58 = vpop.f32.mrb[153].mxu0  ;;  %v4548_v33 = vpop.f32.mrb[157].mxu1  ;;  %v10304_v16 = vadd.f32 %v8150_v24, %v10254_v17  ;;  %v4557_v55 = vadd.f32 %v8184_v11, %v10256_v10 }
0x1afa   :  { %v8151_v23 = vpop.f32.mrb[154].mxu0  ;;  %v8185_v34 = vpop.f32.mrb[158].mxu1  ;;  %v10312_v21 = vadd.f32 %v10254_v17, %v4377_v58  ;;  %v4549_v50 = vadd.f32 %v10256_v10, %v4548_v33 }
0x1afb   :  { %v10308_v41 = vadd.f32 %v8151_v23, %v10254_v17  ;;  %v4560_v12 = vadd.f32 %v8185_v34, %v10256_v10  ;;  %v4380_v46 = vpop.f32.mrb[155].mxu0  ;;  %v4551_v22 = vpop.f32.mrb[159].mxu1 }
0x1afc   :  { %v10316_v37 = vadd.f32 %v10254_v17, %v4380_v46  ;;  %v4552_v40 = vadd.f32 %v10256_v10, %v4551_v22 }
0x1afd   :  { %v10321_v6 = vpack.c.bf16 %v4560_v12, %v4557_v55 }
0x1afe   :  { %v10325_v53 = vpack.c.bf16 %v4552_v40, %v4549_v50 }
0x1b03   :  { %v8154_v8 = vpop.f32.mrb[156].mxu0  ;;  %v8188_v36 = vpop.f32.mrb[160].mxu1 }
0x1b04   :  { %v4393_v0 = vpop.f32.mrb[157].mxu0  ;;  %v4564_v24 = vpop.f32.mrb[161].mxu1  ;;  %v10328_v33 = vadd.f32 %v8154_v8, %v10254_v17  ;;  %v4573_v23 = vadd.f32 %v8188_v36, %v10256_v10 }
0x1b05   :  { %v8155_v11 = vpop.f32.mrb[158].mxu0  ;;  %v8189_v58 = vpop.f32.mrb[162].mxu1  ;;  %v10336_v22 = vadd.f32 %v10254_v17, %v4393_v0  ;;  %v4565_v50 = vadd.f32 %v10256_v10, %v4564_v24 }
0x1b06   :  { %v10332_v34 = vadd.f32 %v8155_v11, %v10254_v17  ;;  %v4576_v55 = vadd.f32 %v8189_v58, %v10256_v10  ;;  %v4396_v12 = vpop.f32.mrb[159].mxu0  ;;  %v4567_v46 = vpop.f32.mrb[163].mxu1 }
0x1b07   :  { %v10340_v40 = vadd.f32 %v10254_v17, %v4396_v12  ;;  %v4568_v8 = vadd.f32 %v10256_v10, %v4567_v46 }
0x1b08   :  { %v10345_v35 = vpack.c.bf16 %v4576_v55, %v4573_v23 }
0x1b09   :  { %v10349_v58 = vpack.c.bf16 %v4568_v8, %v4565_v50 }
0x1b10   :  { %v8158_v20 = vpop.f32.mrb[160].mxu0  ;;  %v8192_v0 = vpop.f32.mrb[164].mxu1 }
0x1b11   :  { %v4409_v49 = vpop.f32.mrb[161].mxu0  ;;  %v4580_v47 = vpop.f32.mrb[165].mxu1  ;;  %v10352_v12 = vadd.f32 %v8158_v20, %v10254_v17  ;;  %v4589_v46 = vadd.f32 %v8192_v0, %v10256_v10 }
0x1b12   :  { %v8159_v24 = vpop.f32.mrb[162].mxu0  ;;  %v8193_v5 = vpop.f32.mrb[166].mxu1  ;;  %v10360_v50 = vadd.f32 %v10254_v17, %v4409_v49  ;;  %v4581_v8 = vadd.f32 %v10256_v10, %v4580_v47 }
0x1b13   :  { %v10356_v7 = vadd.f32 %v8159_v24, %v10254_v17  ;;  %v4592_v23 = vadd.f32 %v8193_v5, %v10256_v10  ;;  %v4412_v55 = vpop.f32.mrb[163].mxu0  ;;  %v4583_v36 = vpop.f32.mrb[167].mxu1 }
0x1b14   :  { %v10364_v11 = vadd.f32 %v10254_v17, %v4412_v55  ;;  %v4584_v20 = vadd.f32 %v10256_v10, %v4583_v36 }
0x1b15   :  { %v10369_v63 = vpack.c.bf16 %v4592_v23, %v4589_v46 }
0x1b16   :  { %v10373_v24 = vpack.c.bf16 %v4584_v20, %v4581_v8 }
0x1b1b   :  { %v8162_v25 = vpop.f32.mrb[164].mxu0  ;;  %v8196_v49 = vpop.f32.mrb[168].mxu1 }
0x1b1c   :  { %v4425_v56 = vpop.f32.mrb[165].mxu0  ;;  %v4596_v44 = vpop.f32.mrb[169].mxu1  ;;  %v10376_v55 = vadd.f32 %v8162_v25, %v10254_v17  ;;  %v4605_v36 = vadd.f32 %v8196_v49, %v10256_v10 }
0x1b1d   :  { %v8163_v47 = vpop.f32.mrb[166].mxu0  ;;  %v8197_v4 = vpop.f32.mrb[170].mxu1  ;;  %v10384_v8 = vadd.f32 %v10254_v17, %v4425_v56  ;;  %v4597_v20 = vadd.f32 %v10256_v10, %v4596_v44 }
0x1b1e   :  { %11112 = vst [vmem:[#allocation17_spill] sm:$0xff] %v10376_v55  ;;  %v10380_v0 = vadd.f32 %v8163_v47, %v10254_v17  ;;  %v4608_v46 = vadd.f32 %v8197_v4, %v10256_v10  ;;  %v4428_v23 = vpop.f32.mrb[167].mxu0  ;;  %v4599_v5 = vpop.f32.mrb[171].mxu1 }
0x1b1f   :  { %11114 = vst [vmem:[#allocation19_spill] sm:$0xff] %v10384_v8  ;;  %v10388_v59 = vadd.f32 %v10254_v17, %v4428_v23  ;;  %v4600_v25 = vadd.f32 %v10256_v10, %v4599_v5 }
0x1b20   :  { %11113 = vst [vmem:[#allocation18_spill] sm:$0xff] %v10380_v0  ;;  %v10393_v48 = vpack.c.bf16 %v4608_v46, %v4605_v36 }
0x1b21   :  { %v10397_v47 = vpack.c.bf16 %v4600_v25, %v4597_v20 }
0x1b22   :  { %11115 = vst [vmem:[#allocation20_spill] sm:$0xff] %v10393_v48 }
0x1b28   :  { %v8166_v2 = vpop.f32.mrb[168].mxu0  ;;  %v8200_v56 = vpop.f32.mrb[172].mxu1 }
0x1b29   :  { %v4441_v19 = vpop.f32.mrb[169].mxu0  ;;  %v4612_v57 = vpop.f32.mrb[173].mxu1  ;;  %v10400_v23 = vadd.f32 %v8166_v2, %v10254_v17  ;;  %v4621_v5 = vadd.f32 %v8200_v56, %v10256_v10 }
0x1b2a   :  { %v8167_v44 = vpop.f32.mrb[170].mxu0  ;;  %v8201_v31 = vpop.f32.mrb[174].mxu1  ;;  %v10408_v20 = vadd.f32 %v10254_v17, %v4441_v19  ;;  %v4613_v25 = vadd.f32 %v10256_v10, %v4612_v57 }
0x1b2b   :  { %11116 = vst [vmem:[#allocation21_spill] sm:$0xff] %v10400_v23  ;;  %v10404_v49 = vadd.f32 %v8167_v44, %v10254_v17  ;;  %v4624_v36 = vadd.f32 %v8201_v31, %v10256_v10  ;;  %v4444_v46 = vpop.f32.mrb[171].mxu0  ;;  %v4615_v4 = vpop.f32.mrb[175].mxu1 }
0x1b2c   :  { %11118 = vst [vmem:[#allocation23_spill] sm:$0xff] %v10408_v20  ;;  %v10412_v13 = vadd.f32 %v10254_v17, %v4444_v46  ;;  %v4616_v2 = vadd.f32 %v10256_v10, %v4615_v4 }
0x1b2d   :  { %11117 = vst [vmem:[#allocation22_spill] sm:$0xff] %v10404_v49  ;;  %v10417_v52 = vpack.c.bf16 %v4624_v36, %v4621_v5 }
0x1b2e   :  { %11119 = vst [vmem:[#allocation24_spill] sm:$0xff] %v10412_v13  ;;  %v10421_v44 = vpack.c.bf16 %v4616_v2, %v4613_v25 }
0x1b2f   :  { %11120 = vst [vmem:[#allocation25_spill] sm:$0xff] %v10417_v52  ;;  %v10447_v52 = vld [vmem:[#allocation2] sm:$0x3] }
0x1b33   :  { %v8170_v55 = vpop.f32.mrb[172].mxu0  ;;  %v8204_v19 = vpop.f32.mrb[176].mxu1 }
0x1b34   :  { %v4457_v0 = vpop.f32.mrb[173].mxu0  ;;  %v4628_v48 = vpop.f32.mrb[177].mxu1  ;;  %v10424_v46 = vadd.f32 %v8170_v55, %v10254_v17  ;;  %v4637_v4 = vadd.f32 %v8204_v19, %v10256_v10 }
0x1b35   :  { %v8171_v57 = vpop.f32.mrb[174].mxu0  ;;  %v8205_v8 = vpop.f32.mrb[178].mxu1  ;;  %v10432_v25 = vadd.f32 %v10254_v17, %v4457_v0  ;;  %v4629_v2 = vadd.f32 %v10256_v10, %v4628_v48  ;;  %v11127_v0 = vsub.s32 0, %v9482_v29 }
0x1b36   :  { %11121 = vst [vmem:[#allocation26_spill] sm:$0xff] %v10424_v46  ;;  %v10428_v56 = vadd.f32 %v8171_v57, %v10254_v17  ;;  %v4640_v5 = vadd.f32 %v8205_v8, %v10256_v10  ;;  %v4460_v36 = vpop.f32.mrb[175].mxu0  ;;  %v4631_v31 = vpop.f32.mrb[179].mxu1 }
0x1b37   :  { %11123 = vst [vmem:[#allocation28_spill] sm:$0xff] %v10432_v25  ;;  %v10436_v23 = vadd.f32 %v10254_v17, %v4460_v36  ;;  %v4632_v55 = vadd.f32 %v10256_v10, %v4631_v31  ;;  %v10452_v48 = vrot.slane %v10447_v52, %v11127_v0 }
0x1b38   :  { %11122 = vst [vmem:[#allocation27_spill] sm:$0xff] %v10428_v56  ;;  %v10441_v49 = vpack.c.bf16 %v4640_v5, %v4637_v4 }
0x1b39   :  { %11124 = vst [vmem:[#allocation29_spill] sm:$0xff] %v10436_v23  ;;  %v10445_v57 = vpack.c.bf16 %v4632_v55, %v4629_v2 }
0x1b3a   :  { %11125 = vst [vmem:[#allocation30_spill] sm:$0xff] %v10441_v49 }
0x1b3b   :  { %11126 = vst [vmem:[#allocation31_spill] sm:$0xff] %v10445_v57 }
0x1b59   :  { %v8212_v17 = vpop.f32.mrb[176].mxu0 }
0x1b5a   :  { %v4697_v36 = vpop.f32.mrb[177].mxu0  ;;  %v4714_v4 = vmul.f32 0.35355338, %v8212_v17 }
0x1b5b   :  { %v4712_v10 = vmul.f32 0.35355338, %v4697_v36  ;;  %v8213_v31 = vpop.f32.mrb[178].mxu0 }
0x1b5c   :  { %v4715_v20 = vmul.f32 0.35355338, %v8213_v31  ;;  %v4700_v19 = vpop.f32.mrb[179].mxu0  ;;  %v4718_v0 = vadd.f32 %v4714_v4, %v10452_v48 }
0x1b5d   :  { %v4713_v5 = vmul.f32 0.35355338, %v4700_v19  ;;  %v4716_v46 = vadd.f32 %v4712_v10, %v10452_v48 }
0x1b5e   :  { %v4719_v8 = vadd.f32 %v4715_v20, %v10452_v48  ;;  %v4726_v17 = vsel %vm129_vm0, %v4718_v0, -inf }
0x1b5f   :  { %v4717_v2 = vadd.f32 %v4713_v5, %v10452_v48  ;;  %v4720_v55 = vsel %vm129_vm0, %v4716_v46, -inf }
0x1b60   :  { %4721 = vmax.xlane.f32.xlu1 %v4720_v55  ;;  %v4729_v36 = vsel %vm129_vm0, %v4719_v8, -inf }
0x1b61   :  { %v4723_v56 = vsel %vm129_vm0, %v4717_v2, -inf }
0x1b62   :  { %4724 = vmax.xlane.f32.xlu0 %v4723_v56 }
0x1b64   :  { %4730 = vmax.xlane.f32.xlu1 %v4729_v36 }
0x1b66   :  { %4727 = vmax.xlane.f32.xlu0 %v4726_v17 }
0x1bed   :  { %v4722_v19 = vpop.xlane.xlu1 %4721 }
0x1bee   :  { %v4732_v10 = vsub.f32 %v4716_v46, %v4722_v19 }
0x1bef   :  { %v4725_v31 = vpop.xlane.xlu0 %4724 }
0x1bf0   :  { %v4736_v5 = vmul.f32 1.442695, %v4732_v10  ;;  %v4733_v49 = vsub.f32 %v4717_v2, %v4725_v31 }
0x1bf1   :  { %v4731_v25 = vpop.xlane.xlu1 %4730 }
0x1bf2   :  { %8692 = vpow2.f32 %v4736_v5  ;;  %v4738_v20 = vmul.f32 1.442695, %v4733_v49  ;;  %v4735_v55 = vsub.f32 %v4719_v8, %v4731_v25 }
0x1bf3   :  { %v4728_v23 = vpop.xlane.xlu0 %4727 }
0x1bf4   :  { %8694 = vpow2.f32 %v4738_v20  ;;  %v4742_v4 = vmul.f32 1.442695, %v4735_v55  ;;  %v4734_v57 = vsub.f32 %v4718_v0, %v4728_v23 }
0x1bf6   :  { %8696 = vpow2.f32 %v4742_v4  ;;  %v4740_v56 = vmul.f32 1.442695, %v4734_v57 }
0x1bf8   :  { %8698 = vpow2.f32 %v4740_v56 }
0x1bfc   :  { %v8693_v36 = vpop.eup %8692 }
0x1bfd   :  { %v4744_v13 = vsel %vm129_vm0, %v8693_v36, 0.0 }
0x1bfe   :  { %v8695_v17 = vpop.eup %8694  ;;  %4745 = vadd.xlane.f32.xlu0 %v4744_v13 }
0x1bff   :  { %v4747_v46 = vsel %vm129_vm0, %v8695_v17, 0.0 }
0x1c00   :  { %v8697_v19 = vpop.eup %8696  ;;  %4748 = vadd.xlane.f32.xlu1 %v4747_v46 }
0x1c01   :  { %v4753_v49 = vsel %vm129_vm0, %v8697_v19, 0.0 }
0x1c02   :  { %v8699_v2 = vpop.eup %8698 }
0x1c03   :  { %v4750_v25 = vsel %vm129_vm0, %v8699_v2, 0.0 }
0x1c04   :  { %4754 = vadd.xlane.f32.xlu1 %v4753_v49  ;;  %4751 = vadd.xlane.f32.xlu0 %v4750_v25 }
0x1c8b   :  { %v4746_v23 = vpop.xlane.xlu0 %4745 }
0x1c8c   :  { %8700 = vrcp.f32 %v4746_v23 }
0x1c8d   :  { %v4749_v8 = vpop.xlane.xlu1 %4748 }
0x1c8e   :  { %8702 = vrcp.f32 %v4749_v8  ;;  %v11130_v8 = vpack.c.bf16 %v10284_v39, %v10280_v32 }
0x1c91   :  { %v4755_v57 = vpop.xlane.xlu1 %4754  ;;  %v4752_v0 = vpop.xlane.xlu0 %4751 }
0x1c92   :  { %8704 = vrcp.f32 %v4755_v57 }
0x1c93   :  { %8706 = vrcp.f32 %v4752_v0 }
0x1c96   :  { %v8701_v13 = vpop.eup %8700 }
0x1c97   :  { %v4760_v31 = vmul.f32 %v8701_v13, %v8693_v36  ;;  %v11128_v36 = vpack.c.bf16 %v10178_v54, %v10176_v14 }
0x1c98   :  { %v8703_v10 = vpop.eup %8702 }
0x1c99   :  { %v4761_v5 = vmul.f32 %v8703_v10, %v8695_v17  ;;  %v4901_v17 = vsel %vm346_vm2, %v10301_v43, 0 }
0x1c9b   :  { %v4765_v20 = vpack.c.bf16 %v4761_v5, %v4760_v31 }
0x1c9c   :  { %v8705_v55 = vpop.eup %8704 }
0x1c9d   :  { %v8707_v4 = vpop.eup %8706  ;;  %v4771_v56 = vsel %vm129_vm0, %v4765_v20, 0  ;;  %v4763_v46 = vmul.f32 %v8705_v55, %v8697_v19  ;;  %v11129_v19 = vpack.c.bf16 %v10292_v38, %v10288_v28 }
0x1c9e   :  { %8215 = vmatpush3.bf16.xpose.msra.mxu1 %v4771_v56  ;;  %v4762_v49 = vmul.f32 %v8707_v4, %v8699_v2  ;;  %v4904_v2 = vsel %vm346_vm2, %v10297_v61, 0 }
0x1c9f   :  { %8216 = vmatprep.subr.bf16.mxu1 %v11081_v9 }
0x1ca0   :  { %v4766_v25 = vpack.c.bf16 %v4763_v46, %v4762_v49 }
0x1ca2   :  { %v4774_v23 = vsel %vm129_vm0, %v4766_v25, 0 }
0x1ca6   :  { %8217 = vmatpush3.bf16.xpose.msra.mxu1 %v4774_v23 }
0x1ca7   :  { %8452 = vmatprep.subr.msk.bf16.mxu1 %vm346_vm2, %v10301_v43 }
0x1cad   :  { %8219 = vmatmul.mubr.msk.bf16.vlgmr.msra.gmra.mrb[180].mxu1 %vm129_vm0, %v11128_v36 }
0x1cae   :  { %8231 = vmatpush3.bf16.xpose.msra.mxu1 %v4901_v17  ;;  %8234 = vmatprep.mubr.msk.bf16.mxu1 %vm346_vm2, %v11129_v19 }
0x1caf   :  { %8453 = vmatprep.subr.msk.bf16.mxu1 %vm346_vm2, %v10297_v61 }
0x1cb6   :  { %8233 = vmatpush3.bf16.xpose.msra.mxu1 %v4904_v2 }
0x1cb7   :  { %8246 = vmatprep.subr.bf16.mxu1 %v11081_v9 }
0x1cbd   :  { %8235 = vmatmul.mubr.msk.bf16.vlgmr.msra.gmra.mrb[184].mxu1 %vm346_vm2, %v11130_v8 }
0x1cbe   :  { %8250 = vmatprep.mubr.msk.bf16.mxu1 %vm8979_vm1, %v11081_v9 }
0x1d80   :  { %v4810_v28 = vpop.f32.mrb[180].mxu1 }
0x1d81   :  { %v4817_v38 = vadd.f32 %v4810_v28, %v10176_v14  ;;  %v8220_v43 = vpop.f32.mrb[181].mxu1 }
0x1d82   :  { %v4813_v57 = vpop.f32.mrb[182].mxu1 }
0x1d83   :  { %v4818_v0 = vadd.f32 %v4813_v57, %v10178_v54  ;;  %v8221_v13 = vpop.f32.mrb[183].mxu1  ;;  %v4819_v55 = vadd.f32 %v4817_v38, %v10452_v48 }
0x1d85   :  { %v4820_v46 = vadd.f32 %v4818_v0, %v10452_v48  ;;  %v4821_v23 = vsel %vm129_vm0, %v4819_v55, -inf }
0x1d87   :  { %v4824_v17 = vsel %vm129_vm0, %v4820_v46, -inf }
0x1d90   :  { %v8236_v61 = vpop.f32.mrb[184].mxu1 }
0x1d91   :  { %v4940_v10 = vpop.f32.mrb[185].mxu1  ;;  %v4957_v4 = vmul.f32 0.35355338, %v8236_v61 }
0x1d92   :  { %v4955_v31 = vmul.f32 0.35355338, %v4940_v10  ;;  %v8237_v5 = vpop.f32.mrb[186].mxu1 }
0x1d93   :  { %v4943_v20 = vpop.f32.mrb[187].mxu1  ;;  %v4958_v54 = vmul.f32 0.35355338, %v8237_v5  ;;  %v4961_v25 = vadd.f32 %v4957_v4, %v10452_v48 }
0x1d94   :  { %v4959_v32 = vadd.f32 %v4955_v31, %v10452_v48  ;;  %v4956_v39 = vmul.f32 0.35355338, %v4943_v20 }
0x1d95   :  { %v4962_v36 = vadd.f32 %v4958_v54, %v10452_v48  ;;  %v4969_v19 = vsel %vm129_vm0, %v4961_v25, -inf }
0x1d96   :  { %v4960_v56 = vadd.f32 %v4956_v39, %v10452_v48  ;;  %v4963_v14 = vsel %vm129_vm0, %v4959_v32, -inf }
0x1d97   :  { %4964 = vmax.xlane.f32.xlu0 %v4963_v14  ;;  %v4972_v2 = vsel %vm129_vm0, %v4962_v36, -inf }
0x1d98   :  { %v4966_v49 = vsel %vm129_vm0, %v4960_v56, -inf }
0x1d99   :  { %4967 = vmax.xlane.f32.xlu1 %v4966_v49 }
0x1d9b   :  { %4822 = vmax.xlane.f32.xlu0 %v4821_v23 }
0x1d9d   :  { %4825 = vmax.xlane.f32.xlu1 %v4824_v17 }
0x1d9f   :  { %4970 = vmax.xlane.f32.xlu0 %v4969_v19 }
0x1da1   :  { %4973 = vmax.xlane.f32.xlu1 %v4972_v2 }
0x1e24   :  { %v4965_v8 = vpop.xlane.xlu0 %4964 }
0x1e25   :  { %v4975_v28 = vsub.f32 %v4959_v32, %v4965_v8 }
0x1e26   :  { %v4968_v38 = vpop.xlane.xlu1 %4967 }
0x1e27   :  { %v4979_v43 = vmul.f32 1.442695, %v4975_v28  ;;  %v4976_v57 = vsub.f32 %v4960_v56, %v4968_v38 }
0x1e28   :  { %v4823_v0 = vpop.xlane.xlu0 %4822 }
0x1e29   :  { %8708 = vpow2.f32 %v4979_v43  ;;  %v4981_v13 = vmul.f32 1.442695, %v4976_v57  ;;  %v4827_v61 = vsub.f32 %v4819_v55, %v4823_v0 }
0x1e2a   :  { %v4826_v10 = vpop.xlane.xlu1 %4825 }
0x1e2b   :  { %8710 = vpow2.f32 %v4981_v13  ;;  %v4829_v31 = vmul.f32 1.442695, %v4827_v61  ;;  %v4828_v5 = vsub.f32 %v4820_v46, %v4826_v10 }
0x1e2c   :  { %v4971_v20 = vpop.xlane.xlu0 %4970 }
0x1e2d   :  { %8712 = vpow2.f32 %v4829_v31  ;;  %v4831_v39 = vmul.f32 1.442695, %v4828_v5  ;;  %v4977_v4 = vsub.f32 %v4961_v25, %v4971_v20 }
0x1e2e   :  { %v4974_v14 = vpop.xlane.xlu1 %4973 }
0x1e2f   :  { %8714 = vpow2.f32 %v4831_v39  ;;  %v4983_v54 = vmul.f32 1.442695, %v4977_v4  ;;  %v4978_v49 = vsub.f32 %v4962_v36, %v4974_v14 }
0x1e31   :  { %8716 = vpow2.f32 %v4983_v54  ;;  %v4985_v32 = vmul.f32 1.442695, %v4978_v49 }
0x1e33   :  { %v8709_v23 = vpop.eup %8708  ;;  %8718 = vpow2.f32 %v4985_v32 }
0x1e34   :  { %v4987_v56 = vsel %vm129_vm0, %v8709_v23, 0.0 }
0x1e35   :  { %v8711_v17 = vpop.eup %8710  ;;  %4988 = vadd.xlane.f32.xlu0 %v4987_v56 }
0x1e36   :  { %v4990_v55 = vsel %vm129_vm0, %v8711_v17, 0.0 }
0x1e37   :  { %v8713_v19 = vpop.eup %8712  ;;  %4991 = vadd.xlane.f32.xlu1 %v4990_v55 }
0x1e38   :  { %v4833_v46 = vsel %vm129_vm0, %v8713_v19, 0.0 }
0x1e39   :  { %v8715_v2 = vpop.eup %8714  ;;  %4834 = vadd.xlane.f32.xlu0 %v4833_v46 }
0x1e3a   :  { %v4836_v25 = vsel %vm129_vm0, %v8715_v2, 0.0 }
0x1e3b   :  { %v8717_v8 = vpop.eup %8716  ;;  %4837 = vadd.xlane.f32.xlu1 %v4836_v25 }
0x1e3c   :  { %v4993_v36 = vsel %vm129_vm0, %v8717_v8, 0.0 }
0x1e3d   :  { %v8719_v28 = vpop.eup %8718  ;;  %4994 = vadd.xlane.f32.xlu0 %v4993_v36 }
0x1e3e   :  { %v4996_v38 = vsel %vm129_vm0, %v8719_v28, 0.0 }
0x1e3f   :  { %4997 = vadd.xlane.f32.xlu1 %v4996_v38  ;;  %v11132_v38 = vpack.c.bf16 %v10316_v37, %v10312_v21 }
0x1ec2   :  { %v4989_v43 = vpop.xlane.xlu0 %4988 }
0x1ec3   :  { %8720 = vrcp.f32 %v4989_v43  ;;  %v11133_v43 = vpack.c.bf16 %v10308_v41, %v10304_v16 }
0x1ec4   :  { %v4992_v57 = vpop.xlane.xlu1 %4991 }
0x1ec5   :  { %8722 = vrcp.f32 %v4992_v57 }
0x1ec6   :  { %v4835_v0 = vpop.xlane.xlu0 %4834 }
0x1ec7   :  { %8724 = vrcp.f32 %v4835_v0 }
0x1ec8   :  { %v4838_v13 = vpop.xlane.xlu1 %4837 }
0x1ec9   :  { %8726 = vrcp.f32 %v4838_v13 }
0x1eca   :  { %v4995_v61 = vpop.xlane.xlu0 %4994 }
0x1ecb   :  { %8728 = vrcp.f32 %v4995_v61 }
0x1ecc   :  { %v4998_v10 = vpop.xlane.xlu1 %4997 }
0x1ecd   :  { %8730 = vrcp.f32 %v4998_v10  ;;  %v8721_v31 = vpop.eup %8720 }
0x1ece   :  { %v5003_v4 = vmul.f32 %v8721_v31, %v8709_v23 }
0x1ecf   :  { %v8723_v5 = vpop.eup %8722 }
0x1ed0   :  { %v5004_v20 = vmul.f32 %v8723_v5, %v8711_v17 }
0x1ed1   :  { %v8725_v39 = vpop.eup %8724 }
0x1ed2   :  { %v4841_v54 = vmul.f32 %v8725_v39, %v8713_v19  ;;  %v5008_v32 = vpack.c.bf16 %v5004_v20, %v5003_v4 }
0x1ed3   :  { %v8727_v14 = vpop.eup %8726 }
0x1ed4   :  { %v4842_v49 = vmul.f32 %v8727_v14, %v8715_v2  ;;  %v5014_v25 = vsel %vm129_vm0, %v5008_v32, 0  ;;  %v11131_v2 = vpack.c.bf16 %v10186_v18, %v10182_v27 }
0x1ed5   :  { %v8729_v56 = vpop.eup %8728 }
0x1ed6   :  { %v4843_v55 = vpack.c.bf16 %v4842_v49, %v4841_v54  ;;  %v5005_v17 = vmul.f32 %v8729_v56, %v8717_v8  ;;  %v5153_v8 = vsel %vm346_vm2, %v10321_v6, 0 }
0x1ed7   :  { %v8731_v46 = vpop.eup %8730 }
0x1ed8   :  { %8227 = vmatmul.mubr.msk.bf16.vlgmr.msra.gmra.mrb[180].mxu0 %vm129_vm0, %v4843_v55  ;;  %v5006_v36 = vmul.f32 %v8731_v46, %v8719_v28  ;;  %v5150_v28 = vsel %vm346_vm2, %v10325_v53, 0 }
0x1ed9   :  { %8239 = vmatpush3.bf16.xpose.msra.mxu0 %v5014_v25  ;;  %8242 = vmatprep.mubr.msk.bf16.mxu0 %vm8979_vm1, %v11081_v9 }
0x1eda   :  { %8240 = vmatprep.subr.bf16.mxu0 %v11081_v9  ;;  %v5009_v23 = vpack.c.bf16 %v5006_v36, %v5005_v17 }
0x1edc   :  { %v5017_v19 = vsel %vm129_vm0, %v5009_v23, 0 }
0x1ee1   :  { %8241 = vmatpush3.bf16.xpose.msra.mxu0 %v5017_v19 }
0x1ee2   :  { %8454 = vmatprep.subr.msk.bf16.mxu0 %vm346_vm2, %v10325_v53 }
0x1ee8   :  { %8243 = vmatmul.mubr.msk.bf16.vlgmr.msra.gmra.mrb[184].mxu0 %vm129_vm0, %v11131_v2 }
0x1ee9   :  { %8255 = vmatpush3.bf16.xpose.msra.mxu0 %v5150_v28  ;;  %8258 = vmatprep.mubr.msk.bf16.mxu0 %vm346_vm2, %v11132_v38 }
0x1eea   :  { %8455 = vmatprep.subr.msk.bf16.mxu0 %vm346_vm2, %v10321_v6 }
0x1ef1   :  { %8257 = vmatpush3.bf16.xpose.msra.mxu0 %v5153_v8 }
0x1ef2   :  { %8270 = vmatprep.subr.bf16.mxu0 %v11081_v9 }
0x1ef8   :  { %8259 = vmatmul.mubr.msk.bf16.vlgmr.msra.gmra.mrb[188].mxu0 %vm346_vm2, %v11133_v43 }
0x1ef9   :  { %8274 = vmatprep.mubr.msk.bf16.mxu0 %vm8979_vm1, %v11081_v9 }
0x1fab   :  { %v10541_v21 = vpop.f32.mrb[180].mxu0 }
0x1fac   :  { %v8228_v37 = vpop.f32.mrb[181].mxu0 }
0x1fad   :  { %v10543_v53 = vpop.f32.mrb[182].mxu0 }
0x1fae   :  { %v8229_v57 = vpop.f32.mrb[183].mxu0 }
0x1fbb   :  { %v5053_v0 = vpop.f32.mrb[184].mxu0 }
0x1fbc   :  { %v5060_v6 = vadd.f32 %v5053_v0, %v10182_v27  ;;  %v8244_v13 = vpop.f32.mrb[185].mxu0 }
0x1fbd   :  { %v5056_v61 = vpop.f32.mrb[186].mxu0 }
0x1fbe   :  { %v5061_v10 = vadd.f32 %v5056_v61, %v10186_v18  ;;  %v8245_v31 = vpop.f32.mrb[187].mxu0  ;;  %v5062_v54 = vadd.f32 %v5060_v6, %v10452_v48 }
0x1fc0   :  { %v5063_v56 = vadd.f32 %v5061_v10, %v10452_v48  ;;  %v5064_v25 = vsel %vm129_vm0, %v5062_v54, -inf }
0x1fc2   :  { %v5067_v17 = vsel %vm129_vm0, %v5063_v56, -inf }
0x1fcb   :  { %v8260_v16 = vpop.f32.mrb[188].mxu0 }
0x1fcc   :  { %v5189_v41 = vpop.f32.mrb[189].mxu0  ;;  %v5206_v49 = vmul.f32 0.35355338, %v8260_v16 }
0x1fcd   :  { %v5204_v5 = vmul.f32 0.35355338, %v5189_v41  ;;  %v8261_v20 = vpop.f32.mrb[190].mxu0 }
0x1fce   :  { %v5192_v39 = vpop.f32.mrb[191].mxu0  ;;  %v5207_v18 = vmul.f32 0.35355338, %v8261_v20  ;;  %v5210_v46 = vadd.f32 %v5206_v49, %v10452_v48 }
0x1fcf   :  { %v5208_v4 = vadd.f32 %v5204_v5, %v10452_v48  ;;  %v5205_v14 = vmul.f32 0.35355338, %v5192_v39 }
0x1fd0   :  { %v5211_v36 = vadd.f32 %v5207_v18, %v10452_v48  ;;  %v5218_v23 = vsel %vm129_vm0, %v5210_v46, -inf }
0x1fd1   :  { %v5209_v32 = vadd.f32 %v5205_v14, %v10452_v48  ;;  %v5212_v27 = vsel %vm129_vm0, %v5208_v4, -inf }
0x1fd2   :  { %5213 = vmax.xlane.f32.xlu0 %v5212_v27  ;;  %v5221_v19 = vsel %vm129_vm0, %v5211_v36, -inf }
0x1fd3   :  { %v5215_v55 = vsel %vm129_vm0, %v5209_v32, -inf }
0x1fd4   :  { %5216 = vmax.xlane.f32.xlu1 %v5215_v55 }
0x1fd6   :  { %5065 = vmax.xlane.f32.xlu0 %v5064_v25 }
0x1fd8   :  { %5068 = vmax.xlane.f32.xlu1 %v5067_v17 }
0x1fda   :  { %5219 = vmax.xlane.f32.xlu0 %v5218_v23 }
0x1fdc   :  { %5222 = vmax.xlane.f32.xlu1 %v5221_v19 }
0x205f   :  { %v5214_v2 = vpop.xlane.xlu0 %5213 }
0x2060   :  { %v5224_v43 = vsub.f32 %v5208_v4, %v5214_v2 }
0x2061   :  { %v5217_v28 = vpop.xlane.xlu1 %5216 }
0x2062   :  { %v5225_v13 = vsub.f32 %v5209_v32, %v5217_v28  ;;  %v5228_v31 = vmul.f32 1.442695, %v5224_v43 }
0x2063   :  { %v5066_v38 = vpop.xlane.xlu0 %5065 }
0x2064   :  { %v5070_v8 = vsub.f32 %v5062_v54, %v5066_v38  ;;  %v5230_v20 = vmul.f32 1.442695, %v5225_v13 }
0x2065   :  { %v5069_v37 = vpop.xlane.xlu1 %5068 }
0x2066   :  { %v5072_v57 = vmul.f32 1.442695, %v5070_v8  ;;  %v5071_v0 = vsub.f32 %v5063_v56, %v5069_v37 }
0x2067   :  { %v5220_v6 = vpop.xlane.xlu0 %5219 }
0x2068   :  { %8732 = vpow2.f32 %v5072_v57  ;;  %v5074_v61 = vmul.f32 1.442695, %v5071_v0  ;;  %v5226_v10 = vsub.f32 %v5210_v46, %v5220_v6 }
0x2069   :  { %v5223_v16 = vpop.xlane.xlu1 %5222 }
0x206a   :  { %8734 = vpow2.f32 %v5074_v61  ;;  %v5232_v41 = vmul.f32 1.442695, %v5226_v10  ;;  %v5227_v5 = vsub.f32 %v5211_v36, %v5223_v16 }
0x206c   :  { %8736 = vpow2.f32 %v5232_v41  ;;  %v5234_v39 = vmul.f32 1.442695, %v5227_v5 }
0x206d   :  { %8738 = vpow2.f32 %v5228_v31 }
0x206e   :  { %8740 = vpow2.f32 %v5234_v39 }
0x206f   :  { %8742 = vpow2.f32 %v5230_v20 }
0x2072   :  { %v8733_v4 = vpop.eup %8732 }
0x2073   :  { %v5076_v14 = vsel %vm129_vm0, %v8733_v4, 0.0 }
0x2074   :  { %v8735_v54 = vpop.eup %8734  ;;  %5077 = vadd.xlane.f32.xlu0 %v5076_v14 }
0x2075   :  { %v5079_v49 = vsel %vm129_vm0, %v8735_v54, 0.0 }
0x2076   :  { %v8737_v32 = vpop.eup %8736  ;;  %5080 = vadd.xlane.f32.xlu1 %v5079_v49 }
0x2077   :  { %v8739_v27 = vpop.eup %8738  ;;  %v5242_v56 = vsel %vm129_vm0, %v8737_v32, 0.0 }
0x2078   :  { %v8741_v18 = vpop.eup %8740  ;;  %5243 = vadd.xlane.f32.xlu0 %v5242_v56  ;;  %v5236_v25 = vsel %vm129_vm0, %v8739_v27, 0.0  ;;  %v5397_v56 = vsel %vm346_vm2, %v10349_v58, 0 }
0x2079   :  { %v5245_v55 = vsel %vm129_vm0, %v8741_v18, 0.0  ;;  %v8743_v46 = vpop.eup %8742 }
0x207a   :  { %5246 = vadd.xlane.f32.xlu1 %v5245_v55  ;;  %v5239_v36 = vsel %vm129_vm0, %v8743_v46, 0.0  ;;  %v11136_v55 = vpack.c.bf16 %v10332_v34, %v10328_v33 }
0x207c   :  { %5237 = vadd.xlane.f32.xlu0 %v5236_v25 }
0x207e   :  { %5240 = vadd.xlane.f32.xlu1 %v5239_v36 }
0x208f   :  { %5091 = vrot.lane.b32.xlu1 %v10076_v42, %s8981_s23 }
0x2092   :  { %5089 = vrot.lane.b32.xlu0 %v10078_v60, %s8981_s23 }
0x2101   :  { %v5078_v17 = vpop.xlane.xlu0 %5077 }
0x2102   :  { %8744 = vrcp.f32 %v5078_v17 }
0x2103   :  { %v5081_v23 = vpop.xlane.xlu1 %5080 }
0x2104   :  { %8746 = vrcp.f32 %v5081_v23 }
0x2105   :  { %v5244_v19 = vpop.xlane.xlu0 %5243 }
0x2107   :  { %v5247_v2 = vpop.xlane.xlu1 %5246 }
0x2109   :  { %v5238_v28 = vpop.xlane.xlu0 %5237 }
0x210a   :  { %8748 = vrcp.f32 %v5238_v28 }
0x210b   :  { %v5241_v38 = vpop.xlane.xlu1 %5240 }
0x210c   :  { %8750 = vrcp.f32 %v5241_v38  ;;  %v8745_v8 = vpop.eup %8744 }
0x210d   :  { %v5090_v43 = vpop.permute.xlu0 %5089  ;;  %8752 = vrcp.f32 %v5247_v2  ;;  %v5084_v0 = vmul.f32 %v8745_v8, %v8733_v4 }
0x210e   :  { %v8747_v37 = vpop.eup %8746  ;;  %8247 = vmatpush3.bf16.msra.mxu1 %v5090_v43  ;;  %8754 = vrcp.f32 %v5244_v19 }
0x210f   :  { %v5085_v57 = vmul.f32 %v8747_v37, %v8735_v54  ;;  %8248 = vmatprep.subr.bf16.mxu1 %v11081_v9  ;;  %v5092_v6 = vpop.permute.xlu1 %5091 }
0x2111   :  { %v5086_v13 = vpack.c.bf16 %v5085_v57, %v5084_v0 }
0x2112   :  { %8249 = vmatpush3.bf16.msra.mxu1 %v5092_v6 }
0x2113   :  { %8262 = vmatprep.subr.bf16.mxu1 %v11081_v9 }
0x2114   :  { %v8749_v61 = vpop.eup %8748 }
0x2115   :  { %8251 = vmatmul.mubr.msk.bf16.vlgmr.msra.gmra.mrb[188].mxu1 %vm129_vm0, %v5086_v13  ;;  %v5252_v31 = vmul.f32 %v8749_v61, %v8739_v27  ;;  %v11134_v27 = vpack.c.bf16 %v10194_v51, %v10192_v15 }
0x2116   :  { %v8751_v10 = vpop.eup %8750  ;;  %8266 = vmatprep.mubr.msk.bf16.mxu1 %vm8979_vm1, %v11081_v9 }
0x2117   :  { %v5253_v16 = vmul.f32 %v8751_v10, %v8743_v46  ;;  %v8753_v41 = vpop.eup %8752 }
0x2118   :  { %v8755_v20 = vpop.eup %8754  ;;  %v5255_v4 = vmul.f32 %v8753_v41, %v8741_v18  ;;  %v11135_v18 = vpack.c.bf16 %v10340_v40, %v10336_v22 }
0x2119   :  { %v5257_v5 = vpack.c.bf16 %v5253_v16, %v5252_v31  ;;  %v5254_v14 = vmul.f32 %v8755_v20, %v8737_v32  ;;  %v5400_v32 = vsel %vm346_vm2, %v10345_v35, 0 }
0x211b   :  { %v5263_v39 = vsel %vm129_vm0, %v5257_v5, 0  ;;  %v5258_v54 = vpack.c.bf16 %v5255_v4, %v5254_v14 }
0x211c   :  { %8263 = vmatpush3.bf16.xpose.msra.mxu1 %v5263_v39 }
0x211d   :  { %8264 = vmatprep.subr.bf16.mxu1 %v11081_v9  ;;  %v5266_v49 = vsel %vm129_vm0, %v5258_v54, 0 }
0x2124   :  { %8265 = vmatpush3.bf16.xpose.msra.mxu1 %v5266_v49 }
0x2125   :  { %8456 = vmatprep.subr.msk.bf16.mxu1 %vm346_vm2, %v10349_v58 }
0x212b   :  { %8267 = vmatmul.mubr.msk.bf16.vlgmr.msra.gmra.mrb[192].mxu1 %vm129_vm0, %v11134_v27 }
0x212c   :  { %8279 = vmatpush3.bf16.xpose.msra.mxu1 %v5397_v56  ;;  %8282 = vmatprep.mubr.msk.bf16.mxu1 %vm346_vm2, %v11135_v18 }
0x212d   :  { %8457 = vmatprep.subr.msk.bf16.mxu1 %vm346_vm2, %v10345_v35 }
0x2134   :  { %8281 = vmatpush3.bf16.xpose.msra.mxu1 %v5400_v32 }
0x2135   :  { %8294 = vmatprep.subr.bf16.mxu1 %v11081_v9 }
0x213b   :  { %8283 = vmatmul.mubr.msk.bf16.vlgmr.msra.gmra.mrb[196].mxu1 %vm346_vm2, %v11136_v55 }
0x213c   :  { %8298 = vmatprep.mubr.msk.bf16.mxu1 %vm8979_vm1, %v11081_v9 }
0x21e8   :  { %v10600_v22 = vpop.f32.mrb[188].mxu1 }
0x21e9   :  { %v8252_v40 = vpop.f32.mrb[189].mxu1 }
0x21ea   :  { %v10602_v58 = vpop.f32.mrb[190].mxu1 }
0x21eb   :  { %v8508_v46 = vpack.i.bf16 %v10602_v58, %v10600_v22  ;;  %v8253_v35 = vpop.f32.mrb[191].mxu1 }
0x21fe   :  { %v5302_v25 = vpop.f32.mrb[192].mxu1 }
0x21ff   :  { %v5309_v36 = vadd.f32 %v5302_v25, %v10192_v15  ;;  %v8268_v17 = vpop.f32.mrb[193].mxu1 }
0x2200   :  { %v5305_v23 = vpop.f32.mrb[194].mxu1 }
0x2201   :  { %v5310_v33 = vadd.f32 %v5305_v23, %v10194_v51  ;;  %v8269_v34 = vpop.f32.mrb[195].mxu1  ;;  %v5311_v13 = vadd.f32 %v5309_v36, %v10452_v48 }
0x2203   :  { %v5312_v57 = vadd.f32 %v5310_v33, %v10452_v48  ;;  %v5313_v41 = vsel %vm129_vm0, %v5311_v13, -inf }
0x2205   :  { %v5316_v31 = vsel %vm129_vm0, %v5312_v57, -inf }
0x220e   :  { %v8284_v19 = vpop.f32.mrb[196].mxu1 }
0x220f   :  { %v5436_v2 = vpop.f32.mrb[197].mxu1  ;;  %v5453_v51 = vmul.f32 0.35355338, %v8284_v19 }
0x2210   :  { %v5451_v28 = vmul.f32 0.35355338, %v5436_v2  ;;  %v8285_v38 = vpop.f32.mrb[198].mxu1 }
0x2211   :  { %v5439_v8 = vpop.f32.mrb[199].mxu1  ;;  %v5454_v0 = vmul.f32 0.35355338, %v8285_v38  ;;  %v5457_v16 = vadd.f32 %v5453_v51, %v10452_v48 }
0x2212   :  { %v5455_v43 = vadd.f32 %v5451_v28, %v10452_v48  ;;  %v5452_v37 = vmul.f32 0.35355338, %v5439_v8 }
0x2213   :  { %v5458_v10 = vadd.f32 %v5454_v0, %v10452_v48  ;;  %v5465_v20 = vsel %vm129_vm0, %v5457_v16, -inf }
0x2214   :  { %v5456_v6 = vadd.f32 %v5452_v37, %v10452_v48  ;;  %v5459_v15 = vsel %vm129_vm0, %v5455_v43, -inf }
0x2215   :  { %5460 = vmax.xlane.f32.xlu1 %v5459_v15  ;;  %v5468_v5 = vsel %vm129_vm0, %v5458_v10, -inf }
0x2216   :  { %v5462_v61 = vsel %vm129_vm0, %v5456_v6, -inf }
0x2217   :  { %5463 = vmax.xlane.f32.xlu0 %v5462_v61 }
0x2219   :  { %5317 = vmax.xlane.f32.xlu1 %v5316_v31 }
0x221b   :  { %5314 = vmax.xlane.f32.xlu0 %v5313_v41 }
0x221d   :  { %5469 = vmax.xlane.f32.xlu1 %v5468_v5 }
0x221f   :  { %5466 = vmax.xlane.f32.xlu0 %v5465_v20 }
0x22a2   :  { %v5461_v39 = vpop.xlane.xlu1 %5460 }
0x22a3   :  { %v5471_v55 = vsub.f32 %v5455_v43, %v5461_v39 }
0x22a4   :  { %v5464_v4 = vpop.xlane.xlu0 %5463 }
0x22a5   :  { %v5472_v49 = vsub.f32 %v5456_v6, %v5464_v4  ;;  %v5475_v33 = vmul.f32 1.442695, %v5471_v55 }
0x22a6   :  { %v5318_v14 = vpop.xlane.xlu1 %5317 }
0x22a7   :  { %v5320_v54 = vsub.f32 %v5312_v57, %v5318_v14  ;;  %v5477_v25 = vmul.f32 1.442695, %v5472_v49 }
0x22a8   :  { %v5315_v27 = vpop.xlane.xlu0 %5314 }
0x22a9   :  { %v5323_v56 = vmul.f32 1.442695, %v5320_v54  ;;  %v5319_v18 = vsub.f32 %v5311_v13, %v5315_v27 }
0x22aa   :  { %v5470_v32 = vpop.xlane.xlu1 %5469 }
0x22ab   :  { %8756 = vpow2.f32 %v5323_v56  ;;  %v5321_v40 = vmul.f32 1.442695, %v5319_v18  ;;  %v5474_v35 = vsub.f32 %v5458_v10, %v5470_v32 }
0x22ac   :  { %v5467_v36 = vpop.xlane.xlu0 %5466 }
0x22ad   :  { %8758 = vpow2.f32 %v5321_v40  ;;  %v5481_v17 = vmul.f32 1.442695, %v5474_v35  ;;  %v5473_v23 = vsub.f32 %v5457_v16, %v5467_v36 }
0x22af   :  { %8760 = vpow2.f32 %v5481_v17  ;;  %v5479_v34 = vmul.f32 1.442695, %v5473_v23 }
0x22b0   :  { %8762 = vpow2.f32 %v5477_v25 }
0x22b1   :  { %8764 = vpow2.f32 %v5479_v34  ;;  %v11137_v34 = vpack.c.bf16 %v10206_v62, %v10202_v1 }
0x22b2   :  { %8766 = vpow2.f32 %v5475_v33 }
0x22b5   :  { %v8757_v19 = vpop.eup %8756 }
0x22b6   :  { %v5328_v2 = vsel %vm129_vm0, %v8757_v19, 0.0 }
0x22b7   :  { %v8759_v28 = vpop.eup %8758  ;;  %5329 = vadd.xlane.f32.xlu1 %v5328_v2  ;;  %v11138_v2 = vpack.c.bf16 %v10364_v11, %v10360_v50 }
0x22b8   :  { %v5325_v38 = vsel %vm129_vm0, %v8759_v28, 0.0 }
0x22b9   :  { %v8761_v8 = vpop.eup %8760  ;;  %5326 = vadd.xlane.f32.xlu0 %v5325_v38  ;;  %v11139_v38 = vpack.c.bf16 %v10356_v7, %v10352_v12 }
0x22ba   :  { %v8763_v43 = vpop.eup %8762  ;;  %v5492_v37 = vsel %vm129_vm0, %v8761_v8, 0.0 }
0x22bb   :  { %v8765_v57 = vpop.eup %8764  ;;  %5493 = vadd.xlane.f32.xlu1 %v5492_v37  ;;  %v5486_v15 = vsel %vm129_vm0, %v8763_v43, 0.0 }
0x22bc   :  { %v5489_v0 = vsel %vm129_vm0, %v8765_v57, 0.0  ;;  %v8767_v6 = vpop.eup %8766 }
0x22bd   :  { %5490 = vadd.xlane.f32.xlu0 %v5489_v0  ;;  %v5483_v13 = vsel %vm129_vm0, %v8767_v6, 0.0 }
0x22bf   :  { %5487 = vadd.xlane.f32.xlu1 %v5486_v15 }
0x22c1   :  { %5484 = vadd.xlane.f32.xlu0 %v5483_v13 }
0x22d0   :  { %5338 = vrot.lane.b32.xlu1 %v10076_v42, %s8980_s28 }
0x22d7   :  { %5336 = vrot.lane.b32.xlu0 %v10078_v60, %s8980_s28 }
0x2344   :  { %v5330_v51 = vpop.xlane.xlu1 %5329 }
0x2346   :  { %v5327_v61 = vpop.xlane.xlu0 %5326 }
0x2347   :  { %8768 = vrcp.f32 %v5327_v61 }
0x2348   :  { %v5494_v10 = vpop.xlane.xlu1 %5493  ;;  %8770 = vrcp.f32 %v5330_v51 }
0x234a   :  { %v5491_v31 = vpop.xlane.xlu0 %5490 }
0x234c   :  { %v5488_v16 = vpop.xlane.xlu1 %5487 }
0x234d   :  { %8772 = vrcp.f32 %v5488_v16 }
0x234e   :  { %v5485_v41 = vpop.xlane.xlu0 %5484 }
0x234f   :  { %8774 = vrcp.f32 %v5485_v41 }
0x2350   :  { %8776 = vrcp.f32 %v5491_v31  ;;  %v5339_v54 = vpop.permute.xlu1 %5338 }
0x2351   :  { %v8769_v5 = vpop.eup %8768  ;;  %8778 = vrcp.f32 %v5494_v10 }
0x2352   :  { %v5337_v20 = vpop.permute.xlu0 %5336  ;;  %v8771_v39 = vpop.eup %8770  ;;  %v5333_v4 = vmul.f32 %v8769_v5, %v8759_v28  ;;  %v5681_v28 = vsel %vm346_vm2, %v10369_v63, 0 }
0x2353   :  { %8271 = vmatpush3.bf16.msra.mxu0 %v5337_v20  ;;  %v5334_v14 = vmul.f32 %v8771_v39, %v8757_v19  ;;  %v5678_v19 = vsel %vm346_vm2, %v10373_v24, 0 }
0x2354   :  { %8272 = vmatprep.subr.bf16.mxu0 %v11081_v9 }
0x2355   :  { %v5335_v27 = vpack.c.bf16 %v5334_v14, %v5333_v4 }
0x2357   :  { %v8773_v49 = vpop.eup %8772  ;;  %8273 = vmatpush3.bf16.msra.mxu0 %v5339_v54 }
0x2358   :  { %8286 = vmatprep.subr.bf16.mxu0 %v11081_v9  ;;  %v5500_v32 = vmul.f32 %v8773_v49, %v8763_v43 }
0x2359   :  { %v8775_v56 = vpop.eup %8774 }
0x235a   :  { %8275 = vmatmul.mubr.msk.bf16.vlgmr.msra.gmra.mrb[192].mxu0 %vm129_vm0, %v5335_v27  ;;  %v5499_v18 = vmul.f32 %v8775_v56, %v8767_v6  ;;  %v8777_v55 = vpop.eup %8776  ;;  %v11140_v6 = vsub.s32 1, %v9482_v29 }
0x235b   :  { %8290 = vmatprep.mubr.msk.bf16.mxu0 %vm8979_vm1, %v11081_v9  ;;  %v8779_v35 = vpop.eup %8778  ;;  %v5501_v36 = vmul.f32 %v8777_v55, %v8765_v57 }
0x235c   :  { %v5504_v40 = vpack.c.bf16 %v5500_v32, %v5499_v18  ;;  %v5502_v17 = vmul.f32 %v8779_v35, %v8761_v8  ;;  %v10676_v15 = vrot.slane %v10447_v52, %v11140_v6 }
0x235e   :  { %v5510_v25 = vsel %vm129_vm0, %v5504_v40, 0  ;;  %v5505_v23 = vpack.c.bf16 %v5502_v17, %v5501_v36 }
0x2360   :  { %8287 = vmatpush3.bf16.xpose.msra.mxu0 %v5510_v25  ;;  %v5513_v33 = vsel %vm129_vm0, %v5505_v23, 0 }
0x2361   :  { %8288 = vmatprep.subr.bf16.mxu0 %v11081_v9 }
0x2368   :  { %8289 = vmatpush3.bf16.xpose.msra.mxu0 %v5513_v33 }
0x2369   :  { %8458 = vmatprep.subr.msk.bf16.mxu0 %vm346_vm2, %v10373_v24 }
0x236f   :  { %8291 = vmatmul.mubr.msk.bf16.vlgmr.msra.gmra.mrb[196].mxu0 %vm129_vm0, %v11137_v34 }
0x2370   :  { %8303 = vmatpush3.bf16.xpose.msra.mxu0 %v5678_v19  ;;  %8306 = vmatprep.mubr.msk.bf16.mxu0 %vm346_vm2, %v11138_v2 }
0x2371   :  { %8459 = vmatprep.subr.msk.bf16.mxu0 %vm346_vm2, %v10369_v63 }
0x2378   :  { %8305 = vmatpush3.bf16.xpose.msra.mxu0 %v5681_v28 }
0x2379   :  { %8318 = vmatprep.subr.bf16.mxu0 %v11081_v9 }
0x237f   :  { %8307 = vmatmul.mubr.msk.bf16.vlgmr.msra.gmra.mrb[200].mxu0 %vm346_vm2, %v11139_v38 }
0x2380   :  { %8319 = vmatpush3.bf16.msra.mxu0 %v10082_v3  ;;  %8322 = vmatprep.mubr.msk.bf16.mxu0 %vm8979_vm1, %v11081_v9 }
0x2381   :  { %8320 = vmatprep.subr.bf16.mxu0 %v11081_v9 }
0x2384   :  { %8321 = vmatpush3.bf16.msra.mxu0 %v10080_v45 }
0x2385   :  { %8334 = vmatprep.subr.bf16.mxu0 %v11081_v9 }
0x242d   :  { %v10665_v63 = vpop.f32.mrb[192].mxu0 }
0x242e   :  { %v8276_v11 = vpop.f32.mrb[193].mxu0 }
0x242f   :  { %v10667_v50 = vpop.f32.mrb[194].mxu0 }
0x2430   :  { %v8513_v7 = vpack.i.bf16 %v10667_v50, %v10665_v63  ;;  %v8277_v12 = vpop.f32.mrb[195].mxu0 }
0x2442   :  { %v5549_v24 = vpop.f32.mrb[196].mxu0 }
0x2443   :  { %v5556_v8 = vadd.f32 %v5549_v24, %v10202_v1  ;;  %v8292_v43 = vpop.f32.mrb[197].mxu0 }
0x2444   :  { %v5552_v37 = vpop.f32.mrb[198].mxu0 }
0x2445   :  { %v5557_v57 = vadd.f32 %v5552_v37, %v10206_v62  ;;  %v8293_v0 = vpop.f32.mrb[199].mxu0  ;;  %v5558_v29 = vadd.f32 %v5556_v8, %v10452_v48 }
0x2447   :  { %v5559_v1 = vadd.f32 %v5557_v57, %v10452_v48  ;;  %v5560_v49 = vsel %vm129_vm0, %v5558_v29, -inf }
0x2449   :  { %v5563_v14 = vsel %vm129_vm0, %v5559_v1, -inf }
0x2452   :  { %v8308_v13 = vpop.f32.mrb[200].mxu0 }
0x2453   :  { %v5717_v51 = vpop.f32.mrb[201].mxu0  ;;  %v5734_v52 = vmul.f32 0.35355338, %v8308_v13 }
0x2454   :  { %v5732_v61 = vmul.f32 0.35355338, %v5717_v51  ;;  %v8309_v10 = vpop.f32.mrb[202].mxu0 }
0x2455   :  { %v5720_v31 = vpop.f32.mrb[203].mxu0  ;;  %v5735_v5 = vmul.f32 0.35355338, %v8309_v10  ;;  %v5738_v54 = vadd.f32 %v5734_v52, %v10676_v15 }
0x2456   :  { %v5736_v16 = vadd.f32 %v5732_v61, %v10676_v15  ;;  %v5733_v41 = vmul.f32 0.35355338, %v5720_v31 }
0x2457   :  { %v5739_v4 = vadd.f32 %v5735_v5, %v10676_v15  ;;  %v5746_v56 = vsel %vm129_vm0, %v5738_v54, -inf }
0x2458   :  { %v5737_v20 = vadd.f32 %v5733_v41, %v10676_v15  ;;  %v5740_v62 = vsel %vm129_vm0, %v5736_v16, -inf }
0x2459   :  { %5741 = vmax.xlane.f32.xlu1 %v5740_v62  ;;  %v5749_v27 = vsel %vm129_vm0, %v5739_v4, -inf }
0x245a   :  { %v5743_v39 = vsel %vm129_vm0, %v5737_v20, -inf }
0x245b   :  { %5744 = vmax.xlane.f32.xlu0 %v5743_v39 }
0x245d   :  { %5564 = vmax.xlane.f32.xlu1 %v5563_v14 }
0x245f   :  { %5561 = vmax.xlane.f32.xlu0 %v5560_v49 }
0x2461   :  { %5750 = vmax.xlane.f32.xlu1 %v5749_v27 }
0x2463   :  { %5747 = vmax.xlane.f32.xlu0 %v5746_v56 }
0x24e6   :  { %v5742_v48 = vpop.xlane.xlu1 %5741 }
0x24e7   :  { %v5752_v23 = vsub.f32 %v5736_v16, %v5742_v48 }
0x24e8   :  { %v5745_v18 = vpop.xlane.xlu0 %5744 }
0x24e9   :  { %v5753_v40 = vsub.f32 %v5737_v20, %v5745_v18  ;;  %v5756_v11 = vmul.f32 1.442695, %v5752_v23  ;;  %v5921_v23 = vsel %vm346_vm2, %v10397_v47, 0 }
0x24ea   :  { %v5565_v32 = vpop.xlane.xlu1 %5564 }
0x24eb   :  { %v5567_v55 = vsub.f32 %v5559_v1, %v5565_v32  ;;  %v5758_v19 = vmul.f32 1.442695, %v5753_v40 }
0x24ec   :  { %v5562_v35 = vpop.xlane.xlu0 %5561 }
0x24ed   :  { %v5570_v25 = vmul.f32 1.442695, %v5567_v55  ;;  %v5566_v36 = vsub.f32 %v5558_v29, %v5562_v35 }
0x24ee   :  { %v5751_v17 = vpop.xlane.xlu1 %5750 }
0x24ef   :  { %8780 = vpow2.f32 %v5570_v25  ;;  %v5568_v33 = vmul.f32 1.442695, %v5566_v36  ;;  %v5755_v34 = vsub.f32 %v5739_v4, %v5751_v17  ;;  %v11141_v17 = vpack.c.bf16 %v10214_v30, %v10212_v26 }
0x24f0   :  { %v5748_v2 = vpop.xlane.xlu0 %5747 }
0x24f1   :  { %8782 = vpow2.f32 %v5568_v33  ;;  %v5762_v28 = vmul.f32 1.442695, %v5755_v34  ;;  %v5754_v38 = vsub.f32 %v5738_v54, %v5748_v2  ;;  %v11142_v33 = vld [vmem:[#allocation19_spill] sm:$0xff] }
0x24f2   :  { %v11143_v34 = vpack.c.bf16 %v10388_v59, %v11142_v33 }
0x24f3   :  { %8784 = vpow2.f32 %v5762_v28  ;;  %v5760_v12 = vmul.f32 1.442695, %v5754_v38  ;;  %v11145_v28 = vld [vmem:[#allocation18_spill] sm:$0xff]  ;;  %v11146_v38 = vld [vmem:[#allocation17_spill] sm:$0xff] }
0x24f4   :  { %8786 = vpow2.f32 %v5758_v19  ;;  %v11144_v19 = vld [vmem:[#allocation20_spill] sm:$0xff] }
0x24f5   :  { %8788 = vpow2.f32 %v5760_v12  ;;  %v5924_v2 = vsel %vm346_vm2, %v11144_v19, 0 }
0x24f6   :  { %8790 = vpow2.f32 %v5756_v11  ;;  %v11147_v11 = vpack.c.bf16 %v11145_v28, %v11146_v38 }
0x24f9   :  { %v8781_v24 = vpop.eup %8780 }
0x24fa   :  { %v5575_v8 = vsel %vm129_vm0, %v8781_v24, 0.0 }
0x24fb   :  { %v8783_v43 = vpop.eup %8782  ;;  %5576 = vadd.xlane.f32.xlu1 %v5575_v8 }
0x24fc   :  { %v5572_v37 = vsel %vm129_vm0, %v8783_v43, 0.0 }
0x24fd   :  { %v8785_v57 = vpop.eup %8784  ;;  %5573 = vadd.xlane.f32.xlu0 %v5572_v37 }
0x24fe   :  { %v8787_v0 = vpop.eup %8786  ;;  %v5773_v6 = vsel %vm129_vm0, %v8785_v57, 0.0 }
0x24ff   :  { %v8789_v13 = vpop.eup %8788  ;;  %5774 = vadd.xlane.f32.xlu1 %v5773_v6  ;;  %v5767_v10 = vsel %vm129_vm0, %v8787_v0, 0.0 }
0x2500   :  { %v5770_v51 = vsel %vm129_vm0, %v8789_v13, 0.0  ;;  %v8791_v61 = vpop.eup %8790 }
0x2501   :  { %5771 = vadd.xlane.f32.xlu0 %v5770_v51  ;;  %v5764_v31 = vsel %vm129_vm0, %v8791_v61, 0.0 }
0x2503   :  { %5768 = vadd.xlane.f32.xlu1 %v5767_v10 }
0x2505   :  { %5765 = vadd.xlane.f32.xlu0 %v5764_v31 }
0x2514   :  { %5585 = vrot.lane.b32.xlu1 %v10076_v42, %s8982_s24 }
0x251b   :  { %5583 = vrot.lane.b32.xlu0 %v10078_v60, %s8982_s24 }
0x2588   :  { %v5577_v16 = vpop.xlane.xlu1 %5576 }
0x258a   :  { %v5574_v41 = vpop.xlane.xlu0 %5573 }
0x258b   :  { %8792 = vrcp.f32 %v5574_v41 }
0x258c   :  { %v5775_v1 = vpop.xlane.xlu1 %5774  ;;  %8794 = vrcp.f32 %v5577_v16 }
0x258e   :  { %v5772_v5 = vpop.xlane.xlu0 %5771 }
0x2590   :  { %v5769_v20 = vpop.xlane.xlu1 %5768 }
0x2591   :  { %8796 = vrcp.f32 %v5769_v20 }
0x2592   :  { %v5766_v62 = vpop.xlane.xlu0 %5765 }
0x2593   :  { %8798 = vrcp.f32 %v5766_v62 }
0x2594   :  { %8800 = vrcp.f32 %v5772_v5  ;;  %v5586_v60 = vpop.permute.xlu1 %5585 }
0x2595   :  { %v8793_v29 = vpop.eup %8792  ;;  %8802 = vrcp.f32 %v5775_v1 }
0x2596   :  { %v5584_v52 = vpop.permute.xlu0 %5583  ;;  %v8795_v39 = vpop.eup %8794  ;;  %v5580_v4 = vmul.f32 %v8793_v29, %v8783_v43 }
0x2597   :  { %8295 = vmatpush3.bf16.msra.mxu1 %v5584_v52  ;;  %v5581_v42 = vmul.f32 %v8795_v39, %v8781_v24 }
0x2598   :  { %8296 = vmatprep.subr.bf16.mxu1 %v11081_v9 }
0x2599   :  { %v5582_v54 = vpack.c.bf16 %v5581_v42, %v5580_v4 }
0x259b   :  { %v8797_v14 = vpop.eup %8796  ;;  %8297 = vmatpush3.bf16.msra.mxu1 %v5586_v60 }
0x259c   :  { %8310 = vmatprep.subr.bf16.mxu1 %v11081_v9  ;;  %v5781_v56 = vmul.f32 %v8797_v14, %v8787_v0 }
0x259d   :  { %v8799_v49 = vpop.eup %8798 }
0x259e   :  { %8299 = vmatmul.mubr.msk.bf16.vlgmr.msra.gmra.mrb[200].mxu1 %vm129_vm0, %v5582_v54  ;;  %v5780_v27 = vmul.f32 %v8799_v49, %v8791_v61  ;;  %v8801_v48 = vpop.eup %8800 }
0x259f   :  { %8314 = vmatprep.mubr.msk.bf16.mxu1 %vm8979_vm1, %v11081_v9  ;;  %v8803_v32 = vpop.eup %8802  ;;  %v5782_v40 = vmul.f32 %v8801_v48, %v8789_v13 }
0x25a0   :  { %v5785_v18 = vpack.c.bf16 %v5781_v56, %v5780_v27  ;;  %v5783_v35 = vmul.f32 %v8803_v32, %v8785_v57 }
0x25a2   :  { %v5791_v55 = vsel %vm129_vm0, %v5785_v18, 0  ;;  %v5786_v25 = vpack.c.bf16 %v5783_v35, %v5782_v40 }
0x25a4   :  { %8311 = vmatpush3.bf16.xpose.msra.mxu1 %v5791_v55  ;;  %v5794_v36 = vsel %vm129_vm0, %v5786_v25, 0 }
0x25a5   :  { %8312 = vmatprep.subr.bf16.mxu1 %v11081_v9 }
0x25ac   :  { %8313 = vmatpush3.bf16.xpose.msra.mxu1 %v5794_v36 }
0x25ad   :  { %8460 = vmatprep.subr.msk.bf16.mxu1 %vm346_vm2, %v10397_v47 }
0x25b3   :  { %8315 = vmatmul.mubr.msk.bf16.vlgmr.msra.gmra.mrb[204].mxu1 %vm129_vm0, %v11141_v17 }
0x25b4   :  { %8327 = vmatpush3.bf16.xpose.msra.mxu1 %v5921_v23  ;;  %8330 = vmatprep.mubr.msk.bf16.mxu1 %vm346_vm2, %v11143_v34 }
0x25b5   :  { %8461 = vmatprep.subr.msk.bf16.mxu1 %vm346_vm2, %v11144_v19 }
0x25bc   :  { %8329 = vmatpush3.bf16.xpose.msra.mxu1 %v5924_v2 }
0x25bd   :  { %8342 = vmatprep.subr.bf16.mxu1 %v11081_v9 }
0x25c3   :  { %8331 = vmatmul.mubr.msk.bf16.vlgmr.msra.gmra.mrb[208].mxu1 %vm346_vm2, %v11147_v11 }
0x25c4   :  { %8346 = vmatprep.mubr.msk.bf16.mxu1 %vm8979_vm1, %v11081_v9 }
0x2671   :  { %v10731_v59 = vpop.f32.mrb[200].mxu1 }
0x2672   :  { %v8300_v47 = vpop.f32.mrb[201].mxu1 }
0x2673   :  { %v10733_v12 = vpop.f32.mrb[202].mxu1 }
0x2674   :  { %v8523_v24 = vpack.i.bf16 %v10733_v12, %v10731_v59  ;;  %v8301_v8 = vpop.f32.mrb[203].mxu1 }
0x2686   :  { %v5830_v43 = vpop.f32.mrb[204].mxu1 }
0x2687   :  { %v5837_v37 = vadd.f32 %v5830_v43, %v10212_v26  ;;  %v8316_v57 = vpop.f32.mrb[205].mxu1 }
0x2688   :  { %v5833_v0 = vpop.f32.mrb[206].mxu1 }
0x2689   :  { %v5838_v6 = vadd.f32 %v5833_v0, %v10214_v30  ;;  %v8317_v13 = vpop.f32.mrb[207].mxu1  ;;  %v5839_v29 = vadd.f32 %v5837_v37, %v10676_v15 }
0x268b   :  { %v5840_v5 = vadd.f32 %v5838_v6, %v10676_v15  ;;  %v5841_v60 = vsel %vm129_vm0, %v5839_v29, -inf }
0x268d   :  { %v5844_v4 = vsel %vm129_vm0, %v5840_v5, -inf }
0x2696   :  { %v8332_v51 = vpop.f32.mrb[208].mxu1 }
0x2697   :  { %v5960_v61 = vpop.f32.mrb[209].mxu1  ;;  %v5977_v30 = vmul.f32 0.35355338, %v8332_v51 }
0x2698   :  { %v5975_v10 = vmul.f32 0.35355338, %v5960_v61  ;;  %v8333_v31 = vpop.f32.mrb[210].mxu1 }
0x2699   :  { %v5963_v16 = vpop.f32.mrb[211].mxu1  ;;  %v5978_v20 = vmul.f32 0.35355338, %v8333_v31  ;;  %v5981_v42 = vadd.f32 %v5977_v30, %v10676_v15 }
0x269a   :  { %v5979_v41 = vadd.f32 %v5975_v10, %v10676_v15  ;;  %v5976_v1 = vmul.f32 0.35355338, %v5963_v16 }
0x269b   :  { %v5982_v39 = vadd.f32 %v5978_v20, %v10676_v15  ;;  %v5989_v54 = vsel %vm129_vm0, %v5981_v42, -inf }
0x269c   :  { %v5980_v62 = vadd.f32 %v5976_v1, %v10676_v15  ;;  %v5983_v26 = vsel %vm129_vm0, %v5979_v41, -inf }
0x269d   :  { %5984 = vmax.xlane.f32.xlu1 %v5983_v26  ;;  %v5992_v14 = vsel %vm129_vm0, %v5982_v39, -inf }
0x269e   :  { %v5986_v52 = vsel %vm129_vm0, %v5980_v62, -inf }
0x269f   :  { %5987 = vmax.xlane.f32.xlu0 %v5986_v52 }
0x26a1   :  { %5845 = vmax.xlane.f32.xlu1 %v5844_v4 }
0x26a3   :  { %5842 = vmax.xlane.f32.xlu0 %v5841_v60 }
0x26a5   :  { %5993 = vmax.xlane.f32.xlu1 %v5992_v14 }
0x26a7   :  { %5990 = vmax.xlane.f32.xlu0 %v5989_v54 }
0x272a   :  { %v5985_v49 = vpop.xlane.xlu1 %5984 }
0x272b   :  { %v5995_v27 = vsub.f32 %v5979_v41, %v5985_v49 }
0x272c   :  { %v5988_v56 = vpop.xlane.xlu0 %5987 }
0x272d   :  { %v5999_v48 = vmul.f32 1.442695, %v5995_v27  ;;  %v5996_v18 = vsub.f32 %v5980_v62, %v5988_v56 }
0x272e   :  { %v5846_v32 = vpop.xlane.xlu1 %5845 }
0x272f   :  { %8804 = vpow2.f32 %v5999_v48  ;;  %v6001_v55 = vmul.f32 1.442695, %v5996_v18  ;;  %v5848_v40 = vsub.f32 %v5840_v5, %v5846_v32  ;;  %v11148_v32 = vld [vmem:[#allocation12_spill] sm:$0xff] }
0x2730   :  { %v5843_v35 = vpop.xlane.xlu0 %5842 }
0x2731   :  { %8806 = vpow2.f32 %v6001_v55  ;;  %v5851_v25 = vmul.f32 1.442695, %v5848_v40  ;;  %v5847_v36 = vsub.f32 %v5839_v29, %v5843_v35  ;;  %v11149_v55 = vld [vmem:[#allocation11_spill] sm:$0xff]  ;;  %v6170_v35 = vsel %vm346_vm2, %v10421_v44, 0 }
0x2732   :  { %v5994_v17 = vpop.xlane.xlu1 %5993  ;;  %v11150_v40 = vpack.c.bf16 %v11148_v32, %v11149_v55 }
0x2733   :  { %8808 = vpow2.f32 %v5851_v25  ;;  %v5849_v23 = vmul.f32 1.442695, %v5847_v36  ;;  %v5998_v33 = vsub.f32 %v5982_v39, %v5994_v17  ;;  %v11151_v25 = vld [vmem:[#allocation24_spill] sm:$0xff]  ;;  %v11152_v36 = vld [vmem:[#allocation23_spill] sm:$0xff] }
0x2734   :  { %v5991_v34 = vpop.xlane.xlu0 %5990  ;;  %v11153_v17 = vpack.c.bf16 %v11151_v25, %v11152_v36 }
0x2735   :  { %8810 = vpow2.f32 %v5849_v23  ;;  %v6005_v19 = vmul.f32 1.442695, %v5998_v33  ;;  %v5997_v2 = vsub.f32 %v5981_v42, %v5991_v34  ;;  %v11154_v23 = vld [vmem:[#allocation25_spill] sm:$0xff]  ;;  %v11155_v34 = vld [vmem:[#allocation22_spill] sm:$0xff] }
0x2736   :  { %v6173_v33 = vsel %vm346_vm2, %v11154_v23, 0 }
0x2737   :  { %8812 = vpow2.f32 %v6005_v19  ;;  %v6003_v28 = vmul.f32 1.442695, %v5997_v2  ;;  %v11156_v19 = vld [vmem:[#allocation21_spill] sm:$0xff] }
0x2738   :  { %v11157_v2 = vpack.c.bf16 %v11155_v34, %v11156_v19 }
0x2739   :  { %v8805_v38 = vpop.eup %8804  ;;  %8814 = vpow2.f32 %v6003_v28 }
0x273a   :  { %v6007_v11 = vsel %vm129_vm0, %v8805_v38, 0.0 }
0x273b   :  { %v8807_v47 = vpop.eup %8806  ;;  %6008 = vadd.xlane.f32.xlu0 %v6007_v11 }
0x273c   :  { %v6010_v8 = vsel %vm129_vm0, %v8807_v47, 0.0 }
0x273d   :  { %v8809_v43 = vpop.eup %8808  ;;  %6011 = vadd.xlane.f32.xlu1 %v6010_v8 }
0x273e   :  { %v5856_v57 = vsel %vm129_vm0, %v8809_v43, 0.0 }
0x273f   :  { %v8811_v37 = vpop.eup %8810 }
0x2740   :  { %v5853_v0 = vsel %vm129_vm0, %v8811_v37, 0.0 }
0x2741   :  { %v8813_v6 = vpop.eup %8812  ;;  %5857 = vadd.xlane.f32.xlu1 %v5856_v57  ;;  %5854 = vadd.xlane.f32.xlu0 %v5853_v0 }
0x2742   :  { %v6016_v51 = vsel %vm129_vm0, %v8813_v6, 0.0 }
0x2743   :  { %v8815_v13 = vpop.eup %8814 }
0x2744   :  { %v6013_v61 = vsel %vm129_vm0, %v8815_v13, 0.0 }
0x2745   :  { %6017 = vadd.xlane.f32.xlu1 %v6016_v51  ;;  %6014 = vadd.xlane.f32.xlu0 %v6013_v61 }
0x27c8   :  { %v6009_v10 = vpop.xlane.xlu0 %6008 }
0x27ca   :  { %v6012_v31 = vpop.xlane.xlu1 %6011 }
0x27cb   :  { %8816 = vrcp.f32 %v6012_v31 }
0x27cc   :  { %8818 = vrcp.f32 %v6009_v10 }
0x27ce   :  { %v5858_v16 = vpop.xlane.xlu1 %5857  ;;  %v5855_v41 = vpop.xlane.xlu0 %5854 }
0x27cf   :  { %8820 = vrcp.f32 %v5858_v16 }
0x27d0   :  { %8822 = vrcp.f32 %v5855_v41 }
0x27d2   :  { %v6018_v1 = vpop.xlane.xlu1 %6017  ;;  %v6015_v5 = vpop.xlane.xlu0 %6014 }
0x27d3   :  { %8824 = vrcp.f32 %v6018_v1 }
0x27d4   :  { %8826 = vrcp.f32 %v6015_v5 }
0x27d5   :  { %v8817_v20 = vpop.eup %8816 }
0x27d6   :  { %v8819_v62 = vpop.eup %8818  ;;  %v6024_v26 = vmul.f32 %v8817_v20, %v8807_v47 }
0x27d7   :  { %v6023_v30 = vmul.f32 %v8819_v62, %v8805_v38 }
0x27d9   :  { %v8821_v29 = vpop.eup %8820  ;;  %v6028_v42 = vpack.c.bf16 %v6024_v26, %v6023_v30 }
0x27da   :  { %v8823_v52 = vpop.eup %8822  ;;  %v5862_v39 = vmul.f32 %v8821_v29, %v8809_v43 }
0x27db   :  { %v5861_v4 = vmul.f32 %v8823_v52, %v8811_v37  ;;  %v6034_v49 = vsel %vm129_vm0, %v6028_v42, 0 }
0x27dd   :  { %v8825_v60 = vpop.eup %8824  ;;  %v5863_v14 = vpack.c.bf16 %v5862_v39, %v5861_v4 }
0x27de   :  { %v8827_v54 = vpop.eup %8826  ;;  %v6026_v56 = vmul.f32 %v8825_v60, %v8813_v6 }
0x27df   :  { %8323 = vmatmul.mubr.msk.bf16.vlgmr.msra.gmra.mrb[204].mxu0 %vm129_vm0, %v5863_v14  ;;  %v6025_v27 = vmul.f32 %v8827_v54, %v8815_v13 }
0x27e0   :  { %8335 = vmatpush3.bf16.xpose.msra.mxu0 %v6034_v49  ;;  %8338 = vmatprep.mubr.msk.bf16.mxu0 %vm8979_vm1, %v11081_v9 }
0x27e1   :  { %8336 = vmatprep.subr.bf16.mxu0 %v11081_v9  ;;  %v6029_v48 = vpack.c.bf16 %v6026_v56, %v6025_v27 }
0x27e3   :  { %v6037_v18 = vsel %vm129_vm0, %v6029_v48, 0 }
0x27e8   :  { %8337 = vmatpush3.bf16.xpose.msra.mxu0 %v6037_v18 }
0x27e9   :  { %8462 = vmatprep.subr.msk.bf16.mxu0 %vm346_vm2, %v10421_v44 }
0x27ef   :  { %8339 = vmatmul.mubr.msk.bf16.vlgmr.msra.gmra.mrb[208].mxu0 %vm129_vm0, %v11150_v40 }
0x27f0   :  { %8351 = vmatpush3.bf16.xpose.msra.mxu0 %v6170_v35  ;;  %8354 = vmatprep.mubr.msk.bf16.mxu0 %vm346_vm2, %v11153_v17 }
0x27f1   :  { %8463 = vmatprep.subr.msk.bf16.mxu0 %vm346_vm2, %v11154_v23 }
0x27f8   :  { %8353 = vmatpush3.bf16.xpose.msra.mxu0 %v6173_v33 }
0x27f9   :  { %8366 = vmatprep.subr.bf16.mxu0 %v11081_v9 }
0x27ff   :  { %8355 = vmatmul.mubr.msk.bf16.vlgmr.msra.gmra.mrb[212].mxu0 %vm346_vm2, %v11157_v2 }
0x2800   :  { %8370 = vmatprep.mubr.msk.bf16.mxu0 %vm8979_vm1, %v11081_v9 }
0x28b2   :  { %v10786_v44 = vpop.f32.mrb[204].mxu0 }
0x28b3   :  { %v8324_v28 = vpop.f32.mrb[205].mxu0 }
0x28b4   :  { %v10788_v38 = vpop.f32.mrb[206].mxu0 }
0x28b5   :  { %v8325_v11 = vpop.f32.mrb[207].mxu0 }
0x28c2   :  { %v6073_v47 = vpop.f32.mrb[208].mxu0 }
0x28c3   :  { %v6080_v8 = vadd.f32 %v6073_v47, %v11149_v55  ;;  %v8340_v43 = vpop.f32.mrb[209].mxu0 }
0x28c4   :  { %v6076_v37 = vpop.f32.mrb[210].mxu0 }
0x28c5   :  { %v6081_v57 = vadd.f32 %v6076_v37, %v11148_v32  ;;  %v8341_v0 = vpop.f32.mrb[211].mxu0  ;;  %v6082_v41 = vadd.f32 %v6080_v8, %v10676_v15 }
0x28c7   :  { %v6083_v62 = vadd.f32 %v6081_v57, %v10676_v15  ;;  %v6084_v52 = vsel %vm129_vm0, %v6082_v41, -inf }
0x28c9   :  { %v6087_v4 = vsel %vm129_vm0, %v6083_v62, -inf }
0x28d2   :  { %v8356_v6 = vpop.f32.mrb[212].mxu0 }
0x28d3   :  { %v6209_v13 = vpop.f32.mrb[213].mxu0  ;;  %v6226_v1 = vmul.f32 0.35355338, %v8356_v6 }
0x28d4   :  { %v6224_v51 = vmul.f32 0.35355338, %v6209_v13  ;;  %v8357_v61 = vpop.f32.mrb[214].mxu0 }
0x28d5   :  { %v6212_v10 = vpop.f32.mrb[215].mxu0  ;;  %v6227_v26 = vmul.f32 0.35355338, %v8357_v61  ;;  %v6230_v30 = vadd.f32 %v6226_v1, %v10676_v15 }
0x28d6   :  { %v6228_v31 = vadd.f32 %v6224_v51, %v10676_v15  ;;  %v6225_v16 = vmul.f32 0.35355338, %v6212_v10 }
0x28d7   :  { %v6231_v39 = vadd.f32 %v6227_v26, %v10676_v15  ;;  %v6238_v42 = vsel %vm129_vm0, %v6230_v30, -inf }
0x28d8   :  { %v6229_v5 = vadd.f32 %v6225_v16, %v10676_v15  ;;  %v6232_v20 = vsel %vm129_vm0, %v6228_v31, -inf }
0x28d9   :  { %6233 = vmax.xlane.f32.xlu0 %v6232_v20  ;;  %v6241_v60 = vsel %vm129_vm0, %v6231_v39, -inf }
0x28da   :  { %v6235_v29 = vsel %vm129_vm0, %v6229_v5, -inf }
0x28db   :  { %6236 = vmax.xlane.f32.xlu1 %v6235_v29 }
0x28dd   :  { %6085 = vmax.xlane.f32.xlu0 %v6084_v52 }
0x28df   :  { %6088 = vmax.xlane.f32.xlu1 %v6087_v4 }
0x28e1   :  { %6239 = vmax.xlane.f32.xlu0 %v6238_v42 }
0x28e3   :  { %6242 = vmax.xlane.f32.xlu1 %v6241_v60 }
0x2966   :  { %v6234_v14 = vpop.xlane.xlu0 %6233 }
0x2967   :  { %v6244_v56 = vsub.f32 %v6228_v31, %v6234_v14 }
0x2968   :  { %v6237_v54 = vpop.xlane.xlu1 %6236 }
0x2969   :  { %v6245_v40 = vsub.f32 %v6229_v5, %v6237_v54  ;;  %v6248_v36 = vmul.f32 1.442695, %v6244_v56 }
0x296a   :  { %v6086_v49 = vpop.xlane.xlu0 %6085 }
0x296b   :  { %v6090_v27 = vsub.f32 %v6082_v41, %v6086_v49  ;;  %v6250_v34 = vmul.f32 1.442695, %v6245_v40  ;;  %v11159_v40 = vld [vmem:[#allocation14_spill] sm:$0xff] }
0x296c   :  { %v6089_v48 = vpop.xlane.xlu1 %6088 }
0x296d   :  { %v6092_v18 = vmul.f32 1.442695, %v6090_v27  ;;  %v6091_v32 = vsub.f32 %v6083_v62, %v6089_v48 }
0x296e   :  { %v6240_v55 = vpop.xlane.xlu0 %6239 }
0x296f   :  { %8828 = vpow2.f32 %v6092_v18  ;;  %v6094_v35 = vmul.f32 1.442695, %v6091_v32  ;;  %v6246_v25 = vsub.f32 %v6230_v30, %v6240_v55  ;;  %v11158_v55 = vld [vmem:[#allocation31_spill] sm:$0xff] }
0x2970   :  { %v6243_v17 = vpop.xlane.xlu1 %6242 }
0x2971   :  { %8830 = vpow2.f32 %v6094_v35  ;;  %v6252_v23 = vmul.f32 1.442695, %v6246_v25  ;;  %v6247_v33 = vsub.f32 %v6231_v39, %v6243_v17  ;;  %v11160_v35 = vld [vmem:[#allocation13_spill] sm:$0xff] }
0x2972   :  { %v11161_v25 = vpack.c.bf16 %v11159_v40, %v11160_v35  ;;  %v11162_v17 = vld [vmem:[#allocation29_spill] sm:$0xff] }
0x2973   :  { %8832 = vpow2.f32 %v6252_v23  ;;  %v6254_v19 = vmul.f32 1.442695, %v6247_v33  ;;  %v11163_v23 = vld [vmem:[#allocation28_spill] sm:$0xff] }
0x2974   :  { %8834 = vpow2.f32 %v6248_v36  ;;  %v6417_v36 = vsel %vm346_vm2, %v11158_v55, 0  ;;  %v11164_v33 = vpack.c.bf16 %v11162_v17, %v11163_v23 }
0x2975   :  { %8836 = vpow2.f32 %v6254_v19 }
0x2976   :  { %8838 = vpow2.f32 %v6250_v34  ;;  %v11165_v34 = vld [vmem:[#allocation30_spill] sm:$0xff] }
0x2977   :  { %v6420_v19 = vsel %vm346_vm2, %v11165_v34, 0 }
0x2979   :  { %v8829_v2 = vpop.eup %8828 }
0x297a   :  { %v6096_v28 = vsel %vm129_vm0, %v8829_v2, 0.0 }
0x297b   :  { %v8831_v11 = vpop.eup %8830  ;;  %6097 = vadd.xlane.f32.xlu0 %v6096_v28  ;;  %v11167_v28 = vld [vmem:[#allocation26_spill] sm:$0xff] }
0x297c   :  { %v6099_v47 = vsel %vm129_vm0, %v8831_v11, 0.0 }
0x297d   :  { %v8833_v8 = vpop.eup %8832  ;;  %6100 = vadd.xlane.f32.xlu1 %v6099_v47 }
0x297e   :  { %v8835_v43 = vpop.eup %8834  ;;  %v6262_v37 = vsel %vm129_vm0, %v8833_v8, 0.0 }
0x297f   :  { %v8837_v57 = vpop.eup %8836  ;;  %6263 = vadd.xlane.f32.xlu0 %v6262_v37  ;;  %v6256_v13 = vsel %vm129_vm0, %v8835_v43, 0.0 }
0x2980   :  { %v6265_v0 = vsel %vm129_vm0, %v8837_v57, 0.0  ;;  %v8839_v6 = vpop.eup %8838 }
0x2981   :  { %6266 = vadd.xlane.f32.xlu1 %v6265_v0  ;;  %v6259_v51 = vsel %vm129_vm0, %v8839_v6, 0.0 }
0x2983   :  { %6257 = vadd.xlane.f32.xlu0 %v6256_v13 }
0x2985   :  { %6260 = vadd.xlane.f32.xlu1 %v6259_v51 }
0x2996   :  { %6111 = vrot.lane.b32.xlu1 %v10080_v45, %s8981_s23 }
0x2999   :  { %6109 = vrot.lane.b32.xlu0 %v10082_v3, %s8981_s23 }
0x2a08   :  { %v6098_v61 = vpop.xlane.xlu0 %6097 }
0x2a09   :  { %8840 = vrcp.f32 %v6098_v61 }
0x2a0a   :  { %v6101_v10 = vpop.xlane.xlu1 %6100 }
0x2a0b   :  { %8842 = vrcp.f32 %v6101_v10 }
0x2a0c   :  { %v6264_v31 = vpop.xlane.xlu0 %6263 }
0x2a0e   :  { %v6267_v16 = vpop.xlane.xlu1 %6266 }
0x2a10   :  { %v6258_v41 = vpop.xlane.xlu0 %6257 }
0x2a11   :  { %8844 = vrcp.f32 %v6258_v41 }
0x2a12   :  { %v6261_v1 = vpop.xlane.xlu1 %6260 }
0x2a13   :  { %8846 = vrcp.f32 %v6261_v1  ;;  %v8841_v5 = vpop.eup %8840 }
0x2a14   :  { %v6110_v20 = vpop.permute.xlu0 %6109  ;;  %8848 = vrcp.f32 %v6267_v16  ;;  %v6104_v29 = vmul.f32 %v8841_v5, %v8829_v2  ;;  %v11166_v2 = vld [vmem:[#allocation27_spill] sm:$0xff] }
0x2a15   :  { %v8843_v62 = vpop.eup %8842  ;;  %8343 = vmatpush3.bf16.msra.mxu1 %v6110_v20  ;;  %8850 = vrcp.f32 %v6264_v31 }
0x2a16   :  { %v6105_v26 = vmul.f32 %v8843_v62, %v8831_v11  ;;  %8344 = vmatprep.subr.bf16.mxu1 %v11081_v9  ;;  %v6112_v30 = vpop.permute.xlu1 %6111  ;;  %v11168_v11 = vpack.c.bf16 %v11166_v2, %v11167_v28 }
0x2a18   :  { %v6106_v52 = vpack.c.bf16 %v6105_v26, %v6104_v29 }
0x2a19   :  { %8345 = vmatpush3.bf16.msra.mxu1 %v6112_v30 }
0x2a1a   :  { %8358 = vmatprep.subr.bf16.mxu1 %v11081_v9 }
0x2a1b   :  { %v8845_v39 = vpop.eup %8844 }
0x2a1c   :  { %8347 = vmatmul.mubr.msk.bf16.vlgmr.msra.gmra.mrb[212].mxu1 %vm129_vm0, %v6106_v52  ;;  %v6272_v42 = vmul.f32 %v8845_v39, %v8835_v43 }
0x2a1d   :  { %v8847_v4 = vpop.eup %8846  ;;  %8362 = vmatprep.mubr.msk.bf16.mxu1 %vm8979_vm1, %v11081_v9 }
0x2a1e   :  { %v6273_v60 = vmul.f32 %v8847_v4, %v8839_v6  ;;  %v8849_v14 = vpop.eup %8848 }
0x2a1f   :  { %v8851_v49 = vpop.eup %8850  ;;  %v6275_v56 = vmul.f32 %v8849_v14, %v8837_v57 }
0x2a20   :  { %v6277_v54 = vpack.c.bf16 %v6273_v60, %v6272_v42  ;;  %v6274_v48 = vmul.f32 %v8851_v49, %v8833_v8 }
0x2a22   :  { %v6283_v27 = vsel %vm129_vm0, %v6277_v54, 0  ;;  %v6278_v18 = vpack.c.bf16 %v6275_v56, %v6274_v48 }
0x2a23   :  { %8359 = vmatpush3.bf16.xpose.msra.mxu1 %v6283_v27 }
0x2a24   :  { %8360 = vmatprep.subr.bf16.mxu1 %v11081_v9  ;;  %v6286_v32 = vsel %vm129_vm0, %v6278_v18, 0 }
0x2a2b   :  { %8361 = vmatpush3.bf16.xpose.msra.mxu1 %v6286_v32 }
0x2a2c   :  { %8464 = vmatprep.subr.msk.bf16.mxu1 %vm346_vm2, %v11158_v55 }
0x2a32   :  { %8363 = vmatmul.mubr.msk.bf16.vlgmr.msra.gmra.mrb[216].mxu1 %vm129_vm0, %v11161_v25 }
0x2a33   :  { %8375 = vmatpush3.bf16.xpose.msra.mxu1 %v6417_v36  ;;  %8378 = vmatprep.mubr.msk.bf16.mxu1 %vm346_vm2, %v11164_v33 }
0x2a34   :  { %8465 = vmatprep.subr.msk.bf16.mxu1 %vm346_vm2, %v11165_v34 }
0x2a3b   :  { %8377 = vmatpush3.bf16.xpose.msra.mxu1 %v6420_v19 }
0x2a3c   :  { %8390 = vmatprep.subr.bf16.mxu1 %v11081_v9 }
0x2a42   :  { %8379 = vmatmul.mubr.msk.bf16.vlgmr.msra.gmra.mrb[220].mxu1 %vm346_vm2, %v11168_v11 }
0x2a43   :  { %8394 = vmatprep.mubr.msk.bf16.mxu1 %vm8979_vm1, %v11081_v9 }
0x2aef   :  { %v10845_v47 = vpop.f32.mrb[212].mxu1 }
0x2af0   :  { %v8348_v8 = vpop.f32.mrb[213].mxu1 }
0x2af1   :  { %v10847_v43 = vpop.f32.mrb[214].mxu1 }
0x2af2   :  { %v8518_v37 = vpack.i.bf16 %v10847_v43, %v10845_v47  ;;  %v8349_v57 = vpop.f32.mrb[215].mxu1 }
0x2b05   :  { %v6322_v0 = vpop.f32.mrb[216].mxu1 }
0x2b06   :  { %v6329_v6 = vadd.f32 %v6322_v0, %v11160_v35  ;;  %v8364_v13 = vpop.f32.mrb[217].mxu1 }
0x2b07   :  { %v6325_v51 = vpop.f32.mrb[218].mxu1 }
0x2b08   :  { %v6330_v61 = vadd.f32 %v6325_v51, %v11159_v40  ;;  %v8365_v10 = vpop.f32.mrb[219].mxu1  ;;  %v6331_v39 = vadd.f32 %v6329_v6, %v10676_v15 }
0x2b0a   :  { %v6332_v26 = vadd.f32 %v6330_v61, %v10676_v15  ;;  %v6333_v49 = vsel %vm129_vm0, %v6331_v39, -inf }
0x2b0c   :  { %v6336_v14 = vsel %vm129_vm0, %v6332_v26, -inf }
0x2b15   :  { %v8380_v31 = vpop.f32.mrb[220].mxu1 }
0x2b16   :  { %v6456_v16 = vpop.f32.mrb[221].mxu1  ;;  %v6473_v4 = vmul.f32 0.35355338, %v8380_v31 }
0x2b17   :  { %v6471_v41 = vmul.f32 0.35355338, %v6456_v16  ;;  %v8381_v1 = vpop.f32.mrb[222].mxu1 }
0x2b18   :  { %v6459_v5 = vpop.f32.mrb[223].mxu1  ;;  %v6474_v29 = vmul.f32 0.35355338, %v8381_v1  ;;  %v6477_v54 = vadd.f32 %v6473_v4, %v10676_v15 }
0x2b19   :  { %v6475_v20 = vadd.f32 %v6471_v41, %v10676_v15  ;;  %v6472_v62 = vmul.f32 0.35355338, %v6459_v5 }
0x2b1a   :  { %v6478_v60 = vadd.f32 %v6474_v29, %v10676_v15  ;;  %v6485_v56 = vsel %vm129_vm0, %v6477_v54, -inf }
0x2b1b   :  { %v6476_v30 = vadd.f32 %v6472_v62, %v10676_v15  ;;  %v6479_v52 = vsel %vm129_vm0, %v6475_v20, -inf }
0x2b1c   :  { %6480 = vmax.xlane.f32.xlu1 %v6479_v52  ;;  %v6488_v27 = vsel %vm129_vm0, %v6478_v60, -inf }
0x2b1d   :  { %v6482_v42 = vsel %vm129_vm0, %v6476_v30, -inf }
0x2b1e   :  { %6483 = vmax.xlane.f32.xlu0 %v6482_v42 }
0x2b20   :  { %6337 = vmax.xlane.f32.xlu1 %v6336_v14 }
0x2b22   :  { %6334 = vmax.xlane.f32.xlu0 %v6333_v49 }
0x2b24   :  { %6489 = vmax.xlane.f32.xlu1 %v6488_v27 }
0x2b26   :  { %6486 = vmax.xlane.f32.xlu0 %v6485_v56 }
0x2ba9   :  { %v6481_v48 = vpop.xlane.xlu1 %6480 }
0x2baa   :  { %v6491_v23 = vsub.f32 %v6475_v20, %v6481_v48 }
0x2bab   :  { %v6484_v18 = vpop.xlane.xlu0 %6483 }
0x2bac   :  { %v6492_v40 = vsub.f32 %v6476_v30, %v6484_v18  ;;  %v6495_v8 = vmul.f32 1.442695, %v6491_v23 }
0x2bad   :  { %v6338_v32 = vpop.xlane.xlu1 %6337 }
0x2bae   :  { %v6340_v55 = vsub.f32 %v6332_v26, %v6338_v32  ;;  %v6497_v19 = vmul.f32 1.442695, %v6492_v40 }
0x2baf   :  { %v6335_v35 = vpop.xlane.xlu0 %6334 }
0x2bb0   :  { %v6343_v25 = vmul.f32 1.442695, %v6340_v55  ;;  %v6339_v36 = vsub.f32 %v6331_v39, %v6335_v35 }
0x2bb1   :  { %v6490_v17 = vpop.xlane.xlu1 %6489 }
0x2bb2   :  { %8852 = vpow2.f32 %v6343_v25  ;;  %v6341_v33 = vmul.f32 1.442695, %v6339_v36  ;;  %v6494_v34 = vsub.f32 %v6478_v60, %v6490_v17 }
0x2bb3   :  { %v6487_v2 = vpop.xlane.xlu0 %6486 }
0x2bb4   :  { %8854 = vpow2.f32 %v6341_v33  ;;  %v6501_v28 = vmul.f32 1.442695, %v6494_v34  ;;  %v6493_v11 = vsub.f32 %v6477_v54, %v6487_v2  ;;  %v11169_v34 = vld [vmem:[#allocation16_spill] sm:$0xff] }
0x2bb6   :  { %8856 = vpow2.f32 %v6501_v28  ;;  %v6499_v57 = vmul.f32 1.442695, %v6493_v11 }
0x2bb7   :  { %8858 = vpow2.f32 %v6497_v19  ;;  %v11170_v19 = vld [vmem:[#allocation15_spill] sm:$0xff] }
0x2bb8   :  { %8860 = vpow2.f32 %v6499_v57  ;;  %v11171_v2 = vpack.c.bf16 %v11169_v34, %v11170_v19 }
0x2bb9   :  { %8862 = vpow2.f32 %v6495_v8 }
0x2bbc   :  { %v8853_v0 = vpop.eup %8852 }
0x2bbd   :  { %v6348_v6 = vsel %vm129_vm0, %v8853_v0, 0.0 }
0x2bbe   :  { %v8855_v13 = vpop.eup %8854  ;;  %6349 = vadd.xlane.f32.xlu1 %v6348_v6 }
0x2bbf   :  { %v6345_v51 = vsel %vm129_vm0, %v8855_v13, 0.0 }
0x2bc0   :  { %v8857_v61 = vpop.eup %8856  ;;  %6346 = vadd.xlane.f32.xlu0 %v6345_v51 }
0x2bc1   :  { %v8859_v10 = vpop.eup %8858  ;;  %v6512_v31 = vsel %vm129_vm0, %v8857_v61, 0.0 }
0x2bc2   :  { %v8861_v16 = vpop.eup %8860  ;;  %6513 = vadd.xlane.f32.xlu1 %v6512_v31  ;;  %v6506_v5 = vsel %vm129_vm0, %v8859_v10, 0.0 }
0x2bc3   :  { %v6509_v41 = vsel %vm129_vm0, %v8861_v16, 0.0  ;;  %v8863_v1 = vpop.eup %8862 }
0x2bc4   :  { %6510 = vadd.xlane.f32.xlu0 %v6509_v41  ;;  %v6503_v20 = vsel %vm129_vm0, %v8863_v1, 0.0 }
0x2bc6   :  { %6507 = vadd.xlane.f32.xlu1 %v6506_v5 }
0x2bc8   :  { %6504 = vadd.xlane.f32.xlu0 %v6503_v20 }
0x2bd7   :  { %6358 = vrot.lane.b32.xlu1 %v10080_v45, %s8980_s28 }
0x2bde   :  { %6356 = vrot.lane.b32.xlu0 %v10082_v3, %s8980_s28 }
0x2c4b   :  { %v6350_v62 = vpop.xlane.xlu1 %6349 }
0x2c4d   :  { %v6347_v26 = vpop.xlane.xlu0 %6346 }
0x2c4e   :  { %8864 = vrcp.f32 %v6347_v26 }
0x2c4f   :  { %v6514_v29 = vpop.xlane.xlu1 %6513  ;;  %8866 = vrcp.f32 %v6350_v62 }
0x2c51   :  { %v6511_v30 = vpop.xlane.xlu0 %6510 }
0x2c53   :  { %v6508_v52 = vpop.xlane.xlu1 %6507 }
0x2c54   :  { %8868 = vrcp.f32 %v6508_v52 }
0x2c55   :  { %v6505_v39 = vpop.xlane.xlu0 %6504 }
0x2c56   :  { %8870 = vrcp.f32 %v6505_v39 }
0x2c57   :  { %8872 = vrcp.f32 %v6511_v30  ;;  %v6359_v49 = vpop.permute.xlu1 %6358 }
0x2c58   :  { %v8865_v4 = vpop.eup %8864  ;;  %8874 = vrcp.f32 %v6514_v29 }
0x2c59   :  { %v6357_v42 = vpop.permute.xlu0 %6356  ;;  %v8867_v60 = vpop.eup %8866  ;;  %v6353_v14 = vmul.f32 %v8865_v4, %v8855_v13 }
0x2c5a   :  { %8367 = vmatpush3.bf16.msra.mxu0 %v6357_v42  ;;  %v6354_v54 = vmul.f32 %v8867_v60, %v8853_v0 }
0x2c5b   :  { %8368 = vmatprep.subr.bf16.mxu0 %v11081_v9 }
0x2c5c   :  { %v6355_v56 = vpack.c.bf16 %v6354_v54, %v6353_v14 }
0x2c5e   :  { %v8869_v27 = vpop.eup %8868  ;;  %8369 = vmatpush3.bf16.msra.mxu0 %v6359_v49 }
0x2c5f   :  { %8382 = vmatprep.subr.bf16.mxu0 %v11081_v9  ;;  %v6520_v32 = vmul.f32 %v8869_v27, %v8859_v10 }
0x2c60   :  { %v8871_v48 = vpop.eup %8870 }
0x2c61   :  { %8371 = vmatmul.mubr.msk.bf16.vlgmr.msra.gmra.mrb[216].mxu0 %vm129_vm0, %v6355_v56  ;;  %v6519_v18 = vmul.f32 %v8871_v48, %v8863_v1  ;;  %v8873_v55 = vpop.eup %8872 }
0x2c62   :  { %8386 = vmatprep.mubr.msk.bf16.mxu0 %vm8979_vm1, %v11081_v9  ;;  %v8875_v35 = vpop.eup %8874  ;;  %v6521_v36 = vmul.f32 %v8873_v55, %v8861_v16 }
0x2c63   :  { %v6524_v40 = vpack.c.bf16 %v6520_v32, %v6519_v18  ;;  %v6522_v17 = vmul.f32 %v8875_v35, %v8857_v61 }
0x2c65   :  { %v6530_v25 = vsel %vm129_vm0, %v6524_v40, 0  ;;  %v6525_v23 = vpack.c.bf16 %v6522_v17, %v6521_v36 }
0x2c67   :  { %8383 = vmatpush3.bf16.xpose.msra.mxu0 %v6530_v25  ;;  %v6533_v33 = vsel %vm129_vm0, %v6525_v23, 0 }
0x2c68   :  { %8384 = vmatprep.subr.bf16.mxu0 %v11081_v9 }
0x2c6f   :  { %8385 = vmatpush3.bf16.xpose.msra.mxu0 %v6533_v33 }
0x2c76   :  { %8387 = vmatmul.mubr.msk.bf16.vlgmr.msra.gmra.mrb[220].mxu0 %vm129_vm0, %v11171_v2 }
0x2d34   :  { %v6399_v28 = vpop.f32.mrb[216].mxu0 }
0x2d35   :  { %v8372_v11 = vpop.f32.mrb[217].mxu0 }
0x2d36   :  { %v6402_v8 = vpop.f32.mrb[218].mxu0 }
0x2d37   :  { %v8528_v57 = vpack.i.bf16 %v6402_v8, %v6399_v28  ;;  %v8373_v0 = vpop.f32.mrb[219].mxu0 }
0x2d49   :  { %v6569_v6 = vpop.f32.mrb[220].mxu0 }
0x2d4a   :  { %v6576_v13 = vadd.f32 %v6569_v6, %v11170_v19  ;;  %v8388_v51 = vpop.f32.mrb[221].mxu0 }
0x2d4b   :  { %v6572_v10 = vpop.f32.mrb[222].mxu0 }
0x2d4c   :  { %v6578_v61 = vadd.f32 %v6576_v13, %v10676_v15  ;;  %v6577_v31 = vadd.f32 %v6572_v10, %v11169_v34  ;;  %v8389_v16 = vpop.f32.mrb[223].mxu0 }
0x2d4e   :  { %v6579_v41 = vadd.f32 %v6577_v31, %v10676_v15  ;;  %v6580_v1 = vsel %vm129_vm0, %v6578_v61, -inf }
0x2d4f   :  { %6581 = vmax.xlane.f32.xlu1 %v6580_v1  ;;  %v8901_v1 = vld [vmem:[%s11032_s0 + $0x10] sm:$0xff] }
0x2d50   :  { %v6583_v5 = vsel %vm129_vm0, %v6579_v41, -inf }
0x2d51   :  { %6584 = vmax.xlane.f32.xlu0 %v6583_v5 }
0x2ddc   :  { %v6582_v20 = vpop.xlane.xlu1 %6581 }
0x2ddd   :  { %v6586_v62 = vsub.f32 %v6578_v61, %v6582_v20  ;;  %v8902_v20 = vld [vmem:[%s11032_s0] sm:$0xff] }
0x2dde   :  { %v6585_v26 = vpop.xlane.xlu0 %6584 }
0x2ddf   :  { %v6588_v29 = vmul.f32 1.442695, %v6586_v62  ;;  %v6587_v30 = vsub.f32 %v6579_v41, %v6585_v26  ;;  %v7359_v41 = vld [vmem:[%s11038_s6 + $0x7] ss:$0 sm:$0xff]  ;;  %v8903_v26 = vld [vmem:[%s11032_s0 + $0x18] sm:$0xff] }
0x2de1   :  { %8876 = vpow2.f32 %v6588_v29  ;;  %v6590_v52 = vmul.f32 1.442695, %v6587_v30 }
0x2de3   :  { %8878 = vpow2.f32 %v6590_v52 }
0x2deb   :  { %v8877_v39 = vpop.eup %8876 }
0x2dec   :  { %v6592_v4 = vsel %vm129_vm0, %v8877_v39, 0.0 }
0x2ded   :  { %v8879_v42 = vpop.eup %8878  ;;  %6593 = vadd.xlane.f32.xlu0 %v6592_v4 }
0x2dee   :  { %v6595_v15 = vsel %vm129_vm0, %v8879_v42, 0.0 }
0x2def   :  { %6596 = vadd.xlane.f32.xlu1 %v6595_v15 }
0x2e00   :  { %6605 = vrot.lane.b32.xlu1 %v10080_v45, %s8982_s24 }
0x2e03   :  { %6603 = vrot.lane.b32.xlu0 %v10082_v3, %s8982_s24 }
0x2e04   :  { %8509 = vrot.lane.b32.xlu1 %v8508_v46, %s8984_s16 }
0x2e07   :  { %8514 = vrot.lane.b32.xlu0 %v8513_v7, %s8983_s2 }
0x2e08   :  { %8519 = vrot.lane.b32.xlu1 %v8518_v37, %s8984_s16 }
0x2e0b   :  { %8524 = vrot.lane.b32.xlu0 %v8523_v24, %s8985_s17 }
0x2e0c   :  { %8529 = vrot.lane.b32.xlu1 %v8528_v57, %s8983_s2 }
0x2e7a   :  { %v6594_v45 = vpop.xlane.xlu0 %6593 }
0x2e7b   :  { %8880 = vrcp.f32 %v6594_v45 }
0x2e7c   :  { %v6597_v3 = vpop.xlane.xlu1 %6596 }
0x2e7d   :  { %8882 = vrcp.f32 %v6597_v3 }
0x2e7e   :  { %v6604_v22 = vpop.permute.xlu0 %6603 }
0x2e7f   :  { %8391 = vmatpush3.bf16.msra.mxu1 %v6604_v22 }
0x2e80   :  { %v6606_v58 = vpop.permute.xlu1 %6605  ;;  %8392 = vmatprep.subr.bf16.mxu1 %v11081_v9 }
0x2e82   :  { %v8515_v46 = vpop.permute.xlu0 %8514 }
0x2e83   :  { %8393 = vmatpush3.bf16.msra.mxu1 %v6606_v58  ;;  %v8517_v43 = vunpack.i.h.bf16 %v8515_v46  ;;  %v8516_v59 = vunpack.i.l.bf16 %v8515_v46 }
0x2e84   :  { %v8510_v63 = vpop.permute.xlu1 %8509 }
0x2e85   :  { %v8881_v50 = vpop.eup %8880  ;;  %v8512_v7 = vunpack.i.h.bf16 %v8510_v63  ;;  %v8511_v47 = vunpack.i.l.bf16 %v8510_v63 }
0x2e86   :  { %v8525_v12 = vpop.permute.xlu0 %8524  ;;  %v6600_v49 = vmul.f32 %v8881_v50, %v8877_v39 }
0x2e87   :  { %v8883_v24 = vpop.eup %8882  ;;  %v5658_v37 = vsel %vm346_vm2, %v10543_v53, %v8512_v7  ;;  %v5657_v60 = vsel %vm346_vm2, %v10541_v21, %v8511_v47  ;;  %v8527_v14 = vunpack.i.h.bf16 %v8525_v12  ;;  %v8526_v54 = vunpack.i.l.bf16 %v8525_v12  ;;  %v8556_v21 = vld [vmem:[%s11037_s5 + $0x70] sm:$0xff]   ;;  %v8557_v53 = vld [vmem:[%s11037_s5 + $0x78] sm:$0xff]  }
0x2e88   :  { %v6601_v9 = vmul.f32 %v8883_v24, %v8879_v42  ;;  %v5659_v27 = vsel %vm1106_vm3, %v5657_v60, %v8516_v59  ;;  %v5660_v56 = vsel %vm1106_vm3, %v5658_v37, %v8517_v43  ;;  %8398 = vmatprep.subr.bf16.mxu1 %v8556_v21  ;;  %v8520_v23 = vpop.permute.xlu1 %8519 }
0x2e89   :  { %v5661_v48 = vsel %vm2158_vm4, %v5659_v27, %v8526_v54  ;;  %v5662_v18 = vsel %vm2158_vm4, %v5660_v56, %v8527_v14  ;;  %v8522_v34 = vunpack.i.h.bf16 %v8520_v23  ;;  %v8521_v19 = vunpack.i.l.bf16 %v8520_v23  ;;  %v8560_v23 = vld [vmem:[%s11043_s11] sm:$0xff]  }
0x2e8a   :  { %v6683_v32 = vpack.c.bf16 %v5662_v18, %v5661_v48  ;;  %v6602_v55 = vpack.c.bf16 %v6601_v9, %v6600_v49 }
0x2e8b   :  { %v6678_v8 = vsel %vm346_vm2, %v10788_v38, %v8522_v34  ;;  %v6677_v57 = vsel %vm346_vm2, %v10786_v44, %v8521_v19  ;;  %v7207_v38 = vld [vmem:[%s11038_s6 + $0x3] ss:$0 sm:$0xff]  ;;  %v8900_v44 = vld [vmem:[%s11032_s0 + $0x8] sm:$0xff] }
0x2e8c   :  { %8395 = vmatmul.mubr.msk.bf16.vlgmr.msra.gmra.mrb[224].mxu1 %vm129_vm0, %v6602_v55  ;;  %v8530_v33 = vpop.permute.xlu1 %8529  ;;  %v8435_v16 = vadd.f32 %v8900_v44, %v7207_v38  ;;  %v8426_v5 = vadd.f32 %v8901_v1, %v7207_v38  ;;  %v8429_v62 = vadd.f32 %v8902_v20, %v7207_v38  ;;  %v8432_v29 = vadd.f32 %v8903_v26, %v7207_v38 }
0x2e8d   :  { %8402 = vmatprep.mubr.msk.bf16.mxu1 %vm129_vm0, %v6683_v32  ;;  %8399 = vmatpush3.bf16.msra.mxu1 %v8556_v21  ;;  %v8532_v2 = vunpack.i.h.bf16 %v8530_v33  ;;  %v8531_v28 = vunpack.i.l.bf16 %v8530_v33 }
0x2e8e   :  { %8400 = vmatprep.subr.bf16.mxu1 %v8557_v53  ;;  %v8436_v52 = vadd.f32 %v8435_v16, %v7359_v41  ;;  %v8433_v45 = vadd.f32 %v8432_v29, %v7359_v41  ;;  %v7365_v16 = vld [vmem:[%s11044_s12 + $0x1] ss:$0 sm:$0xff] }
0x2e8f   :  { %v6679_v13 = vsel %vm1106_vm3, %v6677_v57, %v8531_v28  ;;  %v6680_v51 = vsel %vm1106_vm3, %v6678_v8, %v8532_v2 }
0x2e91   :  { %8401 = vmatpush3.bf16.msra.mxu1 %v8557_v53 }
0x2f5f   :  { %v6646_v40 = vpop.f32.mrb[224].mxu1 }
0x2f60   :  { %v8396_v35 = vpop.f32.mrb[225].mxu1 }
0x2f61   :  { %v6649_v25 = vpop.f32.mrb[226].mxu1 }
0x2f62   :  { %v8533_v36 = vpack.i.bf16 %v6649_v25, %v6646_v40  ;;  %v8397_v17 = vpop.f32.mrb[227].mxu1 }
0x2f63   :  { %v8559_v17 = vld [vmem:[%s11041_s9 + $0x8] sm:$0xff]  }
0x2f64   :  { %8534 = vrot.lane.b32.xlu0 %v8533_v36, %s8985_s17  ;;  %v8558_v36 = vld [vmem:[%s11041_s9] sm:$0xff]  }
0x2f65   :  { %8406 = vmatprep.subr.bf16.mxu0 %v8558_v36 }
0x2f66   :  { %8407 = vmatpush3.bf16.msra.mxu0 %v8558_v36 }
0x2f67   :  { %8408 = vmatprep.subr.bf16.mxu0 %v8559_v17 }
0x2f6a   :  { %8409 = vmatpush3.bf16.msra.mxu0 %v8559_v17 }
0x2f6b   :  { %8414 = vmatprep.subr.bf16.mxu0 %v8560_v23 }
0x2fd6   :  { %v8535_v11 = vpop.permute.xlu0 %8534 }
0x2fd7   :  { %v8537_v0 = vunpack.i.h.bf16 %v8535_v11  ;;  %v8536_v6 = vunpack.i.l.bf16 %v8535_v11 }
0x2fd9   :  { %v6682_v10 = vsel %vm2158_vm4, %v6680_v51, %v8537_v0  ;;  %v6681_v61 = vsel %vm2158_vm4, %v6679_v13, %v8536_v6 }
0x2fda   :  { %v6684_v31 = vpack.c.bf16 %v6682_v10, %v6681_v61  ;;  %v7364_v61 = vld [vmem:[%s11044_s12] ss:$0 sm:$0xff] }
0x2fdc   :  { %8403 = vmatmul.mubr.msk.bf16.vlgmr.msra.gmra.mrb[104].mxu1 %vm129_vm0, %v6684_v31 }
0x30af   :  { %v8404_v30 = vpop.f32.mrb[104].mxu1 }
0x30b0   :  { %v6741_v39 = vpop.f32.mrb[105].mxu1  ;;  %v8427_v4 = vadd.f32 %v8426_v5, %v8404_v30 }
0x30b1   :  { %v8430_v42 = vadd.f32 %v8429_v62, %v6741_v39  ;;  %v8405_v15 = vpop.f32.mrb[106].mxu1 }
0x30b2   :  { %v6744_v3 = vpop.f32.mrb[107].mxu1  ;;  %v8428_v46 = vadd.f32 %v8427_v4, %v7359_v41  ;;  %v8434_v63 = vadd.f32 %v8433_v45, %v8405_v15 }
0x30b3   :  { %v8431_v22 = vadd.f32 %v8430_v42, %v7359_v41  ;;  %v8437_v58 = vadd.f32 %v8436_v52, %v6744_v3  ;;  %v8561_v3 = vld [vmem:[%s11043_s11 + $0x8] sm:$0xff]  }
0x30b4   :  { %v6778_v47 = vsel %vm129_vm0, %v8434_v63, 0.0  ;;  %v6775_v43 = vsel %vm129_vm0, %v8428_v46, 0.0 }
0x30b5   :  { %v6769_v50 = vsel %vm129_vm0, %v8431_v22, 0.0  ;;  %v6772_v7 = vsel %vm129_vm0, %v8437_v58, 0.0 }
0x30b6   :  { %6770 = vadd.xlane.f32.xlu1 %v6769_v50  ;;  %6773 = vadd.xlane.f32.xlu0 %v6772_v7 }
0x30ba   :  { %6779 = vadd.xlane.f32.xlu1 %v6778_v47  ;;  %6776 = vadd.xlane.f32.xlu0 %v6775_v43 }
0x3143   :  { %v6771_v59 = vpop.xlane.xlu1 %6770  ;;  %v6774_v12 = vpop.xlane.xlu0 %6773 }
0x3144   :  { %v6782_v24 = vmul.f32 0.03125, %v6771_v59  ;;  %v6783_v37 = vmul.f32 0.03125, %v6774_v12 }
0x3146   :  { %v6786_v60 = vsub.f32 %v8431_v22, %v6782_v24  ;;  %v6787_v14 = vsub.f32 %v8437_v58, %v6783_v37  ;;  %v8562_v22 = vld [vmem:[%s11043_s11 + $0x10] sm:$0xff]   ;;  %v8563_v58 = vld [vmem:[%s11043_s11 + $0x18] sm:$0xff]  }
0x3147   :  { %v6780_v54 = vpop.xlane.xlu1 %6779  ;;  %v6777_v49 = vpop.xlane.xlu0 %6776 }
0x3148   :  { %v6785_v9 = vmul.f32 0.03125, %v6780_v54  ;;  %v6784_v27 = vmul.f32 0.03125, %v6777_v49  ;;  %v6790_v56 = vmul.f32 %v6786_v60, %v6786_v60  ;;  %v6791_v48 = vmul.f32 %v6787_v14, %v6787_v14 }
0x314a   :  { %v6789_v18 = vsub.f32 %v8434_v63, %v6785_v9  ;;  %v6788_v32 = vsub.f32 %v8428_v46, %v6784_v27  ;;  %v6794_v55 = vsel %vm129_vm0, %v6790_v56, 0.0  ;;  %v6797_v21 = vsel %vm129_vm0, %v6791_v48, 0.0  ;;  %v7366_v46 = vld [vmem:[%s11042_s10] ss:$0 sm:$0xff]  ;;  %v7371_v27 = vld [vmem:[%s11044_s12 + $0x4] ss:$0 sm:$0xff] }
0x314b   :  { %6795 = vadd.xlane.f32.xlu0 %v6794_v55  ;;  %6798 = vadd.xlane.f32.xlu1 %v6797_v21 }
0x314c   :  { %v6793_v53 = vmul.f32 %v6789_v18, %v6789_v18  ;;  %v6792_v40 = vmul.f32 %v6788_v32, %v6788_v32 }
0x314e   :  { %v6803_v35 = vsel %vm129_vm0, %v6793_v53, 0.0  ;;  %v6800_v25 = vsel %vm129_vm0, %v6792_v40, 0.0 }
0x314f   :  { %6804 = vadd.xlane.f32.xlu1 %v6803_v35  ;;  %6801 = vadd.xlane.f32.xlu0 %v6800_v25 }
0x31d8   :  { %v6799_v33 = vpop.xlane.xlu1 %6798  ;;  %v6796_v34 = vpop.xlane.xlu0 %6795 }
0x31d9   :  { %v6807_v19 = vmul.f32 0.03125, %v6799_v33  ;;  %v6806_v2 = vmul.f32 0.03125, %v6796_v34 }
0x31db   :  { %v6811_v28 = vadd.f32 1e-05, %v6807_v19  ;;  %v6810_v11 = vadd.f32 1e-05, %v6806_v2 }
0x31dc   :  { %v6805_v8 = vpop.xlane.xlu1 %6804  ;;  %v6802_v57 = vpop.xlane.xlu0 %6801 }
0x31dd   :  { %8884 = vrsqrt.f32 %v6811_v28  ;;  %v6809_v0 = vmul.f32 0.03125, %v6805_v8  ;;  %v6808_v6 = vmul.f32 0.03125, %v6802_v57 }
0x31de   :  { %8886 = vrsqrt.f32 %v6810_v11 }
0x31df   :  { %v6813_v13 = vadd.f32 1e-05, %v6809_v0  ;;  %v6812_v51 = vadd.f32 1e-05, %v6808_v6 }
0x31e1   :  { %8888 = vrsqrt.f32 %v6813_v13 }
0x31e2   :  { %8890 = vrsqrt.f32 %v6812_v51 }
0x31e7   :  { %v8885_v10 = vpop.eup %8884 }
0x31e8   :  { %v8887_v31 = vpop.eup %8886  ;;  %v6819_v38 = vmul.f32 %v8885_v10, %v6787_v14 }
0x31e9   :  { %v6818_v44 = vmul.f32 %v8887_v31, %v6786_v60 }
0x31ea   :  { %v6827_v41 = vmul.f32 %v7364_v61, %v6819_v38 }
0x31eb   :  { %v8889_v1 = vpop.eup %8888  ;;  %v6826_v5 = vmul.f32 %v7364_v61, %v6818_v44 }
0x31ec   :  { %v8891_v20 = vpop.eup %8890  ;;  %v6821_v62 = vmul.f32 %v8889_v1, %v6789_v18  ;;  %v6835_v26 = vadd.f32 %v7365_v16, %v6827_v41 }
0x31ed   :  { %v6820_v29 = vmul.f32 %v8891_v20, %v6788_v32  ;;  %v6834_v30 = vadd.f32 %v7365_v16, %v6826_v5 }
0x31ee   :  { %v6829_v52 = vmul.f32 %v7364_v61, %v6821_v62 }
0x31ef   :  { %v6828_v39 = vmul.f32 %v7364_v61, %v6820_v29  ;;  %v6842_v4 = vpack.c.bf16 %v6835_v26, %v6834_v30 }
0x31f0   :  { %v6837_v42 = vadd.f32 %v7365_v16, %v6829_v52 }
0x31f1   :  { %8410 = vmatprep.mubr.msk.bf16.mxu0 %vm129_vm0, %v6842_v4  ;;  %v6836_v15 = vadd.f32 %v7365_v16, %v6828_v39 }
0x31f3   :  { %v6843_v45 = vpack.c.bf16 %v6837_v42, %v6836_v15 }
0x31f5   :  { %8411 = vmatmul.mubr.msk.bf16.vlgmr.msra.gmra.mrb[224].mxu0 %vm129_vm0, %v6843_v45 }
0x31f6   :  { %8415 = vmatpush3.bf16.msra.mxu0 %v8560_v23 }
0x31f7   :  { %8416 = vmatprep.subr.bf16.mxu0 %v8561_v3 }
0x31fa   :  { %8417 = vmatpush3.bf16.msra.mxu0 %v8561_v3 }
0x31fb   :  { %8418 = vmatprep.subr.bf16.mxu0 %v8562_v22 }
0x31fe   :  { %8419 = vmatpush3.bf16.msra.mxu0 %v8562_v22 }
0x31ff   :  { %8420 = vmatprep.subr.bf16.mxu0 %v8563_v58 }
0x3202   :  { %8421 = vmatpush3.bf16.msra.mxu0 %v8563_v58 }
0x32c8   :  { %v8412_v63 = vpop.f32.mrb[224].mxu0 }
0x32c9   :  { %v6912_v50 = vadd.f32 %v8412_v63, %v7366_v46  ;;  %v6903_v7 = vpop.f32.mrb[225].mxu0  ;;  %v7378_v63 = vld [vmem:[%s11044_s12 + $0x2] ss:$0 sm:$0xff] }
0x32ca   :  { %v6904_v47 = vadd.f32 %v7366_v46, %v6903_v7  ;;  %v8413_v43 = vpop.f32.mrb[226].mxu0 }
0x32cb   :  { %v6915_v59 = vadd.f32 %v8413_v43, %v7366_v46  ;;  %v6906_v12 = vpop.f32.mrb[227].mxu0  ;;  %v6920_v37 = vmax.f32 %v6912_v50, 0.0 }
0x32cc   :  { %v6907_v24 = vadd.f32 %v7366_v46, %v6906_v12  ;;  %v6918_v14 = vmax.f32 %v6904_v47, 0.0  ;;  %v7379_v47 = vld [vmem:[%s11044_s12 + $0x3] ss:$0 sm:$0xff]  ;;  %s8948_s12 = scalar_lea.vmem %s7098_s3, 512 }
0x32cd   :  { %v6921_v60 = vmax.f32 %v6915_v59, 0.0  ;;  %p8949_p2 = scmp.ne.s32.totalorder %s7098_s3, %s8948_s12  ;;  %p8954_p4 = scmp.lt.s32.totalorder %s8948_s12, %s8948_s12 }
0x32ce   :  { %v6919_v54 = vmax.f32 %v6907_v24, 0.0 }
0x32cf   :  { %v6931_v49 = vpack.c.bf16 %v6921_v60, %v6920_v37  ;;  %p8955_p5 = por %p8954_p4, %p8953_p3 }
0x32d0   :  { %v6930_v9 = vpack.c.bf16 %v6919_v54, %v6918_v14 }
0x32d1   :  { %p8956_p6 = pnand %p8955_p5, %p8949_p2 }
0x32d2   :  { %8422 = vmatprep.mubr.msk.bf16.mxu0 %vm6960_vm5, %v6930_v9 }
0x32d3   :  { %8423 = vmatmul.mubr.msk.bf16.vlgmr.msra.gmra.mrb[228].mxu0 %vm6960_vm5, %v6931_v49 }
0x33a6   :  { %v8424_v56 = vpop.f32.mrb[228].mxu0 }
0x33a7   :  { %v7001_v48 = vpop.f32.mrb[229].mxu0  ;;  %v7010_v18 = vadd.f32 %v8424_v56, %v7371_v27 }
0x33a8   :  { %v7002_v32 = vadd.f32 %v7371_v27, %v7001_v48  ;;  %v8425_v55 = vpop.f32.mrb[230].mxu0 }
0x33a9   :  { %v7004_v21 = vpop.f32.mrb[231].mxu0  ;;  %v7013_v40 = vadd.f32 %v8425_v55, %v7371_v27  ;;  %v7018_v25 = vadd.f32 %v7010_v18, %v6836_v15 }
0x33aa   :  { %v7016_v53 = vadd.f32 %v7002_v32, %v6834_v30  ;;  %v7005_v35 = vadd.f32 %v7371_v27, %v7004_v21 }
0x33ab   :  { %v7019_v23 = vadd.f32 %v7013_v40, %v6837_v42  ;;  %v7026_v34 = vsel %vm129_vm0, %v7018_v25, 0.0 }
0x33ac   :  { %v7017_v36 = vadd.f32 %v7005_v35, %v6835_v26  ;;  %v7020_v17 = vsel %vm129_vm0, %v7016_v53, 0.0 }
0x33ad   :  { %7021 = vadd.xlane.f32.xlu0 %v7020_v17  ;;  %v7029_v19 = vsel %vm129_vm0, %v7019_v23, 0.0 }
0x33ae   :  { %v7023_v33 = vsel %vm129_vm0, %v7017_v36, 0.0 }
0x33af   :  { %7024 = vadd.xlane.f32.xlu1 %v7023_v33 }
0x33b1   :  { %7027 = vadd.xlane.f32.xlu0 %v7026_v34 }
0x33b3   :  { %7030 = vadd.xlane.f32.xlu1 %v7029_v19 }
0x343a   :  { %v7022_v2 = vpop.xlane.xlu0 %7021 }
0x343b   :  { %v7032_v28 = vmul.f32 0.03125, %v7022_v2 }
0x343c   :  { %v7025_v11 = vpop.xlane.xlu1 %7024 }
0x343d   :  { %v7036_v8 = vsub.f32 %v7016_v53, %v7032_v28  ;;  %v7033_v57 = vmul.f32 0.03125, %v7025_v11 }
0x343e   :  { %v7028_v0 = vpop.xlane.xlu0 %7027 }
0x343f   :  { %v7037_v6 = vsub.f32 %v7017_v36, %v7033_v57  ;;  %v7034_v13 = vmul.f32 0.03125, %v7028_v0  ;;  %v7040_v51 = vmul.f32 %v7036_v8, %v7036_v8 }
0x3440   :  { %v7031_v10 = vpop.xlane.xlu1 %7030 }
0x3441   :  { %v7038_v61 = vsub.f32 %v7018_v25, %v7034_v13  ;;  %v7035_v31 = vmul.f32 0.03125, %v7031_v10  ;;  %v7044_v38 = vsel %vm129_vm0, %v7040_v51, 0.0  ;;  %v7041_v44 = vmul.f32 %v7037_v6, %v7037_v6 }
0x3442   :  { %7045 = vadd.xlane.f32.xlu0 %v7044_v38 }
0x3443   :  { %v7039_v16 = vsub.f32 %v7019_v23, %v7035_v31  ;;  %v7047_v41 = vsel %vm129_vm0, %v7041_v44, 0.0  ;;  %v7042_v1 = vmul.f32 %v7038_v61, %v7038_v61 }
0x3444   :  { %7048 = vadd.xlane.f32.xlu1 %v7047_v41 }
0x3445   :  { %v7050_v5 = vsel %vm129_vm0, %v7042_v1, 0.0  ;;  %v7043_v20 = vmul.f32 %v7039_v16, %v7039_v16 }
0x3446   :  { %7051 = vadd.xlane.f32.xlu0 %v7050_v5 }
0x3447   :  { %v7053_v62 = vsel %vm129_vm0, %v7043_v20, 0.0 }
0x3448   :  { %7054 = vadd.xlane.f32.xlu1 %v7053_v62 }
0x34cf   :  { %v7046_v26 = vpop.xlane.xlu0 %7045 }
0x34d0   :  { %v7056_v29 = vmul.f32 0.03125, %v7046_v26 }
0x34d1   :  { %v7049_v30 = vpop.xlane.xlu1 %7048 }
0x34d2   :  { %v7060_v52 = vadd.f32 1e-05, %v7056_v29  ;;  %v7057_v39 = vmul.f32 0.03125, %v7049_v30 }
0x34d3   :  { %v7052_v4 = vpop.xlane.xlu0 %7051 }
0x34d4   :  { %8892 = vrsqrt.f32 %v7060_v52  ;;  %v7061_v42 = vadd.f32 1e-05, %v7057_v39  ;;  %v7058_v15 = vmul.f32 0.03125, %v7052_v4 }
0x34d5   :  { %v7055_v45 = vpop.xlane.xlu1 %7054 }
0x34d6   :  { %8894 = vrsqrt.f32 %v7061_v42  ;;  %v7062_v3 = vadd.f32 1e-05, %v7058_v15  ;;  %v7059_v22 = vmul.f32 0.03125, %v7055_v45 }
0x34d8   :  { %8896 = vrsqrt.f32 %v7062_v3  ;;  %v7063_v58 = vadd.f32 1e-05, %v7059_v22 }
0x34da   :  { %8898 = vrsqrt.f32 %v7063_v58 }
0x34de   :  { %v8893_v46 = vpop.eup %8892 }
0x34df   :  { %v7068_v50 = vmul.f32 %v8893_v46, %v7036_v8 }
0x34e0   :  { %v8895_v7 = vpop.eup %8894 }
0x34e1   :  { %v7076_v43 = vmul.f32 %v7378_v63, %v7068_v50  ;;  %v7069_v59 = vmul.f32 %v8895_v7, %v7037_v6 }
0x34e2   :  { %v8897_v12 = vpop.eup %8896 }
0x34e3   :  { %v7084_v24 = vadd.f32 %v7379_v47, %v7076_v43  ;;  %v7077_v37 = vmul.f32 %v7378_v63, %v7069_v59  ;;  %v7070_v60 = vmul.f32 %v8897_v12, %v7038_v61 }
0x34e4   :  { %v8899_v14 = vpop.eup %8898 }
0x34e5   :  { %7088 = vst.msk [vmem:[#allocation7] sm:$0xff] %vm129_vm0, %v7084_v24  ;;  %v7085_v54 = vadd.f32 %v7379_v47, %v7077_v37  ;;  %v7078_v49 = vmul.f32 %v7378_v63, %v7070_v60  ;;  %v7071_v9 = vmul.f32 %v8899_v14, %v7039_v16 }
0x34e7   :  { %7089 = vst.msk [vmem:[#allocation7 + $0x8] sm:$0xff] %vm129_vm0, %v7085_v54  ;;  %v7086_v27 = vadd.f32 %v7379_v47, %v7078_v49  ;;  %v7079_v56 = vmul.f32 %v7378_v63, %v7071_v9 }
0x34e9   :  { %7090 = vst.msk [vmem:[#allocation7 + $0x10] sm:$0xff] %vm129_vm0, %v7086_v27  ;;  %v7087_v48 = vadd.f32 %v7379_v47, %v7079_v56 }
0x34eb   :  { %7091 = vst.msk [vmem:[#allocation7 + $0x18] sm:$0xff] %vm129_vm0, %v7087_v48 }
0x34ec   :  { %8959 = shalt.err (!%p8956_p6)
}
0x34ed   :  { %s8960_s0 = scalar_lea.hbm %s11045_s13, 512 }
0x34ee   :  { %p8961_p7 = scmp.ne.s32.totalorder %s11045_s13, %s8960_s0  ;;  %p8964_p8 = scmp.lt.u32.totalorder %s8960_s0, %s11045_s13 }
0x34f0   :  { %p8966_p9 = pnand %p8964_p8, %p8961_p7 }
0x34f2   :  { %8969 = shalt.err (!%p8966_p9)
}
0x34f3   :  { %s8987_s29 = smov 128  }
0x34f4   :  { %7103 = dma.vmem_to_hbm [thread:$0]  %s7098_s3, 512, %s11045_s13, [#allocation4], %s8987_s29, %s8987_s29, %s8984_s16  }
0x34f5   :  { %8974 = dma.done.wait [#allocation4], 512  }
0x34f6   :  { %8975 = vsyncadd [#allocation4], 4294966784 }
0x34f7   :  { %7107 = vsyncpa [#allocation3], 1 }
0x34f8   :  { %7108 = vsyncpa [#allocation6], 1 }
0x34f9   :  { %7109 = vsyncpa [#allocation4], 1 }

</bundles_post_ra>
